<compile_context>
chip_gen: v5e
topology: v5e:2x2
jax: 0.10.0
libtpu: 0.0.40
codegen_flags: <defaults>
</compile_context>

<pallas_src>
import math

import jax
import jax.numpy as jnp
from jax.experimental import pallas as pl
from jax.experimental.pallas import tpu as pltpu

_NEG_BIG = -1e30        # used inside softmax masking (pre-softmax where)
_PTR_CLIP = 10.0
_PTR_MASK_VAL = -1e9    # masked pointer logits


# ----------------------------------------------------------------------------
# Fused forward kernel (one pallas_call for the whole model)
# ----------------------------------------------------------------------------

def _make_fused_kernel(treedef, n_leaves, has_agent_mask, has_city_mask,
                       n_city_total, n_agents, embed_dim,
                       enc_heads, dec_heads):
    D = embed_dim
    Na = n_agents
    N = n_city_total
    Nc = N - Na  # number of "context" cities (city_embed[:, :-Na, :])

    def layer_norm(x, lnp):
        mu = jnp.mean(x, axis=-1, keepdims=True)
        var = jnp.mean(jnp.square(x - mu), axis=-1, keepdims=True)
        return (x - mu) * jax.lax.rsqrt(var + 1e-5) * lnp["g"][...] + lnp["b"][...]

    def ffn(x, fp):
        h = jnp.dot(x, fp["w1"][...],
                    preferred_element_type=jnp.float32) + fp["b1"][...]
        h = jnp.maximum(h, 0.0)
        return jnp.dot(h, fp["w2"][...],
                       preferred_element_type=jnp.float32) + fp["b2"][...]

    def mha(xq, xkv, mask, mp, num_heads):
        # xq: (Nq, D), xkv: (Nk, D); per-head weights [nh, D, dh] / [nh, dh, D]
        dh = D // num_heads
        scale = 1.0 / math.sqrt(dh)
        acc = jnp.zeros((xq.shape[0], D), jnp.float32)
        for h in range(num_heads):                       # static unrolled loop
            qh = jnp.dot(xq, mp["wq"][h],
                         preferred_element_type=jnp.float32) + mp["bq"][h]
            kh = jnp.dot(xkv, mp["wk"][h],
                         preferred_element_type=jnp.float32) + mp["bk"][h]
            vh = jnp.dot(xkv, mp["wv"][h],
                         preferred_element_type=jnp.float32) + mp["bv"][h]
            s = jnp.dot(qh, kh.T, preferred_element_type=jnp.float32) * scale
            if mask is not None:
                s = jnp.where(mask > 0.5, _NEG_BIG, s)
            s = s - jnp.max(s, axis=-1, keepdims=True)
            e = jnp.exp(s)
            inv = pl.reciprocal(jnp.sum(e, axis=-1, keepdims=True), approx=True)
            p_attn = e * inv
            ho = jnp.dot(p_attn, vh, preferred_element_type=jnp.float32)
            # concat(heads) @ Wo  ==  sum_h head_h @ Wo[h]
            acc = acc + jnp.dot(ho, mp["wo"][h],
                                preferred_element_type=jnp.float32)
        return acc + mp["bo"][...]

    def kernel(*refs):
        idx = 0
        city_ref = refs[idx]; idx += 1        # (1, N, D)
        mean_ref = refs[idx]; idx += 1        # (1, 1, D)
        agent_ref = refs[idx]; idx += 1       # (1, Na, 2)
        amask_ref = None
        cmask_ref = None
        if has_agent_mask:
            amask_ref = refs[idx]; idx += 1   # (1, Na, Na) float {0,1}
        if has_city_mask:
            cmask_ref = refs[idx]; idx += 1   # (1, Na, N)  float {0,1}
        w_refs = refs[idx:idx + n_leaves]
        out_embed_ref, out_logits_ref = refs[idx + n_leaves:]

        # Reconstruct the param tree of refs (weights stay resident in VMEM).
        p = jax.tree_util.tree_unflatten(treedef, list(w_refs))

        city = city_ref[0]                    # (N, D)
        mean = mean_ref[0]                    # (1, D)
        agent = agent_ref[0]                  # (Na, 2)
        ctx = city[:Nc, :]                    # city context
        depot = city[Nc:, :]                  # per-agent city (depot) embeds
        amask = amask_ref[0] if has_agent_mask else None
        cmask = cmask_ref[0] if has_city_mask else None

        # --- agent feature fusion -------------------------------------------
        h = jnp.dot(agent, p["agent_proj_w"][...],
                    preferred_element_type=jnp.float32) + p["agent_proj_b"][...]
        h = h + depot + mean                  # (Na, D)

        # --- encoder ---------------------------------------------------------
        for layer in p["encoder_layers"]:
            h = layer_norm(h + mha(h, h, amask, layer["self_mha"], enc_heads),
                           layer["ln1"])
            h = layer_norm(h + mha(h, ctx, None, layer["cross_mha"], enc_heads),
                           layer["ln2"])
            h = layer_norm(h + ffn(h, layer["ffn"]), layer["ln3"])

        # --- decoder ---------------------------------------------------------
        for layer in p["decoder_layers"]:
            h = layer_norm(h + mha(h, city, cmask, layer["cross_mha"], dec_heads),
                           layer["ln1"])
            h = layer_norm(h + ffn(h, layer["ffn"]), layer["ln2"])

        # --- pointer logits (fused into the same kernel) ----------------------
        q = jnp.dot(h, p["ptr_q_w"][...],
                    preferred_element_type=jnp.float32) + p["ptr_q_b"][...]
        k = jnp.dot(city, p["ptr_k_w"][...],
                    preferred_element_type=jnp.float32) + p["ptr_k_b"][...]
        s = jnp.dot(q, k.T, preferred_element_type=jnp.float32) * (1.0 / math.sqrt(D))
        logits = _PTR_CLIP * jnp.tanh(s)
        if cmask is not None:
            logits = jnp.where(cmask > 0.5, _PTR_MASK_VAL, logits)

        out_embed_ref[0] = h
        out_logits_ref[0] = logits

    return kernel


# ----------------------------------------------------------------------------
# Model forward (single pallas_call)
# ----------------------------------------------------------------------------

def actions_attention_model_forward(params, cfg, city_embed, city_embed_mean,
                                    agent, agent_mask=None, agent_city_mask=None):
    B, N, D = city_embed.shape
    Na = agent.shape[1]
    has_amask = agent_mask is not None
    has_cmask = agent_city_mask is not None

    leaves, treedef = jax.tree_util.tree_flatten(params)

    inputs = [city_embed, city_embed_mean.reshape(B, 1, D), agent]
    in_specs = [
        pl.BlockSpec((1, N, D), lambda b: (b, 0, 0)),
        pl.BlockSpec((1, 1, D), lambda b: (b, 0, 0)),
        pl.BlockSpec((1, Na, 2), lambda b: (b, 0, 0)),
    ]
    if has_amask:
        amask_f = jnp.broadcast_to(
            agent_mask[:, None, :].astype(jnp.float32), (B, Na, Na))
        inputs.append(amask_f)
        in_specs.append(pl.BlockSpec((1, Na, Na), lambda b: (b, 0, 0)))
    if has_cmask:
        cmask_f = agent_city_mask.astype(jnp.float32)
        inputs.append(cmask_f)
        in_specs.append(pl.BlockSpec((1, Na, N), lambda b: (b, 0, 0)))
    for leaf in leaves:  # weights: full block, constant index map (loaded once)
        inputs.append(leaf)
        in_specs.append(
            pl.BlockSpec(leaf.shape, lambda b, nd=leaf.ndim: (0,) * nd))

    kernel = _make_fused_kernel(
        treedef, len(leaves), has_amask, has_cmask, N, Na, D,
        cfg["agent_encoder_num_heads"], cfg["action_decoder_num_heads"])

    out_embed, out_logits = pl.pallas_call(
        kernel,
        grid=(B,),
        out_shape=(jax.ShapeDtypeStruct((B, Na, D), jnp.float32),
                   jax.ShapeDtypeStruct((B, Na, N), jnp.float32)),
        in_specs=in_specs,
        out_specs=(pl.BlockSpec((1, Na, D), lambda b: (b, 0, 0)),
                   pl.BlockSpec((1, Na, N), lambda b: (b, 0, 0))),
        compiler_params=pltpu.CompilerParams(
            dimension_semantics=("parallel",)),   # 2 TCs on v7x take one batch each
    )(*inputs)
    return out_embed, out_logits


# ----------------------------------------------------------------------------
# Pure-JAX reference (same math) for a numerical self-check
# ----------------------------------------------------------------------------

def reference_forward(params, cfg, city_embed, city_embed_mean, agent,
                      agent_mask=None, agent_city_mask=None):
    D = cfg["embed_dim"]
    B, N, _ = city_embed.shape
    Na = agent.shape[1]
    Nc = N - Na

    def ln(x, lnp):
        mu = jnp.mean(x, -1, keepdims=True)
        var = jnp.mean(jnp.square(x - mu), -1, keepdims=True)
        return (x - mu) * jax.lax.rsqrt(var + 1e-5) * lnp["g"] + lnp["b"]

    def ffn(x, fp):
        h = jnp.maximum(x @ fp["w1"] + fp["b1"], 0.0)
        return h @ fp["w2"] + fp["b2"]

    def mha(xq, xkv, mask, mp, nh):
        dh = D // nh
        scale = 1.0 / math.sqrt(dh)
        acc = jnp.zeros(xq.shape[:-1] + (D,), jnp.float32)
        for h in range(nh):
            qh = xq @ mp["wq"][h] + mp["bq"][h]
            kh = xkv @ mp["wk"][h] + mp["bk"][h]
            vh = xkv @ mp["wv"][h] + mp["bv"][h]
            s = jnp.einsum("bqd,bkd->bqk", qh, kh) * scale
            if mask is not None:
                s = jnp.where(mask > 0.5, _NEG_BIG, s)
            s = s - jnp.max(s, -1, keepdims=True)
            e = jnp.exp(s)
            pr = e / jnp.sum(e, -1, keepdims=True)
            acc = acc + jnp.einsum("bqk,bkd->bqd", pr, vh) @ mp["wo"][h]
        return acc + mp["bo"]

    amask = None
    if agent_mask is not None:
        amask = jnp.broadcast_to(
            agent_mask[:, None, :].astype(jnp.float32), (B, Na, Na))
    cmask = None
    if agent_city_mask is not None:
        cmask = agent_city_mask.astype(jnp.float32)

    h = agent @ params["agent_proj_w"] + params["agent_proj_b"]
    h = h + city_embed[:, Nc:, :] + city_embed_mean[:, None, :]

    enc_nh = cfg["agent_encoder_num_heads"]
    for layer in params["encoder_layers"]:
        h = ln(h + mha(h, h, amask, layer["self_mha"], enc_nh), layer["ln1"])
        h = ln(h + mha(h, city_embed[:, :Nc, :], None, layer["cross_mha"], enc_nh),
               layer["ln2"])
        h = ln(h + ffn(h, layer["ffn"]), layer["ln3"])

    dec_nh = cfg["action_decoder_num_heads"]
    for layer in params["decoder_layers"]:
        h = ln(h + mha(h, city_embed, cmask, layer["cross_mha"], dec_nh),
               layer["ln1"])
        h = ln(h + ffn(h, layer["ffn"]), layer["ln2"])

    q = h @ params["ptr_q_w"] + params["ptr_q_b"]
    k = city_embed @ params["ptr_k_w"] + params["ptr_k_b"]
    s = jnp.einsum("bqd,bkd->bqk", q, k) * (1.0 / math.sqrt(D))
    logits = _PTR_CLIP * jnp.tanh(s)
    if cmask is not None:
        logits = jnp.where(cmask > 0.5, _PTR_MASK_VAL, logits)
    return h, logits


# ----------------------------------------------------------------------------
# Deterministic parameter init (head-split layout used by the kernel)
# ----------------------------------------------------------------------------

def _dense(key, din, dout):
    kw, kb = jax.random.split(key)
    lim = 1.0 / math.sqrt(din)
    w = jax.random.uniform(kw, (din, dout), jnp.float32, -lim, lim)
    b = jax.random.uniform(kb, (dout,), jnp.float32, -lim, lim)
    return w, b


def init_params(key, cfg):
    D = cfg["embed_dim"]
    keys = iter(jax.random.split(key, 64))

    def dense(din, dout):
        return _dense(next(keys), din, dout)

    def mha_params(num_heads):
        dh = D // num_heads
        wq, bq = dense(D, D)
        wk, bk = dense(D, D)
        wv, bv = dense(D, D)
        wo, bo = dense(D, D)
        return dict(
            wq=wq.reshape(D, num_heads, dh).transpose(1, 0, 2),  # (nh, D, dh)
            bq=bq.reshape(num_heads, 1, dh),
            wk=wk.reshape(D, num_heads, dh).transpose(1, 0, 2),
            bk=bk.reshape(num_heads, 1, dh),
            wv=wv.reshape(D, num_heads, dh).transpose(1, 0, 2),
            bv=bv.reshape(num_heads, 1, dh),
            wo=wo.reshape(num_heads, dh, D),                     # (nh, dh, D)
            bo=bo.reshape(1, D),
        )

    def ln_params():
        return dict(g=jnp.ones((1, D), jnp.float32),
                    b=jnp.zeros((1, D), jnp.float32))

    params = {}
    w, b = dense(2, D)
    params["agent_proj_w"], params["agent_proj_b"] = w, b.reshape(1, D)

    enc_nh = cfg["agent_encoder_num_heads"]
    enc = []
    for _ in range(cfg["agent_encoder_num_layers"]):
        w1, b1 = dense(D, cfg["agent_encoder_hidden_dim"])
        w2, b2 = dense(cfg["agent_encoder_hidden_dim"], D)
        enc.append(dict(self_mha=mha_params(enc_nh), cross_mha=mha_params(enc_nh),
                        ln1=ln_params(), ln2=ln_params(), ln3=ln_params(),
                        ffn=dict(w1=w1, b1=b1.reshape(1, -1),
                                 w2=w2, b2=b2.reshape(1, -1))))
    params["encoder_layers"] = enc

    dec_nh = cfg["action_decoder_num_heads"]
    dec = []
    for _ in range(cfg["action_decoder_num_layers"]):
        w1, b1 = dense(D, cfg["action_decoder_hidden_dim"])
        w2, b2 = dense(cfg["action_decoder_hidden_dim"], D)
        dec.append(dict(cross_mha=mha_params(dec_nh),
                        ln1=ln_params(), ln2=ln_params(),
                        ffn=dict(w1=w1, b1=b1.reshape(1, -1),
                                 w2=w2, b2=b2.reshape(1, -1))))
    params["decoder_layers"] = dec

    w, b = dense(D, D)
    params["ptr_q_w"], params["ptr_q_b"] = w, b.reshape(1, D)
    w, b = dense(D, D)
    params["ptr_k_w"], params["ptr_k_b"] = w, b.reshape(1, D)
    return params


# ----------------------------------------------------------------------------
# Main
# ----------------------------------------------------------------------------

if __name__ == "__main__":
    jax.config.update("jax_default_matmul_precision", "highest")

    cfg = dict(
        embed_dim=32,
        agent_encoder_hidden_dim=64,
        agent_encoder_num_heads=4,
        agent_encoder_num_layers=1,
        action_decoder_hidden_dim=64,
        action_decoder_num_heads=4,
        action_decoder_num_layers=1,
    )

    B, n_cities, n_agents = 2, 12, 4
    D = cfg["embed_dim"]
    N = n_cities + n_agents          # city_embed includes agent-city slots

    key = jax.random.PRNGKey(0)
    k_params, k_city, k_agent = jax.random.split(key, 3)

    params = init_params(k_params, cfg)

    city_embed = jax.random.normal(k_city, (B, N, D), jnp.float32)
    city_embed_mean = jnp.mean(city_embed, axis=1)                  # (B, D)
    agent = jax.random.normal(k_agent, (B, n_agents, 2), jnp.float32)
    agent_city_mask = jnp.zeros((B, n_agents, N), dtype=bool)       # nothing masked

    agent_city_embed, act_logits = actions_attention_model_forward(
        params, cfg, city_embed, city_embed_mean, agent,
        agent_mask=None, agent_city_mask=agent_city_mask)
    jax.block_until_ready((agent_city_embed, act_logits))

    ref_embed, ref_logits = reference_forward(
        params, cfg, city_embed, city_embed_mean, agent,
        agent_mask=None, agent_city_mask=agent_city_mask)
    jax.block_until_ready((ref_embed, ref_logits))

    assert agent_city_embed.shape == (B, n_agents, D)
    assert act_logits.shape == (B, n_agents, N)
    assert bool(jnp.all(jnp.isfinite(agent_city_embed)))
    assert bool(jnp.all(jnp.isfinite(act_logits)))
    max_diff = float(jnp.maximum(jnp.max(jnp.abs(agent_city_embed - ref_embed)),
                                 jnp.max(jnp.abs(act_logits - ref_logits))))
    assert max_diff < 0.1, f"kernel vs reference max abs diff {max_diff}"
    print("KERNEL_OK")
</pallas_src>

<mosaic_0001>
module attributes {stable_mosaic.version = 11 : i64} {
  func.func @kernel(%arg0: i32, %arg1: memref<1x16x32xf32, #tpu.memory_space<vmem>>, %arg2: memref<1x1x32xf32, #tpu.memory_space<vmem>>, %arg3: memref<1x4x2xf32, #tpu.memory_space<vmem>>, %arg4: memref<1x4x16xf32, #tpu.memory_space<vmem>>, %arg5: memref<1x32xf32, #tpu.memory_space<vmem>>, %arg6: memref<2x32xf32, #tpu.memory_space<vmem>>, %arg7: memref<4x1x8xf32, #tpu.memory_space<vmem>>, %arg8: memref<1x32xf32, #tpu.memory_space<vmem>>, %arg9: memref<4x1x8xf32, #tpu.memory_space<vmem>>, %arg10: memref<4x1x8xf32, #tpu.memory_space<vmem>>, %arg11: memref<4x32x8xf32, #tpu.memory_space<vmem>>, %arg12: memref<4x8x32xf32, #tpu.memory_space<vmem>>, %arg13: memref<4x32x8xf32, #tpu.memory_space<vmem>>, %arg14: memref<4x32x8xf32, #tpu.memory_space<vmem>>, %arg15: memref<1x64xf32, #tpu.memory_space<vmem>>, %arg16: memref<1x32xf32, #tpu.memory_space<vmem>>, %arg17: memref<32x64xf32, #tpu.memory_space<vmem>>, %arg18: memref<64x32xf32, #tpu.memory_space<vmem>>, %arg19: memref<1x32xf32, #tpu.memory_space<vmem>>, %arg20: memref<1x32xf32, #tpu.memory_space<vmem>>, %arg21: memref<1x32xf32, #tpu.memory_space<vmem>>, %arg22: memref<1x32xf32, #tpu.memory_space<vmem>>, %arg23: memref<4x1x8xf32, #tpu.memory_space<vmem>>, %arg24: memref<1x32xf32, #tpu.memory_space<vmem>>, %arg25: memref<4x1x8xf32, #tpu.memory_space<vmem>>, %arg26: memref<4x1x8xf32, #tpu.memory_space<vmem>>, %arg27: memref<4x32x8xf32, #tpu.memory_space<vmem>>, %arg28: memref<4x8x32xf32, #tpu.memory_space<vmem>>, %arg29: memref<4x32x8xf32, #tpu.memory_space<vmem>>, %arg30: memref<4x32x8xf32, #tpu.memory_space<vmem>>, %arg31: memref<1x64xf32, #tpu.memory_space<vmem>>, %arg32: memref<1x32xf32, #tpu.memory_space<vmem>>, %arg33: memref<32x64xf32, #tpu.memory_space<vmem>>, %arg34: memref<64x32xf32, #tpu.memory_space<vmem>>, %arg35: memref<1x32xf32, #tpu.memory_space<vmem>>, %arg36: memref<1x32xf32, #tpu.memory_space<vmem>>, %arg37: memref<1x32xf32, #tpu.memory_space<vmem>>, %arg38: memref<1x32xf32, #tpu.memory_space<vmem>>, %arg39: memref<1x32xf32, #tpu.memory_space<vmem>>, %arg40: memref<1x32xf32, #tpu.memory_space<vmem>>, %arg41: memref<4x1x8xf32, #tpu.memory_space<vmem>>, %arg42: memref<1x32xf32, #tpu.memory_space<vmem>>, %arg43: memref<4x1x8xf32, #tpu.memory_space<vmem>>, %arg44: memref<4x1x8xf32, #tpu.memory_space<vmem>>, %arg45: memref<4x32x8xf32, #tpu.memory_space<vmem>>, %arg46: memref<4x8x32xf32, #tpu.memory_space<vmem>>, %arg47: memref<4x32x8xf32, #tpu.memory_space<vmem>>, %arg48: memref<4x32x8xf32, #tpu.memory_space<vmem>>, %arg49: memref<1x32xf32, #tpu.memory_space<vmem>>, %arg50: memref<32x32xf32, #tpu.memory_space<vmem>>, %arg51: memref<1x32xf32, #tpu.memory_space<vmem>>, %arg52: memref<32x32xf32, #tpu.memory_space<vmem>>, %arg53: memref<1x4x32xf32, #tpu.memory_space<vmem>>, %arg54: memref<1x4x16xf32, #tpu.memory_space<vmem>>) attributes {dimension_semantics = [#tpu.dimension_semantics<parallel>], iteration_bounds = array<i64: 2>, scalar_prefetch = 0 : i64, scratch_operands = 0 : i64, tpu.core_type = #tpu.core_type<tc>, window_params = [{transform_indices = @transform_0, window_bounds = array<i64: 1, 16, 32>}, {transform_indices = @transform_1, window_bounds = array<i64: 1, 1, 32>}, {transform_indices = @transform_2, window_bounds = array<i64: 1, 4, 2>}, {transform_indices = @transform_3, window_bounds = array<i64: 1, 4, 16>}, {pipeline_mode = #tpu.pipeline_mode<synchronous>, transform_indices = @transform_4, window_bounds = array<i64: 1, 32>}, {pipeline_mode = #tpu.pipeline_mode<synchronous>, transform_indices = @transform_5, window_bounds = array<i64: 2, 32>}, {pipeline_mode = #tpu.pipeline_mode<synchronous>, transform_indices = @transform_6, window_bounds = array<i64: 4, 1, 8>}, {pipeline_mode = #tpu.pipeline_mode<synchronous>, transform_indices = @transform_7, window_bounds = array<i64: 1, 32>}, {pipeline_mode = #tpu.pipeline_mode<synchronous>, transform_indices = @transform_8, window_bounds = array<i64: 4, 1, 8>}, {pipeline_mode = #tpu.pipeline_mode<synchronous>, transform_indices = @transform_9, window_bounds = array<i64: 4, 1, 8>}, {pipeline_mode = #tpu.pipeline_mode<synchronous>, transform_indices = @transform_10, window_bounds = array<i64: 4, 32, 8>}, {pipeline_mode = #tpu.pipeline_mode<synchronous>, transform_indices = @transform_11, window_bounds = array<i64: 4, 8, 32>}, {pipeline_mode = #tpu.pipeline_mode<synchronous>, transform_indices = @transform_12, window_bounds = array<i64: 4, 32, 8>}, {pipeline_mode = #tpu.pipeline_mode<synchronous>, transform_indices = @transform_13, window_bounds = array<i64: 4, 32, 8>}, {pipeline_mode = #tpu.pipeline_mode<synchronous>, transform_indices = @transform_14, window_bounds = array<i64: 1, 64>}, {pipeline_mode = #tpu.pipeline_mode<synchronous>, transform_indices = @transform_15, window_bounds = array<i64: 1, 32>}, {pipeline_mode = #tpu.pipeline_mode<synchronous>, transform_indices = @transform_16, window_bounds = array<i64: 32, 64>}, {pipeline_mode = #tpu.pipeline_mode<synchronous>, transform_indices = @transform_17, window_bounds = array<i64: 64, 32>}, {pipeline_mode = #tpu.pipeline_mode<synchronous>, transform_indices = @transform_18, window_bounds = array<i64: 1, 32>}, {pipeline_mode = #tpu.pipeline_mode<synchronous>, transform_indices = @transform_19, window_bounds = array<i64: 1, 32>}, {pipeline_mode = #tpu.pipeline_mode<synchronous>, transform_indices = @transform_20, window_bounds = array<i64: 1, 32>}, {pipeline_mode = #tpu.pipeline_mode<synchronous>, transform_indices = @transform_21, window_bounds = array<i64: 1, 32>}, {pipeline_mode = #tpu.pipeline_mode<synchronous>, transform_indices = @transform_22, window_bounds = array<i64: 4, 1, 8>}, {pipeline_mode = #tpu.pipeline_mode<synchronous>, transform_indices = @transform_23, window_bounds = array<i64: 1, 32>}, {pipeline_mode = #tpu.pipeline_mode<synchronous>, transform_indices = @transform_24, window_bounds = array<i64: 4, 1, 8>}, {pipeline_mode = #tpu.pipeline_mode<synchronous>, transform_indices = @transform_25, window_bounds = array<i64: 4, 1, 8>}, {pipeline_mode = #tpu.pipeline_mode<synchronous>, transform_indices = @transform_26, window_bounds = array<i64: 4, 32, 8>}, {pipeline_mode = #tpu.pipeline_mode<synchronous>, transform_indices = @transform_27, window_bounds = array<i64: 4, 8, 32>}, {pipeline_mode = #tpu.pipeline_mode<synchronous>, transform_indices = @transform_28, window_bounds = array<i64: 4, 32, 8>}, {pipeline_mode = #tpu.pipeline_mode<synchronous>, transform_indices = @transform_29, window_bounds = array<i64: 4, 32, 8>}, {pipeline_mode = #tpu.pipeline_mode<synchronous>, transform_indices = @transform_30, window_bounds = array<i64: 1, 64>}, {pipeline_mode = #tpu.pipeline_mode<synchronous>, transform_indices = @transform_31, window_bounds = array<i64: 1, 32>}, {pipeline_mode = #tpu.pipeline_mode<synchronous>, transform_indices = @transform_32, window_bounds = array<i64: 32, 64>}, {pipeline_mode = #tpu.pipeline_mode<synchronous>, transform_indices = @transform_33, window_bounds = array<i64: 64, 32>}, {pipeline_mode = #tpu.pipeline_mode<synchronous>, transform_indices = @transform_34, window_bounds = array<i64: 1, 32>}, {pipeline_mode = #tpu.pipeline_mode<synchronous>, transform_indices = @transform_35, window_bounds = array<i64: 1, 32>}, {pipeline_mode = #tpu.pipeline_mode<synchronous>, transform_indices = @transform_36, window_bounds = array<i64: 1, 32>}, {pipeline_mode = #tpu.pipeline_mode<synchronous>, transform_indices = @transform_37, window_bounds = array<i64: 1, 32>}, {pipeline_mode = #tpu.pipeline_mode<synchronous>, transform_indices = @transform_38, window_bounds = array<i64: 1, 32>}, {pipeline_mode = #tpu.pipeline_mode<synchronous>, transform_indices = @transform_39, window_bounds = array<i64: 1, 32>}, {pipeline_mode = #tpu.pipeline_mode<synchronous>, transform_indices = @transform_40, window_bounds = array<i64: 4, 1, 8>}, {pipeline_mode = #tpu.pipeline_mode<synchronous>, transform_indices = @transform_41, window_bounds = array<i64: 1, 32>}, {pipeline_mode = #tpu.pipeline_mode<synchronous>, transform_indices = @transform_42, window_bounds = array<i64: 4, 1, 8>}, {pipeline_mode = #tpu.pipeline_mode<synchronous>, transform_indices = @transform_43, window_bounds = array<i64: 4, 1, 8>}, {pipeline_mode = #tpu.pipeline_mode<synchronous>, transform_indices = @transform_44, window_bounds = array<i64: 4, 32, 8>}, {pipeline_mode = #tpu.pipeline_mode<synchronous>, transform_indices = @transform_45, window_bounds = array<i64: 4, 8, 32>}, {pipeline_mode = #tpu.pipeline_mode<synchronous>, transform_indices = @transform_46, window_bounds = array<i64: 4, 32, 8>}, {pipeline_mode = #tpu.pipeline_mode<synchronous>, transform_indices = @transform_47, window_bounds = array<i64: 4, 32, 8>}, {pipeline_mode = #tpu.pipeline_mode<synchronous>, transform_indices = @transform_48, window_bounds = array<i64: 1, 32>}, {pipeline_mode = #tpu.pipeline_mode<synchronous>, transform_indices = @transform_49, window_bounds = array<i64: 32, 32>}, {pipeline_mode = #tpu.pipeline_mode<synchronous>, transform_indices = @transform_50, window_bounds = array<i64: 1, 32>}, {pipeline_mode = #tpu.pipeline_mode<synchronous>, transform_indices = @transform_51, window_bounds = array<i64: 32, 32>}, {transform_indices = @transform_52, window_bounds = array<i64: 1, 4, 32>}, {transform_indices = @transform_53, window_bounds = array<i64: 1, 4, 16>}]} {
    %c0 = arith.constant 0 : index
    %c0_0 = arith.constant 0 : index
    %c0_1 = arith.constant 0 : index
    %0 = vector.load %arg1[%c0, %c0_0, %c0_1] : memref<1x16x32xf32, #tpu.memory_space<vmem>>, vector<1x16x32xf32>
    %1 = vector.shape_cast %0 : vector<1x16x32xf32> to vector<16x32xf32>
    %c0_2 = arith.constant 0 : index
    %c0_3 = arith.constant 0 : index
    %c0_4 = arith.constant 0 : index
    %2 = vector.load %arg2[%c0_2, %c0_3, %c0_4] : memref<1x1x32xf32, #tpu.memory_space<vmem>>, vector<1x1x32xf32>
    %3 = vector.shape_cast %2 : vector<1x1x32xf32> to vector<1x32xf32>
    %c0_5 = arith.constant 0 : index
    %c0_6 = arith.constant 0 : index
    %c0_7 = arith.constant 0 : index
    %4 = vector.load %arg3[%c0_5, %c0_6, %c0_7] : memref<1x4x2xf32, #tpu.memory_space<vmem>>, vector<1x4x2xf32>
    %5 = vector.shape_cast %4 : vector<1x4x2xf32> to vector<4x2xf32>
    %6 = vector.extract_strided_slice %1 {offsets = [0, 0], sizes = [12, 32], strides = [1, 1]} : vector<16x32xf32> to vector<12x32xf32>
    %7 = vector.extract_strided_slice %1 {offsets = [12, 0], sizes = [4, 32], strides = [1, 1]} : vector<16x32xf32> to vector<4x32xf32>
    %c0_8 = arith.constant 0 : index
    %c0_9 = arith.constant 0 : index
    %c0_10 = arith.constant 0 : index
    %8 = vector.load %arg4[%c0_8, %c0_9, %c0_10] : memref<1x4x16xf32, #tpu.memory_space<vmem>>, vector<1x4x16xf32>
    %9 = vector.shape_cast %8 : vector<1x4x16xf32> to vector<4x16xf32>
    %c0_11 = arith.constant 0 : index
    %c0_12 = arith.constant 0 : index
    %10 = vector.load %arg6[%c0_11, %c0_12] : memref<2x32xf32, #tpu.memory_space<vmem>>, vector<2x32xf32>
    %cst = arith.constant dense<0.000000e+00> : vector<4x32xf32>
    %11 = tpu.matmul %5, %10, %cst {dimension_numbers = #tpu.dot_dimension_numbers<[1], [0], [0], [1], [0, 0, 1, 1], [], []>, precision = #tpu.contract_precision<fp32>} : vector<4x2xf32>, vector<2x32xf32>, vector<4x32xf32> -> vector<4x32xf32>
    %c0_13 = arith.constant 0 : index
    %c0_14 = arith.constant 0 : index
    %12 = vector.load %arg5[%c0_13, %c0_14] : memref<1x32xf32, #tpu.memory_space<vmem>>, vector<1x32xf32>
    %13 = vector.broadcast %12 : vector<1x32xf32> to vector<4x32xf32>
    %14 = arith.addf %11, %13 : vector<4x32xf32>
    %15 = arith.addf %14, %7 : vector<4x32xf32>
    %16 = vector.broadcast %3 : vector<1x32xf32> to vector<4x32xf32>
    %17 = arith.addf %15, %16 : vector<4x32xf32>
    %cst_15 = arith.constant 0.000000e+00 : f32
    %18 = vector.broadcast %cst_15 : f32 to vector<4x32xf32>
    %c0_16 = arith.constant 0 : index
    %c0_17 = arith.constant 0 : index
    %c0_18 = arith.constant 0 : index
    %19 = vector.load %arg47[%c0_16, %c0_17, %c0_18] : memref<4x32x8xf32, #tpu.memory_space<vmem>>, vector<1x32x8xf32>
    %20 = vector.shape_cast %19 : vector<1x32x8xf32> to vector<32x8xf32>
    %cst_19 = arith.constant dense<0.000000e+00> : vector<4x8xf32>
    %21 = tpu.matmul %17, %20, %cst_19 {dimension_numbers = #tpu.dot_dimension_numbers<[1], [0], [0], [1], [0, 0, 1, 1], [], []>, precision = #tpu.contract_precision<fp32>} : vector<4x32xf32>, vector<32x8xf32>, vector<4x8xf32> -> vector<4x8xf32>
    %c0_20 = arith.constant 0 : index
    %c0_21 = arith.constant 0 : index
    %c0_22 = arith.constant 0 : index
    %22 = vector.load %arg43[%c0_20, %c0_21, %c0_22] : memref<4x1x8xf32, #tpu.memory_space<vmem>>, vector<1x1x8xf32>
    %23 = vector.shape_cast %22 : vector<1x1x8xf32> to vector<1x8xf32>
    %24 = vector.broadcast %23 : vector<1x8xf32> to vector<4x8xf32>
    %25 = arith.addf %21, %24 : vector<4x8xf32>
    %c0_23 = arith.constant 0 : index
    %c0_24 = arith.constant 0 : index
    %c0_25 = arith.constant 0 : index
    %26 = vector.load %arg45[%c0_23, %c0_24, %c0_25] : memref<4x32x8xf32, #tpu.memory_space<vmem>>, vector<1x32x8xf32>
    %27 = vector.shape_cast %26 : vector<1x32x8xf32> to vector<32x8xf32>
    %cst_26 = arith.constant dense<0.000000e+00> : vector<4x8xf32>
    %28 = tpu.matmul %17, %27, %cst_26 {dimension_numbers = #tpu.dot_dimension_numbers<[1], [0], [0], [1], [0, 0, 1, 1], [], []>, precision = #tpu.contract_precision<fp32>} : vector<4x32xf32>, vector<32x8xf32>, vector<4x8xf32> -> vector<4x8xf32>
    %c0_27 = arith.constant 0 : index
    %c0_28 = arith.constant 0 : index
    %c0_29 = arith.constant 0 : index
    %29 = vector.load %arg41[%c0_27, %c0_28, %c0_29] : memref<4x1x8xf32, #tpu.memory_space<vmem>>, vector<1x1x8xf32>
    %30 = vector.shape_cast %29 : vector<1x1x8xf32> to vector<1x8xf32>
    %31 = vector.broadcast %30 : vector<1x8xf32> to vector<4x8xf32>
    %32 = arith.addf %28, %31 : vector<4x8xf32>
    %c0_30 = arith.constant 0 : index
    %c0_31 = arith.constant 0 : index
    %c0_32 = arith.constant 0 : index
    %33 = vector.load %arg48[%c0_30, %c0_31, %c0_32] : memref<4x32x8xf32, #tpu.memory_space<vmem>>, vector<1x32x8xf32>
    %34 = vector.shape_cast %33 : vector<1x32x8xf32> to vector<32x8xf32>
    %cst_33 = arith.constant dense<0.000000e+00> : vector<4x8xf32>
    %35 = tpu.matmul %17, %34, %cst_33 {dimension_numbers = #tpu.dot_dimension_numbers<[1], [0], [0], [1], [0, 0, 1, 1], [], []>, precision = #tpu.contract_precision<fp32>} : vector<4x32xf32>, vector<32x8xf32>, vector<4x8xf32> -> vector<4x8xf32>
    %c0_34 = arith.constant 0 : index
    %c0_35 = arith.constant 0 : index
    %c0_36 = arith.constant 0 : index
    %36 = vector.load %arg44[%c0_34, %c0_35, %c0_36] : memref<4x1x8xf32, #tpu.memory_space<vmem>>, vector<1x1x8xf32>
    %37 = vector.shape_cast %36 : vector<1x1x8xf32> to vector<1x8xf32>
    %38 = vector.broadcast %37 : vector<1x8xf32> to vector<4x8xf32>
    %39 = arith.addf %35, %38 : vector<4x8xf32>
    %40 = tpu.transpose %32, [1, 0] : vector<4x8xf32> -> vector<8x4xf32>
    %cst_37 = arith.constant dense<0.000000e+00> : vector<4x4xf32>
    %41 = tpu.matmul %25, %40, %cst_37 {dimension_numbers = #tpu.dot_dimension_numbers<[1], [0], [0], [1], [0, 0, 1, 1], [], []>, precision = #tpu.contract_precision<fp32>} : vector<4x8xf32>, vector<8x4xf32>, vector<4x4xf32> -> vector<4x4xf32>
    %cst_38 = arith.constant 0.353553385 : f32
    %42 = vector.broadcast %cst_38 : f32 to vector<4x4xf32>
    %43 = arith.mulf %41, %42 : vector<4x4xf32>
    %cst_39 = arith.constant dense<0xFF800000> : vector<4xf32>
    %44 = vector.multi_reduction <maximumf>, %43, %cst_39 [1] : vector<4x4xf32> to vector<4xf32>
    %45 = vector.shape_cast %44 : vector<4xf32> to vector<4x1xf32>
    %46 = vector.broadcast %45 : vector<4x1xf32> to vector<4x4xf32>
    %47 = arith.subf %43, %46 : vector<4x4xf32>
    %48 = math.exp %47 : vector<4x4xf32>
    %cst_40 = arith.constant dense<0.000000e+00> : vector<4xf32>
    %49 = vector.multi_reduction <add>, %48, %cst_40 [1] : vector<4x4xf32> to vector<4xf32>
    %50 = vector.shape_cast %49 : vector<4xf32> to vector<4x1xf32>
    %51 = tpu.reciprocal %50 {approx = true} : vector<4x1xf32> -> vector<4x1xf32>
    %52 = vector.broadcast %51 : vector<4x1xf32> to vector<4x4xf32>
    %53 = arith.mulf %48, %52 : vector<4x4xf32>
    %cst_41 = arith.constant dense<0.000000e+00> : vector<4x8xf32>
    %54 = tpu.matmul %53, %39, %cst_41 {dimension_numbers = #tpu.dot_dimension_numbers<[1], [0], [0], [1], [0, 0, 1, 1], [], []>, precision = #tpu.contract_precision<fp32>} : vector<4x4xf32>, vector<4x8xf32>, vector<4x8xf32> -> vector<4x8xf32>
    %c0_42 = arith.constant 0 : index
    %c0_43 = arith.constant 0 : index
    %c0_44 = arith.constant 0 : index
    %55 = vector.load %arg46[%c0_42, %c0_43, %c0_44] : memref<4x8x32xf32, #tpu.memory_space<vmem>>, vector<1x8x32xf32>
    %56 = vector.shape_cast %55 : vector<1x8x32xf32> to vector<8x32xf32>
    %cst_45 = arith.constant dense<0.000000e+00> : vector<4x32xf32>
    %57 = tpu.matmul %54, %56, %cst_45 {dimension_numbers = #tpu.dot_dimension_numbers<[1], [0], [0], [1], [0, 0, 1, 1], [], []>, precision = #tpu.contract_precision<fp32>} : vector<4x8xf32>, vector<8x32xf32>, vector<4x32xf32> -> vector<4x32xf32>
    %58 = arith.addf %18, %57 : vector<4x32xf32>
    %c1 = arith.constant 1 : index
    %c0_46 = arith.constant 0 : index
    %c0_47 = arith.constant 0 : index
    %59 = vector.load %arg47[%c1, %c0_46, %c0_47] : memref<4x32x8xf32, #tpu.memory_space<vmem>>, vector<1x32x8xf32>
    %60 = vector.shape_cast %59 : vector<1x32x8xf32> to vector<32x8xf32>
    %cst_48 = arith.constant dense<0.000000e+00> : vector<4x8xf32>
    %61 = tpu.matmul %17, %60, %cst_48 {dimension_numbers = #tpu.dot_dimension_numbers<[1], [0], [0], [1], [0, 0, 1, 1], [], []>, precision = #tpu.contract_precision<fp32>} : vector<4x32xf32>, vector<32x8xf32>, vector<4x8xf32> -> vector<4x8xf32>
    %c1_49 = arith.constant 1 : index
    %c0_50 = arith.constant 0 : index
    %c0_51 = arith.constant 0 : index
    %62 = vector.load %arg43[%c1_49, %c0_50, %c0_51] : memref<4x1x8xf32, #tpu.memory_space<vmem>>, vector<1x1x8xf32>
    %63 = vector.shape_cast %62 : vector<1x1x8xf32> to vector<1x8xf32>
    %64 = vector.broadcast %63 : vector<1x8xf32> to vector<4x8xf32>
    %65 = arith.addf %61, %64 : vector<4x8xf32>
    %c1_52 = arith.constant 1 : index
    %c0_53 = arith.constant 0 : index
    %c0_54 = arith.constant 0 : index
    %66 = vector.load %arg45[%c1_52, %c0_53, %c0_54] : memref<4x32x8xf32, #tpu.memory_space<vmem>>, vector<1x32x8xf32>
    %67 = vector.shape_cast %66 : vector<1x32x8xf32> to vector<32x8xf32>
    %cst_55 = arith.constant dense<0.000000e+00> : vector<4x8xf32>
    %68 = tpu.matmul %17, %67, %cst_55 {dimension_numbers = #tpu.dot_dimension_numbers<[1], [0], [0], [1], [0, 0, 1, 1], [], []>, precision = #tpu.contract_precision<fp32>} : vector<4x32xf32>, vector<32x8xf32>, vector<4x8xf32> -> vector<4x8xf32>
    %c1_56 = arith.constant 1 : index
    %c0_57 = arith.constant 0 : index
    %c0_58 = arith.constant 0 : index
    %69 = vector.load %arg41[%c1_56, %c0_57, %c0_58] : memref<4x1x8xf32, #tpu.memory_space<vmem>>, vector<1x1x8xf32>
    %70 = vector.shape_cast %69 : vector<1x1x8xf32> to vector<1x8xf32>
    %71 = vector.broadcast %70 : vector<1x8xf32> to vector<4x8xf32>
    %72 = arith.addf %68, %71 : vector<4x8xf32>
    %c1_59 = arith.constant 1 : index
    %c0_60 = arith.constant 0 : index
    %c0_61 = arith.constant 0 : index
    %73 = vector.load %arg48[%c1_59, %c0_60, %c0_61] : memref<4x32x8xf32, #tpu.memory_space<vmem>>, vector<1x32x8xf32>
    %74 = vector.shape_cast %73 : vector<1x32x8xf32> to vector<32x8xf32>
    %cst_62 = arith.constant dense<0.000000e+00> : vector<4x8xf32>
    %75 = tpu.matmul %17, %74, %cst_62 {dimension_numbers = #tpu.dot_dimension_numbers<[1], [0], [0], [1], [0, 0, 1, 1], [], []>, precision = #tpu.contract_precision<fp32>} : vector<4x32xf32>, vector<32x8xf32>, vector<4x8xf32> -> vector<4x8xf32>
    %c1_63 = arith.constant 1 : index
    %c0_64 = arith.constant 0 : index
    %c0_65 = arith.constant 0 : index
    %76 = vector.load %arg44[%c1_63, %c0_64, %c0_65] : memref<4x1x8xf32, #tpu.memory_space<vmem>>, vector<1x1x8xf32>
    %77 = vector.shape_cast %76 : vector<1x1x8xf32> to vector<1x8xf32>
    %78 = vector.broadcast %77 : vector<1x8xf32> to vector<4x8xf32>
    %79 = arith.addf %75, %78 : vector<4x8xf32>
    %80 = tpu.transpose %72, [1, 0] : vector<4x8xf32> -> vector<8x4xf32>
    %cst_66 = arith.constant dense<0.000000e+00> : vector<4x4xf32>
    %81 = tpu.matmul %65, %80, %cst_66 {dimension_numbers = #tpu.dot_dimension_numbers<[1], [0], [0], [1], [0, 0, 1, 1], [], []>, precision = #tpu.contract_precision<fp32>} : vector<4x8xf32>, vector<8x4xf32>, vector<4x4xf32> -> vector<4x4xf32>
    %cst_67 = arith.constant 0.353553385 : f32
    %82 = vector.broadcast %cst_67 : f32 to vector<4x4xf32>
    %83 = arith.mulf %81, %82 : vector<4x4xf32>
    %cst_68 = arith.constant dense<0xFF800000> : vector<4xf32>
    %84 = vector.multi_reduction <maximumf>, %83, %cst_68 [1] : vector<4x4xf32> to vector<4xf32>
    %85 = vector.shape_cast %84 : vector<4xf32> to vector<4x1xf32>
    %86 = vector.broadcast %85 : vector<4x1xf32> to vector<4x4xf32>
    %87 = arith.subf %83, %86 : vector<4x4xf32>
    %88 = math.exp %87 : vector<4x4xf32>
    %cst_69 = arith.constant dense<0.000000e+00> : vector<4xf32>
    %89 = vector.multi_reduction <add>, %88, %cst_69 [1] : vector<4x4xf32> to vector<4xf32>
    %90 = vector.shape_cast %89 : vector<4xf32> to vector<4x1xf32>
    %91 = tpu.reciprocal %90 {approx = true} : vector<4x1xf32> -> vector<4x1xf32>
    %92 = vector.broadcast %91 : vector<4x1xf32> to vector<4x4xf32>
    %93 = arith.mulf %88, %92 : vector<4x4xf32>
    %cst_70 = arith.constant dense<0.000000e+00> : vector<4x8xf32>
    %94 = tpu.matmul %93, %79, %cst_70 {dimension_numbers = #tpu.dot_dimension_numbers<[1], [0], [0], [1], [0, 0, 1, 1], [], []>, precision = #tpu.contract_precision<fp32>} : vector<4x4xf32>, vector<4x8xf32>, vector<4x8xf32> -> vector<4x8xf32>
    %c1_71 = arith.constant 1 : index
    %c0_72 = arith.constant 0 : index
    %c0_73 = arith.constant 0 : index
    %95 = vector.load %arg46[%c1_71, %c0_72, %c0_73] : memref<4x8x32xf32, #tpu.memory_space<vmem>>, vector<1x8x32xf32>
    %96 = vector.shape_cast %95 : vector<1x8x32xf32> to vector<8x32xf32>
    %cst_74 = arith.constant dense<0.000000e+00> : vector<4x32xf32>
    %97 = tpu.matmul %94, %96, %cst_74 {dimension_numbers = #tpu.dot_dimension_numbers<[1], [0], [0], [1], [0, 0, 1, 1], [], []>, precision = #tpu.contract_precision<fp32>} : vector<4x8xf32>, vector<8x32xf32>, vector<4x32xf32> -> vector<4x32xf32>
    %98 = arith.addf %58, %97 : vector<4x32xf32>
    %c2 = arith.constant 2 : index
    %c0_75 = arith.constant 0 : index
    %c0_76 = arith.constant 0 : index
    %99 = vector.load %arg47[%c2, %c0_75, %c0_76] : memref<4x32x8xf32, #tpu.memory_space<vmem>>, vector<1x32x8xf32>
    %100 = vector.shape_cast %99 : vector<1x32x8xf32> to vector<32x8xf32>
    %cst_77 = arith.constant dense<0.000000e+00> : vector<4x8xf32>
    %101 = tpu.matmul %17, %100, %cst_77 {dimension_numbers = #tpu.dot_dimension_numbers<[1], [0], [0], [1], [0, 0, 1, 1], [], []>, precision = #tpu.contract_precision<fp32>} : vector<4x32xf32>, vector<32x8xf32>, vector<4x8xf32> -> vector<4x8xf32>
    %c2_78 = arith.constant 2 : index
    %c0_79 = arith.constant 0 : index
    %c0_80 = arith.constant 0 : index
    %102 = vector.load %arg43[%c2_78, %c0_79, %c0_80] : memref<4x1x8xf32, #tpu.memory_space<vmem>>, vector<1x1x8xf32>
    %103 = vector.shape_cast %102 : vector<1x1x8xf32> to vector<1x8xf32>
    %104 = vector.broadcast %103 : vector<1x8xf32> to vector<4x8xf32>
    %105 = arith.addf %101, %104 : vector<4x8xf32>
    %c2_81 = arith.constant 2 : index
    %c0_82 = arith.constant 0 : index
    %c0_83 = arith.constant 0 : index
    %106 = vector.load %arg45[%c2_81, %c0_82, %c0_83] : memref<4x32x8xf32, #tpu.memory_space<vmem>>, vector<1x32x8xf32>
    %107 = vector.shape_cast %106 : vector<1x32x8xf32> to vector<32x8xf32>
    %cst_84 = arith.constant dense<0.000000e+00> : vector<4x8xf32>
    %108 = tpu.matmul %17, %107, %cst_84 {dimension_numbers = #tpu.dot_dimension_numbers<[1], [0], [0], [1], [0, 0, 1, 1], [], []>, precision = #tpu.contract_precision<fp32>} : vector<4x32xf32>, vector<32x8xf32>, vector<4x8xf32> -> vector<4x8xf32>
    %c2_85 = arith.constant 2 : index
    %c0_86 = arith.constant 0 : index
    %c0_87 = arith.constant 0 : index
    %109 = vector.load %arg41[%c2_85, %c0_86, %c0_87] : memref<4x1x8xf32, #tpu.memory_space<vmem>>, vector<1x1x8xf32>
    %110 = vector.shape_cast %109 : vector<1x1x8xf32> to vector<1x8xf32>
    %111 = vector.broadcast %110 : vector<1x8xf32> to vector<4x8xf32>
    %112 = arith.addf %108, %111 : vector<4x8xf32>
    %c2_88 = arith.constant 2 : index
    %c0_89 = arith.constant 0 : index
    %c0_90 = arith.constant 0 : index
    %113 = vector.load %arg48[%c2_88, %c0_89, %c0_90] : memref<4x32x8xf32, #tpu.memory_space<vmem>>, vector<1x32x8xf32>
    %114 = vector.shape_cast %113 : vector<1x32x8xf32> to vector<32x8xf32>
    %cst_91 = arith.constant dense<0.000000e+00> : vector<4x8xf32>
    %115 = tpu.matmul %17, %114, %cst_91 {dimension_numbers = #tpu.dot_dimension_numbers<[1], [0], [0], [1], [0, 0, 1, 1], [], []>, precision = #tpu.contract_precision<fp32>} : vector<4x32xf32>, vector<32x8xf32>, vector<4x8xf32> -> vector<4x8xf32>
    %c2_92 = arith.constant 2 : index
    %c0_93 = arith.constant 0 : index
    %c0_94 = arith.constant 0 : index
    %116 = vector.load %arg44[%c2_92, %c0_93, %c0_94] : memref<4x1x8xf32, #tpu.memory_space<vmem>>, vector<1x1x8xf32>
    %117 = vector.shape_cast %116 : vector<1x1x8xf32> to vector<1x8xf32>
    %118 = vector.broadcast %117 : vector<1x8xf32> to vector<4x8xf32>
    %119 = arith.addf %115, %118 : vector<4x8xf32>
    %120 = tpu.transpose %112, [1, 0] : vector<4x8xf32> -> vector<8x4xf32>
    %cst_95 = arith.constant dense<0.000000e+00> : vector<4x4xf32>
    %121 = tpu.matmul %105, %120, %cst_95 {dimension_numbers = #tpu.dot_dimension_numbers<[1], [0], [0], [1], [0, 0, 1, 1], [], []>, precision = #tpu.contract_precision<fp32>} : vector<4x8xf32>, vector<8x4xf32>, vector<4x4xf32> -> vector<4x4xf32>
    %cst_96 = arith.constant 0.353553385 : f32
    %122 = vector.broadcast %cst_96 : f32 to vector<4x4xf32>
    %123 = arith.mulf %121, %122 : vector<4x4xf32>
    %cst_97 = arith.constant dense<0xFF800000> : vector<4xf32>
    %124 = vector.multi_reduction <maximumf>, %123, %cst_97 [1] : vector<4x4xf32> to vector<4xf32>
    %125 = vector.shape_cast %124 : vector<4xf32> to vector<4x1xf32>
    %126 = vector.broadcast %125 : vector<4x1xf32> to vector<4x4xf32>
    %127 = arith.subf %123, %126 : vector<4x4xf32>
    %128 = math.exp %127 : vector<4x4xf32>
    %cst_98 = arith.constant dense<0.000000e+00> : vector<4xf32>
    %129 = vector.multi_reduction <add>, %128, %cst_98 [1] : vector<4x4xf32> to vector<4xf32>
    %130 = vector.shape_cast %129 : vector<4xf32> to vector<4x1xf32>
    %131 = tpu.reciprocal %130 {approx = true} : vector<4x1xf32> -> vector<4x1xf32>
    %132 = vector.broadcast %131 : vector<4x1xf32> to vector<4x4xf32>
    %133 = arith.mulf %128, %132 : vector<4x4xf32>
    %cst_99 = arith.constant dense<0.000000e+00> : vector<4x8xf32>
    %134 = tpu.matmul %133, %119, %cst_99 {dimension_numbers = #tpu.dot_dimension_numbers<[1], [0], [0], [1], [0, 0, 1, 1], [], []>, precision = #tpu.contract_precision<fp32>} : vector<4x4xf32>, vector<4x8xf32>, vector<4x8xf32> -> vector<4x8xf32>
    %c2_100 = arith.constant 2 : index
    %c0_101 = arith.constant 0 : index
    %c0_102 = arith.constant 0 : index
    %135 = vector.load %arg46[%c2_100, %c0_101, %c0_102] : memref<4x8x32xf32, #tpu.memory_space<vmem>>, vector<1x8x32xf32>
    %136 = vector.shape_cast %135 : vector<1x8x32xf32> to vector<8x32xf32>
    %cst_103 = arith.constant dense<0.000000e+00> : vector<4x32xf32>
    %137 = tpu.matmul %134, %136, %cst_103 {dimension_numbers = #tpu.dot_dimension_numbers<[1], [0], [0], [1], [0, 0, 1, 1], [], []>, precision = #tpu.contract_precision<fp32>} : vector<4x8xf32>, vector<8x32xf32>, vector<4x32xf32> -> vector<4x32xf32>
    %138 = arith.addf %98, %137 : vector<4x32xf32>
    %c3 = arith.constant 3 : index
    %c0_104 = arith.constant 0 : index
    %c0_105 = arith.constant 0 : index
    %139 = vector.load %arg47[%c3, %c0_104, %c0_105] : memref<4x32x8xf32, #tpu.memory_space<vmem>>, vector<1x32x8xf32>
    %140 = vector.shape_cast %139 : vector<1x32x8xf32> to vector<32x8xf32>
    %cst_106 = arith.constant dense<0.000000e+00> : vector<4x8xf32>
    %141 = tpu.matmul %17, %140, %cst_106 {dimension_numbers = #tpu.dot_dimension_numbers<[1], [0], [0], [1], [0, 0, 1, 1], [], []>, precision = #tpu.contract_precision<fp32>} : vector<4x32xf32>, vector<32x8xf32>, vector<4x8xf32> -> vector<4x8xf32>
    %c3_107 = arith.constant 3 : index
    %c0_108 = arith.constant 0 : index
    %c0_109 = arith.constant 0 : index
    %142 = vector.load %arg43[%c3_107, %c0_108, %c0_109] : memref<4x1x8xf32, #tpu.memory_space<vmem>>, vector<1x1x8xf32>
    %143 = vector.shape_cast %142 : vector<1x1x8xf32> to vector<1x8xf32>
    %144 = vector.broadcast %143 : vector<1x8xf32> to vector<4x8xf32>
    %145 = arith.addf %141, %144 : vector<4x8xf32>
    %c3_110 = arith.constant 3 : index
    %c0_111 = arith.constant 0 : index
    %c0_112 = arith.constant 0 : index
    %146 = vector.load %arg45[%c3_110, %c0_111, %c0_112] : memref<4x32x8xf32, #tpu.memory_space<vmem>>, vector<1x32x8xf32>
    %147 = vector.shape_cast %146 : vector<1x32x8xf32> to vector<32x8xf32>
    %cst_113 = arith.constant dense<0.000000e+00> : vector<4x8xf32>
    %148 = tpu.matmul %17, %147, %cst_113 {dimension_numbers = #tpu.dot_dimension_numbers<[1], [0], [0], [1], [0, 0, 1, 1], [], []>, precision = #tpu.contract_precision<fp32>} : vector<4x32xf32>, vector<32x8xf32>, vector<4x8xf32> -> vector<4x8xf32>
    %c3_114 = arith.constant 3 : index
    %c0_115 = arith.constant 0 : index
    %c0_116 = arith.constant 0 : index
    %149 = vector.load %arg41[%c3_114, %c0_115, %c0_116] : memref<4x1x8xf32, #tpu.memory_space<vmem>>, vector<1x1x8xf32>
    %150 = vector.shape_cast %149 : vector<1x1x8xf32> to vector<1x8xf32>
    %151 = vector.broadcast %150 : vector<1x8xf32> to vector<4x8xf32>
    %152 = arith.addf %148, %151 : vector<4x8xf32>
    %c3_117 = arith.constant 3 : index
    %c0_118 = arith.constant 0 : index
    %c0_119 = arith.constant 0 : index
    %153 = vector.load %arg48[%c3_117, %c0_118, %c0_119] : memref<4x32x8xf32, #tpu.memory_space<vmem>>, vector<1x32x8xf32>
    %154 = vector.shape_cast %153 : vector<1x32x8xf32> to vector<32x8xf32>
    %cst_120 = arith.constant dense<0.000000e+00> : vector<4x8xf32>
    %155 = tpu.matmul %17, %154, %cst_120 {dimension_numbers = #tpu.dot_dimension_numbers<[1], [0], [0], [1], [0, 0, 1, 1], [], []>, precision = #tpu.contract_precision<fp32>} : vector<4x32xf32>, vector<32x8xf32>, vector<4x8xf32> -> vector<4x8xf32>
    %c3_121 = arith.constant 3 : index
    %c0_122 = arith.constant 0 : index
    %c0_123 = arith.constant 0 : index
    %156 = vector.load %arg44[%c3_121, %c0_122, %c0_123] : memref<4x1x8xf32, #tpu.memory_space<vmem>>, vector<1x1x8xf32>
    %157 = vector.shape_cast %156 : vector<1x1x8xf32> to vector<1x8xf32>
    %158 = vector.broadcast %157 : vector<1x8xf32> to vector<4x8xf32>
    %159 = arith.addf %155, %158 : vector<4x8xf32>
    %160 = tpu.transpose %152, [1, 0] : vector<4x8xf32> -> vector<8x4xf32>
    %cst_124 = arith.constant dense<0.000000e+00> : vector<4x4xf32>
    %161 = tpu.matmul %145, %160, %cst_124 {dimension_numbers = #tpu.dot_dimension_numbers<[1], [0], [0], [1], [0, 0, 1, 1], [], []>, precision = #tpu.contract_precision<fp32>} : vector<4x8xf32>, vector<8x4xf32>, vector<4x4xf32> -> vector<4x4xf32>
    %cst_125 = arith.constant 0.353553385 : f32
    %162 = vector.broadcast %cst_125 : f32 to vector<4x4xf32>
    %163 = arith.mulf %161, %162 : vector<4x4xf32>
    %cst_126 = arith.constant dense<0xFF800000> : vector<4xf32>
    %164 = vector.multi_reduction <maximumf>, %163, %cst_126 [1] : vector<4x4xf32> to vector<4xf32>
    %165 = vector.shape_cast %164 : vector<4xf32> to vector<4x1xf32>
    %166 = vector.broadcast %165 : vector<4x1xf32> to vector<4x4xf32>
    %167 = arith.subf %163, %166 : vector<4x4xf32>
    %168 = math.exp %167 : vector<4x4xf32>
    %cst_127 = arith.constant dense<0.000000e+00> : vector<4xf32>
    %169 = vector.multi_reduction <add>, %168, %cst_127 [1] : vector<4x4xf32> to vector<4xf32>
    %170 = vector.shape_cast %169 : vector<4xf32> to vector<4x1xf32>
    %171 = tpu.reciprocal %170 {approx = true} : vector<4x1xf32> -> vector<4x1xf32>
    %172 = vector.broadcast %171 : vector<4x1xf32> to vector<4x4xf32>
    %173 = arith.mulf %168, %172 : vector<4x4xf32>
    %cst_128 = arith.constant dense<0.000000e+00> : vector<4x8xf32>
    %174 = tpu.matmul %173, %159, %cst_128 {dimension_numbers = #tpu.dot_dimension_numbers<[1], [0], [0], [1], [0, 0, 1, 1], [], []>, precision = #tpu.contract_precision<fp32>} : vector<4x4xf32>, vector<4x8xf32>, vector<4x8xf32> -> vector<4x8xf32>
    %c3_129 = arith.constant 3 : index
    %c0_130 = arith.constant 0 : index
    %c0_131 = arith.constant 0 : index
    %175 = vector.load %arg46[%c3_129, %c0_130, %c0_131] : memref<4x8x32xf32, #tpu.memory_space<vmem>>, vector<1x8x32xf32>
    %176 = vector.shape_cast %175 : vector<1x8x32xf32> to vector<8x32xf32>
    %cst_132 = arith.constant dense<0.000000e+00> : vector<4x32xf32>
    %177 = tpu.matmul %174, %176, %cst_132 {dimension_numbers = #tpu.dot_dimension_numbers<[1], [0], [0], [1], [0, 0, 1, 1], [], []>, precision = #tpu.contract_precision<fp32>} : vector<4x8xf32>, vector<8x32xf32>, vector<4x32xf32> -> vector<4x32xf32>
    %178 = arith.addf %138, %177 : vector<4x32xf32>
    %c0_133 = arith.constant 0 : index
    %c0_134 = arith.constant 0 : index
    %179 = vector.load %arg42[%c0_133, %c0_134] : memref<1x32xf32, #tpu.memory_space<vmem>>, vector<1x32xf32>
    %180 = vector.broadcast %179 : vector<1x32xf32> to vector<4x32xf32>
    %181 = arith.addf %178, %180 : vector<4x32xf32>
    %182 = arith.addf %17, %181 : vector<4x32xf32>
    %cst_135 = arith.constant dense<0.000000e+00> : vector<4xf32>
    %183 = vector.multi_reduction <add>, %182, %cst_135 [1] : vector<4x32xf32> to vector<4xf32>
    %184 = vector.shape_cast %183 : vector<4xf32> to vector<4x1xf32>
    %cst_136 = arith.constant 3.200000e+01 : f32
    %185 = vector.broadcast %cst_136 : f32 to vector<4x1xf32>
    %186 = arith.divf %184, %185 : vector<4x1xf32>
    %187 = vector.broadcast %186 : vector<4x1xf32> to vector<4x32xf32>
    %188 = arith.subf %182, %187 : vector<4x32xf32>
    %189 = arith.mulf %188, %188 : vector<4x32xf32>
    %cst_137 = arith.constant dense<0.000000e+00> : vector<4xf32>
    %190 = vector.multi_reduction <add>, %189, %cst_137 [1] : vector<4x32xf32> to vector<4xf32>
    %191 = vector.shape_cast %190 : vector<4xf32> to vector<4x1xf32>
    %cst_138 = arith.constant 3.200000e+01 : f32
    %192 = vector.broadcast %cst_138 : f32 to vector<4x1xf32>
    %193 = arith.divf %191, %192 : vector<4x1xf32>
    %194 = vector.broadcast %186 : vector<4x1xf32> to vector<4x32xf32>
    %195 = arith.subf %182, %194 : vector<4x32xf32>
    %cst_139 = arith.constant 9.99999974E-6 : f32
    %196 = vector.broadcast %cst_139 : f32 to vector<4x1xf32>
    %197 = arith.addf %193, %196 : vector<4x1xf32>
    %198 = math.rsqrt %197 : vector<4x1xf32>
    %199 = vector.broadcast %198 : vector<4x1xf32> to vector<4x32xf32>
    %200 = arith.mulf %195, %199 : vector<4x32xf32>
    %c0_140 = arith.constant 0 : index
    %c0_141 = arith.constant 0 : index
    %201 = vector.load %arg36[%c0_140, %c0_141] : memref<1x32xf32, #tpu.memory_space<vmem>>, vector<1x32xf32>
    %202 = vector.broadcast %201 : vector<1x32xf32> to vector<4x32xf32>
    %203 = arith.mulf %200, %202 : vector<4x32xf32>
    %c0_142 = arith.constant 0 : index
    %c0_143 = arith.constant 0 : index
    %204 = vector.load %arg35[%c0_142, %c0_143] : memref<1x32xf32, #tpu.memory_space<vmem>>, vector<1x32xf32>
    %205 = vector.broadcast %204 : vector<1x32xf32> to vector<4x32xf32>
    %206 = arith.addf %203, %205 : vector<4x32xf32>
    %cst_144 = arith.constant 0.000000e+00 : f32
    %207 = vector.broadcast %cst_144 : f32 to vector<4x32xf32>
    %c0_145 = arith.constant 0 : index
    %c0_146 = arith.constant 0 : index
    %c0_147 = arith.constant 0 : index
    %208 = vector.load %arg29[%c0_145, %c0_146, %c0_147] : memref<4x32x8xf32, #tpu.memory_space<vmem>>, vector<1x32x8xf32>
    %209 = vector.shape_cast %208 : vector<1x32x8xf32> to vector<32x8xf32>
    %cst_148 = arith.constant dense<0.000000e+00> : vector<4x8xf32>
    %210 = tpu.matmul %206, %209, %cst_148 {dimension_numbers = #tpu.dot_dimension_numbers<[1], [0], [0], [1], [0, 0, 1, 1], [], []>, precision = #tpu.contract_precision<fp32>} : vector<4x32xf32>, vector<32x8xf32>, vector<4x8xf32> -> vector<4x8xf32>
    %c0_149 = arith.constant 0 : index
    %c0_150 = arith.constant 0 : index
    %c0_151 = arith.constant 0 : index
    %211 = vector.load %arg25[%c0_149, %c0_150, %c0_151] : memref<4x1x8xf32, #tpu.memory_space<vmem>>, vector<1x1x8xf32>
    %212 = vector.shape_cast %211 : vector<1x1x8xf32> to vector<1x8xf32>
    %213 = vector.broadcast %212 : vector<1x8xf32> to vector<4x8xf32>
    %214 = arith.addf %210, %213 : vector<4x8xf32>
    %c0_152 = arith.constant 0 : index
    %c0_153 = arith.constant 0 : index
    %c0_154 = arith.constant 0 : index
    %215 = vector.load %arg27[%c0_152, %c0_153, %c0_154] : memref<4x32x8xf32, #tpu.memory_space<vmem>>, vector<1x32x8xf32>
    %216 = vector.shape_cast %215 : vector<1x32x8xf32> to vector<32x8xf32>
    %cst_155 = arith.constant dense<0.000000e+00> : vector<12x8xf32>
    %217 = tpu.matmul %6, %216, %cst_155 {dimension_numbers = #tpu.dot_dimension_numbers<[1], [0], [0], [1], [0, 0, 1, 1], [], []>, precision = #tpu.contract_precision<fp32>} : vector<12x32xf32>, vector<32x8xf32>, vector<12x8xf32> -> vector<12x8xf32>
    %c0_156 = arith.constant 0 : index
    %c0_157 = arith.constant 0 : index
    %c0_158 = arith.constant 0 : index
    %218 = vector.load %arg23[%c0_156, %c0_157, %c0_158] : memref<4x1x8xf32, #tpu.memory_space<vmem>>, vector<1x1x8xf32>
    %219 = vector.shape_cast %218 : vector<1x1x8xf32> to vector<1x8xf32>
    %220 = vector.broadcast %219 : vector<1x8xf32> to vector<12x8xf32>
    %221 = arith.addf %217, %220 : vector<12x8xf32>
    %c0_159 = arith.constant 0 : index
    %c0_160 = arith.constant 0 : index
    %c0_161 = arith.constant 0 : index
    %222 = vector.load %arg30[%c0_159, %c0_160, %c0_161] : memref<4x32x8xf32, #tpu.memory_space<vmem>>, vector<1x32x8xf32>
    %223 = vector.shape_cast %222 : vector<1x32x8xf32> to vector<32x8xf32>
    %cst_162 = arith.constant dense<0.000000e+00> : vector<12x8xf32>
    %224 = tpu.matmul %6, %223, %cst_162 {dimension_numbers = #tpu.dot_dimension_numbers<[1], [0], [0], [1], [0, 0, 1, 1], [], []>, precision = #tpu.contract_precision<fp32>} : vector<12x32xf32>, vector<32x8xf32>, vector<12x8xf32> -> vector<12x8xf32>
    %c0_163 = arith.constant 0 : index
    %c0_164 = arith.constant 0 : index
    %c0_165 = arith.constant 0 : index
    %225 = vector.load %arg26[%c0_163, %c0_164, %c0_165] : memref<4x1x8xf32, #tpu.memory_space<vmem>>, vector<1x1x8xf32>
    %226 = vector.shape_cast %225 : vector<1x1x8xf32> to vector<1x8xf32>
    %227 = vector.broadcast %226 : vector<1x8xf32> to vector<12x8xf32>
    %228 = arith.addf %224, %227 : vector<12x8xf32>
    %229 = tpu.transpose %221, [1, 0] : vector<12x8xf32> -> vector<8x12xf32>
    %cst_166 = arith.constant dense<0.000000e+00> : vector<4x12xf32>
    %230 = tpu.matmul %214, %229, %cst_166 {dimension_numbers = #tpu.dot_dimension_numbers<[1], [0], [0], [1], [0, 0, 1, 1], [], []>, precision = #tpu.contract_precision<fp32>} : vector<4x8xf32>, vector<8x12xf32>, vector<4x12xf32> -> vector<4x12xf32>
    %cst_167 = arith.constant 0.353553385 : f32
    %231 = vector.broadcast %cst_167 : f32 to vector<4x12xf32>
    %232 = arith.mulf %230, %231 : vector<4x12xf32>
    %cst_168 = arith.constant dense<0xFF800000> : vector<4xf32>
    %233 = vector.multi_reduction <maximumf>, %232, %cst_168 [1] : vector<4x12xf32> to vector<4xf32>
    %234 = vector.shape_cast %233 : vector<4xf32> to vector<4x1xf32>
    %235 = vector.broadcast %234 : vector<4x1xf32> to vector<4x12xf32>
    %236 = arith.subf %232, %235 : vector<4x12xf32>
    %237 = math.exp %236 : vector<4x12xf32>
    %cst_169 = arith.constant dense<0.000000e+00> : vector<4xf32>
    %238 = vector.multi_reduction <add>, %237, %cst_169 [1] : vector<4x12xf32> to vector<4xf32>
    %239 = vector.shape_cast %238 : vector<4xf32> to vector<4x1xf32>
    %240 = tpu.reciprocal %239 {approx = true} : vector<4x1xf32> -> vector<4x1xf32>
    %241 = vector.broadcast %240 : vector<4x1xf32> to vector<4x12xf32>
    %242 = arith.mulf %237, %241 : vector<4x12xf32>
    %cst_170 = arith.constant dense<0.000000e+00> : vector<4x8xf32>
    %243 = tpu.matmul %242, %228, %cst_170 {dimension_numbers = #tpu.dot_dimension_numbers<[1], [0], [0], [1], [0, 0, 1, 1], [], []>, precision = #tpu.contract_precision<fp32>} : vector<4x12xf32>, vector<12x8xf32>, vector<4x8xf32> -> vector<4x8xf32>
    %c0_171 = arith.constant 0 : index
    %c0_172 = arith.constant 0 : index
    %c0_173 = arith.constant 0 : index
    %244 = vector.load %arg28[%c0_171, %c0_172, %c0_173] : memref<4x8x32xf32, #tpu.memory_space<vmem>>, vector<1x8x32xf32>
    %245 = vector.shape_cast %244 : vector<1x8x32xf32> to vector<8x32xf32>
    %cst_174 = arith.constant dense<0.000000e+00> : vector<4x32xf32>
    %246 = tpu.matmul %243, %245, %cst_174 {dimension_numbers = #tpu.dot_dimension_numbers<[1], [0], [0], [1], [0, 0, 1, 1], [], []>, precision = #tpu.contract_precision<fp32>} : vector<4x8xf32>, vector<8x32xf32>, vector<4x32xf32> -> vector<4x32xf32>
    %247 = arith.addf %207, %246 : vector<4x32xf32>
    %c1_175 = arith.constant 1 : index
    %c0_176 = arith.constant 0 : index
    %c0_177 = arith.constant 0 : index
    %248 = vector.load %arg29[%c1_175, %c0_176, %c0_177] : memref<4x32x8xf32, #tpu.memory_space<vmem>>, vector<1x32x8xf32>
    %249 = vector.shape_cast %248 : vector<1x32x8xf32> to vector<32x8xf32>
    %cst_178 = arith.constant dense<0.000000e+00> : vector<4x8xf32>
    %250 = tpu.matmul %206, %249, %cst_178 {dimension_numbers = #tpu.dot_dimension_numbers<[1], [0], [0], [1], [0, 0, 1, 1], [], []>, precision = #tpu.contract_precision<fp32>} : vector<4x32xf32>, vector<32x8xf32>, vector<4x8xf32> -> vector<4x8xf32>
    %c1_179 = arith.constant 1 : index
    %c0_180 = arith.constant 0 : index
    %c0_181 = arith.constant 0 : index
    %251 = vector.load %arg25[%c1_179, %c0_180, %c0_181] : memref<4x1x8xf32, #tpu.memory_space<vmem>>, vector<1x1x8xf32>
    %252 = vector.shape_cast %251 : vector<1x1x8xf32> to vector<1x8xf32>
    %253 = vector.broadcast %252 : vector<1x8xf32> to vector<4x8xf32>
    %254 = arith.addf %250, %253 : vector<4x8xf32>
    %c1_182 = arith.constant 1 : index
    %c0_183 = arith.constant 0 : index
    %c0_184 = arith.constant 0 : index
    %255 = vector.load %arg27[%c1_182, %c0_183, %c0_184] : memref<4x32x8xf32, #tpu.memory_space<vmem>>, vector<1x32x8xf32>
    %256 = vector.shape_cast %255 : vector<1x32x8xf32> to vector<32x8xf32>
    %cst_185 = arith.constant dense<0.000000e+00> : vector<12x8xf32>
    %257 = tpu.matmul %6, %256, %cst_185 {dimension_numbers = #tpu.dot_dimension_numbers<[1], [0], [0], [1], [0, 0, 1, 1], [], []>, precision = #tpu.contract_precision<fp32>} : vector<12x32xf32>, vector<32x8xf32>, vector<12x8xf32> -> vector<12x8xf32>
    %c1_186 = arith.constant 1 : index
    %c0_187 = arith.constant 0 : index
    %c0_188 = arith.constant 0 : index
    %258 = vector.load %arg23[%c1_186, %c0_187, %c0_188] : memref<4x1x8xf32, #tpu.memory_space<vmem>>, vector<1x1x8xf32>
    %259 = vector.shape_cast %258 : vector<1x1x8xf32> to vector<1x8xf32>
    %260 = vector.broadcast %259 : vector<1x8xf32> to vector<12x8xf32>
    %261 = arith.addf %257, %260 : vector<12x8xf32>
    %c1_189 = arith.constant 1 : index
    %c0_190 = arith.constant 0 : index
    %c0_191 = arith.constant 0 : index
    %262 = vector.load %arg30[%c1_189, %c0_190, %c0_191] : memref<4x32x8xf32, #tpu.memory_space<vmem>>, vector<1x32x8xf32>
    %263 = vector.shape_cast %262 : vector<1x32x8xf32> to vector<32x8xf32>
    %cst_192 = arith.constant dense<0.000000e+00> : vector<12x8xf32>
    %264 = tpu.matmul %6, %263, %cst_192 {dimension_numbers = #tpu.dot_dimension_numbers<[1], [0], [0], [1], [0, 0, 1, 1], [], []>, precision = #tpu.contract_precision<fp32>} : vector<12x32xf32>, vector<32x8xf32>, vector<12x8xf32> -> vector<12x8xf32>
    %c1_193 = arith.constant 1 : index
    %c0_194 = arith.constant 0 : index
    %c0_195 = arith.constant 0 : index
    %265 = vector.load %arg26[%c1_193, %c0_194, %c0_195] : memref<4x1x8xf32, #tpu.memory_space<vmem>>, vector<1x1x8xf32>
    %266 = vector.shape_cast %265 : vector<1x1x8xf32> to vector<1x8xf32>
    %267 = vector.broadcast %266 : vector<1x8xf32> to vector<12x8xf32>
    %268 = arith.addf %264, %267 : vector<12x8xf32>
    %269 = tpu.transpose %261, [1, 0] : vector<12x8xf32> -> vector<8x12xf32>
    %cst_196 = arith.constant dense<0.000000e+00> : vector<4x12xf32>
    %270 = tpu.matmul %254, %269, %cst_196 {dimension_numbers = #tpu.dot_dimension_numbers<[1], [0], [0], [1], [0, 0, 1, 1], [], []>, precision = #tpu.contract_precision<fp32>} : vector<4x8xf32>, vector<8x12xf32>, vector<4x12xf32> -> vector<4x12xf32>
    %cst_197 = arith.constant 0.353553385 : f32
    %271 = vector.broadcast %cst_197 : f32 to vector<4x12xf32>
    %272 = arith.mulf %270, %271 : vector<4x12xf32>
    %cst_198 = arith.constant dense<0xFF800000> : vector<4xf32>
    %273 = vector.multi_reduction <maximumf>, %272, %cst_198 [1] : vector<4x12xf32> to vector<4xf32>
    %274 = vector.shape_cast %273 : vector<4xf32> to vector<4x1xf32>
    %275 = vector.broadcast %274 : vector<4x1xf32> to vector<4x12xf32>
    %276 = arith.subf %272, %275 : vector<4x12xf32>
    %277 = math.exp %276 : vector<4x12xf32>
    %cst_199 = arith.constant dense<0.000000e+00> : vector<4xf32>
    %278 = vector.multi_reduction <add>, %277, %cst_199 [1] : vector<4x12xf32> to vector<4xf32>
    %279 = vector.shape_cast %278 : vector<4xf32> to vector<4x1xf32>
    %280 = tpu.reciprocal %279 {approx = true} : vector<4x1xf32> -> vector<4x1xf32>
    %281 = vector.broadcast %280 : vector<4x1xf32> to vector<4x12xf32>
    %282 = arith.mulf %277, %281 : vector<4x12xf32>
    %cst_200 = arith.constant dense<0.000000e+00> : vector<4x8xf32>
    %283 = tpu.matmul %282, %268, %cst_200 {dimension_numbers = #tpu.dot_dimension_numbers<[1], [0], [0], [1], [0, 0, 1, 1], [], []>, precision = #tpu.contract_precision<fp32>} : vector<4x12xf32>, vector<12x8xf32>, vector<4x8xf32> -> vector<4x8xf32>
    %c1_201 = arith.constant 1 : index
    %c0_202 = arith.constant 0 : index
    %c0_203 = arith.constant 0 : index
    %284 = vector.load %arg28[%c1_201, %c0_202, %c0_203] : memref<4x8x32xf32, #tpu.memory_space<vmem>>, vector<1x8x32xf32>
    %285 = vector.shape_cast %284 : vector<1x8x32xf32> to vector<8x32xf32>
    %cst_204 = arith.constant dense<0.000000e+00> : vector<4x32xf32>
    %286 = tpu.matmul %283, %285, %cst_204 {dimension_numbers = #tpu.dot_dimension_numbers<[1], [0], [0], [1], [0, 0, 1, 1], [], []>, precision = #tpu.contract_precision<fp32>} : vector<4x8xf32>, vector<8x32xf32>, vector<4x32xf32> -> vector<4x32xf32>
    %287 = arith.addf %247, %286 : vector<4x32xf32>
    %c2_205 = arith.constant 2 : index
    %c0_206 = arith.constant 0 : index
    %c0_207 = arith.constant 0 : index
    %288 = vector.load %arg29[%c2_205, %c0_206, %c0_207] : memref<4x32x8xf32, #tpu.memory_space<vmem>>, vector<1x32x8xf32>
    %289 = vector.shape_cast %288 : vector<1x32x8xf32> to vector<32x8xf32>
    %cst_208 = arith.constant dense<0.000000e+00> : vector<4x8xf32>
    %290 = tpu.matmul %206, %289, %cst_208 {dimension_numbers = #tpu.dot_dimension_numbers<[1], [0], [0], [1], [0, 0, 1, 1], [], []>, precision = #tpu.contract_precision<fp32>} : vector<4x32xf32>, vector<32x8xf32>, vector<4x8xf32> -> vector<4x8xf32>
    %c2_209 = arith.constant 2 : index
    %c0_210 = arith.constant 0 : index
    %c0_211 = arith.constant 0 : index
    %291 = vector.load %arg25[%c2_209, %c0_210, %c0_211] : memref<4x1x8xf32, #tpu.memory_space<vmem>>, vector<1x1x8xf32>
    %292 = vector.shape_cast %291 : vector<1x1x8xf32> to vector<1x8xf32>
    %293 = vector.broadcast %292 : vector<1x8xf32> to vector<4x8xf32>
    %294 = arith.addf %290, %293 : vector<4x8xf32>
    %c2_212 = arith.constant 2 : index
    %c0_213 = arith.constant 0 : index
    %c0_214 = arith.constant 0 : index
    %295 = vector.load %arg27[%c2_212, %c0_213, %c0_214] : memref<4x32x8xf32, #tpu.memory_space<vmem>>, vector<1x32x8xf32>
    %296 = vector.shape_cast %295 : vector<1x32x8xf32> to vector<32x8xf32>
    %cst_215 = arith.constant dense<0.000000e+00> : vector<12x8xf32>
    %297 = tpu.matmul %6, %296, %cst_215 {dimension_numbers = #tpu.dot_dimension_numbers<[1], [0], [0], [1], [0, 0, 1, 1], [], []>, precision = #tpu.contract_precision<fp32>} : vector<12x32xf32>, vector<32x8xf32>, vector<12x8xf32> -> vector<12x8xf32>
    %c2_216 = arith.constant 2 : index
    %c0_217 = arith.constant 0 : index
    %c0_218 = arith.constant 0 : index
    %298 = vector.load %arg23[%c2_216, %c0_217, %c0_218] : memref<4x1x8xf32, #tpu.memory_space<vmem>>, vector<1x1x8xf32>
    %299 = vector.shape_cast %298 : vector<1x1x8xf32> to vector<1x8xf32>
    %300 = vector.broadcast %299 : vector<1x8xf32> to vector<12x8xf32>
    %301 = arith.addf %297, %300 : vector<12x8xf32>
    %c2_219 = arith.constant 2 : index
    %c0_220 = arith.constant 0 : index
    %c0_221 = arith.constant 0 : index
    %302 = vector.load %arg30[%c2_219, %c0_220, %c0_221] : memref<4x32x8xf32, #tpu.memory_space<vmem>>, vector<1x32x8xf32>
    %303 = vector.shape_cast %302 : vector<1x32x8xf32> to vector<32x8xf32>
    %cst_222 = arith.constant dense<0.000000e+00> : vector<12x8xf32>
    %304 = tpu.matmul %6, %303, %cst_222 {dimension_numbers = #tpu.dot_dimension_numbers<[1], [0], [0], [1], [0, 0, 1, 1], [], []>, precision = #tpu.contract_precision<fp32>} : vector<12x32xf32>, vector<32x8xf32>, vector<12x8xf32> -> vector<12x8xf32>
    %c2_223 = arith.constant 2 : index
    %c0_224 = arith.constant 0 : index
    %c0_225 = arith.constant 0 : index
    %305 = vector.load %arg26[%c2_223, %c0_224, %c0_225] : memref<4x1x8xf32, #tpu.memory_space<vmem>>, vector<1x1x8xf32>
    %306 = vector.shape_cast %305 : vector<1x1x8xf32> to vector<1x8xf32>
    %307 = vector.broadcast %306 : vector<1x8xf32> to vector<12x8xf32>
    %308 = arith.addf %304, %307 : vector<12x8xf32>
    %309 = tpu.transpose %301, [1, 0] : vector<12x8xf32> -> vector<8x12xf32>
    %cst_226 = arith.constant dense<0.000000e+00> : vector<4x12xf32>
    %310 = tpu.matmul %294, %309, %cst_226 {dimension_numbers = #tpu.dot_dimension_numbers<[1], [0], [0], [1], [0, 0, 1, 1], [], []>, precision = #tpu.contract_precision<fp32>} : vector<4x8xf32>, vector<8x12xf32>, vector<4x12xf32> -> vector<4x12xf32>
    %cst_227 = arith.constant 0.353553385 : f32
    %311 = vector.broadcast %cst_227 : f32 to vector<4x12xf32>
    %312 = arith.mulf %310, %311 : vector<4x12xf32>
    %cst_228 = arith.constant dense<0xFF800000> : vector<4xf32>
    %313 = vector.multi_reduction <maximumf>, %312, %cst_228 [1] : vector<4x12xf32> to vector<4xf32>
    %314 = vector.shape_cast %313 : vector<4xf32> to vector<4x1xf32>
    %315 = vector.broadcast %314 : vector<4x1xf32> to vector<4x12xf32>
    %316 = arith.subf %312, %315 : vector<4x12xf32>
    %317 = math.exp %316 : vector<4x12xf32>
    %cst_229 = arith.constant dense<0.000000e+00> : vector<4xf32>
    %318 = vector.multi_reduction <add>, %317, %cst_229 [1] : vector<4x12xf32> to vector<4xf32>
    %319 = vector.shape_cast %318 : vector<4xf32> to vector<4x1xf32>
    %320 = tpu.reciprocal %319 {approx = true} : vector<4x1xf32> -> vector<4x1xf32>
    %321 = vector.broadcast %320 : vector<4x1xf32> to vector<4x12xf32>
    %322 = arith.mulf %317, %321 : vector<4x12xf32>
    %cst_230 = arith.constant dense<0.000000e+00> : vector<4x8xf32>
    %323 = tpu.matmul %322, %308, %cst_230 {dimension_numbers = #tpu.dot_dimension_numbers<[1], [0], [0], [1], [0, 0, 1, 1], [], []>, precision = #tpu.contract_precision<fp32>} : vector<4x12xf32>, vector<12x8xf32>, vector<4x8xf32> -> vector<4x8xf32>
    %c2_231 = arith.constant 2 : index
    %c0_232 = arith.constant 0 : index
    %c0_233 = arith.constant 0 : index
    %324 = vector.load %arg28[%c2_231, %c0_232, %c0_233] : memref<4x8x32xf32, #tpu.memory_space<vmem>>, vector<1x8x32xf32>
    %325 = vector.shape_cast %324 : vector<1x8x32xf32> to vector<8x32xf32>
    %cst_234 = arith.constant dense<0.000000e+00> : vector<4x32xf32>
    %326 = tpu.matmul %323, %325, %cst_234 {dimension_numbers = #tpu.dot_dimension_numbers<[1], [0], [0], [1], [0, 0, 1, 1], [], []>, precision = #tpu.contract_precision<fp32>} : vector<4x8xf32>, vector<8x32xf32>, vector<4x32xf32> -> vector<4x32xf32>
    %327 = arith.addf %287, %326 : vector<4x32xf32>
    %c3_235 = arith.constant 3 : index
    %c0_236 = arith.constant 0 : index
    %c0_237 = arith.constant 0 : index
    %328 = vector.load %arg29[%c3_235, %c0_236, %c0_237] : memref<4x32x8xf32, #tpu.memory_space<vmem>>, vector<1x32x8xf32>
    %329 = vector.shape_cast %328 : vector<1x32x8xf32> to vector<32x8xf32>
    %cst_238 = arith.constant dense<0.000000e+00> : vector<4x8xf32>
    %330 = tpu.matmul %206, %329, %cst_238 {dimension_numbers = #tpu.dot_dimension_numbers<[1], [0], [0], [1], [0, 0, 1, 1], [], []>, precision = #tpu.contract_precision<fp32>} : vector<4x32xf32>, vector<32x8xf32>, vector<4x8xf32> -> vector<4x8xf32>
    %c3_239 = arith.constant 3 : index
    %c0_240 = arith.constant 0 : index
    %c0_241 = arith.constant 0 : index
    %331 = vector.load %arg25[%c3_239, %c0_240, %c0_241] : memref<4x1x8xf32, #tpu.memory_space<vmem>>, vector<1x1x8xf32>
    %332 = vector.shape_cast %331 : vector<1x1x8xf32> to vector<1x8xf32>
    %333 = vector.broadcast %332 : vector<1x8xf32> to vector<4x8xf32>
    %334 = arith.addf %330, %333 : vector<4x8xf32>
    %c3_242 = arith.constant 3 : index
    %c0_243 = arith.constant 0 : index
    %c0_244 = arith.constant 0 : index
    %335 = vector.load %arg27[%c3_242, %c0_243, %c0_244] : memref<4x32x8xf32, #tpu.memory_space<vmem>>, vector<1x32x8xf32>
    %336 = vector.shape_cast %335 : vector<1x32x8xf32> to vector<32x8xf32>
    %cst_245 = arith.constant dense<0.000000e+00> : vector<12x8xf32>
    %337 = tpu.matmul %6, %336, %cst_245 {dimension_numbers = #tpu.dot_dimension_numbers<[1], [0], [0], [1], [0, 0, 1, 1], [], []>, precision = #tpu.contract_precision<fp32>} : vector<12x32xf32>, vector<32x8xf32>, vector<12x8xf32> -> vector<12x8xf32>
    %c3_246 = arith.constant 3 : index
    %c0_247 = arith.constant 0 : index
    %c0_248 = arith.constant 0 : index
    %338 = vector.load %arg23[%c3_246, %c0_247, %c0_248] : memref<4x1x8xf32, #tpu.memory_space<vmem>>, vector<1x1x8xf32>
    %339 = vector.shape_cast %338 : vector<1x1x8xf32> to vector<1x8xf32>
    %340 = vector.broadcast %339 : vector<1x8xf32> to vector<12x8xf32>
    %341 = arith.addf %337, %340 : vector<12x8xf32>
    %c3_249 = arith.constant 3 : index
    %c0_250 = arith.constant 0 : index
    %c0_251 = arith.constant 0 : index
    %342 = vector.load %arg30[%c3_249, %c0_250, %c0_251] : memref<4x32x8xf32, #tpu.memory_space<vmem>>, vector<1x32x8xf32>
    %343 = vector.shape_cast %342 : vector<1x32x8xf32> to vector<32x8xf32>
    %cst_252 = arith.constant dense<0.000000e+00> : vector<12x8xf32>
    %344 = tpu.matmul %6, %343, %cst_252 {dimension_numbers = #tpu.dot_dimension_numbers<[1], [0], [0], [1], [0, 0, 1, 1], [], []>, precision = #tpu.contract_precision<fp32>} : vector<12x32xf32>, vector<32x8xf32>, vector<12x8xf32> -> vector<12x8xf32>
    %c3_253 = arith.constant 3 : index
    %c0_254 = arith.constant 0 : index
    %c0_255 = arith.constant 0 : index
    %345 = vector.load %arg26[%c3_253, %c0_254, %c0_255] : memref<4x1x8xf32, #tpu.memory_space<vmem>>, vector<1x1x8xf32>
    %346 = vector.shape_cast %345 : vector<1x1x8xf32> to vector<1x8xf32>
    %347 = vector.broadcast %346 : vector<1x8xf32> to vector<12x8xf32>
    %348 = arith.addf %344, %347 : vector<12x8xf32>
    %349 = tpu.transpose %341, [1, 0] : vector<12x8xf32> -> vector<8x12xf32>
    %cst_256 = arith.constant dense<0.000000e+00> : vector<4x12xf32>
    %350 = tpu.matmul %334, %349, %cst_256 {dimension_numbers = #tpu.dot_dimension_numbers<[1], [0], [0], [1], [0, 0, 1, 1], [], []>, precision = #tpu.contract_precision<fp32>} : vector<4x8xf32>, vector<8x12xf32>, vector<4x12xf32> -> vector<4x12xf32>
    %cst_257 = arith.constant 0.353553385 : f32
    %351 = vector.broadcast %cst_257 : f32 to vector<4x12xf32>
    %352 = arith.mulf %350, %351 : vector<4x12xf32>
    %cst_258 = arith.constant dense<0xFF800000> : vector<4xf32>
    %353 = vector.multi_reduction <maximumf>, %352, %cst_258 [1] : vector<4x12xf32> to vector<4xf32>
    %354 = vector.shape_cast %353 : vector<4xf32> to vector<4x1xf32>
    %355 = vector.broadcast %354 : vector<4x1xf32> to vector<4x12xf32>
    %356 = arith.subf %352, %355 : vector<4x12xf32>
    %357 = math.exp %356 : vector<4x12xf32>
    %cst_259 = arith.constant dense<0.000000e+00> : vector<4xf32>
    %358 = vector.multi_reduction <add>, %357, %cst_259 [1] : vector<4x12xf32> to vector<4xf32>
    %359 = vector.shape_cast %358 : vector<4xf32> to vector<4x1xf32>
    %360 = tpu.reciprocal %359 {approx = true} : vector<4x1xf32> -> vector<4x1xf32>
    %361 = vector.broadcast %360 : vector<4x1xf32> to vector<4x12xf32>
    %362 = arith.mulf %357, %361 : vector<4x12xf32>
    %cst_260 = arith.constant dense<0.000000e+00> : vector<4x8xf32>
    %363 = tpu.matmul %362, %348, %cst_260 {dimension_numbers = #tpu.dot_dimension_numbers<[1], [0], [0], [1], [0, 0, 1, 1], [], []>, precision = #tpu.contract_precision<fp32>} : vector<4x12xf32>, vector<12x8xf32>, vector<4x8xf32> -> vector<4x8xf32>
    %c3_261 = arith.constant 3 : index
    %c0_262 = arith.constant 0 : index
    %c0_263 = arith.constant 0 : index
    %364 = vector.load %arg28[%c3_261, %c0_262, %c0_263] : memref<4x8x32xf32, #tpu.memory_space<vmem>>, vector<1x8x32xf32>
    %365 = vector.shape_cast %364 : vector<1x8x32xf32> to vector<8x32xf32>
    %cst_264 = arith.constant dense<0.000000e+00> : vector<4x32xf32>
    %366 = tpu.matmul %363, %365, %cst_264 {dimension_numbers = #tpu.dot_dimension_numbers<[1], [0], [0], [1], [0, 0, 1, 1], [], []>, precision = #tpu.contract_precision<fp32>} : vector<4x8xf32>, vector<8x32xf32>, vector<4x32xf32> -> vector<4x32xf32>
    %367 = arith.addf %327, %366 : vector<4x32xf32>
    %c0_265 = arith.constant 0 : index
    %c0_266 = arith.constant 0 : index
    %368 = vector.load %arg24[%c0_265, %c0_266] : memref<1x32xf32, #tpu.memory_space<vmem>>, vector<1x32xf32>
    %369 = vector.broadcast %368 : vector<1x32xf32> to vector<4x32xf32>
    %370 = arith.addf %367, %369 : vector<4x32xf32>
    %371 = arith.addf %206, %370 : vector<4x32xf32>
    %cst_267 = arith.constant dense<0.000000e+00> : vector<4xf32>
    %372 = vector.multi_reduction <add>, %371, %cst_267 [1] : vector<4x32xf32> to vector<4xf32>
    %373 = vector.shape_cast %372 : vector<4xf32> to vector<4x1xf32>
    %cst_268 = arith.constant 3.200000e+01 : f32
    %374 = vector.broadcast %cst_268 : f32 to vector<4x1xf32>
    %375 = arith.divf %373, %374 : vector<4x1xf32>
    %376 = vector.broadcast %375 : vector<4x1xf32> to vector<4x32xf32>
    %377 = arith.subf %371, %376 : vector<4x32xf32>
    %378 = arith.mulf %377, %377 : vector<4x32xf32>
    %cst_269 = arith.constant dense<0.000000e+00> : vector<4xf32>
    %379 = vector.multi_reduction <add>, %378, %cst_269 [1] : vector<4x32xf32> to vector<4xf32>
    %380 = vector.shape_cast %379 : vector<4xf32> to vector<4x1xf32>
    %cst_270 = arith.constant 3.200000e+01 : f32
    %381 = vector.broadcast %cst_270 : f32 to vector<4x1xf32>
    %382 = arith.divf %380, %381 : vector<4x1xf32>
    %383 = vector.broadcast %375 : vector<4x1xf32> to vector<4x32xf32>
    %384 = arith.subf %371, %383 : vector<4x32xf32>
    %cst_271 = arith.constant 9.99999974E-6 : f32
    %385 = vector.broadcast %cst_271 : f32 to vector<4x1xf32>
    %386 = arith.addf %382, %385 : vector<4x1xf32>
    %387 = math.rsqrt %386 : vector<4x1xf32>
    %388 = vector.broadcast %387 : vector<4x1xf32> to vector<4x32xf32>
    %389 = arith.mulf %384, %388 : vector<4x32xf32>
    %c0_272 = arith.constant 0 : index
    %c0_273 = arith.constant 0 : index
    %390 = vector.load %arg38[%c0_272, %c0_273] : memref<1x32xf32, #tpu.memory_space<vmem>>, vector<1x32xf32>
    %391 = vector.broadcast %390 : vector<1x32xf32> to vector<4x32xf32>
    %392 = arith.mulf %389, %391 : vector<4x32xf32>
    %c0_274 = arith.constant 0 : index
    %c0_275 = arith.constant 0 : index
    %393 = vector.load %arg37[%c0_274, %c0_275] : memref<1x32xf32, #tpu.memory_space<vmem>>, vector<1x32xf32>
    %394 = vector.broadcast %393 : vector<1x32xf32> to vector<4x32xf32>
    %395 = arith.addf %392, %394 : vector<4x32xf32>
    %c0_276 = arith.constant 0 : index
    %c0_277 = arith.constant 0 : index
    %396 = vector.load %arg33[%c0_276, %c0_277] : memref<32x64xf32, #tpu.memory_space<vmem>>, vector<32x64xf32>
    %cst_278 = arith.constant dense<0.000000e+00> : vector<4x64xf32>
    %397 = tpu.matmul %395, %396, %cst_278 {dimension_numbers = #tpu.dot_dimension_numbers<[1], [0], [0], [1], [0, 0, 1, 1], [], []>, precision = #tpu.contract_precision<fp32>} : vector<4x32xf32>, vector<32x64xf32>, vector<4x64xf32> -> vector<4x64xf32>
    %c0_279 = arith.constant 0 : index
    %c0_280 = arith.constant 0 : index
    %398 = vector.load %arg31[%c0_279, %c0_280] : memref<1x64xf32, #tpu.memory_space<vmem>>, vector<1x64xf32>
    %399 = vector.broadcast %398 : vector<1x64xf32> to vector<4x64xf32>
    %400 = arith.addf %397, %399 : vector<4x64xf32>
    %cst_281 = arith.constant 0.000000e+00 : f32
    %401 = vector.broadcast %cst_281 : f32 to vector<4x64xf32>
    %402 = arith.maximumf %400, %401 : vector<4x64xf32>
    %c0_282 = arith.constant 0 : index
    %c0_283 = arith.constant 0 : index
    %403 = vector.load %arg34[%c0_282, %c0_283] : memref<64x32xf32, #tpu.memory_space<vmem>>, vector<64x32xf32>
    %cst_284 = arith.constant dense<0.000000e+00> : vector<4x32xf32>
    %404 = tpu.matmul %402, %403, %cst_284 {dimension_numbers = #tpu.dot_dimension_numbers<[1], [0], [0], [1], [0, 0, 1, 1], [], []>, precision = #tpu.contract_precision<fp32>} : vector<4x64xf32>, vector<64x32xf32>, vector<4x32xf32> -> vector<4x32xf32>
    %c0_285 = arith.constant 0 : index
    %c0_286 = arith.constant 0 : index
    %405 = vector.load %arg32[%c0_285, %c0_286] : memref<1x32xf32, #tpu.memory_space<vmem>>, vector<1x32xf32>
    %406 = vector.broadcast %405 : vector<1x32xf32> to vector<4x32xf32>
    %407 = arith.addf %404, %406 : vector<4x32xf32>
    %408 = arith.addf %395, %407 : vector<4x32xf32>
    %cst_287 = arith.constant dense<0.000000e+00> : vector<4xf32>
    %409 = vector.multi_reduction <add>, %408, %cst_287 [1] : vector<4x32xf32> to vector<4xf32>
    %410 = vector.shape_cast %409 : vector<4xf32> to vector<4x1xf32>
    %cst_288 = arith.constant 3.200000e+01 : f32
    %411 = vector.broadcast %cst_288 : f32 to vector<4x1xf32>
    %412 = arith.divf %410, %411 : vector<4x1xf32>
    %413 = vector.broadcast %412 : vector<4x1xf32> to vector<4x32xf32>
    %414 = arith.subf %408, %413 : vector<4x32xf32>
    %415 = arith.mulf %414, %414 : vector<4x32xf32>
    %cst_289 = arith.constant dense<0.000000e+00> : vector<4xf32>
    %416 = vector.multi_reduction <add>, %415, %cst_289 [1] : vector<4x32xf32> to vector<4xf32>
    %417 = vector.shape_cast %416 : vector<4xf32> to vector<4x1xf32>
    %cst_290 = arith.constant 3.200000e+01 : f32
    %418 = vector.broadcast %cst_290 : f32 to vector<4x1xf32>
    %419 = arith.divf %417, %418 : vector<4x1xf32>
    %420 = vector.broadcast %412 : vector<4x1xf32> to vector<4x32xf32>
    %421 = arith.subf %408, %420 : vector<4x32xf32>
    %cst_291 = arith.constant 9.99999974E-6 : f32
    %422 = vector.broadcast %cst_291 : f32 to vector<4x1xf32>
    %423 = arith.addf %419, %422 : vector<4x1xf32>
    %424 = math.rsqrt %423 : vector<4x1xf32>
    %425 = vector.broadcast %424 : vector<4x1xf32> to vector<4x32xf32>
    %426 = arith.mulf %421, %425 : vector<4x32xf32>
    %c0_292 = arith.constant 0 : index
    %c0_293 = arith.constant 0 : index
    %427 = vector.load %arg40[%c0_292, %c0_293] : memref<1x32xf32, #tpu.memory_space<vmem>>, vector<1x32xf32>
    %428 = vector.broadcast %427 : vector<1x32xf32> to vector<4x32xf32>
    %429 = arith.mulf %426, %428 : vector<4x32xf32>
    %c0_294 = arith.constant 0 : index
    %c0_295 = arith.constant 0 : index
    %430 = vector.load %arg39[%c0_294, %c0_295] : memref<1x32xf32, #tpu.memory_space<vmem>>, vector<1x32xf32>
    %431 = vector.broadcast %430 : vector<1x32xf32> to vector<4x32xf32>
    %432 = arith.addf %429, %431 : vector<4x32xf32>
    %cst_296 = arith.constant 0.000000e+00 : f32
    %433 = vector.broadcast %cst_296 : f32 to vector<4x32xf32>
    %c0_297 = arith.constant 0 : index
    %c0_298 = arith.constant 0 : index
    %c0_299 = arith.constant 0 : index
    %434 = vector.load %arg13[%c0_297, %c0_298, %c0_299] : memref<4x32x8xf32, #tpu.memory_space<vmem>>, vector<1x32x8xf32>
    %435 = vector.shape_cast %434 : vector<1x32x8xf32> to vector<32x8xf32>
    %cst_300 = arith.constant dense<0.000000e+00> : vector<4x8xf32>
    %436 = tpu.matmul %432, %435, %cst_300 {dimension_numbers = #tpu.dot_dimension_numbers<[1], [0], [0], [1], [0, 0, 1, 1], [], []>, precision = #tpu.contract_precision<fp32>} : vector<4x32xf32>, vector<32x8xf32>, vector<4x8xf32> -> vector<4x8xf32>
    %c0_301 = arith.constant 0 : index
    %c0_302 = arith.constant 0 : index
    %c0_303 = arith.constant 0 : index
    %437 = vector.load %arg9[%c0_301, %c0_302, %c0_303] : memref<4x1x8xf32, #tpu.memory_space<vmem>>, vector<1x1x8xf32>
    %438 = vector.shape_cast %437 : vector<1x1x8xf32> to vector<1x8xf32>
    %439 = vector.broadcast %438 : vector<1x8xf32> to vector<4x8xf32>
    %440 = arith.addf %436, %439 : vector<4x8xf32>
    %c0_304 = arith.constant 0 : index
    %c0_305 = arith.constant 0 : index
    %c0_306 = arith.constant 0 : index
    %441 = vector.load %arg11[%c0_304, %c0_305, %c0_306] : memref<4x32x8xf32, #tpu.memory_space<vmem>>, vector<1x32x8xf32>
    %442 = vector.shape_cast %441 : vector<1x32x8xf32> to vector<32x8xf32>
    %cst_307 = arith.constant dense<0.000000e+00> : vector<16x8xf32>
    %443 = tpu.matmul %1, %442, %cst_307 {dimension_numbers = #tpu.dot_dimension_numbers<[1], [0], [0], [1], [0, 0, 1, 1], [], []>, precision = #tpu.contract_precision<fp32>} : vector<16x32xf32>, vector<32x8xf32>, vector<16x8xf32> -> vector<16x8xf32>
    %c0_308 = arith.constant 0 : index
    %c0_309 = arith.constant 0 : index
    %c0_310 = arith.constant 0 : index
    %444 = vector.load %arg7[%c0_308, %c0_309, %c0_310] : memref<4x1x8xf32, #tpu.memory_space<vmem>>, vector<1x1x8xf32>
    %445 = vector.shape_cast %444 : vector<1x1x8xf32> to vector<1x8xf32>
    %446 = vector.broadcast %445 : vector<1x8xf32> to vector<16x8xf32>
    %447 = arith.addf %443, %446 : vector<16x8xf32>
    %c0_311 = arith.constant 0 : index
    %c0_312 = arith.constant 0 : index
    %c0_313 = arith.constant 0 : index
    %448 = vector.load %arg14[%c0_311, %c0_312, %c0_313] : memref<4x32x8xf32, #tpu.memory_space<vmem>>, vector<1x32x8xf32>
    %449 = vector.shape_cast %448 : vector<1x32x8xf32> to vector<32x8xf32>
    %cst_314 = arith.constant dense<0.000000e+00> : vector<16x8xf32>
    %450 = tpu.matmul %1, %449, %cst_314 {dimension_numbers = #tpu.dot_dimension_numbers<[1], [0], [0], [1], [0, 0, 1, 1], [], []>, precision = #tpu.contract_precision<fp32>} : vector<16x32xf32>, vector<32x8xf32>, vector<16x8xf32> -> vector<16x8xf32>
    %c0_315 = arith.constant 0 : index
    %c0_316 = arith.constant 0 : index
    %c0_317 = arith.constant 0 : index
    %451 = vector.load %arg10[%c0_315, %c0_316, %c0_317] : memref<4x1x8xf32, #tpu.memory_space<vmem>>, vector<1x1x8xf32>
    %452 = vector.shape_cast %451 : vector<1x1x8xf32> to vector<1x8xf32>
    %453 = vector.broadcast %452 : vector<1x8xf32> to vector<16x8xf32>
    %454 = arith.addf %450, %453 : vector<16x8xf32>
    %455 = tpu.transpose %447, [1, 0] : vector<16x8xf32> -> vector<8x16xf32>
    %cst_318 = arith.constant dense<0.000000e+00> : vector<4x16xf32>
    %456 = tpu.matmul %440, %455, %cst_318 {dimension_numbers = #tpu.dot_dimension_numbers<[1], [0], [0], [1], [0, 0, 1, 1], [], []>, precision = #tpu.contract_precision<fp32>} : vector<4x8xf32>, vector<8x16xf32>, vector<4x16xf32> -> vector<4x16xf32>
    %cst_319 = arith.constant 0.353553385 : f32
    %457 = vector.broadcast %cst_319 : f32 to vector<4x16xf32>
    %458 = arith.mulf %456, %457 : vector<4x16xf32>
    %cst_320 = arith.constant 5.000000e-01 : f32
    %459 = vector.broadcast %cst_320 : f32 to vector<4x16xf32>
    %460 = arith.cmpf ogt, %9, %459 : vector<4x16xf32>
    %cst_321 = arith.constant -1.000000e+30 : f32
    %461 = vector.broadcast %cst_321 : f32 to vector<4x16xf32>
    %462 = arith.select %460, %461, %458 : vector<4x16xi1>, vector<4x16xf32>
    %cst_322 = arith.constant dense<0xFF800000> : vector<4xf32>
    %463 = vector.multi_reduction <maximumf>, %462, %cst_322 [1] : vector<4x16xf32> to vector<4xf32>
    %464 = vector.shape_cast %463 : vector<4xf32> to vector<4x1xf32>
    %465 = vector.broadcast %464 : vector<4x1xf32> to vector<4x16xf32>
    %466 = arith.subf %462, %465 : vector<4x16xf32>
    %467 = math.exp %466 : vector<4x16xf32>
    %cst_323 = arith.constant dense<0.000000e+00> : vector<4xf32>
    %468 = vector.multi_reduction <add>, %467, %cst_323 [1] : vector<4x16xf32> to vector<4xf32>
    %469 = vector.shape_cast %468 : vector<4xf32> to vector<4x1xf32>
    %470 = tpu.reciprocal %469 {approx = true} : vector<4x1xf32> -> vector<4x1xf32>
    %471 = vector.broadcast %470 : vector<4x1xf32> to vector<4x16xf32>
    %472 = arith.mulf %467, %471 : vector<4x16xf32>
    %cst_324 = arith.constant dense<0.000000e+00> : vector<4x8xf32>
    %473 = tpu.matmul %472, %454, %cst_324 {dimension_numbers = #tpu.dot_dimension_numbers<[1], [0], [0], [1], [0, 0, 1, 1], [], []>, precision = #tpu.contract_precision<fp32>} : vector<4x16xf32>, vector<16x8xf32>, vector<4x8xf32> -> vector<4x8xf32>
    %c0_325 = arith.constant 0 : index
    %c0_326 = arith.constant 0 : index
    %c0_327 = arith.constant 0 : index
    %474 = vector.load %arg12[%c0_325, %c0_326, %c0_327] : memref<4x8x32xf32, #tpu.memory_space<vmem>>, vector<1x8x32xf32>
    %475 = vector.shape_cast %474 : vector<1x8x32xf32> to vector<8x32xf32>
    %cst_328 = arith.constant dense<0.000000e+00> : vector<4x32xf32>
    %476 = tpu.matmul %473, %475, %cst_328 {dimension_numbers = #tpu.dot_dimension_numbers<[1], [0], [0], [1], [0, 0, 1, 1], [], []>, precision = #tpu.contract_precision<fp32>} : vector<4x8xf32>, vector<8x32xf32>, vector<4x32xf32> -> vector<4x32xf32>
    %477 = arith.addf %433, %476 : vector<4x32xf32>
    %c1_329 = arith.constant 1 : index
    %c0_330 = arith.constant 0 : index
    %c0_331 = arith.constant 0 : index
    %478 = vector.load %arg13[%c1_329, %c0_330, %c0_331] : memref<4x32x8xf32, #tpu.memory_space<vmem>>, vector<1x32x8xf32>
    %479 = vector.shape_cast %478 : vector<1x32x8xf32> to vector<32x8xf32>
    %cst_332 = arith.constant dense<0.000000e+00> : vector<4x8xf32>
    %480 = tpu.matmul %432, %479, %cst_332 {dimension_numbers = #tpu.dot_dimension_numbers<[1], [0], [0], [1], [0, 0, 1, 1], [], []>, precision = #tpu.contract_precision<fp32>} : vector<4x32xf32>, vector<32x8xf32>, vector<4x8xf32> -> vector<4x8xf32>
    %c1_333 = arith.constant 1 : index
    %c0_334 = arith.constant 0 : index
    %c0_335 = arith.constant 0 : index
    %481 = vector.load %arg9[%c1_333, %c0_334, %c0_335] : memref<4x1x8xf32, #tpu.memory_space<vmem>>, vector<1x1x8xf32>
    %482 = vector.shape_cast %481 : vector<1x1x8xf32> to vector<1x8xf32>
    %483 = vector.broadcast %482 : vector<1x8xf32> to vector<4x8xf32>
    %484 = arith.addf %480, %483 : vector<4x8xf32>
    %c1_336 = arith.constant 1 : index
    %c0_337 = arith.constant 0 : index
    %c0_338 = arith.constant 0 : index
    %485 = vector.load %arg11[%c1_336, %c0_337, %c0_338] : memref<4x32x8xf32, #tpu.memory_space<vmem>>, vector<1x32x8xf32>
    %486 = vector.shape_cast %485 : vector<1x32x8xf32> to vector<32x8xf32>
    %cst_339 = arith.constant dense<0.000000e+00> : vector<16x8xf32>
    %487 = tpu.matmul %1, %486, %cst_339 {dimension_numbers = #tpu.dot_dimension_numbers<[1], [0], [0], [1], [0, 0, 1, 1], [], []>, precision = #tpu.contract_precision<fp32>} : vector<16x32xf32>, vector<32x8xf32>, vector<16x8xf32> -> vector<16x8xf32>
    %c1_340 = arith.constant 1 : index
    %c0_341 = arith.constant 0 : index
    %c0_342 = arith.constant 0 : index
    %488 = vector.load %arg7[%c1_340, %c0_341, %c0_342] : memref<4x1x8xf32, #tpu.memory_space<vmem>>, vector<1x1x8xf32>
    %489 = vector.shape_cast %488 : vector<1x1x8xf32> to vector<1x8xf32>
    %490 = vector.broadcast %489 : vector<1x8xf32> to vector<16x8xf32>
    %491 = arith.addf %487, %490 : vector<16x8xf32>
    %c1_343 = arith.constant 1 : index
    %c0_344 = arith.constant 0 : index
    %c0_345 = arith.constant 0 : index
    %492 = vector.load %arg14[%c1_343, %c0_344, %c0_345] : memref<4x32x8xf32, #tpu.memory_space<vmem>>, vector<1x32x8xf32>
    %493 = vector.shape_cast %492 : vector<1x32x8xf32> to vector<32x8xf32>
    %cst_346 = arith.constant dense<0.000000e+00> : vector<16x8xf32>
    %494 = tpu.matmul %1, %493, %cst_346 {dimension_numbers = #tpu.dot_dimension_numbers<[1], [0], [0], [1], [0, 0, 1, 1], [], []>, precision = #tpu.contract_precision<fp32>} : vector<16x32xf32>, vector<32x8xf32>, vector<16x8xf32> -> vector<16x8xf32>
    %c1_347 = arith.constant 1 : index
    %c0_348 = arith.constant 0 : index
    %c0_349 = arith.constant 0 : index
    %495 = vector.load %arg10[%c1_347, %c0_348, %c0_349] : memref<4x1x8xf32, #tpu.memory_space<vmem>>, vector<1x1x8xf32>
    %496 = vector.shape_cast %495 : vector<1x1x8xf32> to vector<1x8xf32>
    %497 = vector.broadcast %496 : vector<1x8xf32> to vector<16x8xf32>
    %498 = arith.addf %494, %497 : vector<16x8xf32>
    %499 = tpu.transpose %491, [1, 0] : vector<16x8xf32> -> vector<8x16xf32>
    %cst_350 = arith.constant dense<0.000000e+00> : vector<4x16xf32>
    %500 = tpu.matmul %484, %499, %cst_350 {dimension_numbers = #tpu.dot_dimension_numbers<[1], [0], [0], [1], [0, 0, 1, 1], [], []>, precision = #tpu.contract_precision<fp32>} : vector<4x8xf32>, vector<8x16xf32>, vector<4x16xf32> -> vector<4x16xf32>
    %cst_351 = arith.constant 0.353553385 : f32
    %501 = vector.broadcast %cst_351 : f32 to vector<4x16xf32>
    %502 = arith.mulf %500, %501 : vector<4x16xf32>
    %cst_352 = arith.constant 5.000000e-01 : f32
    %503 = vector.broadcast %cst_352 : f32 to vector<4x16xf32>
    %504 = arith.cmpf ogt, %9, %503 : vector<4x16xf32>
    %cst_353 = arith.constant -1.000000e+30 : f32
    %505 = vector.broadcast %cst_353 : f32 to vector<4x16xf32>
    %506 = arith.select %504, %505, %502 : vector<4x16xi1>, vector<4x16xf32>
    %cst_354 = arith.constant dense<0xFF800000> : vector<4xf32>
    %507 = vector.multi_reduction <maximumf>, %506, %cst_354 [1] : vector<4x16xf32> to vector<4xf32>
    %508 = vector.shape_cast %507 : vector<4xf32> to vector<4x1xf32>
    %509 = vector.broadcast %508 : vector<4x1xf32> to vector<4x16xf32>
    %510 = arith.subf %506, %509 : vector<4x16xf32>
    %511 = math.exp %510 : vector<4x16xf32>
    %cst_355 = arith.constant dense<0.000000e+00> : vector<4xf32>
    %512 = vector.multi_reduction <add>, %511, %cst_355 [1] : vector<4x16xf32> to vector<4xf32>
    %513 = vector.shape_cast %512 : vector<4xf32> to vector<4x1xf32>
    %514 = tpu.reciprocal %513 {approx = true} : vector<4x1xf32> -> vector<4x1xf32>
    %515 = vector.broadcast %514 : vector<4x1xf32> to vector<4x16xf32>
    %516 = arith.mulf %511, %515 : vector<4x16xf32>
    %cst_356 = arith.constant dense<0.000000e+00> : vector<4x8xf32>
    %517 = tpu.matmul %516, %498, %cst_356 {dimension_numbers = #tpu.dot_dimension_numbers<[1], [0], [0], [1], [0, 0, 1, 1], [], []>, precision = #tpu.contract_precision<fp32>} : vector<4x16xf32>, vector<16x8xf32>, vector<4x8xf32> -> vector<4x8xf32>
    %c1_357 = arith.constant 1 : index
    %c0_358 = arith.constant 0 : index
    %c0_359 = arith.constant 0 : index
    %518 = vector.load %arg12[%c1_357, %c0_358, %c0_359] : memref<4x8x32xf32, #tpu.memory_space<vmem>>, vector<1x8x32xf32>
    %519 = vector.shape_cast %518 : vector<1x8x32xf32> to vector<8x32xf32>
    %cst_360 = arith.constant dense<0.000000e+00> : vector<4x32xf32>
    %520 = tpu.matmul %517, %519, %cst_360 {dimension_numbers = #tpu.dot_dimension_numbers<[1], [0], [0], [1], [0, 0, 1, 1], [], []>, precision = #tpu.contract_precision<fp32>} : vector<4x8xf32>, vector<8x32xf32>, vector<4x32xf32> -> vector<4x32xf32>
    %521 = arith.addf %477, %520 : vector<4x32xf32>
    %c2_361 = arith.constant 2 : index
    %c0_362 = arith.constant 0 : index
    %c0_363 = arith.constant 0 : index
    %522 = vector.load %arg13[%c2_361, %c0_362, %c0_363] : memref<4x32x8xf32, #tpu.memory_space<vmem>>, vector<1x32x8xf32>
    %523 = vector.shape_cast %522 : vector<1x32x8xf32> to vector<32x8xf32>
    %cst_364 = arith.constant dense<0.000000e+00> : vector<4x8xf32>
    %524 = tpu.matmul %432, %523, %cst_364 {dimension_numbers = #tpu.dot_dimension_numbers<[1], [0], [0], [1], [0, 0, 1, 1], [], []>, precision = #tpu.contract_precision<fp32>} : vector<4x32xf32>, vector<32x8xf32>, vector<4x8xf32> -> vector<4x8xf32>
    %c2_365 = arith.constant 2 : index
    %c0_366 = arith.constant 0 : index
    %c0_367 = arith.constant 0 : index
    %525 = vector.load %arg9[%c2_365, %c0_366, %c0_367] : memref<4x1x8xf32, #tpu.memory_space<vmem>>, vector<1x1x8xf32>
    %526 = vector.shape_cast %525 : vector<1x1x8xf32> to vector<1x8xf32>
    %527 = vector.broadcast %526 : vector<1x8xf32> to vector<4x8xf32>
    %528 = arith.addf %524, %527 : vector<4x8xf32>
    %c2_368 = arith.constant 2 : index
    %c0_369 = arith.constant 0 : index
    %c0_370 = arith.constant 0 : index
    %529 = vector.load %arg11[%c2_368, %c0_369, %c0_370] : memref<4x32x8xf32, #tpu.memory_space<vmem>>, vector<1x32x8xf32>
    %530 = vector.shape_cast %529 : vector<1x32x8xf32> to vector<32x8xf32>
    %cst_371 = arith.constant dense<0.000000e+00> : vector<16x8xf32>
    %531 = tpu.matmul %1, %530, %cst_371 {dimension_numbers = #tpu.dot_dimension_numbers<[1], [0], [0], [1], [0, 0, 1, 1], [], []>, precision = #tpu.contract_precision<fp32>} : vector<16x32xf32>, vector<32x8xf32>, vector<16x8xf32> -> vector<16x8xf32>
    %c2_372 = arith.constant 2 : index
    %c0_373 = arith.constant 0 : index
    %c0_374 = arith.constant 0 : index
    %532 = vector.load %arg7[%c2_372, %c0_373, %c0_374] : memref<4x1x8xf32, #tpu.memory_space<vmem>>, vector<1x1x8xf32>
    %533 = vector.shape_cast %532 : vector<1x1x8xf32> to vector<1x8xf32>
    %534 = vector.broadcast %533 : vector<1x8xf32> to vector<16x8xf32>
    %535 = arith.addf %531, %534 : vector<16x8xf32>
    %c2_375 = arith.constant 2 : index
    %c0_376 = arith.constant 0 : index
    %c0_377 = arith.constant 0 : index
    %536 = vector.load %arg14[%c2_375, %c0_376, %c0_377] : memref<4x32x8xf32, #tpu.memory_space<vmem>>, vector<1x32x8xf32>
    %537 = vector.shape_cast %536 : vector<1x32x8xf32> to vector<32x8xf32>
    %cst_378 = arith.constant dense<0.000000e+00> : vector<16x8xf32>
    %538 = tpu.matmul %1, %537, %cst_378 {dimension_numbers = #tpu.dot_dimension_numbers<[1], [0], [0], [1], [0, 0, 1, 1], [], []>, precision = #tpu.contract_precision<fp32>} : vector<16x32xf32>, vector<32x8xf32>, vector<16x8xf32> -> vector<16x8xf32>
    %c2_379 = arith.constant 2 : index
    %c0_380 = arith.constant 0 : index
    %c0_381 = arith.constant 0 : index
    %539 = vector.load %arg10[%c2_379, %c0_380, %c0_381] : memref<4x1x8xf32, #tpu.memory_space<vmem>>, vector<1x1x8xf32>
    %540 = vector.shape_cast %539 : vector<1x1x8xf32> to vector<1x8xf32>
    %541 = vector.broadcast %540 : vector<1x8xf32> to vector<16x8xf32>
    %542 = arith.addf %538, %541 : vector<16x8xf32>
    %543 = tpu.transpose %535, [1, 0] : vector<16x8xf32> -> vector<8x16xf32>
    %cst_382 = arith.constant dense<0.000000e+00> : vector<4x16xf32>
    %544 = tpu.matmul %528, %543, %cst_382 {dimension_numbers = #tpu.dot_dimension_numbers<[1], [0], [0], [1], [0, 0, 1, 1], [], []>, precision = #tpu.contract_precision<fp32>} : vector<4x8xf32>, vector<8x16xf32>, vector<4x16xf32> -> vector<4x16xf32>
    %cst_383 = arith.constant 0.353553385 : f32
    %545 = vector.broadcast %cst_383 : f32 to vector<4x16xf32>
    %546 = arith.mulf %544, %545 : vector<4x16xf32>
    %cst_384 = arith.constant 5.000000e-01 : f32
    %547 = vector.broadcast %cst_384 : f32 to vector<4x16xf32>
    %548 = arith.cmpf ogt, %9, %547 : vector<4x16xf32>
    %cst_385 = arith.constant -1.000000e+30 : f32
    %549 = vector.broadcast %cst_385 : f32 to vector<4x16xf32>
    %550 = arith.select %548, %549, %546 : vector<4x16xi1>, vector<4x16xf32>
    %cst_386 = arith.constant dense<0xFF800000> : vector<4xf32>
    %551 = vector.multi_reduction <maximumf>, %550, %cst_386 [1] : vector<4x16xf32> to vector<4xf32>
    %552 = vector.shape_cast %551 : vector<4xf32> to vector<4x1xf32>
    %553 = vector.broadcast %552 : vector<4x1xf32> to vector<4x16xf32>
    %554 = arith.subf %550, %553 : vector<4x16xf32>
    %555 = math.exp %554 : vector<4x16xf32>
    %cst_387 = arith.constant dense<0.000000e+00> : vector<4xf32>
    %556 = vector.multi_reduction <add>, %555, %cst_387 [1] : vector<4x16xf32> to vector<4xf32>
    %557 = vector.shape_cast %556 : vector<4xf32> to vector<4x1xf32>
    %558 = tpu.reciprocal %557 {approx = true} : vector<4x1xf32> -> vector<4x1xf32>
    %559 = vector.broadcast %558 : vector<4x1xf32> to vector<4x16xf32>
    %560 = arith.mulf %555, %559 : vector<4x16xf32>
    %cst_388 = arith.constant dense<0.000000e+00> : vector<4x8xf32>
    %561 = tpu.matmul %560, %542, %cst_388 {dimension_numbers = #tpu.dot_dimension_numbers<[1], [0], [0], [1], [0, 0, 1, 1], [], []>, precision = #tpu.contract_precision<fp32>} : vector<4x16xf32>, vector<16x8xf32>, vector<4x8xf32> -> vector<4x8xf32>
    %c2_389 = arith.constant 2 : index
    %c0_390 = arith.constant 0 : index
    %c0_391 = arith.constant 0 : index
    %562 = vector.load %arg12[%c2_389, %c0_390, %c0_391] : memref<4x8x32xf32, #tpu.memory_space<vmem>>, vector<1x8x32xf32>
    %563 = vector.shape_cast %562 : vector<1x8x32xf32> to vector<8x32xf32>
    %cst_392 = arith.constant dense<0.000000e+00> : vector<4x32xf32>
    %564 = tpu.matmul %561, %563, %cst_392 {dimension_numbers = #tpu.dot_dimension_numbers<[1], [0], [0], [1], [0, 0, 1, 1], [], []>, precision = #tpu.contract_precision<fp32>} : vector<4x8xf32>, vector<8x32xf32>, vector<4x32xf32> -> vector<4x32xf32>
    %565 = arith.addf %521, %564 : vector<4x32xf32>
    %c3_393 = arith.constant 3 : index
    %c0_394 = arith.constant 0 : index
    %c0_395 = arith.constant 0 : index
    %566 = vector.load %arg13[%c3_393, %c0_394, %c0_395] : memref<4x32x8xf32, #tpu.memory_space<vmem>>, vector<1x32x8xf32>
    %567 = vector.shape_cast %566 : vector<1x32x8xf32> to vector<32x8xf32>
    %cst_396 = arith.constant dense<0.000000e+00> : vector<4x8xf32>
    %568 = tpu.matmul %432, %567, %cst_396 {dimension_numbers = #tpu.dot_dimension_numbers<[1], [0], [0], [1], [0, 0, 1, 1], [], []>, precision = #tpu.contract_precision<fp32>} : vector<4x32xf32>, vector<32x8xf32>, vector<4x8xf32> -> vector<4x8xf32>
    %c3_397 = arith.constant 3 : index
    %c0_398 = arith.constant 0 : index
    %c0_399 = arith.constant 0 : index
    %569 = vector.load %arg9[%c3_397, %c0_398, %c0_399] : memref<4x1x8xf32, #tpu.memory_space<vmem>>, vector<1x1x8xf32>
    %570 = vector.shape_cast %569 : vector<1x1x8xf32> to vector<1x8xf32>
    %571 = vector.broadcast %570 : vector<1x8xf32> to vector<4x8xf32>
    %572 = arith.addf %568, %571 : vector<4x8xf32>
    %c3_400 = arith.constant 3 : index
    %c0_401 = arith.constant 0 : index
    %c0_402 = arith.constant 0 : index
    %573 = vector.load %arg11[%c3_400, %c0_401, %c0_402] : memref<4x32x8xf32, #tpu.memory_space<vmem>>, vector<1x32x8xf32>
    %574 = vector.shape_cast %573 : vector<1x32x8xf32> to vector<32x8xf32>
    %cst_403 = arith.constant dense<0.000000e+00> : vector<16x8xf32>
    %575 = tpu.matmul %1, %574, %cst_403 {dimension_numbers = #tpu.dot_dimension_numbers<[1], [0], [0], [1], [0, 0, 1, 1], [], []>, precision = #tpu.contract_precision<fp32>} : vector<16x32xf32>, vector<32x8xf32>, vector<16x8xf32> -> vector<16x8xf32>
    %c3_404 = arith.constant 3 : index
    %c0_405 = arith.constant 0 : index
    %c0_406 = arith.constant 0 : index
    %576 = vector.load %arg7[%c3_404, %c0_405, %c0_406] : memref<4x1x8xf32, #tpu.memory_space<vmem>>, vector<1x1x8xf32>
    %577 = vector.shape_cast %576 : vector<1x1x8xf32> to vector<1x8xf32>
    %578 = vector.broadcast %577 : vector<1x8xf32> to vector<16x8xf32>
    %579 = arith.addf %575, %578 : vector<16x8xf32>
    %c3_407 = arith.constant 3 : index
    %c0_408 = arith.constant 0 : index
    %c0_409 = arith.constant 0 : index
    %580 = vector.load %arg14[%c3_407, %c0_408, %c0_409] : memref<4x32x8xf32, #tpu.memory_space<vmem>>, vector<1x32x8xf32>
    %581 = vector.shape_cast %580 : vector<1x32x8xf32> to vector<32x8xf32>
    %cst_410 = arith.constant dense<0.000000e+00> : vector<16x8xf32>
    %582 = tpu.matmul %1, %581, %cst_410 {dimension_numbers = #tpu.dot_dimension_numbers<[1], [0], [0], [1], [0, 0, 1, 1], [], []>, precision = #tpu.contract_precision<fp32>} : vector<16x32xf32>, vector<32x8xf32>, vector<16x8xf32> -> vector<16x8xf32>
    %c3_411 = arith.constant 3 : index
    %c0_412 = arith.constant 0 : index
    %c0_413 = arith.constant 0 : index
    %583 = vector.load %arg10[%c3_411, %c0_412, %c0_413] : memref<4x1x8xf32, #tpu.memory_space<vmem>>, vector<1x1x8xf32>
    %584 = vector.shape_cast %583 : vector<1x1x8xf32> to vector<1x8xf32>
    %585 = vector.broadcast %584 : vector<1x8xf32> to vector<16x8xf32>
    %586 = arith.addf %582, %585 : vector<16x8xf32>
    %587 = tpu.transpose %579, [1, 0] : vector<16x8xf32> -> vector<8x16xf32>
    %cst_414 = arith.constant dense<0.000000e+00> : vector<4x16xf32>
    %588 = tpu.matmul %572, %587, %cst_414 {dimension_numbers = #tpu.dot_dimension_numbers<[1], [0], [0], [1], [0, 0, 1, 1], [], []>, precision = #tpu.contract_precision<fp32>} : vector<4x8xf32>, vector<8x16xf32>, vector<4x16xf32> -> vector<4x16xf32>
    %cst_415 = arith.constant 0.353553385 : f32
    %589 = vector.broadcast %cst_415 : f32 to vector<4x16xf32>
    %590 = arith.mulf %588, %589 : vector<4x16xf32>
    %cst_416 = arith.constant 5.000000e-01 : f32
    %591 = vector.broadcast %cst_416 : f32 to vector<4x16xf32>
    %592 = arith.cmpf ogt, %9, %591 : vector<4x16xf32>
    %cst_417 = arith.constant -1.000000e+30 : f32
    %593 = vector.broadcast %cst_417 : f32 to vector<4x16xf32>
    %594 = arith.select %592, %593, %590 : vector<4x16xi1>, vector<4x16xf32>
    %cst_418 = arith.constant dense<0xFF800000> : vector<4xf32>
    %595 = vector.multi_reduction <maximumf>, %594, %cst_418 [1] : vector<4x16xf32> to vector<4xf32>
    %596 = vector.shape_cast %595 : vector<4xf32> to vector<4x1xf32>
    %597 = vector.broadcast %596 : vector<4x1xf32> to vector<4x16xf32>
    %598 = arith.subf %594, %597 : vector<4x16xf32>
    %599 = math.exp %598 : vector<4x16xf32>
    %cst_419 = arith.constant dense<0.000000e+00> : vector<4xf32>
    %600 = vector.multi_reduction <add>, %599, %cst_419 [1] : vector<4x16xf32> to vector<4xf32>
    %601 = vector.shape_cast %600 : vector<4xf32> to vector<4x1xf32>
    %602 = tpu.reciprocal %601 {approx = true} : vector<4x1xf32> -> vector<4x1xf32>
    %603 = vector.broadcast %602 : vector<4x1xf32> to vector<4x16xf32>
    %604 = arith.mulf %599, %603 : vector<4x16xf32>
    %cst_420 = arith.constant dense<0.000000e+00> : vector<4x8xf32>
    %605 = tpu.matmul %604, %586, %cst_420 {dimension_numbers = #tpu.dot_dimension_numbers<[1], [0], [0], [1], [0, 0, 1, 1], [], []>, precision = #tpu.contract_precision<fp32>} : vector<4x16xf32>, vector<16x8xf32>, vector<4x8xf32> -> vector<4x8xf32>
    %c3_421 = arith.constant 3 : index
    %c0_422 = arith.constant 0 : index
    %c0_423 = arith.constant 0 : index
    %606 = vector.load %arg12[%c3_421, %c0_422, %c0_423] : memref<4x8x32xf32, #tpu.memory_space<vmem>>, vector<1x8x32xf32>
    %607 = vector.shape_cast %606 : vector<1x8x32xf32> to vector<8x32xf32>
    %cst_424 = arith.constant dense<0.000000e+00> : vector<4x32xf32>
    %608 = tpu.matmul %605, %607, %cst_424 {dimension_numbers = #tpu.dot_dimension_numbers<[1], [0], [0], [1], [0, 0, 1, 1], [], []>, precision = #tpu.contract_precision<fp32>} : vector<4x8xf32>, vector<8x32xf32>, vector<4x32xf32> -> vector<4x32xf32>
    %609 = arith.addf %565, %608 : vector<4x32xf32>
    %c0_425 = arith.constant 0 : index
    %c0_426 = arith.constant 0 : index
    %610 = vector.load %arg8[%c0_425, %c0_426] : memref<1x32xf32, #tpu.memory_space<vmem>>, vector<1x32xf32>
    %611 = vector.broadcast %610 : vector<1x32xf32> to vector<4x32xf32>
    %612 = arith.addf %609, %611 : vector<4x32xf32>
    %613 = arith.addf %432, %612 : vector<4x32xf32>
    %cst_427 = arith.constant dense<0.000000e+00> : vector<4xf32>
    %614 = vector.multi_reduction <add>, %613, %cst_427 [1] : vector<4x32xf32> to vector<4xf32>
    %615 = vector.shape_cast %614 : vector<4xf32> to vector<4x1xf32>
    %cst_428 = arith.constant 3.200000e+01 : f32
    %616 = vector.broadcast %cst_428 : f32 to vector<4x1xf32>
    %617 = arith.divf %615, %616 : vector<4x1xf32>
    %618 = vector.broadcast %617 : vector<4x1xf32> to vector<4x32xf32>
    %619 = arith.subf %613, %618 : vector<4x32xf32>
    %620 = arith.mulf %619, %619 : vector<4x32xf32>
    %cst_429 = arith.constant dense<0.000000e+00> : vector<4xf32>
    %621 = vector.multi_reduction <add>, %620, %cst_429 [1] : vector<4x32xf32> to vector<4xf32>
    %622 = vector.shape_cast %621 : vector<4xf32> to vector<4x1xf32>
    %cst_430 = arith.constant 3.200000e+01 : f32
    %623 = vector.broadcast %cst_430 : f32 to vector<4x1xf32>
    %624 = arith.divf %622, %623 : vector<4x1xf32>
    %625 = vector.broadcast %617 : vector<4x1xf32> to vector<4x32xf32>
    %626 = arith.subf %613, %625 : vector<4x32xf32>
    %cst_431 = arith.constant 9.99999974E-6 : f32
    %627 = vector.broadcast %cst_431 : f32 to vector<4x1xf32>
    %628 = arith.addf %624, %627 : vector<4x1xf32>
    %629 = math.rsqrt %628 : vector<4x1xf32>
    %630 = vector.broadcast %629 : vector<4x1xf32> to vector<4x32xf32>
    %631 = arith.mulf %626, %630 : vector<4x32xf32>
    %c0_432 = arith.constant 0 : index
    %c0_433 = arith.constant 0 : index
    %632 = vector.load %arg20[%c0_432, %c0_433] : memref<1x32xf32, #tpu.memory_space<vmem>>, vector<1x32xf32>
    %633 = vector.broadcast %632 : vector<1x32xf32> to vector<4x32xf32>
    %634 = arith.mulf %631, %633 : vector<4x32xf32>
    %c0_434 = arith.constant 0 : index
    %c0_435 = arith.constant 0 : index
    %635 = vector.load %arg19[%c0_434, %c0_435] : memref<1x32xf32, #tpu.memory_space<vmem>>, vector<1x32xf32>
    %636 = vector.broadcast %635 : vector<1x32xf32> to vector<4x32xf32>
    %637 = arith.addf %634, %636 : vector<4x32xf32>
    %c0_436 = arith.constant 0 : index
    %c0_437 = arith.constant 0 : index
    %638 = vector.load %arg17[%c0_436, %c0_437] : memref<32x64xf32, #tpu.memory_space<vmem>>, vector<32x64xf32>
    %cst_438 = arith.constant dense<0.000000e+00> : vector<4x64xf32>
    %639 = tpu.matmul %637, %638, %cst_438 {dimension_numbers = #tpu.dot_dimension_numbers<[1], [0], [0], [1], [0, 0, 1, 1], [], []>, precision = #tpu.contract_precision<fp32>} : vector<4x32xf32>, vector<32x64xf32>, vector<4x64xf32> -> vector<4x64xf32>
    %c0_439 = arith.constant 0 : index
    %c0_440 = arith.constant 0 : index
    %640 = vector.load %arg15[%c0_439, %c0_440] : memref<1x64xf32, #tpu.memory_space<vmem>>, vector<1x64xf32>
    %641 = vector.broadcast %640 : vector<1x64xf32> to vector<4x64xf32>
    %642 = arith.addf %639, %641 : vector<4x64xf32>
    %cst_441 = arith.constant 0.000000e+00 : f32
    %643 = vector.broadcast %cst_441 : f32 to vector<4x64xf32>
    %644 = arith.maximumf %642, %643 : vector<4x64xf32>
    %c0_442 = arith.constant 0 : index
    %c0_443 = arith.constant 0 : index
    %645 = vector.load %arg18[%c0_442, %c0_443] : memref<64x32xf32, #tpu.memory_space<vmem>>, vector<64x32xf32>
    %cst_444 = arith.constant dense<0.000000e+00> : vector<4x32xf32>
    %646 = tpu.matmul %644, %645, %cst_444 {dimension_numbers = #tpu.dot_dimension_numbers<[1], [0], [0], [1], [0, 0, 1, 1], [], []>, precision = #tpu.contract_precision<fp32>} : vector<4x64xf32>, vector<64x32xf32>, vector<4x32xf32> -> vector<4x32xf32>
    %c0_445 = arith.constant 0 : index
    %c0_446 = arith.constant 0 : index
    %647 = vector.load %arg16[%c0_445, %c0_446] : memref<1x32xf32, #tpu.memory_space<vmem>>, vector<1x32xf32>
    %648 = vector.broadcast %647 : vector<1x32xf32> to vector<4x32xf32>
    %649 = arith.addf %646, %648 : vector<4x32xf32>
    %650 = arith.addf %637, %649 : vector<4x32xf32>
    %cst_447 = arith.constant dense<0.000000e+00> : vector<4xf32>
    %651 = vector.multi_reduction <add>, %650, %cst_447 [1] : vector<4x32xf32> to vector<4xf32>
    %652 = vector.shape_cast %651 : vector<4xf32> to vector<4x1xf32>
    %cst_448 = arith.constant 3.200000e+01 : f32
    %653 = vector.broadcast %cst_448 : f32 to vector<4x1xf32>
    %654 = arith.divf %652, %653 : vector<4x1xf32>
    %655 = vector.broadcast %654 : vector<4x1xf32> to vector<4x32xf32>
    %656 = arith.subf %650, %655 : vector<4x32xf32>
    %657 = arith.mulf %656, %656 : vector<4x32xf32>
    %cst_449 = arith.constant dense<0.000000e+00> : vector<4xf32>
    %658 = vector.multi_reduction <add>, %657, %cst_449 [1] : vector<4x32xf32> to vector<4xf32>
    %659 = vector.shape_cast %658 : vector<4xf32> to vector<4x1xf32>
    %cst_450 = arith.constant 3.200000e+01 : f32
    %660 = vector.broadcast %cst_450 : f32 to vector<4x1xf32>
    %661 = arith.divf %659, %660 : vector<4x1xf32>
    %662 = vector.broadcast %654 : vector<4x1xf32> to vector<4x32xf32>
    %663 = arith.subf %650, %662 : vector<4x32xf32>
    %cst_451 = arith.constant 9.99999974E-6 : f32
    %664 = vector.broadcast %cst_451 : f32 to vector<4x1xf32>
    %665 = arith.addf %661, %664 : vector<4x1xf32>
    %666 = math.rsqrt %665 : vector<4x1xf32>
    %667 = vector.broadcast %666 : vector<4x1xf32> to vector<4x32xf32>
    %668 = arith.mulf %663, %667 : vector<4x32xf32>
    %c0_452 = arith.constant 0 : index
    %c0_453 = arith.constant 0 : index
    %669 = vector.load %arg22[%c0_452, %c0_453] : memref<1x32xf32, #tpu.memory_space<vmem>>, vector<1x32xf32>
    %670 = vector.broadcast %669 : vector<1x32xf32> to vector<4x32xf32>
    %671 = arith.mulf %668, %670 : vector<4x32xf32>
    %c0_454 = arith.constant 0 : index
    %c0_455 = arith.constant 0 : index
    %672 = vector.load %arg21[%c0_454, %c0_455] : memref<1x32xf32, #tpu.memory_space<vmem>>, vector<1x32xf32>
    %673 = vector.broadcast %672 : vector<1x32xf32> to vector<4x32xf32>
    %674 = arith.addf %671, %673 : vector<4x32xf32>
    %c0_456 = arith.constant 0 : index
    %c0_457 = arith.constant 0 : index
    %675 = vector.load %arg52[%c0_456, %c0_457] : memref<32x32xf32, #tpu.memory_space<vmem>>, vector<32x32xf32>
    %cst_458 = arith.constant dense<0.000000e+00> : vector<4x32xf32>
    %676 = tpu.matmul %674, %675, %cst_458 {dimension_numbers = #tpu.dot_dimension_numbers<[1], [0], [0], [1], [0, 0, 1, 1], [], []>, precision = #tpu.contract_precision<fp32>} : vector<4x32xf32>, vector<32x32xf32>, vector<4x32xf32> -> vector<4x32xf32>
    %c0_459 = arith.constant 0 : index
    %c0_460 = arith.constant 0 : index
    %677 = vector.load %arg51[%c0_459, %c0_460] : memref<1x32xf32, #tpu.memory_space<vmem>>, vector<1x32xf32>
    %678 = vector.broadcast %677 : vector<1x32xf32> to vector<4x32xf32>
    %679 = arith.addf %676, %678 : vector<4x32xf32>
    %c0_461 = arith.constant 0 : index
    %c0_462 = arith.constant 0 : index
    %680 = vector.load %arg50[%c0_461, %c0_462] : memref<32x32xf32, #tpu.memory_space<vmem>>, vector<32x32xf32>
    %cst_463 = arith.constant dense<0.000000e+00> : vector<16x32xf32>
    %681 = tpu.matmul %1, %680, %cst_463 {dimension_numbers = #tpu.dot_dimension_numbers<[1], [0], [0], [1], [0, 0, 1, 1], [], []>, precision = #tpu.contract_precision<fp32>} : vector<16x32xf32>, vector<32x32xf32>, vector<16x32xf32> -> vector<16x32xf32>
    %c0_464 = arith.constant 0 : index
    %c0_465 = arith.constant 0 : index
    %682 = vector.load %arg49[%c0_464, %c0_465] : memref<1x32xf32, #tpu.memory_space<vmem>>, vector<1x32xf32>
    %683 = vector.broadcast %682 : vector<1x32xf32> to vector<16x32xf32>
    %684 = arith.addf %681, %683 : vector<16x32xf32>
    %685 = tpu.transpose %684, [1, 0] : vector<16x32xf32> -> vector<32x16xf32>
    %cst_466 = arith.constant dense<0.000000e+00> : vector<4x16xf32>
    %686 = tpu.matmul %679, %685, %cst_466 {dimension_numbers = #tpu.dot_dimension_numbers<[1], [0], [0], [1], [0, 0, 1, 1], [], []>, precision = #tpu.contract_precision<fp32>} : vector<4x32xf32>, vector<32x16xf32>, vector<4x16xf32> -> vector<4x16xf32>
    %cst_467 = arith.constant 0.176776692 : f32
    %687 = vector.broadcast %cst_467 : f32 to vector<4x16xf32>
    %688 = arith.mulf %686, %687 : vector<4x16xf32>
    %689 = math.tanh %688 : vector<4x16xf32>
    %cst_468 = arith.constant 1.000000e+01 : f32
    %690 = vector.broadcast %cst_468 : f32 to vector<4x16xf32>
    %691 = arith.mulf %690, %689 : vector<4x16xf32>
    %cst_469 = arith.constant 5.000000e-01 : f32
    %692 = vector.broadcast %cst_469 : f32 to vector<4x16xf32>
    %693 = arith.cmpf ogt, %9, %692 : vector<4x16xf32>
    %cst_470 = arith.constant -1.000000e+09 : f32
    %694 = vector.broadcast %cst_470 : f32 to vector<4x16xf32>
    %695 = arith.select %693, %694, %691 : vector<4x16xi1>, vector<4x16xf32>
    %c0_471 = arith.constant 0 : index
    %c0_472 = arith.constant 0 : index
    %c0_473 = arith.constant 0 : index
    %696 = vector.load %arg53[%c0_471, %c0_472, %c0_473] : memref<1x4x32xf32, #tpu.memory_space<vmem>>, vector<1x4x32xf32>
    %697 = vector.shape_cast %696 : vector<1x4x32xf32> to vector<4x32xf32>
    %698 = vector.shape_cast %674 : vector<4x32xf32> to vector<1x4x32xf32>
    tpu.vector_store %arg53[%c0_471, %c0_472, %c0_473], %698 {strides = array<i32>} : memref<1x4x32xf32, #tpu.memory_space<vmem>>, vector<1x4x32xf32>,
    %c0_474 = arith.constant 0 : index
    %c0_475 = arith.constant 0 : index
    %c0_476 = arith.constant 0 : index
    %699 = vector.load %arg54[%c0_474, %c0_475, %c0_476] : memref<1x4x16xf32, #tpu.memory_space<vmem>>, vector<1x4x16xf32>
    %700 = vector.shape_cast %699 : vector<1x4x16xf32> to vector<4x16xf32>
    %701 = vector.shape_cast %695 : vector<4x16xf32> to vector<1x4x16xf32>
    tpu.vector_store %arg54[%c0_474, %c0_475, %c0_476], %701 {strides = array<i32>} : memref<1x4x16xf32, #tpu.memory_space<vmem>>, vector<1x4x16xf32>,
    return
  }
  func.func @transform_0(%arg0: i32) -> (i32, i32, i32) {
    %c0_i32 = arith.constant 0 : i32
    %c0_i32_0 = arith.constant 0 : i32
    %c0_i32_1 = arith.constant 0 : i32
    return %arg0, %c0_i32, %c0_i32_0 : i32, i32, i32
  }
  func.func @transform_1(%arg0: i32) -> (i32, i32, i32) {
    %c0_i32 = arith.constant 0 : i32
    %c0_i32_0 = arith.constant 0 : i32
    %c0_i32_1 = arith.constant 0 : i32
    return %arg0, %c0_i32, %c0_i32_0 : i32, i32, i32
  }
  func.func @transform_2(%arg0: i32) -> (i32, i32, i32) {
    %c0_i32 = arith.constant 0 : i32
    %c0_i32_0 = arith.constant 0 : i32
    %c0_i32_1 = arith.constant 0 : i32
    return %arg0, %c0_i32, %c0_i32_0 : i32, i32, i32
  }
  func.func @transform_3(%arg0: i32) -> (i32, i32, i32) {
    %c0_i32 = arith.constant 0 : i32
    %c0_i32_0 = arith.constant 0 : i32
    %c0_i32_1 = arith.constant 0 : i32
    return %arg0, %c0_i32, %c0_i32_0 : i32, i32, i32
  }
  func.func @transform_4(%arg0: i32) -> (i32, i32) {
    %c0_i32 = arith.constant 0 : i32
    %c0_i32_0 = arith.constant 0 : i32
    %c0_i32_1 = arith.constant 0 : i32
    return %c0_i32, %c0_i32_0 : i32, i32
  }
  func.func @transform_5(%arg0: i32) -> (i32, i32) {
    %c0_i32 = arith.constant 0 : i32
    %c0_i32_0 = arith.constant 0 : i32
    %c0_i32_1 = arith.constant 0 : i32
    return %c0_i32, %c0_i32_0 : i32, i32
  }
  func.func @transform_6(%arg0: i32) -> (i32, i32, i32) {
    %c0_i32 = arith.constant 0 : i32
    %c0_i32_0 = arith.constant 0 : i32
    %c0_i32_1 = arith.constant 0 : i32
    %c0_i32_2 = arith.constant 0 : i32
    return %c0_i32, %c0_i32_0, %c0_i32_1 : i32, i32, i32
  }
  func.func @transform_7(%arg0: i32) -> (i32, i32) {
    %c0_i32 = arith.constant 0 : i32
    %c0_i32_0 = arith.constant 0 : i32
    %c0_i32_1 = arith.constant 0 : i32
    return %c0_i32, %c0_i32_0 : i32, i32
  }
  func.func @transform_8(%arg0: i32) -> (i32, i32, i32) {
    %c0_i32 = arith.constant 0 : i32
    %c0_i32_0 = arith.constant 0 : i32
    %c0_i32_1 = arith.constant 0 : i32
    %c0_i32_2 = arith.constant 0 : i32
    return %c0_i32, %c0_i32_0, %c0_i32_1 : i32, i32, i32
  }
  func.func @transform_9(%arg0: i32) -> (i32, i32, i32) {
    %c0_i32 = arith.constant 0 : i32
    %c0_i32_0 = arith.constant 0 : i32
    %c0_i32_1 = arith.constant 0 : i32
    %c0_i32_2 = arith.constant 0 : i32
    return %c0_i32, %c0_i32_0, %c0_i32_1 : i32, i32, i32
  }
  func.func @transform_10(%arg0: i32) -> (i32, i32, i32) {
    %c0_i32 = arith.constant 0 : i32
    %c0_i32_0 = arith.constant 0 : i32
    %c0_i32_1 = arith.constant 0 : i32
    %c0_i32_2 = arith.constant 0 : i32
    return %c0_i32, %c0_i32_0, %c0_i32_1 : i32, i32, i32
  }
  func.func @transform_11(%arg0: i32) -> (i32, i32, i32) {
    %c0_i32 = arith.constant 0 : i32
    %c0_i32_0 = arith.constant 0 : i32
    %c0_i32_1 = arith.constant 0 : i32
    %c0_i32_2 = arith.constant 0 : i32
    return %c0_i32, %c0_i32_0, %c0_i32_1 : i32, i32, i32
  }
  func.func @transform_12(%arg0: i32) -> (i32, i32, i32) {
    %c0_i32 = arith.constant 0 : i32
    %c0_i32_0 = arith.constant 0 : i32
    %c0_i32_1 = arith.constant 0 : i32
    %c0_i32_2 = arith.constant 0 : i32
    return %c0_i32, %c0_i32_0, %c0_i32_1 : i32, i32, i32
  }
  func.func @transform_13(%arg0: i32) -> (i32, i32, i32) {
    %c0_i32 = arith.constant 0 : i32
    %c0_i32_0 = arith.constant 0 : i32
    %c0_i32_1 = arith.constant 0 : i32
    %c0_i32_2 = arith.constant 0 : i32
    return %c0_i32, %c0_i32_0, %c0_i32_1 : i32, i32, i32
  }
  func.func @transform_14(%arg0: i32) -> (i32, i32) {
    %c0_i32 = arith.constant 0 : i32
    %c0_i32_0 = arith.constant 0 : i32
    %c0_i32_1 = arith.constant 0 : i32
    return %c0_i32, %c0_i32_0 : i32, i32
  }
  func.func @transform_15(%arg0: i32) -> (i32, i32) {
    %c0_i32 = arith.constant 0 : i32
    %c0_i32_0 = arith.constant 0 : i32
    %c0_i32_1 = arith.constant 0 : i32
    return %c0_i32, %c0_i32_0 : i32, i32
  }
  func.func @transform_16(%arg0: i32) -> (i32, i32) {
    %c0_i32 = arith.constant 0 : i32
    %c0_i32_0 = arith.constant 0 : i32
    %c0_i32_1 = arith.constant 0 : i32
    return %c0_i32, %c0_i32_0 : i32, i32
  }
  func.func @transform_17(%arg0: i32) -> (i32, i32) {
    %c0_i32 = arith.constant 0 : i32
    %c0_i32_0 = arith.constant 0 : i32
    %c0_i32_1 = arith.constant 0 : i32
    return %c0_i32, %c0_i32_0 : i32, i32
  }
  func.func @transform_18(%arg0: i32) -> (i32, i32) {
    %c0_i32 = arith.constant 0 : i32
    %c0_i32_0 = arith.constant 0 : i32
    %c0_i32_1 = arith.constant 0 : i32
    return %c0_i32, %c0_i32_0 : i32, i32
  }
  func.func @transform_19(%arg0: i32) -> (i32, i32) {
    %c0_i32 = arith.constant 0 : i32
    %c0_i32_0 = arith.constant 0 : i32
    %c0_i32_1 = arith.constant 0 : i32
    return %c0_i32, %c0_i32_0 : i32, i32
  }
  func.func @transform_20(%arg0: i32) -> (i32, i32) {
    %c0_i32 = arith.constant 0 : i32
    %c0_i32_0 = arith.constant 0 : i32
    %c0_i32_1 = arith.constant 0 : i32
    return %c0_i32, %c0_i32_0 : i32, i32
  }
  func.func @transform_21(%arg0: i32) -> (i32, i32) {
    %c0_i32 = arith.constant 0 : i32
    %c0_i32_0 = arith.constant 0 : i32
    %c0_i32_1 = arith.constant 0 : i32
    return %c0_i32, %c0_i32_0 : i32, i32
  }
  func.func @transform_22(%arg0: i32) -> (i32, i32, i32) {
    %c0_i32 = arith.constant 0 : i32
    %c0_i32_0 = arith.constant 0 : i32
    %c0_i32_1 = arith.constant 0 : i32
    %c0_i32_2 = arith.constant 0 : i32
    return %c0_i32, %c0_i32_0, %c0_i32_1 : i32, i32, i32
  }
  func.func @transform_23(%arg0: i32) -> (i32, i32) {
    %c0_i32 = arith.constant 0 : i32
    %c0_i32_0 = arith.constant 0 : i32
    %c0_i32_1 = arith.constant 0 : i32
    return %c0_i32, %c0_i32_0 : i32, i32
  }
  func.func @transform_24(%arg0: i32) -> (i32, i32, i32) {
    %c0_i32 = arith.constant 0 : i32
    %c0_i32_0 = arith.constant 0 : i32
    %c0_i32_1 = arith.constant 0 : i32
    %c0_i32_2 = arith.constant 0 : i32
    return %c0_i32, %c0_i32_0, %c0_i32_1 : i32, i32, i32
  }
  func.func @transform_25(%arg0: i32) -> (i32, i32, i32) {
    %c0_i32 = arith.constant 0 : i32
    %c0_i32_0 = arith.constant 0 : i32
    %c0_i32_1 = arith.constant 0 : i32
    %c0_i32_2 = arith.constant 0 : i32
    return %c0_i32, %c0_i32_0, %c0_i32_1 : i32, i32, i32
  }
  func.func @transform_26(%arg0: i32) -> (i32, i32, i32) {
    %c0_i32 = arith.constant 0 : i32
    %c0_i32_0 = arith.constant 0 : i32
    %c0_i32_1 = arith.constant 0 : i32
    %c0_i32_2 = arith.constant 0 : i32
    return %c0_i32, %c0_i32_0, %c0_i32_1 : i32, i32, i32
  }
  func.func @transform_27(%arg0: i32) -> (i32, i32, i32) {
    %c0_i32 = arith.constant 0 : i32
    %c0_i32_0 = arith.constant 0 : i32
    %c0_i32_1 = arith.constant 0 : i32
    %c0_i32_2 = arith.constant 0 : i32
    return %c0_i32, %c0_i32_0, %c0_i32_1 : i32, i32, i32
  }
  func.func @transform_28(%arg0: i32) -> (i32, i32, i32) {
    %c0_i32 = arith.constant 0 : i32
    %c0_i32_0 = arith.constant 0 : i32
    %c0_i32_1 = arith.constant 0 : i32
    %c0_i32_2 = arith.constant 0 : i32
    return %c0_i32, %c0_i32_0, %c0_i32_1 : i32, i32, i32
  }
  func.func @transform_29(%arg0: i32) -> (i32, i32, i32) {
    %c0_i32 = arith.constant 0 : i32
    %c0_i32_0 = arith.constant 0 : i32
    %c0_i32_1 = arith.constant 0 : i32
    %c0_i32_2 = arith.constant 0 : i32
    return %c0_i32, %c0_i32_0, %c0_i32_1 : i32, i32, i32
  }
  func.func @transform_30(%arg0: i32) -> (i32, i32) {
    %c0_i32 = arith.constant 0 : i32
    %c0_i32_0 = arith.constant 0 : i32
    %c0_i32_1 = arith.constant 0 : i32
    return %c0_i32, %c0_i32_0 : i32, i32
  }
  func.func @transform_31(%arg0: i32) -> (i32, i32) {
    %c0_i32 = arith.constant 0 : i32
    %c0_i32_0 = arith.constant 0 : i32
    %c0_i32_1 = arith.constant 0 : i32
    return %c0_i32, %c0_i32_0 : i32, i32
  }
  func.func @transform_32(%arg0: i32) -> (i32, i32) {
    %c0_i32 = arith.constant 0 : i32
    %c0_i32_0 = arith.constant 0 : i32
    %c0_i32_1 = arith.constant 0 : i32
    return %c0_i32, %c0_i32_0 : i32, i32
  }
  func.func @transform_33(%arg0: i32) -> (i32, i32) {
    %c0_i32 = arith.constant 0 : i32
    %c0_i32_0 = arith.constant 0 : i32
    %c0_i32_1 = arith.constant 0 : i32
    return %c0_i32, %c0_i32_0 : i32, i32
  }
  func.func @transform_34(%arg0: i32) -> (i32, i32) {
    %c0_i32 = arith.constant 0 : i32
    %c0_i32_0 = arith.constant 0 : i32
    %c0_i32_1 = arith.constant 0 : i32
    return %c0_i32, %c0_i32_0 : i32, i32
  }
  func.func @transform_35(%arg0: i32) -> (i32, i32) {
    %c0_i32 = arith.constant 0 : i32
    %c0_i32_0 = arith.constant 0 : i32
    %c0_i32_1 = arith.constant 0 : i32
    return %c0_i32, %c0_i32_0 : i32, i32
  }
  func.func @transform_36(%arg0: i32) -> (i32, i32) {
    %c0_i32 = arith.constant 0 : i32
    %c0_i32_0 = arith.constant 0 : i32
    %c0_i32_1 = arith.constant 0 : i32
    return %c0_i32, %c0_i32_0 : i32, i32
  }
  func.func @transform_37(%arg0: i32) -> (i32, i32) {
    %c0_i32 = arith.constant 0 : i32
    %c0_i32_0 = arith.constant 0 : i32
    %c0_i32_1 = arith.constant 0 : i32
    return %c0_i32, %c0_i32_0 : i32, i32
  }
  func.func @transform_38(%arg0: i32) -> (i32, i32) {
    %c0_i32 = arith.constant 0 : i32
    %c0_i32_0 = arith.constant 0 : i32
    %c0_i32_1 = arith.constant 0 : i32
    return %c0_i32, %c0_i32_0 : i32, i32
  }
  func.func @transform_39(%arg0: i32) -> (i32, i32) {
    %c0_i32 = arith.constant 0 : i32
    %c0_i32_0 = arith.constant 0 : i32
    %c0_i32_1 = arith.constant 0 : i32
    return %c0_i32, %c0_i32_0 : i32, i32
  }
  func.func @transform_40(%arg0: i32) -> (i32, i32, i32) {
    %c0_i32 = arith.constant 0 : i32
    %c0_i32_0 = arith.constant 0 : i32
    %c0_i32_1 = arith.constant 0 : i32
    %c0_i32_2 = arith.constant 0 : i32
    return %c0_i32, %c0_i32_0, %c0_i32_1 : i32, i32, i32
  }
  func.func @transform_41(%arg0: i32) -> (i32, i32) {
    %c0_i32 = arith.constant 0 : i32
    %c0_i32_0 = arith.constant 0 : i32
    %c0_i32_1 = arith.constant 0 : i32
    return %c0_i32, %c0_i32_0 : i32, i32
  }
  func.func @transform_42(%arg0: i32) -> (i32, i32, i32) {
    %c0_i32 = arith.constant 0 : i32
    %c0_i32_0 = arith.constant 0 : i32
    %c0_i32_1 = arith.constant 0 : i32
    %c0_i32_2 = arith.constant 0 : i32
    return %c0_i32, %c0_i32_0, %c0_i32_1 : i32, i32, i32
  }
  func.func @transform_43(%arg0: i32) -> (i32, i32, i32) {
    %c0_i32 = arith.constant 0 : i32
    %c0_i32_0 = arith.constant 0 : i32
    %c0_i32_1 = arith.constant 0 : i32
    %c0_i32_2 = arith.constant 0 : i32
    return %c0_i32, %c0_i32_0, %c0_i32_1 : i32, i32, i32
  }
  func.func @transform_44(%arg0: i32) -> (i32, i32, i32) {
    %c0_i32 = arith.constant 0 : i32
    %c0_i32_0 = arith.constant 0 : i32
    %c0_i32_1 = arith.constant 0 : i32
    %c0_i32_2 = arith.constant 0 : i32
    return %c0_i32, %c0_i32_0, %c0_i32_1 : i32, i32, i32
  }
  func.func @transform_45(%arg0: i32) -> (i32, i32, i32) {
    %c0_i32 = arith.constant 0 : i32
    %c0_i32_0 = arith.constant 0 : i32
    %c0_i32_1 = arith.constant 0 : i32
    %c0_i32_2 = arith.constant 0 : i32
    return %c0_i32, %c0_i32_0, %c0_i32_1 : i32, i32, i32
  }
  func.func @transform_46(%arg0: i32) -> (i32, i32, i32) {
    %c0_i32 = arith.constant 0 : i32
    %c0_i32_0 = arith.constant 0 : i32
    %c0_i32_1 = arith.constant 0 : i32
    %c0_i32_2 = arith.constant 0 : i32
    return %c0_i32, %c0_i32_0, %c0_i32_1 : i32, i32, i32
  }
  func.func @transform_47(%arg0: i32) -> (i32, i32, i32) {
    %c0_i32 = arith.constant 0 : i32
    %c0_i32_0 = arith.constant 0 : i32
    %c0_i32_1 = arith.constant 0 : i32
    %c0_i32_2 = arith.constant 0 : i32
    return %c0_i32, %c0_i32_0, %c0_i32_1 : i32, i32, i32
  }
  func.func @transform_48(%arg0: i32) -> (i32, i32) {
    %c0_i32 = arith.constant 0 : i32
    %c0_i32_0 = arith.constant 0 : i32
    %c0_i32_1 = arith.constant 0 : i32
    return %c0_i32, %c0_i32_0 : i32, i32
  }
  func.func @transform_49(%arg0: i32) -> (i32, i32) {
    %c0_i32 = arith.constant 0 : i32
    %c0_i32_0 = arith.constant 0 : i32
    %c0_i32_1 = arith.constant 0 : i32
    return %c0_i32, %c0_i32_0 : i32, i32
  }
  func.func @transform_50(%arg0: i32) -> (i32, i32) {
    %c0_i32 = arith.constant 0 : i32
    %c0_i32_0 = arith.constant 0 : i32
    %c0_i32_1 = arith.constant 0 : i32
    return %c0_i32, %c0_i32_0 : i32, i32
  }
  func.func @transform_51(%arg0: i32) -> (i32, i32) {
    %c0_i32 = arith.constant 0 : i32
    %c0_i32_0 = arith.constant 0 : i32
    %c0_i32_1 = arith.constant 0 : i32
    return %c0_i32, %c0_i32_0 : i32, i32
  }
  func.func @transform_52(%arg0: i32) -> (i32, i32, i32) {
    %c0_i32 = arith.constant 0 : i32
    %c0_i32_0 = arith.constant 0 : i32
    %c0_i32_1 = arith.constant 0 : i32
    return %arg0, %c0_i32, %c0_i32_0 : i32, i32, i32
  }
  func.func @transform_53(%arg0: i32) -> (i32, i32, i32) {
    %c0_i32 = arith.constant 0 : i32
    %c0_i32_0 = arith.constant 0 : i32
    %c0_i32_1 = arith.constant 0 : i32
    return %arg0, %c0_i32, %c0_i32_0 : i32, i32, i32
  }
}

</mosaic_0001>

<bundles_post_ra>
// kernel: tpu_custom_call.1
= control target key start
LH: loop header
LB: loop body
LE: loop exit
PB: predicated region body
PF: predicated region fallthrough
CT: control target
= control target key end

     0   :  { %s17807_s6 = smov 1   ;;  %s17808_s10 = smov 2   ;;  %s20683_s0 = inlined_call_operand.smem [shape: u32[54], index: -1, kind: input, shape index: {}] }
   0x1   :  { %s17873_s5 = sld [smem:[%s20683_s0]]   ;;  %s17809_s14 = smov 3  }
   0x2   :  { %s17878_s9 = sld [smem:[%s20683_s0 + %s17807_s6]]   ;;  %s17810_s18 = smov 4  }
   0x3   :  { %s17883_s13 = sld [smem:[%s20683_s0 + %s17808_s10]]   ;;  %s17811_s22 = smov 5  }
   0x4   :  { %s17888_s17 = sld [smem:[%s20683_s0 + %s17809_s14]]   ;;  %s17812_s26 = smov 6  }
   0x5   :  { %s17893_s21 = sld [smem:[%s20683_s0 + %s17810_s18]]   ;;  %s17813_s30 = smov 7  }
   0x6   :  { %s17898_s25 = sld [smem:[%s20683_s0 + %s17811_s22]]   ;;  %s17814_s4 = smov 8  }
   0x7   :  { %20735 = sst [smem:[#allocation18_spill]] %s17873_s5  ;;  %s17815_s10 = smov 9  }
   0x8   :  { %20736 = sst [smem:[#allocation19_spill]] %s17878_s9  ;;  %s17816_s15 = smov 10  }
   0x9   :  { %s17903_s29 = sld [smem:[%s20683_s0 + %s17812_s26]]   ;;  %s17817_s20 = smov 11  }
   0xa   :  { %20737 = sst [smem:[#allocation20_spill]] %s17888_s17  ;;  %s17818_s26 = smov 12  }
   0xb   :  { %s17908_s3 = sld [smem:[%s20683_s0 + %s17813_s30]]   ;;  %s17819_s1 = smov 13  }
   0xc   :  { %s17913_s8 = sld [smem:[%s20683_s0 + %s17814_s4]]   ;;  %s17820_s7 = smov 14  }
   0xd   :  { %s17918_s14 = sld [smem:[%s20683_s0 + %s17815_s10]]   ;;  %s17822_s22 = smov 16  }
   0xe   :  { %s17923_s19 = sld [smem:[%s20683_s0 + %s17816_s15]]   ;;  %s17821_s15 = smov 15  }
   0xf   :  { %20738 = sst [smem:[#allocation21_spill]] %s17903_s29  ;;  %s17823_s28 = smov 17  }
  0x10   :  { %s17928_s24 = sld [smem:[%s20683_s0 + %s17817_s20]]  }
  0x11   :  { %20739 = sst [smem:[#allocation22_spill]] %s17908_s3 }
  0x12   :  { %20740 = sst [smem:[#allocation23_spill]] %s17913_s8 }
  0x13   :  { %20741 = sst [smem:[#allocation24_spill]] %s17918_s14 }
  0x14   :  { %20742 = sst [smem:[#allocation25_spill]] %s17923_s19 }
  0x15   :  { %s17933_s30 = sld [smem:[%s20683_s0 + %s17818_s26]]  }
  0x16   :  { %20743 = sst [smem:[#allocation26_spill]] %s17928_s24 }
  0x17   :  { %s17938_s6 = sld [smem:[%s20683_s0 + %s17819_s1]]  }
  0x18   :  { %s17943_s12 = sld [smem:[%s20683_s0 + %s17820_s7]]   ;;  %s17824_s7 = smov 18  }
  0x19   :  { %s17948_s20 = sld [smem:[%s20683_s0 + %s17821_s15]]   ;;  %s17825_s15 = smov 19  }
  0x1a   :  { %s17953_s27 = sld [smem:[%s20683_s0 + %s17822_s22]]   ;;  %s17826_s22 = smov 20  }
  0x1b   :  { %20744 = sst [smem:[#allocation27_spill]] %s17933_s30 }
  0x1c   :  { %s17958_s4 = sld [smem:[%s20683_s0 + %s17823_s28]]   ;;  %s17827_s28 = smov 21  }
  0x1d   :  { %20745 = sst [smem:[#allocation28_spill]] %s17938_s6 }
  0x1e   :  { %20746 = sst [smem:[#allocation29_spill]] %s17943_s12 }
  0x1f   :  { %20747 = sst [smem:[#allocation30_spill]] %s17948_s20 }
  0x20   :  { %20748 = sst [smem:[#allocation31_spill]] %s17953_s27 }
  0x21   :  { %s17963_s12 = sld [smem:[%s20683_s0 + %s17824_s7]]   ;;  %s17828_s7 = smov 22  }
  0x22   :  { %20749 = sst [smem:[#allocation32_spill]] %s17958_s4 }
  0x23   :  { %s17968_s20 = sld [smem:[%s20683_s0 + %s17825_s15]]   ;;  %s17829_s15 = smov 23  }
  0x24   :  { %s17973_s27 = sld [smem:[%s20683_s0 + %s17826_s22]]   ;;  %s17830_s22 = smov 24  }
  0x25   :  { %s17978_s4 = sld [smem:[%s20683_s0 + %s17827_s28]]   ;;  %s17831_s28 = smov 25  }
  0x27   :  { %20750 = sst [smem:[#allocation33_spill]] %s17963_s12 }
  0x28   :  { %s17983_s12 = sld [smem:[%s20683_s0 + %s17828_s7]]   ;;  %s17832_s7 = smov 26  }
  0x29   :  { %20751 = sst [smem:[#allocation34_spill]] %s17968_s20 }
  0x2a   :  { %20752 = sst [smem:[#allocation35_spill]] %s17973_s27 }
  0x2b   :  { %20753 = sst [smem:[#allocation36_spill]] %s17978_s4 }
  0x2c   :  { %s17988_s20 = sld [smem:[%s20683_s0 + %s17829_s15]]   ;;  %s17833_s15 = smov 27  }
  0x2d   :  { %s17993_s27 = sld [smem:[%s20683_s0 + %s17830_s22]]   ;;  %s17834_s22 = smov 28  }
  0x2e   :  { %20754 = sst [smem:[#allocation37_spill]] %s17983_s12 }
  0x2f   :  { %s17998_s4 = sld [smem:[%s20683_s0 + %s17831_s28]]   ;;  %s17835_s28 = smov 29  }
  0x30   :  { %s18003_s3 = sld [smem:[%s20683_s0 + %s17832_s7]]   ;;  %s17836_s7 = smov 30  }
  0x31   :  { %s18008_s24 = sld [smem:[%s20683_s0 + %s17833_s15]]   ;;  %s17837_s15 = smov 31  }
  0x32   :  { %20755 = sst [smem:[#allocation38_spill]] %s17988_s20 }
  0x33   :  { %20756 = sst [smem:[#allocation39_spill]] %s17993_s27 }
  0x34   :  { %s18013_s17 = sld [smem:[%s20683_s0 + %s17834_s22]]   ;;  %s17838_s22 = smov 32  }
  0x35   :  { %20757 = sst [smem:[#allocation40_spill]] %s17998_s4 }
  0x36   :  { %20758 = sst [smem:[#allocation41_spill]] %s18003_s3 }
  0x37   :  { %20759 = sst [smem:[#allocation42_spill]] %s18008_s24 }
  0x38   :  { %s18018_s14 = sld [smem:[%s20683_s0 + %s17835_s28]]   ;;  %s17839_s28 = smov 33  }
  0x39   :  { %s18023_s29 = sld [smem:[%s20683_s0 + %s17836_s7]]   ;;  %s17840_s7 = smov 34  }
  0x3a   :  { %20760 = sst [smem:[#allocation43_spill]] %s18013_s17 }
  0x3b   :  { %s18028_s8 = sld [smem:[%s20683_s0 + %s17837_s15]]   ;;  %s17841_s15 = smov 35  }
  0x3c   :  { %s18033_s6 = sld [smem:[%s20683_s0 + %s17838_s22]]   ;;  %s17842_s22 = smov 36  }
  0x3d   :  { %s18038_s19 = sld [smem:[%s20683_s0 + %s17839_s28]]   ;;  %s17843_s28 = smov 37  }
  0x3e   :  { %20761 = sst [smem:[#allocation44_spill]] %s18018_s14 }
  0x3f   :  { %20762 = sst [smem:[#allocation45_spill]] %s18023_s29 }
  0x40   :  { %s18043_s30 = sld [smem:[%s20683_s0 + %s17840_s7]]   ;;  %s17844_s7 = smov 38  }
  0x41   :  { %20763 = sst [smem:[#allocation46_spill]] %s18028_s8 }
  0x42   :  { %20764 = sst [smem:[#allocation47_spill]] %s18033_s6 }
  0x43   :  { %20765 = sst [smem:[#allocation48_spill]] %s18038_s19 }
  0x44   :  { %s18048_s8 = sld [smem:[%s20683_s0 + %s17841_s15]]   ;;  %s17845_s15 = smov 39  }
  0x45   :  { %s18053_s29 = sld [smem:[%s20683_s0 + %s17842_s22]]   ;;  %s17846_s22 = smov 40  }
  0x46   :  { %20766 = sst [smem:[#allocation49_spill]] %s18043_s30 }
  0x47   :  { %s18058_s19 = sld [smem:[%s20683_s0 + %s17843_s28]]   ;;  %s17847_s28 = smov 41  }
  0x48   :  { %s18063_s6 = sld [smem:[%s20683_s0 + %s17844_s7]]   ;;  %s17848_s7 = smov 42  }
  0x49   :  { %s18068_s20 = sld [smem:[%s20683_s0 + %s17845_s15]]   ;;  %s17849_s15 = smov 43  }
  0x4a   :  { %20767 = sst [smem:[#allocation50_spill]] %s18048_s8 }
  0x4b   :  { %20768 = sst [smem:[#allocation51_spill]] %s18053_s29 }
  0x4c   :  { %s18073_s29 = sld [smem:[%s20683_s0 + %s17846_s22]]   ;;  %s17850_s22 = smov 44  }
  0x4d   :  { %20769 = sst [smem:[#allocation52_spill]] %s18058_s19 }
  0x4e   :  { %20770 = sst [smem:[#allocation53_spill]] %s18063_s6 }
  0x4f   :  { %s18078_s19 = sld [smem:[%s20683_s0 + %s17847_s28]]   ;;  %s17851_s28 = smov 45  }
  0x50   :  { %s18083_s6 = sld [smem:[%s20683_s0 + %s17848_s7]]   ;;  %s17852_s7 = smov 46  }
  0x51   :  { %s18088_s24 = sld [smem:[%s20683_s0 + %s17849_s15]]   ;;  %s17853_s15 = smov 47  }
  0x52   :  { %s18093_s4 = sld [smem:[%s20683_s0 + %s17850_s22]]   ;;  %s17854_s22 = smov 48  }
  0x53   :  { %s18098_s12 = sld [smem:[%s20683_s0 + %s17851_s28]]   ;;  %s17855_s28 = smov 49  }
  0x54   :  { %s18103_s27 = sld [smem:[%s20683_s0 + %s17852_s7]]   ;;  %s17856_s7 = smov 50  }
  0x55   :  { %s18108_s14 = sld [smem:[%s20683_s0 + %s17853_s15]]   ;;  %s17857_s15 = smov 51  }
  0x56   :  { %20771 = sst [smem:[#allocation54_spill]] %s18083_s6 }
  0x57   :  { %s18113_s30 = sld [smem:[%s20683_s0 + %s17854_s22]]   ;;  %s17858_s22 = smov 52  }
  0x58   :  { %20772 = sst [smem:[#allocation55_spill]] %s18093_s4 }
  0x59   :  { %20773 = sst [smem:[#allocation56_spill]] %s18098_s12 }
  0x5a   :  { %s18118_s8 = sld [smem:[%s20683_s0 + %s17855_s28]]   ;;  %s17859_s28 = smov 53  }
  0x5b   :  { %s18123_s3 = sld [smem:[%s20683_s0 + %s17856_s7]]  }
  0x5c   :  { %s18128_s17 = sld [smem:[%s20683_s0 + %s17857_s15]]  }
  0x5d   :  { %s18133_s12 = sld [smem:[%s20683_s0 + %s17858_s22]]  }
  0x60   :  { %20774 = sst [smem:[#allocation57_spill]] %s18118_s8 }
  0x61   :  { %20775 = sst [smem:[#allocation58_spill]] %s18123_s3 }
  0x62   :  { %s18138_s8 = sld [smem:[%s20683_s0 + %s17859_s28]]  }
  0x63   :  { %20776 = sst [smem:[#allocation59_spill]] %s18133_s12 }
  0x68   :  { %20777 = sst [smem:[#allocation60_spill]] %s18138_s8 }
  0x69   :  { %113 = vsyncpa [#allocation3], 0 }
  0x6a   :  { %114 = vsyncpa [#allocation6], 0 }
  0x6b   :  { %115 = vsyncpa [#allocation9], 0 }
  0x6c   :  { %116 = vsyncpa [#allocation4], 0 }
  0x6d   :  { %118 = vsyncpa [#allocation4 + $0x1], 0 }
  0x6e   :  { %119 = vsyncpa [#allocation12], 0 }
  0x6f   :  { %121 = vsyncpa [#allocation12 + $0x1], 0  ;;  %s18140_s7 = smov 0   ;;  %s18142_s10 = smov 0  }
  0x70   :  { %s18144_s11 = smov 0   ;;  %s18146_s15 = smov 0  }
  0x71 LB: > { %s20778_s12 = sld [smem:[#allocation59_spill]]  ;;  %s18161_s0 = sadd.s32 4294967295, %s17805_s15   ;;  %s17793_s7 = sphi %s18140_s7, %s20857_s7   ;;  %s17805_s15 = sphi %s18146_s15, %s20854_s15   ;;  %s17801_s11 = sphi %s18144_s11, %s20856_s11   ;;  %s17797_s10 = sphi %s18142_s10, %s20858_s10  }
  0x72   : > { %s20779_s9 = sld [smem:[#allocation19_spill]]  ;;  %s17151_s16 = sadd.s32 4294967294, %s17805_s15  }
  0x73   : > { %s20780_s6 = sld [smem:[#allocation54_spill]]  ;;  %s18165_s18 = sadd.s32 1, %s17805_s15  }
  0x74   : > { %s20781_s4 = sld [smem:[#allocation55_spill]]  ;;  %s1246_s22 = sadd.s32 1, %s17801_s11 }
  0x75   : > { %s20782_s3 = sld [smem:[#allocation58_spill]]  ;;  %s1243_s23 = ssub.s32 %s17805_s15, %s18165_s18 }
  0x76   : > { %20783 = sst [smem:[#allocation61_spill]] %s17793_s7  ;;  %p1256_p0 = scmp.ne.s32.totalorder %s17801_s11, %s17797_s10 }
  0x77   : > { %20784 = sst [smem:[#allocation62_spill]] %s17801_s11  ;;  %p1244_p1 = scmp.eq.s32.totalorder %s1243_s23, 0 }
  0x78   : > { %20785 = sst [smem:[#allocation63_spill]] %s17805_s15  ;;  %p1257_p2 = scmp.eq.s32.totalorder %s18161_s0, 1 }
  0x79   : > { %20786 = sst [smem:[#allocation64_spill]] %s18165_s18  ;;  %p1262_p3 = scmp.ne.s32.totalorder %s17797_s10, %s17793_s7 }
  0x7a   : > { %p1263_p4 = scmp.eq.s32.totalorder %s17151_s16, 1  ;;  %p18178_p5 = por %p1257_p2, %p1256_p0 }
  0x7b   : > { %s18176_s26 = scalar_select %p1244_p1, %s17801_s11, %s1246_s22  }
  0x7c   : > { %s20788_s28 = scalar_select %p18178_p5, 1, 0 }
  0x7d   : > { %20787 = sst [smem:[#allocation65_spill]] %s18176_s26  ;;  %p18182_p6 = por %p1263_p4, %p1262_p3 }
  0x7e   : > { %20789 = sst [smem:[#allocation66_spill]] %s20788_s28  ;;  %p17152_p7 = scmp.ge.s32.totalorder %s17805_s15, 1 }
  0x7f   : > { %s20790_s1 = scalar_select %p18182_p6, 1, 0 }
  0x80   : > { %p1296_p8 = scmp.lt.s32.totalorder %s17805_s15, 3  ;;  %p17360_p9 = scmp.eq.s32.totalorder %s18161_s0, 0 }
  0x81   : > { %20791 = sst [smem:[#allocation67_spill]] %s20790_s1  ;;  %s1428_s16 = sshll.u32 %s18078_s19, 4  ;;  %s1429_s16 = int_to_ptr.hbm [resolvable:$true] %s1428_s16 }
  0x82   : > { %p18189_p10 = pnand %p17152_p7, %p1296_p8  ;;  %s17860_s22 = smov [#allocation5]  }
  0x83   : > { %s1430_s23 = sshll.u32 %s17860_s22, 4  ;;  %s1413_s26 = sshll.u32 %s18068_s20, 4  ;;  %s1431_s23 = int_to_ptr.vmem [resolvable:$true] %s1430_s23  ;;  %s18203_s26 = int_to_ptr.hbm [resolvable:$true] %s1413_s26 }
  0x84   : > { %p17340_p11 = pneg %p18189_p10  ;;  %s1458_s18 = sshll.u32 %s18113_s30, 4  ;;  %s18218_s18 = int_to_ptr.hbm [resolvable:$true] %s1458_s18 }
  0x85   : > { %s17861_s1 = smov [#allocation2]   ;;  %s17579_s15 = sshra.s32 %s1429_s16, 4  ;;  %s17580_s15 = int_to_ptr.hbm [resolvable:$true] %s17579_s15 }
  0x86   : > { %p18199_p12 = pnand %p17360_p9, %p17340_p11  ;;  %s18206_s7 = sshll.u32 %s17861_s1, 4  ;;  %s1416_s7 = int_to_ptr.vmem [resolvable:$true] %s18206_s7 }
  0x87   : > { %s17581_s8 = scalar_lea.hbm %s17580_s15, 1  ;;  %s17586_s22 = scalar_lea.hbm %s18078_s19, 1 }
  0x88   : > { %p17582_p13 = scmp.ne.s32.totalorder %s17580_s15, %s17581_s8  ;;  %p17583_p0 = pneg %p18199_p12 }
  0x89   : > { %p17587_p3 = scmp.lt.s32.totalorder %s17580_s15, %s18078_s19  ;;  %p17588_p4 = scmp.lt.s32.totalorder %s17586_s22, %s17581_s8 }
  0x8a   : > { %p17584_p1 = pnand %p17583_p0, %p17582_p13 }
  0x8b   : > { %p17589_p7 = por %p17588_p4, %p17587_p3 }
  0x8c   : > { %p17585_p2 = pneg %p17584_p1 }
  0x8e   : > { %p17590_p8 = pnand %p17589_p7, %p17585_p2 }
  0x90   : > { %17593 = shalt.err (!%p17590_p8)
}
  0x91   : > { %17346 = dma.hbm_to_vmem [thread:$0]  (!%p18199_p12), %s1429_s16, 16, %s1431_s23, [#allocation6]  }
  0x92   : > { %s17609_s1 = sshra.s32 %s18203_s26, 4  ;;  %s17616_s8 = scalar_lea.hbm %s18068_s20, 1  ;;  %s17610_s1 = int_to_ptr.hbm [resolvable:$true] %s17609_s1 }
  0x93   : > { %s17611_s28 = scalar_lea.hbm %s17610_s1, 1  ;;  %p17617_p2 = scmp.lt.s32.totalorder %s17610_s1, %s18068_s20 }
  0x94   : > { %p17612_p11 = scmp.ne.s32.totalorder %s17610_s1, %s17611_s28  ;;  %p17618_p3 = scmp.lt.s32.totalorder %s17616_s8, %s17611_s28 }
  0x96   : > { %p17614_p13 = pnand %p17612_p11, %p17583_p0  ;;  %p17619_p4 = por %p17618_p3, %p17617_p2 }
  0x98   : > { %p17615_p1 = pneg %p17614_p13 }
  0x9a   : > { %p17620_p7 = pnand %p17619_p4, %p17615_p1 }
  0x9c   : > { %17623 = shalt.err (!%p17620_p7)
}
  0x9d   : > { %17343 = dma.hbm_to_vmem [thread:$0]  (!%p18199_p12), %s18203_s26, 16, %s1416_s7, [#allocation3]  }
  0x9e   : > { %s1473_s15 = sshll.u32 %s20782_s3, 4  ;;  %s17862_s16 = smov [#allocation7]   ;;  %s18230_s15 = int_to_ptr.hbm [resolvable:$true] %s1473_s15 }
  0x9f   : > { %s1460_s23 = sshll.u32 %s17862_s16, 4  ;;  %s17639_s22 = sshra.s32 %s18218_s18, 4  ;;  %s1461_s23 = int_to_ptr.vmem [resolvable:$true] %s1460_s23  ;;  %s17640_s22 = int_to_ptr.hbm [resolvable:$true] %s17639_s22 }
  0xa0   : > { %s17641_s28 = scalar_lea.hbm %s17640_s22, 1  ;;  %s17646_s1 = scalar_lea.hbm %s18113_s30, 1 }
  0xa1   : > { %p17642_p8 = scmp.ne.s32.totalorder %s17640_s22, %s17641_s28  ;;  %p17647_p1 = scmp.lt.s32.totalorder %s17640_s22, %s18113_s30 }
  0xa2   : > { %p17648_p2 = scmp.lt.s32.totalorder %s17646_s1, %s17641_s28 }
  0xa3   : > { %p17644_p11 = pnand %p17642_p8, %p17583_p0 }
  0xa4   : > { %p17649_p3 = por %p17648_p2, %p17647_p1 }
  0xa5   : > { %p17645_p13 = pneg %p17644_p11 }
  0xa7   : > { %p17650_p4 = pnand %p17649_p3, %p17645_p13 }
  0xa9   : > { %17653 = shalt.err (!%p17650_p4)
}
  0xaa   : > { %17349 = dma.hbm_to_vmem [thread:$0]  (!%p18199_p12), %s18218_s18, 16, %s1461_s23, [#allocation6]  }
  0xab   : > { %s17863_s7 = smov [#allocation8]   ;;  %s17669_s8 = sshra.s32 %s18230_s15, 4  ;;  %s17670_s8 = int_to_ptr.hbm [resolvable:$true] %s17669_s8 }
  0xac   : > { %s1475_s26 = sshll.u32 %s17863_s7, 4  ;;  %s17671_s16 = scalar_lea.hbm %s17670_s8, 1  ;;  %s1476_s26 = int_to_ptr.vmem [resolvable:$true] %s1475_s26 }
  0xad   : > { %p17672_p7 = scmp.ne.s32.totalorder %s17670_s8, %s17671_s16  ;;  %s17676_s22 = scalar_lea.hbm %s20782_s3, 1 }
  0xae   : > { %p17677_p13 = scmp.lt.s32.totalorder %s17670_s8, %s20782_s3  ;;  %p17678_p1 = scmp.lt.s32.totalorder %s17676_s22, %s17671_s16 }
  0xaf   : > { %p17674_p8 = pnand %p17672_p7, %p17583_p0 }
  0xb0   : > { %p17679_p2 = por %p17678_p1, %p17677_p13 }
  0xb1   : > { %p17675_p11 = pneg %p17674_p8 }
  0xb3   : > { %p17680_p3 = pnand %p17679_p2, %p17675_p11 }
  0xb5   : > { %17683 = shalt.err (!%p17680_p3)
}
  0xb6   : > { %17352 = dma.hbm_to_vmem [thread:$0]  (!%p18199_p12), %s18230_s15, 16, %s1476_s26, [#allocation9]  }
  0xb7   : > { %1519 = sbr.rel (%p18189_p10) target bundleno = 11686 (0x2da6), region = 228 }
  0xbc   : > { %17772 = dma.done.wait (%p17360_p9), [#allocation3], 16  }
  0xbd   : > { %17774 = vsyncadd (%p17360_p9), [#allocation3], 4294967280 }
  0xbe   : > { %17776 = dma.done.wait (%p17360_p9), [#allocation6], 32  }
  0xbf   : > { %17778 = vsyncadd (%p17360_p9), [#allocation6], 4294967264 }
  0xc0   : > { %17780 = dma.done.wait (%p17360_p9), [#allocation9], 16  }
  0xc1   : > { %17782 = vsyncadd (%p17360_p9), [#allocation9], 4294967280  ;;  %p1675_p10 = scmp.lt.s32.totalorder %s18161_s0, 1  ;;  %vm1705_vm0 = vcmask 1041408   ;;  %vm1701_vm1 = vcmask 15360   ;;  %v1866_v14 = vld [vmem:[%s18103_s27 + $0x18] sm:$0xff] }
  0xc2   : > { %v1696_v0 = vld [vmem:[%s17898_s25] sm:$0x3]  ;;  %v1887_v15 = vand.u32 4294901760, %v1866_v14  ;;  %v1865_v16 = vld [vmem:[%s18103_s27 + $0x10] sm:$0xff]  ;;  %v1864_v19 = vld [vmem:[%s18103_s27 + $0x8] sm:$0xff]  ;;  %s20794_s5 = sld [smem:[#allocation18_spill]] }
  0xc3   : > { %s18266_s11 = scalar_select %p1675_p10, %s18161_s0, 1  ;;  %v1707_v2 = vsel %vm1705_vm0, %v1696_v0, 0  ;;  %v1889_v18 = vand.u32 4294901760, %v1865_v16  ;;  %v1891_v22 = vand.u32 4294901760, %v1864_v19  ;;  %v1863_v23 = vld [vmem:[%s18103_s27] sm:$0xff]  ;;  %v2063_v35 = vld [vmem:[%s20781_s4 + $0x18] sm:$0xff] }
  0xc4   : > { %v1724_v4 = vand.u32 4294901760, %v1707_v2  ;;  %v1917_v17 = vsub.f32 %v1866_v14, %v1887_v15  ;;  %v1893_v27 = vand.u32 4294901760, %v1863_v23  ;;  %v18280_v37 = vand.u32 4294901760, %v2063_v35  ;;  %v2062_v39 = vld [vmem:[%s20781_s4 + $0x10] sm:$0xff]  ;;  %v2061_v43 = vld [vmem:[%s20781_s4 + $0x8] sm:$0xff]  ;;  %v2060_v47 = vld [vmem:[%s20781_s4] sm:$0xff] }
  0xc5   : > { %s20713_s18 = sshll.u32 %s18266_s11, 2  ;;  %s1682_s15 = scalar_lea.vmem %s20779_s9, %s18266_s11  ;;  %v1923_v21 = vsub.f32 %v1865_v16, %v1889_v18  ;;  %v1929_v26 = vsub.f32 %v1864_v19, %v1891_v22  ;;  %v18287_v41 = vand.u32 4294901760, %v2062_v39  ;;  %v18292_v45 = vand.u32 4294901760, %v2061_v43  ;;  %v17459_v61 = vld [vmem:[%s17893_s21] ss:$0 sm:$0xff]  ;;  %v2255_v14 = vld [vmem:[%s18108_s14 + $0x10] sm:$0xff] }
  0xc6   : > { %s1686_s2 = scalar_lea.vmem %s17883_s13, %s20713_s18  ;;  %v1751_v6 = vsub.f32 %v1707_v2, %v1724_v4  ;;  %1725 = vmatpush.msra.mxu0 %v1724_v4  ;;  %1801 = vmatpush.msra.mxu3 %v1724_v4  ;;  %v1918_v20 = vand.u32 4294901760, %v1917_v17  ;;  %v1935_v31 = vsub.f32 %v1863_v23, %v1893_v27  ;;  %v18285_v40 = vsub.f32 %v2063_v35, %v18280_v37  ;;  %s17319_s23 = sshll.u32 %s18266_s11, 4  ;;  %v17460_v16 = vld [vmem:[%s1682_s15] ss:$0 sm:$0xff] }
  0xc7   : > { %v1694_v1 = vld [vmem:[%s1686_s2] sm:$0xf]  ;;  %v1924_v25 = vand.u32 4294901760, %v1923_v21  ;;  %v1930_v30 = vand.u32 4294901760, %v1929_v26  ;;  %v18295_v46 = vsub.f32 %v2062_v39, %v18287_v41  ;;  %v18303_v50 = vand.u32 4294901760, %v2060_v47  ;;  %s20795_s1 = sld [smem:[#allocation56_spill]] }
  0xc8   : > { %v1703_v3 = vsel %vm1701_vm1, %v1694_v1, 0  ;;  %1778 = vmatpush.msra.mxu2 %v1751_v6  ;;  %v1752_v9 = vand.u32 4294901760, %v1751_v6  ;;  %v1919_v24 = vsub.f32 %v1917_v17, %v1918_v20  ;;  %v1936_v34 = vand.u32 4294901760, %v1935_v31  ;;  %s18326_s28 = scalar_lea.vmem %s20794_s5, %s17319_s23  ;;  %v2253_v23 = vld [vmem:[%s18108_s14] sm:$0xff]  ;;  %s20796_s7 = sld [smem:[#allocation43_spill]] }
  0xc9   : > { %v1726_v5 = vand.u32 4294901760, %v1703_v3  ;;  %v1925_v29 = vsub.f32 %v1923_v21, %v1924_v25  ;;  %v1931_v33 = vsub.f32 %v1929_v26, %v1930_v30  ;;  %v2111_v44 = vand.u32 4294901760, %v18285_v40  ;;  %s20798_s8 = sld [smem:[#allocation41_spill]]  ;;  %s17719_s9 = scalar_lea.hbm %s20778_s12, 8 }
  0xca   : > { %v1753_v11 = vsub.f32 %v1751_v6, %v1752_v9  ;;  %1827 = vmatpush.msrb.mxu0 %v1752_v9  ;;  %1888 = vmatpush.msrb.mxu2 %v1887_v15  ;;  %v1920_v28 = vand.u32 4294901760, %v1919_v24  ;;  %v1937_v38 = vsub.f32 %v1935_v31, %v1936_v34  ;;  %v2117_v49 = vand.u32 4294901760, %v18295_v46  ;;  %v1692_v6 = vld [vmem:[%s18326_s28 + $0x8] sm:$0xff]  ;;  %s20799_s16 = sld [smem:[#allocation50_spill]] }
  0xcb   : > { %v1727_v7 = vsub.f32 %v1703_v3, %v1726_v5  ;;  %v1926_v32 = vand.u32 4294901760, %v1925_v29  ;;  %v1932_v36 = vand.u32 4294901760, %v1931_v33  ;;  %v2112_v48 = vsub.f32 %v18285_v40, %v2111_v44  ;;  %s20800_s22 = sld [smem:[#allocation49_spill]] }
  0xcc   : > { %v1754_v13 = vand.u32 4294901760, %v1753_v11  ;;  %1890 = vmatpush.msrb.mxu2 %v1889_v18  ;;  %1921 = vmatpush.msrb.mxu3 %v1920_v28  ;;  %v1938_v42 = vand.u32 4294901760, %v1937_v38  ;;  %v18306_v51 = vsub.f32 %v2061_v43, %v18292_v45  ;;  %v2118_v53 = vsub.f32 %v18295_v46, %v2117_v49  ;;  %s20801_s2 = sld [smem:[#allocation44_spill]] }
  0xcd   : > { %v1728_v8 = vand.u32 4294901760, %v1727_v7  ;;  %1781 = vmatmul.f32.vlgmr.msra.gmra.mxu2 %v1727_v7  ;;  %v2113_v52 = vand.u32 4294901760, %v2112_v48  ;;  %v18314_v55 = vsub.f32 %v2060_v47, %v18303_v50  ;;  %v18337_v19 = vand.u32 4294901760, %v2255_v14  ;;  %s20802_s15 = sld [smem:[#allocation39_spill]] }
  0xce   : > { %1755 = vmatpush.msra.mxu1 %v1754_v13  ;;  %1892 = vmatpush.msrb.mxu2 %v1891_v22  ;;  %v2123_v54 = vand.u32 4294901760, %v18306_v51  ;;  %v2119_v56 = vand.u32 4294901760, %v2118_v53  ;;  %vm1871_vm2 = vcmask 261120   ;;  %v18355_v28 = vand.u32 4294901760, %v2253_v23  ;;  %s20797_s26 = smov %s20796_s7 }
  0xcf   : > { %v1729_v10 = vsub.f32 %v1727_v7, %v1728_v8  ;;  %1805 = vmatmul.f32.vlgmr.msra.gmra.mxu3 %v1728_v8  ;;  %1757 = vmatmul.f32.vlgmr.msra.gmra.mxu1 %v1726_v5  ;;  %v2129_v58 = vand.u32 4294901760, %v18314_v55  ;;  %v2256_v8 = vld [vmem:[%s18108_s14 + $0x18] sm:$0xff]  ;;  %vm2446_vm3 = vcmask 64512   ;;  %vm2616_vm4 = vcmask 1043456  }
  0xd0   : > { %1849 = vmatpush.msrb.mxu1 %v1724_v4  ;;  %1894 = vmatpush.msrb.mxu2 %v1893_v27  ;;  %v2124_v57 = vsub.f32 %v18306_v51, %v2123_v54  ;;  %v18330_v13 = vand.u32 4294901760, %v2256_v8  ;;  %vm2600_vm5 = vcmask 27648   ;;  %vm2612_vm6 = vcmask 31744  }
  0xd1   : > { %v1730_v12 = vand.u32 4294901760, %v1729_v10  ;;  %1927 = vmatpush.msrb.mxu3 %v1926_v32  ;;  %v2130_v60 = vsub.f32 %v18314_v55, %v2129_v58  ;;  %vm6080_vm7 = vcmask 257024   ;;  %vm6938_vm12 = vcmask 93184  }
  0xd2   : > { %1988 = vmatpush.msra.mxu1 %v1887_v15  ;;  %2017 = vmatpush.msra.mxu2 %v1918_v20  ;;  %v2125_v59 = vand.u32 4294901760, %v2124_v57  ;;  %v18340_v20 = vsub.f32 %v2256_v8, %v18330_v13  ;;  %vm6950_vm13 = vcmask 97280   ;;  %vm10944_vm1 = vcmask 523264  }
  0xd3   : > { %1731 = vmatmul.f32.vlgmr.msra.gmra.mxu0 %v1730_v12  ;;  %1933 = vmatpush.msrb.mxu3 %v1932_v36  ;;  %v2131_v62 = vand.u32 4294901760, %v2130_v60  ;;  %v1856_v12 = vrot.slane %v1692_v6, 4  ;;  %s20803_s23 = smov %s20802_s15 }
  0xd4   : > { %1959 = vmatpush.msra.mxu0 %v1917_v17  ;;  %1990 = vmatpush.msra.mxu1 %v1889_v18  ;;  %v2254_v17 = vld [vmem:[%s18108_s14 + $0x8] sm:$0xff] }
  0xd5   : > { %2021 = vmatpush.msra.mxu2 %v1924_v25  ;;  %1939 = vmatpush.msrb.mxu3 %v1938_v42  ;;  %v18350_v25 = vsub.f32 %v2255_v14, %v18337_v19 }
  0xd6   : > { %1962 = vmatpush.msra.mxu0 %v1923_v21  ;;  %1992 = vmatpush.msra.mxu1 %v1891_v22 }
  0xd7   : > { %1851 = vmatmul.f32.vlgmr.msrb.gmra.mxu1 %v1726_v5  ;;  %2025 = vmatpush.msra.mxu2 %v1930_v30 }
  0xd8   : > { %1965 = vmatpush.msra.mxu0 %v1929_v26  ;;  %1994 = vmatpush.msra.mxu1 %v1893_v27 }
  0xd9   : > { %2029 = vmatpush.msra.mxu2 %v1936_v34  ;;  %2048 = vmatpush.msra.mxu3 %v1887_v15  ;;  %v18374_v34 = vsub.f32 %v2253_v23, %v18355_v28 }
  0xda   : > { %1968 = vmatpush.msra.mxu0 %v1935_v31  ;;  %2114 = vmatpush.msrb.mxu1 %v2113_v52  ;;  %v2310_v31 = vand.u32 4294901760, %v18350_v25 }
  0xdb   : > { %1829 = vmatmul.f32.vlgmr.msrb.gmra.mxu0 %v1726_v5  ;;  %2050 = vmatpush.msra.mxu3 %v1889_v18  ;;  %v2322_v43 = vand.u32 4294901760, %v18374_v34 }
  0xdc   : > { %2081 = vmatpush.msrb.mxu0 %v18280_v37  ;;  %2120 = vmatpush.msrb.mxu1 %v2119_v56  ;;  %v2311_v38 = vsub.f32 %v18350_v25, %v2310_v31 }
  0xdd   : > { %2052 = vmatpush.msra.mxu3 %v1891_v22  ;;  %v18344_v22 = vand.u32 4294901760, %v2254_v17 }
  0xde   : > { %2083 = vmatpush.msrb.mxu0 %v18287_v41  ;;  %2126 = vmatpush.msrb.mxu1 %v2125_v59  ;;  %v2312_v47 = vand.u32 4294901760, %v2311_v38 }
  0xdf   : > { %2054 = vmatpush.msra.mxu3 %v1893_v27  ;;  %v2304_v27 = vand.u32 4294901760, %v18340_v20  ;;  %v18358_v29 = vsub.f32 %v2254_v17, %v18344_v22 }
  0xe0   : > { %2085 = vmatpush.msrb.mxu0 %v18292_v45  ;;  %2132 = vmatpush.msrb.mxu1 %v2131_v62 }
  0xe1   : > { %v2305_v33 = vsub.f32 %v18340_v20, %v2304_v27  ;;  %v2316_v35 = vand.u32 4294901760, %v18358_v29 }
  0xe2   : > { %2087 = vmatpush.msrb.mxu0 %v18303_v50 }
  0xe3   : > { %v2306_v42 = vand.u32 4294901760, %v2305_v33 }
 0x14c   : > { %v1758_v1 = vpop.f32.mrf.mxu1 }
 0x150   : > { %v1732_v63 = vpop.f32.mrf.mxu0  ;;  %v1782_v2 = vpop.f32.mrf.mxu2 }
 0x151   : > { %v1733_v0 = vadd.f32 %v17459_v61, %v1732_v63 }
 0x152   : > { %v1806_v4 = vpop.f32.mrf.mxu3 }
 0x153   : > { %v1759_v3 = vadd.f32 %v1758_v1, %v1733_v0 }
 0x154   : > { %v1852_v11 = vpop.f32.mrf.mxu1 }
 0x155   : > { %v1783_v5 = vadd.f32 %v1782_v2, %v1759_v3 }
 0x157   : > { %v1807_v7 = vadd.f32 %v1806_v4, %v1783_v5 }
 0x158   : > { %v1830_v9 = vpop.f32.mrf.mxu0 }
 0x159   : > { %v1831_v10 = vadd.f32 %v1830_v9, %v1807_v7 }
 0x15b   : > { %v1853_v15 = vadd.f32 %v1852_v11, %v1831_v10  ;;  %v17463_v10 = vld [vmem:[%s18088_s24] ss:$0 sm:$0xff] }
 0x15d   : > { %v1858_v18 = vadd.f32 %v1856_v12, %v1853_v15 }
 0x15f   : > { %v18342_v21 = vadd.f32 %v17460_v16, %v1858_v18 }
 0x161   : > { %v1873_v24 = vsel %vm1871_vm2, %v18342_v21, 0 }
 0x162   : > { %v18352_v26 = vand.u32 4294901760, %v1873_v24 }
 0x164   : > { %v18361_v30 = vsub.f32 %v1873_v24, %v18352_v26  ;;  %1941 = vmatmul.f32.vlgmr.msrb.gmra.mxu3 %v18352_v26 }
 0x165   : > { %2181 = vmatpush.msrb.mxu3 %v18280_v37 }
 0x166   : > { %1971 = vmatmul.f32.vlgmr.msra.gmra.mxu0 %v18361_v30  ;;  %v18368_v32 = vand.u32 4294901760, %v18361_v30 }
 0x167   : > { %2183 = vmatpush.msrb.mxu3 %v18287_v41  ;;  %2210 = vmatpush.msra.mxu0 %v2111_v44  ;;  %v2317_v44 = vsub.f32 %v18358_v29, %v2316_v35 }
 0x168   : > { %1998 = vmatmul.f32.vlgmr.msra.gmra.mxu1 %v18368_v32  ;;  %v1898_v36 = vsub.f32 %v18361_v30, %v18368_v32 }
 0x169   : > { %2185 = vmatpush.msrb.mxu3 %v18292_v45  ;;  %2214 = vmatpush.msra.mxu0 %v2117_v49  ;;  %v2318_v48 = vand.u32 4294901760, %v2317_v44 }
 0x16a   : > { %v18389_v39 = vand.u32 4294901760, %v1898_v36  ;;  %2241 = vmatpush.msra.mxu1 %v18280_v37  ;;  %v2323_v37 = vsub.f32 %v18374_v34, %v2322_v43 }
 0x16b   : > { %2187 = vmatpush.msrb.mxu3 %v18303_v50  ;;  %2218 = vmatpush.msra.mxu0 %v2123_v54 }
 0x16c   : > { %1900 = vmatmul.f32.vlgmr.msrb.gmra.mxu2 %v18389_v39  ;;  %2056 = vmatmul.f32.vlgmr.msra.gmra.mxu3 %v18352_v26 }
 0x16d   : > { %2243 = vmatpush.msra.mxu1 %v18287_v41  ;;  %2152 = vmatpush.msrb.mxu2 %v18285_v40  ;;  %v2324_v40 = vand.u32 4294901760, %v2323_v37 }
 0x16e   : > { %2093 = vmatmul.f32.vlgmr.msrb.gmra.mxu0 %v18389_v39  ;;  %2307 = vmatpush.msra.mxu3 %v2306_v42 }
 0x16f   : > { %2222 = vmatpush.msra.mxu0 %v2129_v58  ;;  %2245 = vmatpush.msra.mxu1 %v18292_v45  ;;  %v17462_v45 = vld [vmem:[%s20780_s6] ss:$0 sm:$0xff] }
 0x170   : > { %2134 = vmatmul.f32.vlgmr.msrb.gmra.mxu1 %v18352_v26  ;;  %2155 = vmatpush.msrb.mxu2 %v18295_v46 }
 0x171   : > { %2247 = vmatpush.msra.mxu1 %v18303_v50  ;;  %2313 = vmatpush.msra.mxu3 %v2312_v47 }
 0x172   : > { %2345 = vmatpush.msrb.mxu0 %v18340_v20  ;;  %2158 = vmatpush.msrb.mxu2 %v18306_v51 }
 0x173   : > { %2319 = vmatpush.msra.mxu3 %v2318_v48  ;;  %2374 = vmatpush.msrb.mxu1 %v18330_v13 }
 0x174   : > { %2031 = vmatmul.f32.vlgmr.msra.gmra.mxu2 %v18352_v26  ;;  %2191 = vmatmul.f32.vlgmr.msrb.gmra.mxu3 %v18368_v32 }
 0x175   : > { %2348 = vmatpush.msrb.mxu0 %v18350_v25  ;;  %2161 = vmatpush.msrb.mxu2 %v18314_v55  ;;  %v17461_v55 = vld [vmem:[%s18073_s29] ss:$0 sm:$0xff] }
 0x176   : > { %2224 = vmatmul.f32.vlgmr.msra.gmra.mxu0 %v18352_v26  ;;  %2325 = vmatpush.msra.mxu3 %v2324_v40 }
 0x177   : > { %2351 = vmatpush.msrb.mxu0 %v18358_v29  ;;  %2376 = vmatpush.msrb.mxu1 %v18337_v19 }
 0x178   : > { %2249 = vmatmul.f32.vlgmr.msra.gmra.mxu1 %v18352_v26  ;;  %2274 = vmatpush.msra.mxu2 %v18330_v13 }
 0x179   : > { %2354 = vmatpush.msrb.mxu0 %v18374_v34  ;;  %2378 = vmatpush.msrb.mxu1 %v18344_v22 }
 0x17a   : > { %2434 = vmatpush.msrb.mxu3 %v18330_v13  ;;  %2276 = vmatpush.msra.mxu2 %v18337_v19 }
 0x17b   : > { %2380 = vmatpush.msrb.mxu1 %v18355_v28 }
 0x17c   : > { %2164 = vmatmul.f32.vlgmr.msrb.gmra.mxu2 %v18361_v30  ;;  %2327 = vmatmul.f32.vlgmr.msra.gmra.mxu3 %v18352_v26 }
 0x17d   : > { %2436 = vmatpush.msrb.mxu3 %v18337_v19  ;;  %2278 = vmatpush.msra.mxu2 %v18344_v22 }
 0x17e   : > { %2357 = vmatmul.f32.vlgmr.msrb.gmra.mxu0 %v18361_v30 }
 0x17f   : > { %2438 = vmatpush.msrb.mxu3 %v18344_v22  ;;  %2280 = vmatpush.msra.mxu2 %v18355_v28 }
 0x180   : > { %2384 = vmatmul.f32.vlgmr.msrb.gmra.mxu1 %v18368_v32 }
 0x181   : > { %2403 = vmatpush.msrb.mxu2 %v2304_v27  ;;  %2440 = vmatpush.msrb.mxu3 %v18355_v28 }
 0x183   : > { %2407 = vmatpush.msrb.mxu2 %v2310_v31 }
 0x184   : > { %2286 = vmatmul.f32.vlgmr.msra.gmra.mxu2 %v18389_v39  ;;  %2442 = vmatmul.f32.vlgmr.msrb.gmra.mxu3 %v18352_v26 }
 0x185   : > { %2411 = vmatpush.msrb.mxu2 %v2316_v35 }
 0x187   : > { %2415 = vmatpush.msrb.mxu2 %v2322_v43 }
 0x18c   : > { %2417 = vmatmul.f32.vlgmr.msrb.gmra.mxu2 %v18352_v26 }
 0x1e3   : > { %v1972_v46 = vpop.f32.mrf.mxu0 }
 0x1e5   : > { %v1999_v49 = vpop.f32.mrf.mxu1 }
 0x1e7   : > { %v1942_v41 = vpop.f32.mrf.mxu3 }
 0x1eb   : > { %v2094_v57 = vpop.f32.mrf.mxu0 }
 0x1ec   : > { %v2095_v61 = vadd.f32 %v17461_v55, %v2094_v57 }
 0x1ed   : > { %v2135_v60 = vpop.f32.mrf.mxu1 }
 0x1ee   : > { %v2136_v2 = vadd.f32 %v2135_v60, %v2095_v61 }
 0x1ef   : > { %v1901_v50 = vpop.f32.mrf.mxu2  ;;  %v2057_v53 = vpop.f32.mrf.mxu3 }
 0x1f0   : > { %v1902_v51 = vadd.f32 %v17462_v45, %v1901_v50 }
 0x1f2   : > { %v1943_v52 = vadd.f32 %v1942_v41, %v1902_v51 }
 0x1f3   : > { %v2225_v6 = vpop.f32.mrf.mxu0 }
 0x1f4   : > { %v1973_v54 = vadd.f32 %v1972_v46, %v1943_v52 }
 0x1f5   : > { %v2250_v8 = vpop.f32.mrf.mxu1 }
 0x1f6   : > { %v2000_v56 = vadd.f32 %v1999_v49, %v1973_v54 }
 0x1f7   : > { %v2032_v58 = vpop.f32.mrf.mxu2  ;;  %v2192_v1 = vpop.f32.mrf.mxu3 }
 0x1f8   : > { %v2033_v59 = vadd.f32 %v2032_v58, %v2000_v56 }
 0x1fa   : > { %v2058_v62 = vadd.f32 %v2057_v53, %v2033_v59 }
 0x1fb   : > { %v2358_v20 = vpop.f32.mrf.mxu0 }
 0x1fc   : > { %v2448_v63 = vsel %vm2446_vm3, %v2058_v62, 0  ;;  %v17172_v62 = vld [vmem:[%s18103_s27 + $0x38] sm:$0xff] }
 0x1fd   : > { %v2470_v0 = vand.u32 4294901760, %v2448_v63  ;;  %v2385_v25 = vpop.f32.mrf.mxu1 }
 0x1ff   : > { %v2165_v3 = vpop.f32.mrf.mxu2  ;;  %v2471_v4 = vsub.f32 %v2448_v63, %v2470_v0  ;;  %v2328_v13 = vpop.f32.mrf.mxu3  ;;  %v18451_v63 = vand.u32 4294901760, %v17172_v62 }
 0x200   : > { %v2166_v5 = vadd.f32 %v2165_v3, %v2136_v2  ;;  %v17170_v3 = vld [vmem:[%s18103_s27 + $0x28] sm:$0xff] }
 0x201   : > { %v2472_v11 = vand.u32 4294901760, %v2471_v4 }
 0x202   : > { %v2193_v7 = vadd.f32 %v2192_v1, %v2166_v5  ;;  %v18456_v1 = vsub.f32 %v17172_v62, %v18451_v63  ;;  %v18463_v5 = vand.u32 4294901760, %v17170_v3 }
 0x203   : > { %v2473_v17 = vsub.f32 %v2471_v4, %v2472_v11 }
 0x204   : > { %v2226_v9 = vadd.f32 %v2225_v6, %v2193_v7  ;;  %v17169_v7 = vld [vmem:[%s18103_s27 + $0x20] sm:$0xff] }
 0x205   : > { %v2474_v23 = vand.u32 4294901760, %v2473_v17 }
 0x206   : > { %v2251_v12 = vadd.f32 %v2250_v8, %v2226_v9 }
 0x207   : > { %v2287_v14 = vpop.f32.mrf.mxu2  ;;  %v2443_v34 = vpop.f32.mrf.mxu3 }
 0x208   : > { %v2288_v15 = vadd.f32 %v17463_v10, %v2287_v14  ;;  %v2451_v16 = vsel %vm2446_vm3, %v2251_v12, 0  ;;  %v18472_v10 = vand.u32 4294901760, %v17169_v7 }
 0x209   : > { %v2468_v18 = vand.u32 4294901760, %v2451_v16 }
 0x20a   : > { %v2329_v19 = vadd.f32 %v2328_v13, %v2288_v15  ;;  %v18481_v15 = vsub.f32 %v17169_v7, %v18472_v10 }
 0x20b   : > { %2469 = vmatpush.xpose.msra.mxu0 %v2468_v18  ;;  %2545 = vmatpush.xpose.msra.mxu3 %v2468_v18  ;;  %v2495_v22 = vsub.f32 %v2451_v16, %v2468_v18 }
 0x20c   : > { %v2359_v24 = vadd.f32 %v2358_v20, %v2329_v19 }
 0x20d   : > { %2522 = vmatpush.xpose.msra.mxu2 %v2495_v22  ;;  %v2496_v27 = vand.u32 4294901760, %v2495_v22 }
 0x20e   : > { %2475 = vmatmul.f32.vlgmr.msra.gmra.mxu0 %v2474_v23  ;;  %2549 = vmatmul.f32.vlgmr.msra.gmra.mxu3 %v2472_v11  ;;  %v2386_v28 = vadd.f32 %v2385_v25, %v2359_v24  ;;  %v18475_v11 = vsub.f32 %v17170_v3, %v18463_v5  ;;  %v17177_v24 = vld [vmem:[%s20781_s4 + $0x38] sm:$0xff] }
 0x20f   : > { %v2418_v29 = vpop.f32.mrf.mxu2  ;;  %2571 = vmatpush.xpose.msrb.mxu0 %v2496_v27  ;;  %v2497_v31 = vsub.f32 %v2495_v22, %v2496_v27  ;;  %v18487_v25 = vand.u32 4294901760, %v17177_v24  ;;  %v17176_v27 = vld [vmem:[%s20781_s4 + $0x30] sm:$0xff] }
 0x210   : > { %v2419_v33 = vadd.f32 %v2418_v29, %v2386_v28  ;;  %2525 = vmatmul.f32.vlgmr.msra.gmra.mxu2 %v2471_v4  ;;  %v2820_v4 = vand.u32 4294901760, %v18456_v1  ;;  %v2832_v14 = vand.u32 4294901760, %v18475_v11  ;;  %v17175_v28 = vld [vmem:[%s20781_s4 + $0x28] sm:$0xff]  ;;  %v18491_v29 = vand.u32 4294901760, %v17176_v27 }
 0x211   : > { %v2498_v35 = vand.u32 4294901760, %v2497_v31 }
 0x212   : > { %v2444_v36 = vadd.f32 %v2443_v34, %v2419_v33  ;;  %v2821_v8 = vsub.f32 %v18456_v1, %v2820_v4  ;;  %v2833_v17 = vsub.f32 %v18475_v11, %v2832_v14  ;;  %v18494_v33 = vsub.f32 %v17177_v24, %v18487_v25 }
 0x213   : > { %2499 = vmatpush.xpose.msra.mxu1 %v2498_v35  ;;  %v18496_v35 = vand.u32 4294901760, %v17175_v28 }
 0x214   : > { %v2618_v38 = vsel %vm2616_vm4, %v2444_v36, 0  ;;  %v2822_v12 = vand.u32 4294901760, %v2821_v8  ;;  %v2834_v19 = vand.u32 4294901760, %v2833_v17  ;;  %v17174_v36 = vld [vmem:[%s20781_s4 + $0x20] sm:$0xff] }
 0x215   : > { %v2635_v42 = vand.u32 4294901760, %v2618_v38 }
 0x216   : > { %2501 = vmatmul.f32.vlgmr.msra.gmra.mxu1 %v2470_v0  ;;  %2573 = vmatmul.f32.vlgmr.msrb.gmra.mxu0 %v2470_v0 }
 0x217   : > { %2593 = vmatpush.xpose.msrb.mxu1 %v2468_v18  ;;  %v2662_v43 = vsub.f32 %v2618_v38, %v2635_v42  ;;  %2636 = vmatpush.msrb.mxu2 %v2635_v42  ;;  %v2838_v18 = vand.u32 4294901760, %v18481_v15 }
 0x219   : > { %2689 = vmatpush.msra.mxu0 %v2662_v43  ;;  %v2663_v44 = vand.u32 4294901760, %v2662_v43  ;;  %v2839_v20 = vsub.f32 %v18481_v15, %v2838_v18 }
 0x21b   : > { %2712 = vmatpush.msra.mxu1 %v2635_v42  ;;  %2738 = vmatpush.msra.mxu2 %v2663_v44  ;;  %v2664_v47 = vsub.f32 %v2662_v43, %v2663_v44  ;;  %v2840_v22 = vand.u32 4294901760, %v2839_v20  ;;  %v3015_v44 = vand.u32 4294901760, %v18494_v33 }
 0x21c   : > { %2790 = vmatpush.msrb.mxu0 %v18451_v63 }
 0x21d   : > { %v2665_v37 = vand.u32 4294901760, %v2664_v47  ;;  %v18504_v47 = vand.u32 4294901760, %v17174_v36 }
 0x21e   : > { %2595 = vmatmul.f32.vlgmr.msrb.gmra.mxu1 %v2470_v0  ;;  %v17171_v0 = vld [vmem:[%s18103_s27 + $0x30] sm:$0xff] }
 0x21f   : > { %2666 = vmatpush.msrb.mxu3 %v2665_v37  ;;  %v18458_v2 = vand.u32 4294901760, %v17171_v0  ;;  %2823 = vmatpush.msrb.mxu1 %v2822_v12  ;;  %v18507_v37 = vsub.f32 %v17175_v28, %v18496_v35 }
 0x221   : > { %2760 = vmatpush.msra.mxu3 %v2635_v42  ;;  %2792 = vmatpush.msrb.mxu0 %v18458_v2  ;;  %v18466_v6 = vsub.f32 %v17171_v0, %v18458_v2  ;;  %v18501_v42 = vsub.f32 %v17176_v27, %v18491_v29 }
 0x223   : > { %2794 = vmatpush.msrb.mxu0 %v18463_v5  ;;  %v2826_v9 = vand.u32 4294901760, %v18466_v6 }
 0x225   : > { %v2827_v13 = vsub.f32 %v18466_v6, %v2826_v9  ;;  %2796 = vmatpush.msrb.mxu0 %v18472_v10 }
 0x227   : > { %v2828_v16 = vand.u32 4294901760, %v2827_v13 }
 0x229   : > { %2829 = vmatpush.msrb.mxu1 %v2828_v16 }
 0x22b   : > { %2835 = vmatpush.msrb.mxu1 %v2834_v19 }
 0x22d   : > { %2841 = vmatpush.msrb.mxu1 %v2840_v22 }
 0x28b   : > { %v2476_v48 = vpop.f32.mrf.mxu0 }
 0x291   : > { %v2550_v49 = vpop.f32.mrf.mxu3 }
 0x293   : > { %v2502_v40 = vpop.f32.mrf.mxu1  ;;  %v2526_v45 = vpop.f32.mrf.mxu2 }
 0x294   : > { %v2503_v41 = vadd.f32 %v2502_v40, %v2476_v48  ;;  %v2574_v51 = vpop.f32.mrf.mxu0  ;;  %v3021_v40 = vand.u32 4294901760, %v18501_v42 }
 0x296   : > { %v2527_v46 = vadd.f32 %v2526_v45, %v2503_v41  ;;  %v3016_v45 = vsub.f32 %v18494_v33, %v3015_v44 }
 0x298   : > { %v2551_v50 = vadd.f32 %v2550_v49, %v2527_v46  ;;  %v18515_v46 = vsub.f32 %v17174_v36, %v18504_v47  ;;  %v3027_v49 = vand.u32 4294901760, %v18507_v37 }
 0x29a   : > { %v2575_v52 = vadd.f32 %v2574_v51, %v2551_v50  ;;  %v17182_v50 = vld [vmem:[%s18108_s14 + $0x38] sm:$0xff] }
 0x29b   : > { %v2596_v53 = vpop.f32.mrf.mxu1 }
 0x29c   : > { %v2597_v54 = vadd.f32 %v2596_v53, %v2575_v52  ;;  %v3022_v52 = vsub.f32 %v18501_v42, %v3021_v40 }
 0x29e   : > { %v2599_v55 = vmul.f32 0.35355338, %v2597_v54  ;;  %v3017_v54 = vand.u32 4294901760, %v3016_v45 }
 0x2a0   : > { %v2601_v56 = vsel %vm2600_vm5, %v2599_v55, -inf }
 0x2a1   : > { %2602 = vmax.xlane.f32.xlu0 %v2601_v56  ;;  %v18526_v56 = vand.u32 4294901760, %v17182_v50 }
 0x314   : > { %v2603_v57 = vpop.xlane.xlu0 %2602 }
 0x315   : > { %v2604_v58 = vsub.f32 %v2599_v55, %v2603_v57  ;;  %v3033_v55 = vand.u32 4294901760, %v18515_v46  ;;  %v3028_v57 = vsub.f32 %v18507_v37, %v3027_v49 }
 0x317   : > { %v2605_v59 = vmul.f32 1.442695, %v2604_v58  ;;  %v17181_v58 = vld [vmem:[%s18108_s14 + $0x30] sm:$0xff]  ;;  %v3029_v0 = vand.u32 4294901760, %v3028_v57 }
 0x318   : > { %v18542_v62 = vand.u32 4294901760, %v17181_v58 }
 0x319   : > { %17516 = vpow2.f32 %v2605_v59  ;;  %v3023_v59 = vand.u32 4294901760, %v3022_v52 }
 0x31f   : > { %v17517_v60 = vpop.eup %17516 }
 0x320   : > { %v2607_v61 = vsel %vm2600_vm5, %v17517_v60, 0.0 }
 0x321   : > { %2608 = vadd.xlane.f32.xlu0 %v2607_v61  ;;  %v18540_v61 = vsub.f32 %v17182_v50, %v18526_v56 }
 0x394   : > { %v2609_v23 = vpop.xlane.xlu0 %2608 }
 0x395   : > { %17518 = vrcp.f32 %v2609_v23 }
 0x39b   : > { %v17519_v31 = vpop.eup %17518 }
 0x39c   : > { %v2611_v34 = vmul.f32 %v17519_v31, %v17517_v60  ;;  %v3034_v60 = vsub.f32 %v18515_v46, %v3033_v55 }
 0x39e   : > { %v2614_v38 = vsel %vm2612_vm6, %v2611_v34, 0  ;;  %v3035_v3 = vand.u32 4294901760, %v3034_v60 }
 0x39f   : > { %v2637_v43 = vand.u32 4294901760, %v2614_v38 }
 0x3a1   : > { %2668 = vmatmul.f32.vlgmr.msrb.gmra.mxu3 %v2637_v43  ;;  %v2638_v48 = vsub.f32 %v2614_v38, %v2637_v43 }
 0x3a2   : > { %2890 = vmatpush.msrb.mxu3 %v18451_v63 }
 0x3a3   : > { %2692 = vmatmul.f32.vlgmr.msra.gmra.mxu0 %v2638_v48  ;;  %v2639_v41 = vand.u32 4294901760, %v2638_v48 }
 0x3a4   : > { %2892 = vmatpush.msrb.mxu3 %v18458_v2  ;;  %2919 = vmatpush.msra.mxu0 %v2820_v4  ;;  %v3210_v4 = vand.u32 4294901760, %v18540_v61 }
 0x3a5   : > { %2716 = vmatmul.f32.vlgmr.msra.gmra.mxu1 %v2639_v41  ;;  %v2640_v51 = vsub.f32 %v2638_v48, %v2639_v41  ;;  %v17466_v48 = vld [vmem:[%s18073_s29 + $0x1] ss:$0 sm:$0xff] }
 0x3a6   : > { %2894 = vmatpush.msrb.mxu3 %v18463_v5  ;;  %2923 = vmatpush.msra.mxu0 %v2826_v9  ;;  %v3211_v8 = vsub.f32 %v18540_v61, %v3210_v4 }
 0x3a7   : > { %v2641_v53 = vand.u32 4294901760, %v2640_v51  ;;  %2950 = vmatpush.msra.mxu1 %v18451_v63  ;;  %v17180_v63 = vld [vmem:[%s18108_s14 + $0x28] sm:$0xff] }
 0x3a8   : > { %2896 = vmatpush.msrb.mxu3 %v18472_v10  ;;  %2927 = vmatpush.msra.mxu0 %v2832_v14  ;;  %v3212_v12 = vand.u32 4294901760, %v3211_v8 }
 0x3a9   : > { %2642 = vmatmul.f32.vlgmr.msrb.gmra.mxu2 %v2641_v53  ;;  %2762 = vmatmul.f32.vlgmr.msra.gmra.mxu3 %v2637_v43 }
 0x3aa   : > { %2952 = vmatpush.msra.mxu1 %v18458_v2  ;;  %2861 = vmatpush.msrb.mxu2 %v18456_v1  ;;  %v17179_v1 = vld [vmem:[%s18108_s14 + $0x20] sm:$0xff]  ;;  %v18550_v2 = vand.u32 4294901760, %v17180_v63 }
 0x3ab   : > { %2802 = vmatmul.f32.vlgmr.msrb.gmra.mxu0 %v18389_v39  ;;  %3018 = vmatpush.msra.mxu3 %v3017_v54 }
 0x3ac   : > { %2931 = vmatpush.msra.mxu0 %v2838_v18  ;;  %2954 = vmatpush.msra.mxu1 %v18463_v5  ;;  %v18556_v5 = vsub.f32 %v17181_v58, %v18542_v62  ;;  %v18565_v7 = vsub.f32 %v17180_v63, %v18550_v2 }
 0x3ad   : > { %2843 = vmatmul.f32.vlgmr.msrb.gmra.mxu1 %v18352_v26  ;;  %2864 = vmatpush.msrb.mxu2 %v18466_v6  ;;  %v18559_v6 = vand.u32 4294901760, %v17179_v1 }
 0x3ae   : > { %2956 = vmatpush.msra.mxu1 %v18472_v10  ;;  %3024 = vmatpush.msra.mxu3 %v3023_v59  ;;  %v3216_v9 = vand.u32 4294901760, %v18556_v5 }
 0x3af   : > { %3056 = vmatpush.msrb.mxu0 %v18494_v33  ;;  %2867 = vmatpush.msrb.mxu2 %v18475_v11  ;;  %v3227_v10 = vsub.f32 %v17179_v1, %v18559_v6  ;;  %v3222_v11 = vand.u32 4294901760, %v18565_v7 }
 0x3b0   : > { %3030 = vmatpush.msra.mxu3 %v3029_v0  ;;  %3085 = vmatpush.msrb.mxu1 %v18487_v25  ;;  %v3217_v13 = vsub.f32 %v18556_v5, %v3216_v9 }
 0x3b1   : > { %2740 = vmatmul.f32.vlgmr.msra.gmra.mxu2 %v2637_v43  ;;  %2900 = vmatmul.f32.vlgmr.msrb.gmra.mxu3 %v18368_v32  ;;  %v3228_v14 = vand.u32 4294901760, %v3227_v10 }
 0x3b2   : > { %3059 = vmatpush.msrb.mxu0 %v18501_v42  ;;  %2870 = vmatpush.msrb.mxu2 %v18481_v15  ;;  %v3223_v15 = vsub.f32 %v18565_v7, %v3222_v11  ;;  %v3218_v16 = vand.u32 4294901760, %v3217_v13 }
 0x3b3   : > { %2933 = vmatmul.f32.vlgmr.msra.gmra.mxu0 %v18352_v26  ;;  %3036 = vmatpush.msra.mxu3 %v3035_v3  ;;  %v3229_v17 = vsub.f32 %v3227_v10, %v3228_v14 }
 0x3b4   : > { %3062 = vmatpush.msrb.mxu0 %v18507_v37  ;;  %3087 = vmatpush.msrb.mxu1 %v18491_v29  ;;  %v3224_v18 = vand.u32 4294901760, %v3223_v15 }
 0x3b5   : > { %2958 = vmatmul.f32.vlgmr.msra.gmra.mxu1 %v18352_v26  ;;  %2985 = vmatpush.msra.mxu2 %v18487_v25  ;;  %v3230_v19 = vand.u32 4294901760, %v3229_v17 }
 0x3b6   : > { %3065 = vmatpush.msrb.mxu0 %v18515_v46  ;;  %3089 = vmatpush.msrb.mxu1 %v18496_v35 }
 0x3b7   : > { %3145 = vmatpush.msrb.mxu3 %v18487_v25  ;;  %2987 = vmatpush.msra.mxu2 %v18491_v29 }
 0x3b8   : > { %3091 = vmatpush.msrb.mxu1 %v18504_v47  ;;  %3180 = vmatpush.msra.mxu0 %v18526_v56 }
 0x3b9   : > { %2873 = vmatmul.f32.vlgmr.msrb.gmra.mxu2 %v18361_v30  ;;  %3038 = vmatmul.f32.vlgmr.msra.gmra.mxu3 %v18352_v26 }
 0x3ba   : > { %3147 = vmatpush.msrb.mxu3 %v18491_v29  ;;  %2989 = vmatpush.msra.mxu2 %v18496_v35  ;;  %v17464_v29 = vld [vmem:[%s20780_s6 + $0x1] ss:$0 sm:$0xff] }
 0x3bb   : > { %3068 = vmatmul.f32.vlgmr.msrb.gmra.mxu0 %v18361_v30  ;;  %3213 = vmatpush.msra.mxu1 %v3212_v12 }
 0x3bc   : > { %3149 = vmatpush.msrb.mxu3 %v18496_v35  ;;  %3182 = vmatpush.msra.mxu0 %v18542_v62 }
 0x3bd   : > { %3095 = vmatmul.f32.vlgmr.msrb.gmra.mxu1 %v18368_v32  ;;  %2991 = vmatpush.msra.mxu2 %v18504_v47 }
 0x3be   : > { %3151 = vmatpush.msrb.mxu3 %v18504_v47  ;;  %3184 = vmatpush.msra.mxu0 %v18550_v2 }
 0x3bf   : > { %3219 = vmatpush.msra.mxu1 %v3218_v16  ;;  %3114 = vmatpush.msrb.mxu2 %v3015_v44 }
 0x3c0   : > { %3186 = vmatpush.msra.mxu0 %v18559_v6  ;;  %3280 = vmatpush.msra.mxu3 %v18526_v56 }
 0x3c1   : > { %2997 = vmatmul.f32.vlgmr.msra.gmra.mxu2 %v18389_v39  ;;  %3153 = vmatmul.f32.vlgmr.msrb.gmra.mxu3 %v18352_v26 }
 0x3c2   : > { %3225 = vmatpush.msra.mxu1 %v3224_v18  ;;  %3118 = vmatpush.msrb.mxu2 %v3021_v40 }
 0x3c3   : > { %3192 = vmatmul.f32.vlgmr.msra.gmra.mxu0 %v18389_v39  ;;  %3282 = vmatpush.msra.mxu3 %v18542_v62 }
 0x3c4   : > { %3231 = vmatpush.msra.mxu1 %v3230_v19  ;;  %3309 = vmatpush.msrb.mxu0 %v3210_v4 }
 0x3c5   : > { %3233 = vmatmul.f32.vlgmr.msra.gmra.mxu1 %v18352_v26  ;;  %3122 = vmatpush.msrb.mxu2 %v3027_v49 }
 0x3c6   : > { %3284 = vmatpush.msra.mxu3 %v18550_v2  ;;  %3313 = vmatpush.msrb.mxu0 %v3216_v9 }
 0x3c7   : > { %3340 = vmatpush.msrb.mxu1 %v18526_v56  ;;  %3126 = vmatpush.msrb.mxu2 %v3033_v55  ;;  %v17465_v55 = vld [vmem:[%s18088_s24 + $0x1] ss:$0 sm:$0xff] }
 0x3c8   : > { %3286 = vmatpush.msra.mxu3 %v18559_v6  ;;  %3317 = vmatpush.msrb.mxu0 %v3222_v11 }
 0x3c9   : > { %3342 = vmatpush.msrb.mxu1 %v18542_v62  ;;  %3128 = vmatmul.f32.vlgmr.msrb.gmra.mxu2 %v18352_v26 }
 0x3ca   : > { %3290 = vmatmul.f32.vlgmr.msra.gmra.mxu3 %v18368_v32  ;;  %3251 = vmatpush.msra.mxu2 %v18540_v61 }
 0x3cb   : > { %3321 = vmatpush.msrb.mxu0 %v3228_v14  ;;  %3344 = vmatpush.msrb.mxu1 %v18550_v2 }
 0x3cc   : > { %3323 = vmatmul.f32.vlgmr.msrb.gmra.mxu0 %v18352_v26  ;;  %3254 = vmatpush.msra.mxu2 %v18556_v5 }
 0x3cd   : > { %3346 = vmatpush.msrb.mxu1 %v18559_v6 }
 0x3ce   : > { %3348 = vmatmul.f32.vlgmr.msrb.gmra.mxu1 %v18352_v26  ;;  %3257 = vmatpush.msra.mxu2 %v18565_v7 }
 0x3d0   : > { %3260 = vmatpush.msra.mxu2 %v3227_v10 }
 0x3d1   : > { %3263 = vmatmul.f32.vlgmr.msra.gmra.mxu2 %v18361_v30 }
 0x420   : > { %v18624_v20 = vpop.f32.mrf.mxu0 }
 0x422   : > { %v18628_v23 = vpop.f32.mrf.mxu1 }
 0x424   : > { %v18626_v22 = vpop.f32.mrf.mxu3 }
 0x428   : > { %v2803_v25 = vpop.f32.mrf.mxu0 }
 0x429   : > { %v2804_v33 = vadd.f32 %v17464_v29, %v2803_v25 }
 0x42a   : > { %v2844_v28 = vpop.f32.mrf.mxu1 }
 0x42b   : > { %v2845_v36 = vadd.f32 %v2844_v28, %v2804_v33 }
 0x42c   : > { %v18630_v24 = vpop.f32.mrf.mxu2  ;;  %v18632_v27 = vpop.f32.mrf.mxu3 }
 0x430   : > { %v2934_v34 = vpop.f32.mrf.mxu0 }
 0x432   : > { %v2959_v38 = vpop.f32.mrf.mxu1 }
 0x434   : > { %v18635_v31 = vpop.f32.mrf.mxu2  ;;  %v2901_v35 = vpop.f32.mrf.mxu3 }
 0x438   : > { %v3069_v47 = vpop.f32.mrf.mxu0 }
 0x43a   : > { %v3096_v50 = vpop.f32.mrf.mxu1 }
 0x43c   : > { %v2874_v42 = vpop.f32.mrf.mxu2  ;;  %v3039_v40 = vpop.f32.mrf.mxu3 }
 0x43d   : > { %v2875_v43 = vadd.f32 %v2874_v42, %v2845_v36 }
 0x43f   : > { %v2902_v44 = vadd.f32 %v2901_v35, %v2875_v43 }
 0x440   : > { %v3193_v56 = vpop.f32.mrf.mxu0 }
 0x441   : > { %v2935_v37 = vadd.f32 %v2934_v34, %v2902_v44  ;;  %v3194_v62 = vadd.f32 %v17465_v55, %v3193_v56 }
 0x442   : > { %v3234_v0 = vpop.f32.mrf.mxu1 }
 0x443   : > { %v2960_v41 = vadd.f32 %v2959_v38, %v2935_v37  ;;  %v3235_v4 = vadd.f32 %v3234_v0, %v3194_v62  ;;  %v17184_v62 = vld [vmem:[%s20795_s1 + $0x8] sm:$0xff] }
 0x444   : > { %v2998_v45 = vpop.f32.mrf.mxu2  ;;  %v3154_v58 = vpop.f32.mrf.mxu3 }
 0x445   : > { %v3353_v46 = vsel %vm2446_vm3, %v2960_v41, 0  ;;  %v2999_v49 = vadd.f32 %v17466_v48, %v2998_v45 }
 0x446   : > { %v3375_v51 = vand.u32 4294901760, %v3353_v46 }
 0x447   : > { %v3040_v52 = vadd.f32 %v3039_v40, %v2999_v49 }
 0x448   : > { %v3376_v53 = vsub.f32 %v3353_v46, %v3375_v51 }
 0x449   : > { %v3070_v54 = vadd.f32 %v3069_v47, %v3040_v52  ;;  %v3324_v12 = vpop.f32.mrf.mxu0 }
 0x44a   : > { %v3377_v61 = vand.u32 4294901760, %v3376_v53 }
 0x44b   : > { %v3097_v57 = vadd.f32 %v3096_v50, %v3070_v54  ;;  %v3349_v15 = vpop.f32.mrf.mxu1 }
 0x44c   : > { %v3129_v59 = vpop.f32.mrf.mxu2  ;;  %v3378_v2 = vsub.f32 %v3376_v53, %v3377_v61 }
 0x44d   : > { %v3130_v60 = vadd.f32 %v3129_v59, %v3097_v57  ;;  %v3291_v9 = vpop.f32.mrf.mxu3 }
 0x44e   : > { %v3379_v8 = vand.u32 4294901760, %v3378_v2 }
 0x44f   : > { %v3155_v63 = vadd.f32 %v3154_v58, %v3130_v60 }
 0x451   : > { %v3356_v1 = vsel %vm2446_vm3, %v3155_v63, 0  ;;  %v3688_v63 = vand.u32 4294901760, %v17184_v62 }
 0x452   : > { %v3373_v3 = vand.u32 4294901760, %v3356_v1 }
 0x453   : > { %v3715_v0 = vsub.f32 %v17184_v62, %v3688_v63 }
 0x454   : > { %v3400_v5 = vsub.f32 %v3356_v1, %v3373_v3  ;;  %v3264_v6 = vpop.f32.mrf.mxu2  ;;  %3374 = vmatpush.xpose.msrb.mxu2 %v3373_v3  ;;  %3450 = vmatpush.xpose.msra.mxu1 %v3373_v3 }
 0x455   : > { %v3265_v7 = vadd.f32 %v3264_v6, %v3235_v4  ;;  %v3716_v1 = vand.u32 4294901760, %v3715_v0  ;;  %v2766_v4 = vld [vmem:[%s20795_s1] sm:$0xff]  ;;  %v2670_v6 = vadd.f32 %v18626_v22, %v18630_v24 }
 0x456   : > { %3427 = vmatpush.xpose.msra.mxu0 %v3400_v5  ;;  %v3401_v10 = vand.u32 4294901760, %v3400_v5 }
 0x457   : > { %v3292_v11 = vadd.f32 %v3291_v9, %v3265_v7  ;;  %3380 = vmatmul.f32.vlgmr.msrb.gmra.mxu2 %v3379_v8  ;;  %3454 = vmatmul.f32.vlgmr.msra.gmra.mxu1 %v3377_v61  ;;  %v3717_v2 = vsub.f32 %v3715_v0, %v3716_v1  ;;  %v2694_v9 = vadd.f32 %v18624_v20, %v2670_v6 }
 0x458   : > { %3476 = vmatpush.xpose.msra.mxu2 %v3401_v10  ;;  %v3402_v13 = vsub.f32 %v3400_v5, %v3401_v10  ;;  %v3837_v5 = vand.u32 4294901760, %v2766_v4 }
 0x459   : > { %v3325_v14 = vadd.f32 %v3324_v12, %v3292_v11  ;;  %3430 = vmatmul.f32.vlgmr.msra.gmra.mxu0 %v3376_v53  ;;  %v2718_v12 = vadd.f32 %v18628_v23, %v2694_v9 }
 0x45a   : > { %v3403_v16 = vand.u32 4294901760, %v3402_v13  ;;  %v18649_v7 = vsub.f32 %v2766_v4, %v3837_v5 }
 0x45b   : > { %v3350_v17 = vadd.f32 %v3349_v15, %v3325_v14  ;;  %v2742_v13 = vadd.f32 %v18635_v31, %v2718_v12 }
 0x45c   : > { %3404 = vmatpush.xpose.msrb.mxu3 %v3403_v16  ;;  %v3865_v8 = vand.u32 4294901760, %v18649_v7 }
 0x45d   : > { %v3520_v18 = vsel %vm2616_vm4, %v3350_v17, 0  ;;  %v2764_v24 = vadd.f32 %v18632_v27, %v2742_v13  ;;  %v17188_v17 = vld [vmem:[%s18103_s27 + $0x58] sm:$0xff] }
 0x45e   : > { %v3537_v19 = vand.u32 4294901760, %v3520_v18  ;;  %v3866_v10 = vsub.f32 %v18649_v7, %v3865_v8 }
 0x45f   : > { %3406 = vmatmul.f32.vlgmr.msrb.gmra.mxu3 %v3375_v51  ;;  %3478 = vmatmul.f32.vlgmr.msra.gmra.mxu2 %v3375_v51  ;;  %v3820_v20 = vsel %vm2446_vm3, %v2764_v24, 0 }
 0x460   : > { %3498 = vmatpush.xpose.msra.mxu3 %v3373_v3  ;;  %3538 = vmatpush.msrb.mxu0 %v3537_v19  ;;  %v3564_v25 = vsub.f32 %v3520_v18, %v3537_v19  ;;  %v3718_v3 = vand.u32 4294901760, %v3717_v2  ;;  %v3867_v11 = vand.u32 4294901760, %v3866_v10  ;;  %v18665_v31 = vand.u32 4294901760, %v3820_v20 }
 0x462   : > { %3591 = vmatpush.msrb.mxu2 %v3564_v25  ;;  %v3565_v28 = vand.u32 4294901760, %v3564_v25 }
 0x464   : > { %3614 = vmatpush.msrb.mxu3 %v3537_v19  ;;  %3640 = vmatpush.msra.mxu0 %v3565_v28  ;;  %v3566_v29 = vsub.f32 %v3564_v25, %v3565_v28  ;;  %v18660_v25 = vand.u32 4294901760, %v17188_v17 }
 0x465   : > { %3689 = vmatpush.msra.mxu2 %v3688_v63 }
 0x466   : > { %v3567_v33 = vand.u32 4294901760, %v3566_v29  ;;  %v17186_v29 = vld [vmem:[%s18103_s27 + $0x48] sm:$0xff]  ;;  %v18669_v27 = vsub.f32 %v17188_v17, %v18660_v25 }
 0x467   : > { %3500 = vmatmul.f32.vlgmr.msra.gmra.mxu3 %v3375_v51 }
 0x468   : > { %3568 = vmatpush.msrb.mxu1 %v3567_v33  ;;  %3719 = vmatpush.msra.mxu3 %v3718_v3 }
 0x46a   : > { %3662 = vmatpush.msra.mxu1 %v3537_v19  ;;  %v17187_v19 = vld [vmem:[%s18103_s27 + $0x50] sm:$0xff] }
 0x46b   : > { %v18663_v33 = vand.u32 4294901760, %v17187_v19 }
 0x4d4   : > { %v3455_v43 = vpop.f32.mrf.mxu1 }
 0x4d6   : > { %v3431_v38 = vpop.f32.mrf.mxu0 }
 0x4da   : > { %v3381_v34 = vpop.f32.mrf.mxu2 }
 0x4e2   : > { %v3407_v35 = vpop.f32.mrf.mxu3  ;;  %v3479_v47 = vpop.f32.mrf.mxu2 }
 0x4e3   : > { %v3408_v36 = vadd.f32 %v3407_v35, %v3381_v34  ;;  %v17185_v35 = vld [vmem:[%s18103_s27 + $0x40] sm:$0xff] }
 0x4e5   : > { %v3432_v42 = vadd.f32 %v3431_v38, %v3408_v36  ;;  %v18671_v38 = vand.u32 4294901760, %v17186_v29 }
 0x4e7   : > { %v3456_v44 = vadd.f32 %v3455_v43, %v3432_v42 }
 0x4e9   : > { %v3480_v37 = vadd.f32 %v3479_v47, %v3456_v44  ;;  %v18674_v44 = vsub.f32 %v17187_v19, %v18663_v33  ;;  %v18676_v47 = vand.u32 4294901760, %v17185_v35 }
 0x4ea   : > { %v3501_v48 = vpop.f32.mrf.mxu3 }
 0x4eb   : > { %v3502_v40 = vadd.f32 %v3501_v48, %v3480_v37  ;;  %v18679_v37 = vsub.f32 %v3820_v20, %v18665_v31 }
 0x4ed   : > { %v3504_v41 = vmul.f32 0.35355338, %v3502_v40  ;;  %v4021_v40 = vand.u32 4294901760, %v18669_v27 }
 0x4ef   : > { %v3505_v45 = vsel %vm2600_vm5, %v3504_v41, -inf }
 0x4f0   : > { %3506 = vmax.xlane.f32.xlu1 %v3505_v45 }
 0x563   : > { %v3507_v46 = vpop.xlane.xlu1 %3506 }
 0x564   : > { %v3508_v49 = vsub.f32 %v3504_v41, %v3507_v46  ;;  %v18684_v41 = vsub.f32 %v17186_v29, %v18671_v38  ;;  %v4027_v46 = vand.u32 4294901760, %v18674_v44  ;;  %v17197_v29 = vld [vmem:[%s18108_s14 + $0x50] sm:$0xff] }
 0x566   : > { %v3509_v50 = vmul.f32 1.442695, %v3508_v49  ;;  %v18688_v49 = vsub.f32 %v17185_v35, %v18676_v47 }
 0x568   : > { %17520 = vpow2.f32 %v3509_v50 }
 0x56e   : > { %v17521_v51 = vpop.eup %17520 }
 0x56f   : > { %v3511_v52 = vsel %vm2600_vm5, %v17521_v51, 0.0 }
 0x570   : > { %3512 = vadd.xlane.f32.xlu1 %v3511_v52  ;;  %v17193_v52 = vld [vmem:[%s20781_s4 + $0x58] sm:$0xff] }
 0x5e3   : > { %v3513_v53 = vpop.xlane.xlu1 %3512 }
 0x5e4   : > { %17522 = vrcp.f32 %v3513_v53  ;;  %v4022_v53 = vsub.f32 %v18669_v27, %v4021_v40 }
 0x5e6   : > { %v4023_v62 = vand.u32 4294901760, %v4022_v53 }
 0x5ea   : > { %v17523_v54 = vpop.eup %17522 }
 0x5eb   : > { %v3515_v55 = vmul.f32 %v17523_v54, %v17521_v51  ;;  %v3841_v51 = vand.u32 4294901760, %v18679_v37  ;;  %v4033_v54 = vand.u32 4294901760, %v18684_v41 }
 0x5ed   : > { %v3517_v56 = vsel %vm2612_vm6, %v3515_v55, 0 }
 0x5ee   : > { %v3539_v57 = vand.u32 4294901760, %v3517_v56 }
 0x5f0   : > { %3570 = vmatmul.f32.vlgmr.msrb.gmra.mxu1 %v3539_v57  ;;  %v3540_v58 = vsub.f32 %v3517_v56, %v3539_v57  ;;  %v4028_v56 = vsub.f32 %v18674_v44, %v4027_v46 }
 0x5f1   : > { %3765 = vmatpush.msrb.mxu1 %v3688_v63 }
 0x5f2   : > { %3594 = vmatmul.f32.vlgmr.msrb.gmra.mxu2 %v3540_v58  ;;  %v3541_v59 = vand.u32 4294901760, %v3540_v58  ;;  %v4029_v2 = vand.u32 4294901760, %v4028_v56 }
 0x5f3   : > { %3791 = vmatpush.msrb.mxu2 %v3716_v1  ;;  %v17191_v1 = vld [vmem:[%s20781_s4 + $0x48] sm:$0xff] }
 0x5f4   : > { %3618 = vmatmul.f32.vlgmr.msrb.gmra.mxu3 %v3541_v59  ;;  %v3542_v60 = vsub.f32 %v3540_v58, %v3541_v59  ;;  %v18700_v58 = vand.u32 4294901760, %v17193_v52  ;;  %v18718_v10 = vand.u32 4294901760, %v17191_v1 }
 0x5f5   : > { %3813 = vmatpush.msrb.mxu3 %v3688_v63  ;;  %v4034_v63 = vsub.f32 %v18684_v41, %v4033_v54 }
 0x5f6   : > { %v3543_v61 = vand.u32 4294901760, %v3542_v60  ;;  %v3842_v60 = vsub.f32 %v18679_v37, %v3841_v51  ;;  %v18712_v4 = vsub.f32 %v17193_v52, %v18700_v58 }
 0x5f7   : > { %v4035_v9 = vand.u32 4294901760, %v4034_v63 }
 0x5f8   : > { %3544 = vmatmul.f32.vlgmr.msrb.gmra.mxu0 %v3543_v61  ;;  %3664 = vmatmul.f32.vlgmr.msra.gmra.mxu1 %v3539_v57  ;;  %v17192_v61 = vld [vmem:[%s20781_s4 + $0x50] sm:$0xff]  ;;  %v4216_v12 = vand.u32 4294901760, %v18712_v4 }
 0x5f9   : > { %3742 = vmatpush.msrb.mxu0 %v3715_v0  ;;  %3868 = vmatpush.msra.mxu1 %v3867_v11  ;;  %v18714_v6 = vand.u32 4294901760, %v17192_v61 }
 0x5fb   : > { %v18723_v13 = vsub.f32 %v17192_v61, %v18714_v6 }
 0x5fd   : > { %v4222_v24 = vand.u32 4294901760, %v18723_v13 }
 0x5ff   : > { %v4223_v19 = vsub.f32 %v18723_v13, %v4222_v24 }
 0x600   : > { %3642 = vmatmul.f32.vlgmr.msra.gmra.mxu0 %v3539_v57  ;;  %v4039_v57 = vand.u32 4294901760, %v18688_v49 }
 0x601   : > { %3838 = vmatpush.msra.mxu0 %v3837_v5 }
 0x602   : > { %v4040_v3 = vsub.f32 %v18688_v49, %v4039_v57 }
 0x604   : > { %v4041_v11 = vand.u32 4294901760, %v4040_v3 }
 0x66d   : > { %v3571_v14 = vpop.f32.mrf.mxu1 }
 0x675   : > { %v3545_v22 = vpop.f32.mrf.mxu0  ;;  %v3595_v16 = vpop.f32.mrf.mxu2 }
 0x676   : > { %v3572_v15 = vadd.f32 %v3571_v14, %v3545_v22  ;;  %v3665_v42 = vpop.f32.mrf.mxu1  ;;  %v4217_v22 = vsub.f32 %v18712_v4, %v4216_v12 }
 0x677   : > { %v3619_v28 = vpop.f32.mrf.mxu3 }
 0x678   : > { %v3596_v18 = vadd.f32 %v3595_v16, %v3572_v15  ;;  %v17198_v16 = vld [vmem:[%s18108_s14 + $0x58] sm:$0xff] }
 0x67a   : > { %v3620_v23 = vadd.f32 %v3619_v28, %v3596_v18  ;;  %v4218_v18 = vand.u32 4294901760, %v4217_v22  ;;  %v18753_v28 = vand.u32 4294901760, %v17198_v16 }
 0x67d   : > { %v3643_v34 = vpop.f32.mrf.mxu0 }
 0x67e   : > { %v3644_v36 = vadd.f32 %v3643_v34, %v3620_v23  ;;  %v18765_v23 = vand.u32 4294901760, %v17197_v29  ;;  %v17196_v34 = vld [vmem:[%s18108_s14 + $0x48] sm:$0xff] }
 0x680   : > { %v3666_v43 = vadd.f32 %v3665_v42, %v3644_v36  ;;  %v17195_v36 = vld [vmem:[%s18108_s14 + $0x40] sm:$0xff] }
 0x682   : > { %v3671_v48 = vsel %vm2446_vm3, %v3666_v43, 0  ;;  %v18785_v43 = vsub.f32 %v17197_v29, %v18765_v23 }
 0x683   : > { %v3690_v45 = vand.u32 4294901760, %v3671_v48 }
 0x685   : > { %v3691_v50 = vsub.f32 %v3671_v48, %v3690_v45  ;;  %3721 = vmatmul.f32.vlgmr.msra.gmra.mxu3 %v3690_v45 }
 0x686   : > { %3914 = vmatpush.msra.mxu3 %v3837_v5 }
 0x687   : > { %3745 = vmatmul.f32.vlgmr.msrb.gmra.mxu0 %v3691_v50  ;;  %v3692_v55 = vand.u32 4294901760, %v3691_v50 }
 0x688   : > { %3940 = vmatpush.msrb.mxu0 %v3865_v8  ;;  %v3843_v8 = vand.u32 4294901760, %v3842_v60 }
 0x689   : > { %3769 = vmatmul.f32.vlgmr.msrb.gmra.mxu1 %v3692_v55  ;;  %v3693_v59 = vsub.f32 %v3691_v50, %v3692_v55  ;;  %v4417_v50 = vand.u32 4294901760, %v18785_v43 }
 0x68a   : > { %3962 = vmatpush.msrb.mxu1 %v3837_v5  ;;  %v17190_v5 = vld [vmem:[%s20781_s4 + $0x40] sm:$0xff] }
 0x68b   : > { %v3694_v0 = vand.u32 4294901760, %v3693_v59  ;;  %v18725_v14 = vand.u32 4294901760, %v17190_v5 }
 0x68d   : > { %3695 = vmatmul.f32.vlgmr.msra.gmra.mxu2 %v3694_v0  ;;  %3815 = vmatmul.f32.vlgmr.msrb.gmra.mxu3 %v3690_v45  ;;  %v18739_v15 = vsub.f32 %v17190_v5, %v18725_v14 }
 0x68e   : > { %4024 = vmatpush.msrb.mxu3 %v4023_v62  ;;  %3891 = vmatpush.msra.mxu2 %v18649_v7  ;;  %v18730_v7 = vsub.f32 %v17191_v1, %v18718_v10 }
 0x68f   : > { %3844 = vmatmul.f32.vlgmr.msra.gmra.mxu0 %v3843_v8  ;;  %v4234_v20 = vand.u32 4294901760, %v18739_v15 }
 0x690   : > { %4030 = vmatpush.msrb.mxu3 %v4029_v2  ;;  %4062 = vmatpush.msra.mxu0 %v18669_v27  ;;  %v4228_v17 = vand.u32 4294901760, %v18730_v7 }
 0x691   : > { %3870 = vmatmul.f32.vlgmr.msra.gmra.mxu1 %v18665_v31  ;;  %v4235_v35 = vsub.f32 %v18739_v15, %v4234_v20 }
 0x692   : > { %4036 = vmatpush.msrb.mxu3 %v4035_v9  ;;  %4065 = vmatpush.msra.mxu0 %v18674_v44 }
 0x693   : > { %4091 = vmatpush.msra.mxu1 %v18660_v25 }
 0x694   : > { %4042 = vmatpush.msrb.mxu3 %v4041_v11  ;;  %4068 = vmatpush.msra.mxu0 %v18684_v41 }
 0x695   : > { %3793 = vmatmul.f32.vlgmr.msrb.gmra.mxu2 %v3690_v45  ;;  %3918 = vmatmul.f32.vlgmr.msra.gmra.mxu3 %v3841_v51  ;;  %v18789_v45 = vand.u32 4294901760, %v17195_v36 }
 0x696   : > { %4093 = vmatpush.msra.mxu1 %v18663_v33  ;;  %3991 = vmatpush.msrb.mxu2 %v18660_v25 }
 0x697   : > { %3942 = vmatmul.f32.vlgmr.msrb.gmra.mxu0 %v18665_v31  ;;  %4151 = vmatpush.msra.mxu3 %v18660_v25  ;;  %v4229_v25 = vsub.f32 %v18730_v7, %v4228_v17 }
 0x698   : > { %4071 = vmatpush.msra.mxu0 %v18688_v49  ;;  %4095 = vmatpush.msra.mxu1 %v18671_v38 }
 0x699   : > { %3964 = vmatmul.f32.vlgmr.msrb.gmra.mxu1 %v18665_v31  ;;  %3993 = vmatpush.msrb.mxu2 %v18663_v33  ;;  %v4224_v31 = vand.u32 4294901760, %v4223_v19  ;;  %v4230_v42 = vand.u32 4294901760, %v4229_v25 }
 0x69a   : > { %4097 = vmatpush.msra.mxu1 %v18676_v47  ;;  %4153 = vmatpush.msra.mxu3 %v18663_v33  ;;  %v18773_v33 = vsub.f32 %v17198_v16, %v18753_v28 }
 0x69b   : > { %4186 = vmatpush.msrb.mxu0 %v18700_v58  ;;  %3995 = vmatpush.msrb.mxu2 %v18671_v38 }
 0x69c   : > { %4155 = vmatpush.msra.mxu3 %v18671_v38  ;;  %4219 = vmatpush.msrb.mxu1 %v4218_v18  ;;  %v18780_v38 = vand.u32 4294901760, %v17196_v34  ;;  %v4411_v48 = vand.u32 4294901760, %v18773_v33 }
 0x69d   : > { %3894 = vmatmul.f32.vlgmr.msra.gmra.mxu2 %v18679_v37  ;;  %4044 = vmatmul.f32.vlgmr.msrb.gmra.mxu3 %v18352_v26  ;;  %v4236_v37 = vand.u32 4294901760, %v4235_v35 }
 0x69e   : > { %4188 = vmatpush.msrb.mxu0 %v18714_v6  ;;  %3997 = vmatpush.msrb.mxu2 %v18676_v47  ;;  %v4412_v27 = vsub.f32 %v18773_v33, %v4411_v48 }
 0x69f   : > { %4074 = vmatmul.f32.vlgmr.msra.gmra.mxu0 %v18361_v30  ;;  %4157 = vmatpush.msra.mxu3 %v18676_v47  ;;  %v18796_v47 = vsub.f32 %v17196_v34, %v18780_v38 }
 0x6a0   : > { %4190 = vmatpush.msrb.mxu0 %v18718_v10  ;;  %4225 = vmatpush.msrb.mxu1 %v4224_v31  ;;  %v4413_v51 = vand.u32 4294901760, %v4412_v27 }
 0x6a1   : > { %4101 = vmatmul.f32.vlgmr.msra.gmra.mxu1 %v18368_v32  ;;  %4120 = vmatpush.msra.mxu2 %v4021_v40  ;;  %v18808_v40 = vsub.f32 %v17195_v36, %v18789_v45  ;;  %v4423_v44 = vand.u32 4294901760, %v18796_v47 }
 0x6a2   : > { %4192 = vmatpush.msrb.mxu0 %v18725_v14  ;;  %4231 = vmatpush.msrb.mxu1 %v4230_v42 }
 0x6a3   : > { %4286 = vmatpush.msrb.mxu3 %v18700_v58  ;;  %4124 = vmatpush.msra.mxu2 %v4027_v46  ;;  %v4418_v46 = vsub.f32 %v18785_v43, %v4417_v50  ;;  %v4429_v52 = vand.u32 4294901760, %v18808_v40  ;;  %v4424_v41 = vsub.f32 %v18796_v47, %v4423_v44 }
 0x6a4   : > { %4237 = vmatpush.msrb.mxu1 %v4236_v37  ;;  %4315 = vmatpush.msra.mxu0 %v4216_v12 }
 0x6a5   : > { %4003 = vmatmul.f32.vlgmr.msrb.gmra.mxu2 %v18389_v39  ;;  %4159 = vmatmul.f32.vlgmr.msra.gmra.mxu3 %v18352_v26  ;;  %v4419_v53 = vand.u32 4294901760, %v4418_v46  ;;  %v4425_v49 = vand.u32 4294901760, %v4424_v41 }
 0x6a6   : > { %4288 = vmatpush.msrb.mxu3 %v18714_v6  ;;  %4128 = vmatpush.msra.mxu2 %v4033_v54  ;;  %v4430_v54 = vsub.f32 %v18808_v40, %v4429_v52 }
 0x6a7   : > { %4198 = vmatmul.f32.vlgmr.msrb.gmra.mxu0 %v18389_v39  ;;  %4346 = vmatpush.msra.mxu1 %v18700_v58 }
 0x6a8   : > { %4290 = vmatpush.msrb.mxu3 %v18718_v10  ;;  %4319 = vmatpush.msra.mxu0 %v4222_v24  ;;  %v4431_v55 = vand.u32 4294901760, %v4430_v54 }
 0x6a9   : > { %4239 = vmatmul.f32.vlgmr.msrb.gmra.mxu1 %v18352_v26  ;;  %4132 = vmatpush.msra.mxu2 %v4039_v57 }
 0x6aa   : > { %4292 = vmatpush.msrb.mxu3 %v18725_v14  ;;  %4323 = vmatpush.msra.mxu0 %v4228_v17 }
 0x6ab   : > { %4348 = vmatpush.msra.mxu1 %v18714_v6  ;;  %4257 = vmatpush.msrb.mxu2 %v18712_v4  ;;  %v17468_v6 = vld [vmem:[%s20780_s6 + $0x2] ss:$0 sm:$0xff] }
 0x6ac   : > { %4327 = vmatpush.msra.mxu0 %v4234_v20  ;;  %4414 = vmatpush.msra.mxu3 %v4413_v51 }
 0x6ad   : > { %4134 = vmatmul.f32.vlgmr.msra.gmra.mxu2 %v18352_v26  ;;  %4296 = vmatmul.f32.vlgmr.msrb.gmra.mxu3 %v18368_v32 }
 0x6ae   : > { %4350 = vmatpush.msra.mxu1 %v18718_v10  ;;  %4260 = vmatpush.msrb.mxu2 %v18723_v13 }
 0x6af   : > { %4329 = vmatmul.f32.vlgmr.msra.gmra.mxu0 %v18352_v26  ;;  %4420 = vmatpush.msra.mxu3 %v4419_v53 }
 0x6b0   : > { %4352 = vmatpush.msra.mxu1 %v18725_v14  ;;  %4452 = vmatpush.msrb.mxu0 %v18773_v33  ;;  %v17467_v14 = vld [vmem:[%s18073_s29 + $0x2] ss:$0 sm:$0xff] }
 0x6b1   : > { %4354 = vmatmul.f32.vlgmr.msra.gmra.mxu1 %v18352_v26  ;;  %4263 = vmatpush.msrb.mxu2 %v18730_v7 }
 0x6b2   : > { %4426 = vmatpush.msra.mxu3 %v4425_v49  ;;  %4455 = vmatpush.msrb.mxu0 %v18785_v43 }
 0x6b3   : > { %4481 = vmatpush.msrb.mxu1 %v18753_v28  ;;  %4266 = vmatpush.msrb.mxu2 %v18739_v15 }
 0x6b4   : > { %4432 = vmatpush.msra.mxu3 %v4431_v55  ;;  %4458 = vmatpush.msrb.mxu0 %v18796_v47 }
 0x6b5   : > { %4483 = vmatpush.msrb.mxu1 %v18765_v23  ;;  %4269 = vmatmul.f32.vlgmr.msrb.gmra.mxu2 %v18361_v30 }
 0x6b6   : > { %4434 = vmatmul.f32.vlgmr.msra.gmra.mxu3 %v18352_v26  ;;  %4381 = vmatpush.msra.mxu2 %v18753_v28 }
 0x6b7   : > { %4461 = vmatpush.msrb.mxu0 %v18808_v40  ;;  %4485 = vmatpush.msrb.mxu1 %v18780_v38 }
 0x6b8   : > { %4541 = vmatpush.msrb.mxu3 %v18753_v28  ;;  %4464 = vmatmul.f32.vlgmr.msrb.gmra.mxu0 %v18361_v30 }
 0x6b9   : > { %4383 = vmatpush.msra.mxu2 %v18765_v23  ;;  %4487 = vmatpush.msrb.mxu1 %v18789_v45 }
 0x6ba   : > { %4543 = vmatpush.msrb.mxu3 %v18765_v23  ;;  %4491 = vmatmul.f32.vlgmr.msrb.gmra.mxu1 %v18368_v32 }
 0x6bb   : > { %4385 = vmatpush.msra.mxu2 %v18780_v38 }
 0x6bc   : > { %4545 = vmatpush.msrb.mxu3 %v18780_v38  ;;  %v17469_v38 = vld [vmem:[%s18088_s24 + $0x2] ss:$0 sm:$0xff] }
 0x6bd   : > { %4387 = vmatpush.msra.mxu2 %v18789_v45 }
 0x6be   : > { %4547 = vmatpush.msrb.mxu3 %v18789_v45  ;;  %4393 = vmatmul.f32.vlgmr.msra.gmra.mxu2 %v18389_v39 }
 0x6bf   : > { %4549 = vmatmul.f32.vlgmr.msrb.gmra.mxu3 %v18352_v26  ;;  %4510 = vmatpush.msrb.mxu2 %v4411_v48 }
 0x6c1   : > { %4514 = vmatpush.msrb.mxu2 %v4417_v50 }
 0x6c3   : > { %4518 = vmatpush.msrb.mxu2 %v4423_v44 }
 0x6c5   : > { %4522 = vmatpush.msrb.mxu2 %v4429_v52 }
 0x6c6   : > { %4524 = vmatmul.f32.vlgmr.msrb.gmra.mxu2 %v18352_v26 }
 0x704   : > { %v18873_v56 = vpop.f32.mrf.mxu0 }
 0x706   : > { %v18877_v58 = vpop.f32.mrf.mxu1 }
 0x708   : > { %v18875_v57 = vpop.f32.mrf.mxu3 }
 0x70c   : > { %v18883_v61 = vpop.f32.mrf.mxu0 }
 0x70e   : > { %v18885_v62 = vpop.f32.mrf.mxu1 }
 0x710   : > { %v18879_v59 = vpop.f32.mrf.mxu2  ;;  %v18881_v60 = vpop.f32.mrf.mxu3 }
 0x714   : > { %v18891_v1 = vpop.f32.mrf.mxu0 }
 0x716   : > { %v18893_v2 = vpop.f32.mrf.mxu1 }
 0x718   : > { %v18887_v63 = vpop.f32.mrf.mxu2  ;;  %v18889_v0 = vpop.f32.mrf.mxu3 }
 0x71c   : > { %v4075_v8 = vpop.f32.mrf.mxu0 }
 0x71e   : > { %v4102_v9 = vpop.f32.mrf.mxu1 }
 0x720   : > { %v18895_v3 = vpop.f32.mrf.mxu2  ;;  %v4045_v4 = vpop.f32.mrf.mxu3 }
 0x724   : > { %v4199_v22 = vpop.f32.mrf.mxu0 }
 0x725   : > { %v4200_v16 = vadd.f32 %v17467_v14, %v4199_v22 }
 0x726   : > { %v4240_v17 = vpop.f32.mrf.mxu1 }
 0x727   : > { %v4241_v28 = vadd.f32 %v4240_v17, %v4200_v16 }
 0x728   : > { %v4004_v5 = vpop.f32.mrf.mxu2  ;;  %v4160_v12 = vpop.f32.mrf.mxu3 }
 0x729   : > { %v4005_v10 = vadd.f32 %v17468_v6, %v4004_v5 }
 0x72b   : > { %v4046_v11 = vadd.f32 %v4045_v4, %v4005_v10 }
 0x72c   : > { %v4330_v31 = vpop.f32.mrf.mxu0 }
 0x72d   : > { %v4076_v13 = vadd.f32 %v4075_v8, %v4046_v11 }
 0x72e   : > { %v4355_v33 = vpop.f32.mrf.mxu1 }
 0x72f   : > { %v4103_v7 = vadd.f32 %v4102_v9, %v4076_v13 }
 0x730   : > { %v4135_v24 = vpop.f32.mrf.mxu2  ;;  %v4297_v29 = vpop.f32.mrf.mxu3 }
 0x731   : > { %v4136_v15 = vadd.f32 %v4135_v24, %v4103_v7 }
 0x733   : > { %v4161_v18 = vadd.f32 %v4160_v12, %v4136_v15 }
 0x735   : > { %v4554_v19 = vsel %vm2446_vm3, %v4161_v18, 0  ;;  %v4465_v51 = vpop.f32.mrf.mxu0 }
 0x736   : > { %v4576_v20 = vand.u32 4294901760, %v4554_v19 }
 0x737   : > { %v4492_v53 = vpop.f32.mrf.mxu1 }
 0x738   : > { %v4270_v25 = vpop.f32.mrf.mxu2  ;;  %v4577_v23 = vsub.f32 %v4554_v19, %v4576_v20 }
 0x739   : > { %v4271_v34 = vadd.f32 %v4270_v25, %v4241_v28  ;;  %v4435_v48 = vpop.f32.mrf.mxu3 }
 0x73a   : > { %v4578_v36 = vand.u32 4294901760, %v4577_v23 }
 0x73b   : > { %v4298_v35 = vadd.f32 %v4297_v29, %v4271_v34 }
 0x73c   : > { %v4579_v37 = vsub.f32 %v4577_v23, %v4578_v36 }
 0x73d   : > { %v4331_v42 = vadd.f32 %v4330_v31, %v4298_v35 }
 0x73e   : > { %v4580_v46 = vand.u32 4294901760, %v4579_v37 }
 0x73f   : > { %v4356_v43 = vadd.f32 %v4355_v33, %v4331_v42 }
 0x741   : > { %v4394_v45 = vpop.f32.mrf.mxu2  ;;  %v4557_v47 = vsel %vm2446_vm3, %v4356_v43, 0 }
 0x742   : > { %v4395_v50 = vadd.f32 %v17469_v38, %v4394_v45  ;;  %v4574_v27 = vand.u32 4294901760, %v4557_v47  ;;  %v4550_v8 = vpop.f32.mrf.mxu3 }
 0x744   : > { %v4436_v40 = vadd.f32 %v4435_v48, %v4395_v50  ;;  %4575 = vmatpush.xpose.msra.mxu0 %v4574_v27  ;;  %4651 = vmatpush.xpose.msra.mxu3 %v4574_v27  ;;  %v4601_v44 = vsub.f32 %v4557_v47, %v4574_v27 }
 0x746   : > { %4628 = vmatpush.xpose.msra.mxu2 %v4601_v44  ;;  %v4466_v52 = vadd.f32 %v4465_v51, %v4436_v40  ;;  %v4602_v41 = vand.u32 4294901760, %v4601_v44  ;;  %v17200_v40 = vld [vmem:[%s20795_s1 + $0x10] sm:$0xff] }
 0x747   : > { %4581 = vmatmul.f32.vlgmr.msra.gmra.mxu0 %v4580_v46  ;;  %4655 = vmatmul.f32.vlgmr.msra.gmra.mxu3 %v4578_v36 }
 0x748   : > { %v4493_v54 = vadd.f32 %v4492_v53, %v4466_v52  ;;  %4677 = vmatpush.xpose.msrb.mxu0 %v4602_v41  ;;  %v4603_v49 = vsub.f32 %v4601_v44, %v4602_v41  ;;  %v4889_v44 = vand.u32 4294901760, %v17200_v40  ;;  %v17204_v52 = vld [vmem:[%s18103_s27 + $0x78] sm:$0xff] }
 0x749   : > { %v4525_v55 = vpop.f32.mrf.mxu2  ;;  %4631 = vmatmul.f32.vlgmr.msra.gmra.mxu2 %v4577_v23  ;;  %v18908_v53 = vand.u32 4294901760, %v17204_v52 }
 0x74a   : > { %v4526_v4 = vadd.f32 %v4525_v55, %v4493_v54  ;;  %v4604_v6 = vand.u32 4294901760, %v4603_v49  ;;  %v4916_v46 = vsub.f32 %v17200_v40, %v4889_v44  ;;  %v17203_v54 = vld [vmem:[%s18103_s27 + $0x70] sm:$0xff] }
 0x74b   : > { %v18913_v55 = vsub.f32 %v17204_v52, %v18908_v53 }
 0x74c   : > { %v4551_v5 = vadd.f32 %v4550_v8, %v4526_v4  ;;  %4605 = vmatpush.xpose.msra.mxu1 %v4604_v6  ;;  %v4917_v51 = vand.u32 4294901760, %v4916_v46  ;;  %v18915_v4 = vand.u32 4294901760, %v17203_v54  ;;  %v17202_v6 = vld [vmem:[%s18103_s27 + $0x68] sm:$0xff] }
 0x74d   : > { %v5074_v8 = vand.u32 4294901760, %v18913_v55 }
 0x74e   : > { %v4721_v9 = vsel %vm2616_vm4, %v4551_v5, 0  ;;  %v4918_v41 = vsub.f32 %v4916_v46, %v4917_v51  ;;  %v18920_v5 = vand.u32 4294901760, %v17202_v6 }
 0x74f   : > { %v4738_v10 = vand.u32 4294901760, %v4721_v9  ;;  %4607 = vmatmul.f32.vlgmr.msra.gmra.mxu1 %v4576_v20  ;;  %4679 = vmatmul.f32.vlgmr.msrb.gmra.mxu0 %v4576_v20 }
 0x750   : > { %4699 = vmatpush.xpose.msrb.mxu1 %v4574_v27  ;;  %v4919_v49 = vand.u32 4294901760, %v4918_v41 }
 0x751   : > { %v4765_v11 = vsub.f32 %v4721_v9, %v4738_v10  ;;  %4739 = vmatpush.msrb.mxu2 %v4738_v10  ;;  %v18923_v9 = vsub.f32 %v17203_v54, %v18915_v4 }
 0x753   : > { %4792 = vmatpush.msra.mxu0 %v4765_v11  ;;  %v4766_v12 = vand.u32 4294901760, %v4765_v11 }
 0x754   : > { %4815 = vmatpush.msra.mxu1 %v4738_v10 }
 0x755   : > { %4841 = vmatpush.msra.mxu2 %v4766_v12  ;;  %v4767_v13 = vsub.f32 %v4765_v11, %v4766_v12  ;;  %4890 = vmatpush.msrb.mxu0 %v4889_v44  ;;  %v5075_v11 = vsub.f32 %v18913_v55, %v5074_v8  ;;  %v5080_v12 = vand.u32 4294901760, %v18923_v9 }
 0x757   : > { %4701 = vmatmul.f32.vlgmr.msrb.gmra.mxu1 %v4576_v20  ;;  %v4768_v14 = vand.u32 4294901760, %v4767_v13 }
 0x758   : > { %4920 = vmatpush.msrb.mxu1 %v4919_v49 }
 0x759   : > { %4769 = vmatpush.msrb.mxu3 %v4768_v14  ;;  %v18932_v14 = vsub.f32 %v17202_v6, %v18920_v5 }
 0x75b   : > { %4863 = vmatpush.msra.mxu3 %v4738_v10  ;;  %v17201_v10 = vld [vmem:[%s18103_s27 + $0x60] sm:$0xff] }
 0x75c   : > { %v18929_v13 = vand.u32 4294901760, %v17201_v10 }
 0x7c4   : > { %v4582_v7 = vpop.f32.mrf.mxu0 }
 0x7ca   : > { %v4656_v17 = vpop.f32.mrf.mxu3 }
 0x7cc   : > { %v4608_v22 = vpop.f32.mrf.mxu1  ;;  %v4632_v15 = vpop.f32.mrf.mxu2 }
 0x7cd   : > { %v4609_v24 = vadd.f32 %v4608_v22, %v4582_v7  ;;  %v4680_v19 = vpop.f32.mrf.mxu0  ;;  %v5076_v7 = vand.u32 4294901760, %v5075_v11  ;;  %v5081_v22 = vsub.f32 %v18923_v9, %v5080_v12 }
 0x7cf   : > { %v4633_v16 = vadd.f32 %v4632_v15, %v4609_v24  ;;  %v5086_v24 = vand.u32 4294901760, %v18932_v14  ;;  %v18938_v15 = vsub.f32 %v17201_v10, %v18929_v13 }
 0x7d1   : > { %v4657_v18 = vadd.f32 %v4656_v17, %v4633_v16  ;;  %v5082_v16 = vand.u32 4294901760, %v5081_v22  ;;  %v5087_v17 = vsub.f32 %v18932_v14, %v5086_v24 }
 0x7d3   : > { %v4681_v28 = vadd.f32 %v4680_v19, %v4657_v18  ;;  %v5092_v18 = vand.u32 4294901760, %v18938_v15  ;;  %v5088_v19 = vand.u32 4294901760, %v5087_v17  ;;  %v17214_v17 = vld [vmem:[%s18108_s14 + $0x78] sm:$0xff] }
 0x7d4   : > { %v4702_v29 = vpop.f32.mrf.mxu1 }
 0x7d5   : > { %v4703_v25 = vadd.f32 %v4702_v29, %v4681_v28  ;;  %v5093_v28 = vsub.f32 %v18938_v15, %v5092_v18 }
 0x7d7   : > { %v4705_v23 = vmul.f32 0.35355338, %v4703_v25  ;;  %v5094_v29 = vand.u32 4294901760, %v5093_v28 }
 0x7d9   : > { %v4706_v34 = vsel %vm2600_vm5, %v4705_v23, -inf }
 0x7da   : > { %4707 = vmax.xlane.f32.xlu2 %v4706_v34 }
 0x84d   : > { %v4708_v31 = vpop.xlane.xlu2 %4707 }
 0x84e   : > { %v4709_v20 = vsub.f32 %v4705_v23, %v4708_v31 }
 0x850   : > { %v4710_v35 = vmul.f32 1.442695, %v4709_v20 }
 0x852   : > { %17524 = vpow2.f32 %v4710_v35  ;;  %v17209_v35 = vld [vmem:[%s20781_s4 + $0x78] sm:$0xff] }
 0x858   : > { %v17525_v33 = vpop.eup %17524 }
 0x859   : > { %v4712_v36 = vsel %vm2600_vm5, %v17525_v33, 0.0 }
 0x85a   : > { %4713 = vadd.xlane.f32.xlu2 %v4712_v36  ;;  %v18946_v36 = vand.u32 4294901760, %v17209_v35 }
 0x8cd   : > { %v4714_v42 = vpop.xlane.xlu2 %4713 }
 0x8ce   : > { %17526 = vrcp.f32 %v4714_v42  ;;  %v17208_v42 = vld [vmem:[%s20781_s4 + $0x70] sm:$0xff] }
 0x8d4   : > { %v17527_v38 = vpop.eup %17526 }
 0x8d5   : > { %v4716_v43 = vmul.f32 %v17527_v38, %v17525_v33 }
 0x8d7   : > { %v4718_v37 = vsel %vm2612_vm6, %v4716_v43, 0 }
 0x8d8   : > { %v4740_v48 = vand.u32 4294901760, %v4718_v37 }
 0x8da   : > { %v4741_v45 = vsub.f32 %v4718_v37, %v4740_v48  ;;  %4771 = vmatmul.f32.vlgmr.msrb.gmra.mxu3 %v4740_v48  ;;  %v17207_v37 = vld [vmem:[%s20781_s4 + $0x68] sm:$0xff] }
 0x8db   : > { %4966 = vmatpush.msrb.mxu3 %v4889_v44  ;;  %v18955_v40 = vand.u32 4294901760, %v17207_v37 }
 0x8dc   : > { %4795 = vmatmul.f32.vlgmr.msra.gmra.mxu0 %v4741_v45  ;;  %v4742_v47 = vand.u32 4294901760, %v4741_v45 }
 0x8dd   : > { %4992 = vmatpush.msra.mxu0 %v4917_v51  ;;  %v18966_v49 = vsub.f32 %v17207_v37, %v18955_v40 }
 0x8de   : > { %4819 = vmatmul.f32.vlgmr.msra.gmra.mxu1 %v4742_v47  ;;  %v4743_v50 = vsub.f32 %v4741_v45, %v4742_v47  ;;  %v18950_v45 = vand.u32 4294901760, %v17208_v42 }
 0x8df   : > { %5014 = vmatpush.msra.mxu1 %v4889_v44  ;;  %v17206_v44 = vld [vmem:[%s20781_s4 + $0x60] sm:$0xff] }
 0x8e0   : > { %v4744_v27 = vand.u32 4294901760, %v4743_v50  ;;  %v18953_v50 = vsub.f32 %v17209_v35, %v18946_v36  ;;  %v18960_v51 = vsub.f32 %v17208_v42, %v18950_v45  ;;  %v18963_v54 = vand.u32 4294901760, %v17206_v44  ;;  %v17212_v35 = vld [vmem:[%s18108_s14 + $0x68] sm:$0xff] }
 0x8e2   : > { %4745 = vmatmul.f32.vlgmr.msrb.gmra.mxu2 %v4744_v27  ;;  %4865 = vmatmul.f32.vlgmr.msra.gmra.mxu3 %v4740_v48  ;;  %v5269_v41 = vand.u32 4294901760, %v18953_v50  ;;  %v5275_v10 = vand.u32 4294901760, %v18960_v51  ;;  %v18974_v22 = vsub.f32 %v17206_v44, %v18963_v54 }
 0x8e3   : > { %4943 = vmatpush.msrb.mxu2 %v4916_v46  ;;  %5077 = vmatpush.msra.mxu3 %v5076_v7 }
 0x8e4   : > { %v5270_v7 = vsub.f32 %v18953_v50, %v5269_v41  ;;  %v5276_v28 = vsub.f32 %v18960_v51, %v5275_v10 }
 0x8e5   : > { %5083 = vmatpush.msra.mxu3 %v5082_v16  ;;  %v5281_v16 = vand.u32 4294901760, %v18966_v49 }
 0x8e7   : > { %5089 = vmatpush.msra.mxu3 %v5088_v19 }
 0x8e9   : > { %5095 = vmatpush.msra.mxu3 %v5094_v29 }
 0x8ea   : > { %4843 = vmatmul.f32.vlgmr.msra.gmra.mxu2 %v4740_v48 }
 0x8eb   : > { %5044 = vmatpush.msra.mxu2 %v18908_v53 }
 0x8ed   : > { %5046 = vmatpush.msra.mxu2 %v18915_v4 }
 0x8ef   : > { %5048 = vmatpush.msra.mxu2 %v18920_v5 }
 0x8f1   : > { %5050 = vmatpush.msra.mxu2 %v18929_v13 }
 0x959   : > { %v4796_v31 = vpop.f32.mrf.mxu0 }
 0x95b   : > { %v4820_v33 = vpop.f32.mrf.mxu1 }
 0x95d   : > { %v4772_v25 = vpop.f32.mrf.mxu3 }
 0x965   : > { %v4746_v23 = vpop.f32.mrf.mxu2  ;;  %v4866_v47 = vpop.f32.mrf.mxu3 }
 0x966   : > { %v4773_v34 = vadd.f32 %v4772_v25, %v4746_v23  ;;  %v5271_v25 = vand.u32 4294901760, %v5270_v7  ;;  %v5287_v23 = vand.u32 4294901760, %v18974_v22 }
 0x968   : > { %v4797_v20 = vadd.f32 %v4796_v31, %v4773_v34  ;;  %v17213_v34 = vld [vmem:[%s18108_s14 + $0x70] sm:$0xff] }
 0x96a   : > { %v4821_v38 = vadd.f32 %v4820_v33, %v4797_v20  ;;  %v19001_v20 = vand.u32 4294901760, %v17213_v34  ;;  %v19011_v33 = vand.u32 4294901760, %v17212_v35 }
 0x96d   : > { %v4844_v43 = vpop.f32.mrf.mxu2 }
 0x96e   : > { %v4845_v48 = vadd.f32 %v4844_v43, %v4821_v38 }
 0x970   : > { %v4867_v27 = vadd.f32 %v4866_v47, %v4845_v48 }
 0x972   : > { %v4872_v46 = vsel %vm2446_vm3, %v4867_v27, 0 }
 0x973   : > { %v4891_v52 = vand.u32 4294901760, %v4872_v46 }
 0x975   : > { %v4892_v6 = vsub.f32 %v4872_v46, %v4891_v52  ;;  %4922 = vmatmul.f32.vlgmr.msrb.gmra.mxu1 %v4891_v52 }
 0x976   : > { %5144 = vmatpush.msrb.mxu1 %v18908_v53 }
 0x977   : > { %v4893_v11 = vand.u32 4294901760, %v4892_v6  ;;  %4946 = vmatmul.f32.vlgmr.msrb.gmra.mxu2 %v4892_v6 }
 0x978   : > { %5146 = vmatpush.msrb.mxu1 %v18915_v4  ;;  %5173 = vmatpush.msrb.mxu2 %v5074_v8  ;;  %v18985_v8 = vand.u32 4294901760, %v17214_v17 }
 0x979   : > { %v4894_v19 = vsub.f32 %v4892_v6, %v4893_v11  ;;  %4970 = vmatmul.f32.vlgmr.msrb.gmra.mxu3 %v4893_v11 }
 0x97a   : > { %5148 = vmatpush.msrb.mxu1 %v18920_v5  ;;  %5177 = vmatpush.msrb.mxu2 %v5080_v12  ;;  %v5282_v12 = vsub.f32 %v18966_v49, %v5281_v16  ;;  %v18999_v31 = vsub.f32 %v17214_v17, %v18985_v8 }
 0x97b   : > { %v4895_v29 = vand.u32 4294901760, %v4894_v19  ;;  %5204 = vmatpush.msrb.mxu3 %v18908_v53  ;;  %v5277_v53 = vand.u32 4294901760, %v5276_v28  ;;  %v17471_v28 = vld [vmem:[%s18073_s29 + $0x3] ss:$0 sm:$0xff] }
 0x97c   : > { %5150 = vmatpush.msrb.mxu1 %v18929_v13  ;;  %5181 = vmatpush.msrb.mxu2 %v5086_v24  ;;  %v5288_v24 = vsub.f32 %v18974_v22, %v5287_v23 }
 0x97d   : > { %4896 = vmatmul.f32.vlgmr.msrb.gmra.mxu0 %v4895_v29  ;;  %5016 = vmatmul.f32.vlgmr.msra.gmra.mxu1 %v4891_v52 }
 0x97e   : > { %5206 = vmatpush.msrb.mxu3 %v18915_v4  ;;  %5115 = vmatpush.msrb.mxu0 %v18913_v55  ;;  %v5283_v55 = vand.u32 4294901760, %v5282_v12  ;;  %v17211_v4 = vld [vmem:[%s18108_s14 + $0x60] sm:$0xff]  ;;  %v5289_v42 = vand.u32 4294901760, %v5288_v24 }
 0x97f   : > { %5056 = vmatmul.f32.vlgmr.msra.gmra.mxu2 %v18389_v39  ;;  %5272 = vmatpush.msra.mxu1 %v5271_v25 }
 0x980   : > { %5185 = vmatpush.msrb.mxu2 %v5092_v18  ;;  %5208 = vmatpush.msrb.mxu3 %v18920_v5  ;;  %v5464_v18 = vand.u32 4294901760, %v18999_v31  ;;  %v19017_v5 = vsub.f32 %v17213_v34, %v19001_v20 }
 0x981   : > { %5097 = vmatmul.f32.vlgmr.msra.gmra.mxu3 %v18352_v26  ;;  %5118 = vmatpush.msrb.mxu0 %v18923_v9  ;;  %v19020_v9 = vand.u32 4294901760, %v17211_v4 }
 0x982   : > { %5210 = vmatpush.msrb.mxu3 %v18929_v13  ;;  %5278 = vmatpush.msra.mxu1 %v5277_v53  ;;  %v19026_v13 = vsub.f32 %v17212_v35, %v19011_v33  ;;  %v5470_v38 = vand.u32 4294901760, %v19017_v5 }
 0x983   : > { %5310 = vmatpush.msra.mxu2 %v18953_v50  ;;  %5121 = vmatpush.msrb.mxu0 %v18932_v14  ;;  %v5465_v14 = vsub.f32 %v18999_v31, %v5464_v18  ;;  %v5481_v43 = vsub.f32 %v17211_v4, %v19020_v9  ;;  %v17472_v4 = vld [vmem:[%s18088_s24 + $0x3] ss:$0 sm:$0xff] }
 0x984   : > { %5284 = vmatpush.msra.mxu1 %v5283_v55  ;;  %5339 = vmatpush.msra.mxu3 %v18946_v36  ;;  %v5471_v48 = vsub.f32 %v19017_v5, %v5470_v38 }
 0x985   : > { %4994 = vmatmul.f32.vlgmr.msra.gmra.mxu0 %v4891_v52  ;;  %5154 = vmatmul.f32.vlgmr.msrb.gmra.mxu1 %v18368_v32  ;;  %v5466_v37 = vand.u32 4294901760, %v5465_v14  ;;  %v5482_v47 = vand.u32 4294901760, %v5481_v43  ;;  %v17470_v52 = vld [vmem:[%s20780_s6 + $0x3] ss:$0 sm:$0xff] }
 0x986   : > { %5313 = vmatpush.msra.mxu2 %v18960_v51  ;;  %5124 = vmatpush.msrb.mxu0 %v18938_v15  ;;  %v5476_v15 = vand.u32 4294901760, %v19026_v13  ;;  %v5472_v27 = vand.u32 4294901760, %v5471_v48 }
 0x987   : > { %5187 = vmatmul.f32.vlgmr.msrb.gmra.mxu2 %v18352_v26  ;;  %5290 = vmatpush.msra.mxu1 %v5289_v42  ;;  %v5483_v44 = vsub.f32 %v5481_v43, %v5482_v47 }
 0x988   : > { %5316 = vmatpush.msra.mxu2 %v18966_v49  ;;  %5341 = vmatpush.msra.mxu3 %v18950_v45 }
 0x989   : > { %5212 = vmatmul.f32.vlgmr.msrb.gmra.mxu3 %v18352_v26  ;;  %5239 = vmatpush.msra.mxu0 %v18946_v36 }
 0x98a   : > { %5319 = vmatpush.msra.mxu2 %v18974_v22  ;;  %5343 = vmatpush.msra.mxu3 %v18955_v40 }
 0x98b   : > { %5399 = vmatpush.msrb.mxu1 %v18946_v36  ;;  %5241 = vmatpush.msra.mxu0 %v18950_v45  ;;  %v5477_v36 = vsub.f32 %v19026_v13, %v5476_v15 }
 0x98c   : > { %5345 = vmatpush.msra.mxu3 %v18963_v54  ;;  %5434 = vmatpush.msrb.mxu2 %v18985_v8 }
 0x98d   : > { %5127 = vmatmul.f32.vlgmr.msrb.gmra.mxu0 %v18361_v30  ;;  %5292 = vmatmul.f32.vlgmr.msra.gmra.mxu1 %v18352_v26 }
 0x98e   : > { %5401 = vmatpush.msrb.mxu1 %v18950_v45  ;;  %5243 = vmatpush.msra.mxu0 %v18955_v40  ;;  %v5478_v45 = vand.u32 4294901760, %v5477_v36 }
 0x98f   : > { %5322 = vmatmul.f32.vlgmr.msra.gmra.mxu2 %v18361_v30  ;;  %5467 = vmatpush.msrb.mxu3 %v5466_v37 }
 0x990   : > { %5403 = vmatpush.msrb.mxu1 %v18955_v40  ;;  %5436 = vmatpush.msrb.mxu2 %v19001_v20  ;;  %v5484_v40 = vand.u32 4294901760, %v5483_v44 }
 0x991   : > { %5349 = vmatmul.f32.vlgmr.msra.gmra.mxu3 %v18368_v32  ;;  %5245 = vmatpush.msra.mxu0 %v18963_v54 }
 0x992   : > { %5405 = vmatpush.msrb.mxu1 %v18963_v54  ;;  %5438 = vmatpush.msrb.mxu2 %v19011_v33 }
 0x993   : > { %5473 = vmatpush.msrb.mxu3 %v5472_v27  ;;  %5368 = vmatpush.msrb.mxu0 %v5269_v41 }
 0x994   : > { %5440 = vmatpush.msrb.mxu2 %v19020_v9  ;;  %5534 = vmatpush.msra.mxu1 %v18985_v8 }
 0x995   : > { %5251 = vmatmul.f32.vlgmr.msra.gmra.mxu0 %v18389_v39  ;;  %5407 = vmatmul.f32.vlgmr.msrb.gmra.mxu1 %v18352_v26 }
 0x996   : > { %5479 = vmatpush.msrb.mxu3 %v5478_v45  ;;  %5372 = vmatpush.msrb.mxu0 %v5275_v10 }
 0x997   : > { %5446 = vmatmul.f32.vlgmr.msrb.gmra.mxu2 %v18389_v39  ;;  %5536 = vmatpush.msra.mxu1 %v19001_v20 }
 0x998   : > { %5485 = vmatpush.msrb.mxu3 %v5484_v40  ;;  %5563 = vmatpush.msra.mxu2 %v5464_v18 }
 0x999   : > { %5487 = vmatmul.f32.vlgmr.msrb.gmra.mxu3 %v18352_v26  ;;  %5376 = vmatpush.msrb.mxu0 %v5281_v16 }
 0x99a   : > { %5538 = vmatpush.msra.mxu1 %v19011_v33  ;;  %5567 = vmatpush.msra.mxu2 %v5470_v38 }
 0x99b   : > { %5594 = vmatpush.msra.mxu3 %v18985_v8  ;;  %5380 = vmatpush.msrb.mxu0 %v5287_v23 }
 0x99c   : > { %5540 = vmatpush.msra.mxu1 %v19020_v9  ;;  %5571 = vmatpush.msra.mxu2 %v5476_v15 }
 0x99d   : > { %5596 = vmatpush.msra.mxu3 %v19001_v20  ;;  %5382 = vmatmul.f32.vlgmr.msrb.gmra.mxu0 %v18352_v26 }
 0x99e   : > { %5544 = vmatmul.f32.vlgmr.msra.gmra.mxu1 %v18368_v32  ;;  %5505 = vmatpush.msra.mxu0 %v18999_v31 }
 0x99f   : > { %5575 = vmatpush.msra.mxu2 %v5482_v47  ;;  %5598 = vmatpush.msra.mxu3 %v19011_v33 }
 0x9a0   : > { %5577 = vmatmul.f32.vlgmr.msra.gmra.mxu2 %v18352_v26  ;;  %5508 = vmatpush.msra.mxu0 %v19017_v5 }
 0x9a1   : > { %5600 = vmatpush.msra.mxu3 %v19020_v9 }
 0x9a2   : > { %5602 = vmatmul.f32.vlgmr.msra.gmra.mxu3 %v18352_v26  ;;  %5511 = vmatpush.msra.mxu0 %v19026_v13 }
 0x9a4   : > { %5514 = vmatpush.msra.mxu0 %v5481_v43 }
 0x9a5   : > { %5517 = vmatmul.f32.vlgmr.msra.gmra.mxu0 %v18361_v30 }
 0x9f2   : > { %v19085_v32 = vpop.f32.mrf.mxu1 }
 0x9fa   : > { %v19087_v39 = vpop.f32.mrf.mxu0  ;;  %v19089_v50 = vpop.f32.mrf.mxu2 }
 0x9fb   : > { %v19091_v46 = vpop.f32.mrf.mxu1 }
 0x9fc   : > { %v19093_v51 = vpop.f32.mrf.mxu3 }
 0xa02   : > { %v19096_v41 = vpop.f32.mrf.mxu0  ;;  %v5057_v26 = vpop.f32.mrf.mxu2 }
 0xa03   : > { %v5058_v49 = vadd.f32 %v17470_v52, %v5057_v26  ;;  %v5155_v6 = vpop.f32.mrf.mxu1 }
 0xa04   : > { %v5098_v54 = vpop.f32.mrf.mxu3 }
 0xa05   : > { %v5099_v10 = vadd.f32 %v5098_v54, %v5058_v49 }
 0xa0a   : > { %v5128_v30 = vpop.f32.mrf.mxu0  ;;  %v5188_v11 = vpop.f32.mrf.mxu2 }
 0xa0b   : > { %v5129_v7 = vadd.f32 %v5128_v30, %v5099_v10  ;;  %v5293_v19 = vpop.f32.mrf.mxu1 }
 0xa0c   : > { %v5213_v22 = vpop.f32.mrf.mxu3 }
 0xa0d   : > { %v5156_v16 = vadd.f32 %v5155_v6, %v5129_v7 }
 0xa0f   : > { %v5189_v17 = vadd.f32 %v5188_v11, %v5156_v16 }
 0xa11   : > { %v5214_v29 = vadd.f32 %v5213_v22, %v5189_v17 }
 0xa12   : > { %v5252_v25 = vpop.f32.mrf.mxu0  ;;  %v5323_v23 = vpop.f32.mrf.mxu2 }
 0xa13   : > { %v5607_v8 = vsel %vm2446_vm3, %v5214_v29, 0  ;;  %v5253_v12 = vadd.f32 %v17471_v28, %v5252_v25  ;;  %v5408_v35 = vpop.f32.mrf.mxu1 }
 0xa14   : > { %v5629_v34 = vand.u32 4294901760, %v5607_v8  ;;  %v5350_v53 = vpop.f32.mrf.mxu3 }
 0xa15   : > { %v5294_v24 = vadd.f32 %v5293_v19, %v5253_v12 }
 0xa16   : > { %v5630_v31 = vsub.f32 %v5607_v8, %v5629_v34 }
 0xa17   : > { %v5324_v20 = vadd.f32 %v5323_v23, %v5294_v24 }
 0xa18   : > { %v5631_v18 = vand.u32 4294901760, %v5630_v31 }
 0xa19   : > { %v5351_v55 = vadd.f32 %v5350_v53, %v5324_v20 }
 0xa1a   : > { %v5383_v33 = vpop.f32.mrf.mxu0  ;;  %v5447_v42 = vpop.f32.mrf.mxu2  ;;  %v5632_v38 = vsub.f32 %v5630_v31, %v5631_v18 }
 0xa1b   : > { %v5384_v5 = vadd.f32 %v5383_v33, %v5351_v55  ;;  %v5448_v13 = vadd.f32 %v17472_v4, %v5447_v42  ;;  %v5545_v44 = vpop.f32.mrf.mxu1 }
 0xa1c   : > { %v5488_v14 = vpop.f32.mrf.mxu3  ;;  %v5633_v36 = vand.u32 4294901760, %v5632_v38 }
 0xa1d   : > { %v5409_v9 = vadd.f32 %v5408_v35, %v5384_v5  ;;  %v5489_v37 = vadd.f32 %v5488_v14, %v5448_v13 }
 0xa1f   : > { %v5610_v43 = vsel %vm2446_vm3, %v5409_v9, 0 }
 0xa20   : > { %v5627_v15 = vand.u32 4294901760, %v5610_v43 }
 0xa22   : > { %v5654_v48 = vsub.f32 %v5610_v43, %v5627_v15  ;;  %v5518_v47 = vpop.f32.mrf.mxu0  ;;  %5628 = vmatpush.xpose.msrb.mxu0 %v5627_v15  ;;  %5704 = vmatpush.xpose.msrb.mxu3 %v5627_v15 }
 0xa23   : > { %v5519_v27 = vadd.f32 %v5518_v47, %v5489_v37  ;;  %v5578_v52 = vpop.f32.mrf.mxu2  ;;  %v17216_v47 = vld [vmem:[%s20795_s1 + $0x18] sm:$0xff]  ;;  %s20813_s1 = sld [smem:[#allocation48_spill]] }
 0xa24   : > { %5681 = vmatpush.xpose.msrb.mxu2 %v5654_v48  ;;  %v5655_v45 = vand.u32 4294901760, %v5654_v48 }
 0xa25   : > { %v5546_v40 = vadd.f32 %v5545_v44, %v5519_v27  ;;  %5634 = vmatmul.f32.vlgmr.msrb.gmra.mxu0 %v5633_v36  ;;  %5708 = vmatmul.f32.vlgmr.msrb.gmra.mxu3 %v5631_v18  ;;  %v5603_v49 = vpop.f32.mrf.mxu3  ;;  %v5942_v36 = vand.u32 4294901760, %v17216_v47 }
 0xa26   : > { %5730 = vmatpush.xpose.msra.mxu0 %v5655_v45  ;;  %v5656_v26 = vsub.f32 %v5654_v48, %v5655_v45 }
 0xa27   : > { %v5579_v54 = vadd.f32 %v5578_v52, %v5546_v40  ;;  %5684 = vmatmul.f32.vlgmr.msrb.gmra.mxu2 %v5630_v31  ;;  %v5969_v27 = vsub.f32 %v17216_v47, %v5942_v36 }
 0xa28   : > { %v5657_v6 = vand.u32 4294901760, %v5656_v26 }
 0xa29   : > { %v5604_v10 = vadd.f32 %v5603_v49, %v5579_v54  ;;  %v5970_v44 = vand.u32 4294901760, %v5969_v27 }
 0xa2a   : > { %5658 = vmatpush.xpose.msrb.mxu1 %v5657_v6 }
 0xa2b   : > { %v5774_v30 = vsel %vm2616_vm4, %v5604_v10, 0  ;;  %v5971_v45 = vsub.f32 %v5969_v27, %v5970_v44 }
 0xa2c   : > { %v5791_v11 = vand.u32 4294901760, %v5774_v30 }
 0xa2d   : > { %5660 = vmatmul.f32.vlgmr.msrb.gmra.mxu1 %v5629_v34  ;;  %5732 = vmatmul.f32.vlgmr.msra.gmra.mxu0 %v5629_v34  ;;  %v5972_v40 = vand.u32 4294901760, %v5971_v45  ;;  %v6123_v45 = vld [vmem:[%s20796_s7 + $0x18] sm:$0xff]  ;;  %s20805_s7 = sld [smem:[#allocation40_spill]] }
 0xa2e   : > { %5752 = vmatpush.xpose.msra.mxu1 %v5627_v15  ;;  %v5818_v7 = vsub.f32 %v5774_v30, %v5791_v11  ;;  %5792 = vmatpush.msra.mxu2 %v5791_v11 }
 0xa30   : > { %5845 = vmatpush.msrb.mxu0 %v5818_v7  ;;  %v5819_v22 = vand.u32 4294901760, %v5818_v7 }
 0xa32   : > { %5868 = vmatpush.msrb.mxu1 %v5791_v11  ;;  %5894 = vmatpush.msrb.mxu2 %v5819_v22  ;;  %v5820_v16 = vsub.f32 %v5818_v7, %v5819_v22 }
 0xa33   : > { %5943 = vmatpush.msra.mxu0 %v5942_v36 }
 0xa34   : > { %v5821_v17 = vand.u32 4294901760, %v5820_v16 }
 0xa35   : > { %5754 = vmatmul.f32.vlgmr.msra.gmra.mxu1 %v5629_v34 }
 0xa36   : > { %5822 = vmatpush.msra.mxu3 %v5821_v17  ;;  %5973 = vmatpush.msra.mxu1 %v5972_v40  ;;  %v6143_v40 = vand.u32 4294901760, %v6123_v45 }
 0xa38   : > { %5916 = vmatpush.msrb.mxu3 %v5791_v11 }
 0xaa2   : > { %v5635_v19 = vpop.f32.mrf.mxu0 }
 0xaa8   : > { %v5709_v8 = vpop.f32.mrf.mxu3 }
 0xaaa   : > { %v5661_v28 = vpop.f32.mrf.mxu1  ;;  %v5685_v25 = vpop.f32.mrf.mxu2 }
 0xaab   : > { %v5662_v29 = vadd.f32 %v5661_v28, %v5635_v19  ;;  %v5733_v53 = vpop.f32.mrf.mxu0 }
 0xaad   : > { %v5686_v23 = vadd.f32 %v5685_v25, %v5662_v29 }
 0xaaf   : > { %v5710_v12 = vadd.f32 %v5709_v8, %v5686_v23  ;;  %v3723_v8 = vadd.f32 %v18875_v57, %v18879_v59 }
 0xab1   : > { %v5734_v24 = vadd.f32 %v5733_v53, %v5710_v12  ;;  %v3747_v12 = vadd.f32 %v18873_v56, %v3723_v8 }
 0xab2   : > { %v5755_v31 = vpop.f32.mrf.mxu1 }
 0xab3   : > { %v5756_v20 = vadd.f32 %v5755_v31, %v5734_v24  ;;  %v3771_v53 = vadd.f32 %v18877_v58, %v3747_v12 }
 0xab5   : > { %v5758_v35 = vmul.f32 0.35355338, %v5756_v20  ;;  %v3795_v24 = vadd.f32 %v18887_v63, %v3771_v53 }
 0xab7   : > { %v5759_v55 = vsel %vm2600_vm5, %v5758_v35, -inf  ;;  %v3817_v31 = vadd.f32 %v18881_v60, %v3795_v24 }
 0xab8   : > { %5760 = vmax.xlane.f32.xlu0 %v5759_v55  ;;  %v4924_v55 = vadd.f32 %v19085_v32, %v19087_v39 }
 0xab9   : > { %v3846_v20 = vadd.f32 %v18883_v61, %v3817_v31 }
 0xb2b   : > { %v5761_v4 = vpop.xlane.xlu0 %5760 }
 0xb2c   : > { %v5762_v33 = vsub.f32 %v5758_v35, %v5761_v4  ;;  %v3872_v35 = vadd.f32 %v18885_v62, %v3846_v20 }
 0xb2e   : > { %v5763_v34 = vmul.f32 1.442695, %v5762_v33  ;;  %v3896_v4 = vadd.f32 %v18895_v3, %v3872_v35  ;;  %v4948_v33 = vadd.f32 %v19089_v50, %v4924_v55 }
 0xb30   : > { %17528 = vpow2.f32 %v5763_v34  ;;  %v3920_v56 = vadd.f32 %v18889_v0, %v3896_v4  ;;  %v4972_v58 = vadd.f32 %v19093_v51, %v4948_v33  ;;  %v6319_v4 = vld [vmem:[%s20798_s8 + $0x18] sm:$0xff] }
 0xb31   : > { %v19142_v33 = vand.u32 4294901760, %v6319_v4 }
 0xb32   : > { %v4996_v60 = vadd.f32 %v19096_v41, %v4972_v58  ;;  %v3944_v62 = vadd.f32 %v18891_v1, %v3920_v56  ;;  %v17864_v1 = vmov 32.0   ;;  %v6317_v58 = vld [vmem:[%s20798_s8 + $0x8] sm:$0xff] }
 0xb34   : > { %v5018_v32 = vadd.f32 %v19091_v46, %v4996_v60  ;;  %v3966_v50 = vadd.f32 %v18893_v2, %v3944_v62 }
 0xb36   : > { %v17529_v42 = vpop.eup %17528 }
 0xb37   : > { %v5765_v18 = vsel %vm2600_vm5, %v17529_v42, 0.0 }
 0xb38   : > { %5766 = vadd.xlane.f32.xlu1 %v5765_v18 }
 0xbab   : > { %v5767_v5 = vpop.xlane.xlu1 %5766 }
 0xbac   : > { %17530 = vrcp.f32 %v5767_v5 }
 0xbad   : > { %17532 = vrcp.f32 %v17864_v1 }
 0xbb2   : > { %v17531_v9 = vpop.eup %17530 }
 0xbb3   : > { %v5769_v13 = vmul.f32 %v17531_v9, %v17529_v42  ;;  %v5020_v9 = vadd.f32 %v5018_v32, %v3966_v50  ;;  %v17533_v46 = vpop.eup %17532 }
 0xbb4   : > { %vm6089_vm8 = vweird.f32 %v17533_v46 }
 0xbb5   : > { %v5771_v14 = vsel %vm2612_vm6, %v5769_v13, 0  ;;  %v17473_v13 = vld [vmem:[#allocation5] ss:$0 sm:$0xff] }
 0xbb6   : > { %v5793_v38 = vand.u32 4294901760, %v5771_v14 }
 0xbb8   : > { %v5794_v43 = vsub.f32 %v5771_v14, %v5793_v38  ;;  %5824 = vmatmul.f32.vlgmr.msra.gmra.mxu3 %v5793_v38 }
 0xbb9   : > { %6019 = vmatpush.msra.mxu3 %v5942_v36 }
 0xbba   : > { %5848 = vmatmul.f32.vlgmr.msrb.gmra.mxu0 %v5794_v43  ;;  %v5795_v15 = vand.u32 4294901760, %v5794_v43 }
 0xbbb   : > { %6045 = vmatpush.msrb.mxu0 %v5970_v44 }
 0xbbc   : > { %5872 = vmatmul.f32.vlgmr.msrb.gmra.mxu1 %v5795_v15  ;;  %v5796_v37 = vsub.f32 %v5794_v43, %v5795_v15  ;;  %v6085_v43 = vmul.f32 32.0, %v17533_v46 }
 0xbbd   : > { %6067 = vmatpush.msrb.mxu1 %v5942_v36 }
 0xbbe   : > { %v5797_v48 = vand.u32 4294901760, %v5796_v37  ;;  %v6086_v2 = vsub.f32 1.0, %v6085_v43 }
 0xbc0   : > { %5798 = vmatmul.f32.vlgmr.msra.gmra.mxu2 %v5797_v48  ;;  %5918 = vmatmul.f32.vlgmr.msrb.gmra.mxu3 %v5793_v38  ;;  %v6087_v15 = vmul.f32 %v17533_v46, %v6086_v2 }
 0xbc1   : > { %5996 = vmatpush.msra.mxu2 %v5969_v27 }
 0xbc2   : > { %v6088_v37 = vadd.f32 %v17533_v46, %v6087_v15 }
 0xbc4   : > { %v19128_v48 = vsel %vm6089_vm8, %v17533_v46, %v6088_v37 }
 0xbc8   : > { %5896 = vmatmul.f32.vlgmr.msrb.gmra.mxu2 %v5793_v38 }
 0xbc9   : > { %6144 = vmatpush.msrb.mxu2 %v6143_v40 }
 0xc37   : > { %v5849_v49 = vpop.f32.mrf.mxu0 }
 0xc39   : > { %v5873_v10 = vpop.f32.mrf.mxu1 }
 0xc3b   : > { %v5825_v52 = vpop.f32.mrf.mxu3 }
 0xc43   : > { %v5799_v26 = vpop.f32.mrf.mxu2  ;;  %v5919_v22 = vpop.f32.mrf.mxu3 }
 0xc44   : > { %v5826_v54 = vadd.f32 %v5825_v52, %v5799_v26  ;;  %v6122_v52 = vld [vmem:[%s20797_s26 + $0x10] sm:$0xff]  ;;  %v6173_v26 = vsub.f32 %v6123_v45, %v6143_v40  ;;  %v17475_v45 = vld [vmem:[%s20800_s22] ss:$0 sm:$0xff]  ;;  %s20807_s22 = sld [smem:[#allocation42_spill]] }
 0xc46   : > { %v5850_v6 = vadd.f32 %v5849_v49, %v5826_v54  ;;  %v6145_v54 = vand.u32 4294901760, %v6122_v52  ;;  %v6121_v49 = vld [vmem:[%s20797_s26 + $0x8] sm:$0xff] }
 0xc48   : > { %v5874_v30 = vadd.f32 %v5873_v10, %v5850_v6  ;;  %v6174_v6 = vand.u32 4294901760, %v6173_v26  ;;  %v6179_v10 = vsub.f32 %v6122_v52, %v6145_v54  ;;  %6146 = vmatpush.msrb.mxu2 %v6145_v54 }
 0xc4b   : > { %v5897_v11 = vpop.f32.mrf.mxu2 }
 0xc4c   : > { %v5898_v7 = vadd.f32 %v5897_v11, %v5874_v30  ;;  %v6147_v30 = vand.u32 4294901760, %v6121_v49  ;;  %v6120_v11 = vld [vmem:[%s20797_s26] sm:$0xff] }
 0xc4e   : > { %v5920_v16 = vadd.f32 %v5919_v22, %v5898_v7  ;;  %v6175_v7 = vsub.f32 %v6173_v26, %v6174_v6  ;;  %v6180_v22 = vand.u32 4294901760, %v6179_v10  ;;  %6148 = vmatpush.msrb.mxu2 %v6147_v30 }
 0xc50   : > { %v5925_v17 = vsel %vm2446_vm3, %v5920_v16, 0  ;;  %v6185_v16 = vsub.f32 %v6121_v49, %v6147_v30 }
 0xc51   : > { %v5944_v19 = vand.u32 4294901760, %v5925_v17 }
 0xc53   : > { %v5945_v28 = vsub.f32 %v5925_v17, %v5944_v19  ;;  %5975 = vmatmul.f32.vlgmr.msra.gmra.mxu1 %v5944_v19  ;;  %v6149_v17 = vand.u32 4294901760, %v6120_v11 }
 0xc54   : > { %6244 = vmatpush.msra.mxu1 %v6143_v40 }
 0xc55   : > { %v5946_v29 = vand.u32 4294901760, %v5945_v28  ;;  %5999 = vmatmul.f32.vlgmr.msra.gmra.mxu2 %v5945_v28 }
 0xc56   : > { %6246 = vmatpush.msra.mxu1 %v6145_v54  ;;  %6150 = vmatpush.msrb.mxu2 %v6149_v17 }
 0xc57   : > { %v5947_v25 = vsub.f32 %v5945_v28, %v5946_v29  ;;  %6023 = vmatmul.f32.vlgmr.msra.gmra.mxu3 %v5946_v29  ;;  %v6181_v28 = vsub.f32 %v6179_v10, %v6180_v22  ;;  %v6186_v29 = vand.u32 4294901760, %v6185_v16 }
 0xc58   : > { %6248 = vmatpush.msra.mxu1 %v6147_v30  ;;  %6273 = vmatpush.msra.mxu2 %v6174_v6 }
 0xc59   : > { %v5948_v23 = vand.u32 4294901760, %v5947_v25  ;;  %v6191_v25 = vsub.f32 %v6120_v11, %v6149_v17  ;;  %v6187_v8 = vsub.f32 %v6185_v16, %v6186_v29 }
 0xc5a   : > { %6250 = vmatpush.msra.mxu1 %v6149_v17  ;;  %6277 = vmatpush.msra.mxu2 %v6180_v22 }
 0xc5b   : > { %5949 = vmatmul.f32.vlgmr.msra.gmra.mxu0 %v5948_v23  ;;  %6069 = vmatmul.f32.vlgmr.msrb.gmra.mxu1 %v5944_v19  ;;  %v6182_v23 = vand.u32 4294901760, %v6181_v28  ;;  %v6192_v12 = vand.u32 4294901760, %v6191_v25  ;;  %v6188_v53 = vand.u32 4294901760, %v6187_v8  ;;  %v6548_v28 = vld [vmem:[%s20801_s2 + $0x18] sm:$0xff] }
 0xc5c   : > { %6215 = vmatpush.msra.mxu0 %v6173_v26  ;;  %6281 = vmatpush.msra.mxu2 %v6186_v29  ;;  %v6547_v29 = vld [vmem:[%s20801_s2 + $0x10] sm:$0xff] }
 0xc5d   : > { %v6193_v24 = vsub.f32 %v6191_v25, %v6192_v12  ;;  %v19224_v8 = vand.u32 4294901760, %v6547_v29 }
 0xc5e   : > { %6218 = vmatpush.msra.mxu0 %v6179_v10  ;;  %6285 = vmatpush.msra.mxu2 %v6192_v12 }
 0xc5f   : > { %v6194_v31 = vand.u32 4294901760, %v6193_v24 }
 0xc60   : > { %6221 = vmatpush.msra.mxu0 %v6185_v16 }
 0xc62   : > { %6224 = vmatpush.msra.mxu0 %v6191_v25  ;;  %v6546_v25 = vld [vmem:[%s20801_s2 + $0x8] sm:$0xff] }
 0xc63   : > { %6047 = vmatmul.f32.vlgmr.msrb.gmra.mxu0 %v5944_v19  ;;  %v6176_v19 = vand.u32 4294901760, %v6175_v7  ;;  %v19226_v12 = vand.u32 4294901760, %v6546_v25 }
 0xc64   : > { %6342 = vmatpush.msrb.mxu0 %v19142_v33 }
 0xc65   : > { %6177 = vmatpush.msrb.mxu3 %v6176_v19 }
 0xc67   : > { %6183 = vmatpush.msrb.mxu3 %v6182_v23  ;;  %v6565_v23 = vand.u32 4294901760, %v6548_v28 }
 0xc69   : > { %6189 = vmatpush.msrb.mxu3 %v6188_v53  ;;  %v6545_v53 = vld [vmem:[%s20801_s2] sm:$0xff] }
 0xc6b   : > { %6195 = vmatpush.msrb.mxu3 %v6194_v31 }
 0xc6d   : > { %6304 = vmatpush.msra.mxu3 %v6143_v40 }
 0xc6f   : > { %6306 = vmatpush.msra.mxu3 %v6145_v54  ;;  %v17578_v54 = vld [vmem:[%s18326_s28 + $0x8] sm:$0xff] }
 0xc70   : > { %v6327_v49 = vsel %vm1871_vm2, %v17578_v54, 0 }
 0xc71   : > { %6308 = vmatpush.msra.mxu3 %v6147_v30  ;;  %v19198_v11 = vand.u32 4294901760, %v6327_v49 }
 0xc73   : > { %6310 = vmatpush.msra.mxu3 %v6149_v17  ;;  %v19208_v22 = vsub.f32 %v6327_v49, %v19198_v11 }
 0xc75   : > { %v19230_v24 = vand.u32 4294901760, %v19208_v22 }
 0xcd0   : > { %v5976_v57 = vpop.f32.mrf.mxu1 }
 0xcd8   : > { %v5950_v59 = vpop.f32.mrf.mxu0  ;;  %v6000_v34 = vpop.f32.mrf.mxu2 }
 0xcd9   : > { %v5977_v63 = vadd.f32 %v5976_v57, %v5950_v59  ;;  %v6070_v5 = vpop.f32.mrf.mxu1  ;;  %v6318_v57 = vld [vmem:[%s20798_s8 + $0x10] sm:$0xff]  ;;  %v19147_v59 = vsub.f32 %v6319_v4, %v19142_v33  ;;  %v6609_v4 = vsub.f32 %v6547_v29, %v19224_v8 }
 0xcda   : > { %v6024_v42 = vpop.f32.mrf.mxu3  ;;  %v19149_v56 = vand.u32 4294901760, %v6318_v57 }
 0xcdb   : > { %v6001_v61 = vadd.f32 %v6000_v34, %v5977_v63  ;;  %v6380_v63 = vand.u32 4294901760, %v19147_v59  ;;  %v19154_v34 = vand.u32 4294901760, %v6317_v58 }
 0xcdc   : > { %6344 = vmatpush.msrb.mxu0 %v19149_v56  ;;  %v19157_v60 = vsub.f32 %v6318_v57, %v19149_v56  ;;  %v6615_v57 = vsub.f32 %v6546_v25, %v19226_v12 }
 0xcdd   : > { %v6025_v39 = vadd.f32 %v6024_v42, %v6001_v61  ;;  %v6316_v61 = vld [vmem:[%s20798_s8] sm:$0xff]  ;;  %v6381_v42 = vsub.f32 %v19147_v59, %v6380_v63 }
 0xcde   : > { %6346 = vmatpush.msrb.mxu0 %v19154_v34  ;;  %v6386_v32 = vand.u32 4294901760, %v19157_v60 }
 0xce0   : > { %v6048_v3 = vpop.f32.mrf.mxu0 }
 0xce1   : > { %v6049_v18 = vadd.f32 %v6048_v3, %v6025_v39  ;;  %v19163_v39 = vand.u32 4294901760, %v6316_v61  ;;  %v19166_v3 = vsub.f32 %v6317_v58, %v19154_v34 }
 0xce3   : > { %v6071_v0 = vadd.f32 %v6070_v5, %v6049_v18  ;;  %v6382_v18 = vand.u32 4294901760, %v6381_v42  ;;  %v6387_v5 = vsub.f32 %v19157_v60, %v6386_v32  ;;  %6348 = vmatpush.msrb.mxu0 %v19163_v39 }
 0xce5   : > { %v6073_v51 = vadd.f32 %v6071_v0, %v5020_v9  ;;  %v6392_v9 = vand.u32 4294901760, %v19166_v3  ;;  %v19172_v0 = vsub.f32 %v6316_v61, %v19163_v39  ;;  %6383 = vmatpush.msrb.mxu1 %v6382_v18  ;;  %v6616_v61 = vand.u32 4294901760, %v6615_v57 }
 0xce7   : > { %v6078_v14 = vadd.f32 %v17473_v13, %v6073_v51  ;;  %v6388_v51 = vand.u32 4294901760, %v6387_v5 }
 0xce9   : > { %v6079_v41 = vadd.f32 %v6078_v14, %v18342_v21  ;;  %v6393_v14 = vsub.f32 %v19166_v3, %v6392_v9  ;;  %6389 = vmatpush.msrb.mxu1 %v6388_v51  ;;  %v17476_v51 = vld [vmem:[%s20802_s15] ss:$0 sm:$0xff]  ;;  %s20808_s15 = sld [smem:[#allocation38_spill]] }
 0xceb   : > { %v6081_v38 = vsel %vm6080_vm7, %v6079_v41, 0.0  ;;  %v6394_v46 = vand.u32 4294901760, %v6393_v14 }
 0xcec   : > { %6082 = vadd.xlane.f32.xlu2 %v6081_v38  ;;  %v1691_v38 = vld [vmem:[%s18326_s28] sm:$0xff]  ;;  %s20804_s28 = sld [smem:[#allocation37_spill]] }
 0xced   : > { %v6325_v15 = vsel %vm1871_vm2, %v1691_v38, 0  ;;  %6395 = vmatpush.msrb.mxu1 %v6394_v46 }
 0xd5f   : > { %v6083_v47 = vpop.xlane.xlu2 %6082 }
 0xd60   : > { %v6091_v36 = vmul.f32 %v19128_v48, %v6083_v47 }
 0xd62   : > { %v19131_v21 = vsub.f32 %v6079_v41, %v6091_v36  ;;  %v6398_v41 = vand.u32 4294901760, %v19172_v0  ;;  %v17474_v36 = vld [vmem:[%s20799_s16] ss:$0 sm:$0xff]  ;;  %s20806_s16 = smov %s20805_s7 }
 0xd64   : > { %v6093_v27 = vmul.f32 %v19131_v21, %v19131_v21  ;;  %v6399_v43 = vsub.f32 %v19172_v0, %v6398_v41 }
 0xd66   : > { %v6094_v44 = vsel %vm6080_vm7, %v6093_v27, 0.0  ;;  %v6400_v37 = vand.u32 4294901760, %v6399_v43  ;;  %v19182_v27 = vand.u32 4294901760, %v6325_v15 }
 0xd67   : > { %6095 = vadd.xlane.f32.xlu0 %v6094_v44 }
 0xd68   : > { %6401 = vmatpush.msrb.mxu1 %v6400_v37  ;;  %v19187_v26 = vsub.f32 %v6325_v15, %v19182_v27  ;;  %v17477_v15 = vld [vmem:[%s20804_s28] ss:$0 sm:$0xff] }
 0xd6a   : > { %v19196_v30 = vand.u32 4294901760, %v19187_v26 }
 0xd6c   : > { %v6352_v17 = vsub.f32 %v19187_v26, %v19196_v30 }
 0xdda   : > { %v6096_v20 = vpop.xlane.xlu0 %6095 }
 0xddb   : > { %v6097_v35 = vmul.f32 %v6096_v20, %v19128_v48  ;;  %v19234_v20 = vand.u32 4294901760, %v6352_v17 }
 0xddd   : > { %v6098_v55 = vadd.f32 1e-05, %v6097_v35  ;;  %v19237_v35 = vand.u32 4294901760, %v6545_v53 }
 0xddf   : > { %17534 = vrsqrt.f32 %v6098_v55  ;;  %vm6105_vm10 = vweird.f32 %v6098_v55  ;;  %v6621_v58 = vsub.f32 %v6545_v53, %v19237_v35 }
 0xde5   : > { %v17535_v62 = vpop.eup %17534 }
 0xde6   : > { %v6100_v50 = vmul.f32 %v17535_v62, %v6098_v55  ;;  %vm6106_vm9 = vweird.f32 %v17535_v62  ;;  %v6603_v55 = vsub.f32 %v6548_v28, %v6565_v23 }
 0xde7   : > { %vm6107_vm11 = vmor %vm6105_vm10, %vm6106_vm9  ;;  %vm12033_vm9 = vcmask 125952   ;;  %vm12045_vm10 = vcmask 130048  }
 0xde8   : > { %v6101_v13 = vmul.f32 %v17535_v62, %v6100_v50  ;;  %v6622_v50 = vand.u32 4294901760, %v6621_v58 }
 0xdea   : > { %v6102_v1 = vmul.f32 0.5, %v6101_v13  ;;  %v6623_v5 = vsub.f32 %v6621_v58, %v6622_v50 }
 0xdec   : > { %v6103_v2 = vsub.f32 1.5, %v6102_v1 }
 0xdee   : > { %v6104_v47 = vmul.f32 %v17535_v62, %v6103_v2 }
 0xdf0   : > { %v6108_v44 = vsel %vm6107_vm11, %v17535_v62, %v6104_v47  ;;  %v6360_v62 = vsub.f32 %v19208_v22, %v19230_v24 }
 0xdf1   : > { %v6109_v40 = vmul.f32 %v6108_v44, %v19131_v21 }
 0xdf2   : > { %v19256_v18 = vand.u32 4294901760, %v6360_v62 }
 0xdf3   : > { %v6114_v52 = vmul.f32 %v17474_v36, %v6109_v40 }
 0xdf5   : > { %v19191_v6 = vadd.f32 %v17475_v45, %v6114_v52 }
 0xdf7   : > { %v6129_v10 = vsel %vm1871_vm2, %v19191_v6, 0 }
 0xdf8   : > { %v19200_v21 = vand.u32 4294901760, %v6129_v10 }
 0xdfa   : > { %v19203_v7 = vsub.f32 %v6129_v10, %v19200_v21  ;;  %6197 = vmatmul.f32.vlgmr.msrb.gmra.mxu3 %v19200_v21 }
 0xdfb   : > { %6459 = vmatpush.msrb.mxu3 %v19142_v33 }
 0xdfc   : > { %6227 = vmatmul.f32.vlgmr.msra.gmra.mxu0 %v19203_v7  ;;  %v19212_v16 = vand.u32 4294901760, %v19203_v7 }
 0xdfd   : > { %6461 = vmatpush.msrb.mxu3 %v19149_v56  ;;  %6494 = vmatpush.msra.mxu0 %v6380_v63  ;;  %v6610_v63 = vand.u32 4294901760, %v6609_v4 }
 0xdfe   : > { %6254 = vmatmul.f32.vlgmr.msra.gmra.mxu1 %v19212_v16  ;;  %v6154_v19 = vsub.f32 %v19203_v7, %v19212_v16 }
 0xdff   : > { %6463 = vmatpush.msrb.mxu3 %v19154_v34  ;;  %6498 = vmatpush.msra.mxu0 %v6386_v32  ;;  %v6611_v32 = vsub.f32 %v6609_v4, %v6610_v63 }
 0xe00   : > { %v19232_v31 = vand.u32 4294901760, %v6154_v19  ;;  %6529 = vmatpush.msra.mxu1 %v19142_v33  ;;  %v6604_v33 = vand.u32 4294901760, %v6603_v55 }
 0xe01   : > { %6465 = vmatpush.msrb.mxu3 %v19163_v39  ;;  %6502 = vmatpush.msra.mxu0 %v6392_v9 }
 0xe02   : > { %6156 = vmatmul.f32.vlgmr.msrb.gmra.mxu2 %v19232_v31  ;;  %6312 = vmatmul.f32.vlgmr.msra.gmra.mxu3 %v19200_v21  ;;  %v6605_v42 = vsub.f32 %v6603_v55, %v6604_v33 }
 0xe03   : > { %6425 = vmatpush.msrb.mxu2 %v19147_v59  ;;  %6531 = vmatpush.msra.mxu1 %v19149_v56  ;;  %v6617_v56 = vsub.f32 %v6615_v57, %v6616_v61 }
 0xe04   : > { %6354 = vmatmul.f32.vlgmr.msrb.gmra.mxu0 %v19234_v20  ;;  %v6606_v59 = vand.u32 4294901760, %v6605_v42 }
 0xe05   : > { %6428 = vmatpush.msrb.mxu2 %v19157_v60  ;;  %6506 = vmatpush.msra.mxu0 %v6398_v41  ;;  %v6612_v60 = vand.u32 4294901760, %v6611_v32 }
 0xe06   : > { %6403 = vmatmul.f32.vlgmr.msrb.gmra.mxu1 %v19182_v27  ;;  %6607 = vmatpush.msra.mxu3 %v6606_v59  ;;  %v17478_v59 = vld [vmem:[%s20805_s7] ss:$0 sm:$0xff]  ;;  %s20809_s7 = sld [smem:[#allocation47_spill]] }
 0xe07   : > { %6649 = vmatpush.msrb.mxu0 %v6603_v55  ;;  %6431 = vmatpush.msrb.mxu2 %v19166_v3  ;;  %v6618_v3 = vand.u32 4294901760, %v6617_v56 }
 0xe08   : > { %6533 = vmatpush.msra.mxu1 %v19154_v34  ;;  %6613 = vmatpush.msra.mxu3 %v6612_v60  ;;  %v6624_v34 = vand.u32 4294901760, %v6623_v5 }
 0xe09   : > { %6652 = vmatpush.msrb.mxu0 %v6609_v4  ;;  %6434 = vmatpush.msrb.mxu2 %v19172_v0 }
 0xe0a   : > { %6535 = vmatpush.msra.mxu1 %v19163_v39  ;;  %6287 = vmatmul.f32.vlgmr.msra.gmra.mxu2 %v19200_v21 }
 0xe0b   : > { %6469 = vmatmul.f32.vlgmr.msrb.gmra.mxu3 %v19196_v30  ;;  %6566 = vmatpush.msra.mxu2 %v6565_v23 }
 0xe0c   : > { %6362 = vmatmul.f32.gmra.mxu0 %v19256_v18  ;;  %6683 = vmatpush.msrb.mxu1 %v6565_v23  ;;  %s20810_s18 = smov %s20809_s7 }
 0xe0d   : > { %6568 = vmatpush.msra.mxu2 %v19224_v8  ;;  %6655 = vmatpush.msrb.mxu0 %v6615_v57 }
 0xe0e   : > { %6407 = vmatmul.f32.gmra.mxu1 %v19198_v11  ;;  %6619 = vmatpush.msra.mxu3 %v6618_v3 }
 0xe0f   : > { %6570 = vmatpush.msra.mxu2 %v19226_v12  ;;  %6685 = vmatpush.msrb.mxu1 %v19224_v8 }
 0xe10   : > { %6658 = vmatpush.msrb.mxu0 %v6621_v58  ;;  %6625 = vmatpush.msra.mxu3 %v6624_v34 }
 0xe11   : > { %6572 = vmatpush.msra.mxu2 %v19237_v35  ;;  %6687 = vmatpush.msrb.mxu1 %v19226_v12 }
 0xe12   : > { %6437 = vmatmul.f32.vlgmr.msrb.gmra.mxu2 %v19187_v26  ;;  %6753 = vmatpush.msrb.mxu3 %v6565_v23 }
 0xe13   : > { %6475 = vmatmul.f32.gmra.mxu3 %v19230_v24  ;;  %6718 = vmatpush.msrb.mxu2 %v6604_v33 }
 0xe14   : > { %6508 = vmatmul.f32.vlgmr.msra.gmra.mxu0 %v19182_v27  ;;  %6755 = vmatpush.msrb.mxu3 %v19224_v8 }
 0xe15   : > { %6722 = vmatpush.msrb.mxu2 %v6610_v63  ;;  %6689 = vmatpush.msrb.mxu1 %v19237_v35 }
 0xe16   : > { %6537 = vmatmul.f32.vlgmr.msra.gmra.mxu1 %v19182_v27  ;;  %6757 = vmatpush.msrb.mxu3 %v19226_v12 }
 0xe17   : > { %6726 = vmatpush.msrb.mxu2 %v6616_v61 }
 0xe18   : > { %6759 = vmatpush.msrb.mxu3 %v19237_v35 }
 0xe19   : > { %6730 = vmatpush.msrb.mxu2 %v6622_v50 }
 0xe1a   : > { %6442 = vmatmul.f32.gmra.mxu2 %v19208_v22 }
 0xe1b   : > { %6627 = vmatmul.f32.vlgmr.msra.gmra.mxu3 %v19182_v27 }
 0xe1c   : > { %6512 = vmatmul.f32.gmra.mxu0 %v19198_v11 }
 0xe1e   : > { %6541 = vmatmul.f32.gmra.mxu1 %v19198_v11 }
 0xe22   : > { %6578 = vmatmul.f32.vlgmr.msra.gmra.mxu2 %v19234_v20 }
 0xe23   : > { %6631 = vmatmul.f32.gmra.mxu3 %v19198_v11 }
 0xe24   : > { %6661 = vmatmul.f32.vlgmr.msrb.gmra.mxu0 %v19187_v26 }
 0xe26   : > { %6693 = vmatmul.f32.vlgmr.msrb.gmra.mxu1 %v19196_v30 }
 0xe2a   : > { %6586 = vmatmul.f32.gmra.mxu2 %v19256_v18 }
 0xe2b   : > { %6761 = vmatmul.f32.vlgmr.msrb.gmra.mxu3 %v19182_v27 }
 0xe2c   : > { %6666 = vmatmul.f32.gmra.mxu0 %v19208_v22 }
 0xe2e   : > { %6699 = vmatmul.f32.gmra.mxu1 %v19230_v24 }
 0xe32   : > { %6732 = vmatmul.f32.vlgmr.msrb.gmra.mxu2 %v19182_v27 }
 0xe33   : > { %6765 = vmatmul.f32.gmra.mxu3 %v19198_v11 }
 0xe3a   : > { %6736 = vmatmul.f32.gmra.mxu2 %v19198_v11 }
 0xe79   : > { %v6228_v39 = vpop.f32.mrf.mxu0 }
 0xe7b   : > { %v6255_v9 = vpop.f32.mrf.mxu1 }
 0xe7d   : > { %v6198_v0 = vpop.f32.mrf.mxu3 }
 0xe81   : > { %v6355_v13 = vpop.f32.mrf.mxu0 }
 0xe82   : > { %v6356_v45 = vadd.f32 %v17477_v15, %v6355_v13 }
 0xe83   : > { %v6404_v14 = vpop.f32.mrf.mxu1 }
 0xe84   : > { %v6405_v52 = vadd.f32 %v6404_v14, %v6356_v45 }
 0xe85   : > { %v6157_v41 = vpop.f32.mrf.mxu2  ;;  %v6313_v1 = vpop.f32.mrf.mxu3 }
 0xe86   : > { %v6158_v38 = vadd.f32 %v17476_v51, %v6157_v41 }
 0xe88   : > { %v6199_v46 = vadd.f32 %v6198_v0, %v6158_v38 }
 0xe89   : > { %v6363_v2 = vpop.f32.mrf.mxu0 }
 0xe8a   : > { %v6229_v43 = vadd.f32 %v6228_v39, %v6199_v46  ;;  %v6364_v28 = vadd.f32 %v17477_v15, %v6363_v2 }
 0xe8b   : > { %v6408_v47 = vpop.f32.mrf.mxu1 }
 0xe8c   : > { %v6256_v44 = vadd.f32 %v6255_v9, %v6229_v43  ;;  %v6409_v12 = vadd.f32 %v6408_v47, %v6364_v28 }
 0xe8d   : > { %v6288_v37 = vpop.f32.mrf.mxu2 }
 0xe8e   : > { %v6470_v36 = vpop.f32.mrf.mxu3  ;;  %v6289_v40 = vadd.f32 %v6288_v37, %v6256_v44 }
 0xe90   : > { %v6314_v17 = vadd.f32 %v6313_v1, %v6289_v40 }
 0xe91   : > { %v6509_v49 = vpop.f32.mrf.mxu0 }
 0xe92   : > { %v6770_v8 = vsel %vm2446_vm3, %v6314_v17, 0 }
 0xe93   : > { %v6538_v19 = vpop.f32.mrf.mxu1  ;;  %v19295_v55 = vand.u32 4294901760, %v6770_v8 }
 0xe95   : > { %v6438_v54 = vpop.f32.mrf.mxu2  ;;  %v6797_v62 = vsub.f32 %v6770_v8, %v19295_v55 }
 0xe96   : > { %v6439_v10 = vadd.f32 %v6438_v54, %v6405_v52  ;;  %v6476_v25 = vpop.f32.mrf.mxu3 }
 0xe97   : > { %v6798_v60 = vand.u32 4294901760, %v6797_v62 }
 0xe98   : > { %v6471_v29 = vadd.f32 %v6470_v36, %v6439_v10 }
 0xe99   : > { %v6513_v57 = vpop.f32.mrf.mxu0  ;;  %v6799_v51 = vsub.f32 %v6797_v62, %v6798_v60 }
 0xe9a   : > { %v6510_v23 = vadd.f32 %v6509_v49, %v6471_v29 }
 0xe9b   : > { %v6542_v61 = vpop.f32.mrf.mxu1  ;;  %v6800_v2 = vand.u32 4294901760, %v6799_v51 }
 0xe9c   : > { %v6539_v53 = vadd.f32 %v6538_v19, %v6510_v23 }
 0xe9d   : > { %v6443_v35 = vpop.f32.mrf.mxu2 }
 0xe9e   : > { %v6444_v4 = vadd.f32 %v6443_v35, %v6409_v12  ;;  %v6773_v58 = vsel %vm2446_vm3, %v6539_v53, 0  ;;  %v6628_v63 = vpop.f32.mrf.mxu3 }
 0xe9f   : > { %v6794_v32 = vand.u32 4294901760, %v6773_v58 }
 0xea0   : > { %v6477_v33 = vadd.f32 %v6476_v25, %v6444_v4 }
 0xea1   : > { %v6826_v39 = vsub.f32 %v6773_v58, %v6794_v32  ;;  %v6662_v13 = vpop.f32.mrf.mxu0 }
 0xea2   : > { %v6514_v42 = vadd.f32 %v6513_v57, %v6477_v33 }
 0xea3   : > { %v6827_v38 = vand.u32 4294901760, %v6826_v39  ;;  %v6694_v43 = vpop.f32.mrf.mxu1 }
 0xea4   : > { %v6543_v50 = vadd.f32 %v6542_v61, %v6514_v42 }
 0xea5   : > { %v6579_v56 = vpop.f32.mrf.mxu2  ;;  %v6828_v36 = vsub.f32 %v6826_v39, %v6827_v38 }
 0xea6   : > { %v6776_v5 = vsel %vm2446_vm3, %v6543_v50, 0  ;;  %v6580_v3 = vadd.f32 %v17478_v59, %v6579_v56  ;;  %v6632_v0 = vpop.f32.mrf.mxu3 }
 0xea7   : > { %v6792_v34 = vand.u32 4294901760, %v6776_v5  ;;  %v6829_v40 = vand.u32 4294901760, %v6828_v36  ;;  %v17218_v36 = vld [vmem:[%s20797_s26 + $0x28] sm:$0xff] }
 0xea8   : > { %v6629_v14 = vadd.f32 %v6628_v63, %v6580_v3 }
 0xea9   : > { %v6820_v9 = vsub.f32 %v6776_v5, %v6792_v34  ;;  %6793 = vmatpush.xpose.msra.mxu0 %v6792_v34  ;;  %6877 = vmatpush.xpose.msra.mxu3 %v6792_v34  ;;  %v6667_v54 = vpop.f32.mrf.mxu0 }
 0xeaa   : > { %v6663_v37 = vadd.f32 %v6662_v13, %v6629_v14 }
 0xeab   : > { %6852 = vmatpush.xpose.msra.mxu2 %v6820_v9  ;;  %v6821_v41 = vand.u32 4294901760, %v6820_v9  ;;  %v6700_v19 = vpop.f32.mrf.mxu1 }
 0xeac   : > { %v6695_v45 = vadd.f32 %v6694_v43, %v6663_v37  ;;  %v17220_v43 = vld [vmem:[%s20797_s26 + $0x38] sm:$0xff] }
 0xead   : > { %6795 = vmatpush.xpose.msra.mxu0 %v6794_v32  ;;  %6879 = vmatpush.xpose.msra.mxu3 %v6794_v32  ;;  %v6822_v1 = vsub.f32 %v6820_v9, %v6821_v41  ;;  %v6587_v46 = vpop.f32.mrf.mxu2 }
 0xeae   : > { %v6588_v15 = vadd.f32 %v17478_v59, %v6587_v46  ;;  %v6762_v52 = vpop.f32.mrf.mxu3 }
 0xeaf   : > { %6855 = vmatpush.xpose.msra.mxu2 %v6826_v39  ;;  %v6823_v47 = vand.u32 4294901760, %v6822_v1 }
 0xeb0   : > { %6801 = vmatmul.f32.vlgmr.msra.gmra.mxu0 %v6800_v2  ;;  %6883 = vmatmul.f32.vlgmr.msra.gmra.mxu3 %v6798_v60  ;;  %v6633_v44 = vadd.f32 %v6632_v0, %v6588_v15  ;;  %v19308_v2 = vand.u32 4294901760, %v17220_v43  ;;  %v17219_v15 = vld [vmem:[%s20797_s26 + $0x30] sm:$0xff] }
 0xeb1   : > { %6904 = vmatpush.xpose.msrb.mxu0 %v6821_v41  ;;  %6824 = vmatpush.xpose.msra.mxu1 %v6823_v47  ;;  %v19315_v47 = vand.u32 4294901760, %v17219_v15 }
 0xeb2   : > { %6858 = vmatmul.f32.vlgmr.msra.gmra.mxu2 %v6797_v62  ;;  %v6668_v17 = vadd.f32 %v6667_v54, %v6633_v44  ;;  %v19313_v37 = vsub.f32 %v17220_v43, %v19308_v2 }
 0xeb4   : > { %v6701_v29 = vadd.f32 %v6700_v19, %v6668_v17  ;;  %v7170_v44 = vand.u32 4294901760, %v19313_v37 }
 0xeb5   : > { %6908 = vmatpush.xpose.msrb.mxu0 %v6827_v38  ;;  %6830 = vmatpush.xpose.msra.mxu1 %v6829_v40  ;;  %v6733_v49 = vpop.f32.mrf.mxu2  ;;  %v19323_v40 = vsub.f32 %v17219_v15, %v19315_v47 }
 0xeb6   : > { %v6734_v10 = vadd.f32 %v6733_v49, %v6695_v45  ;;  %v6766_v8 = vpop.f32.mrf.mxu3  ;;  %v19320_v45 = vand.u32 4294901760, %v17218_v36  ;;  %v7171_v54 = vsub.f32 %v19313_v37, %v7170_v44 }
 0xeb7   : > { %v7176_v49 = vand.u32 4294901760, %v19323_v40 }
 0xeb8   : > { %6832 = vmatmul.f32.vlgmr.msra.gmra.mxu1 %v19295_v55  ;;  %6910 = vmatmul.f32.vlgmr.msrb.gmra.mxu0 %v19295_v55  ;;  %v6763_v28 = vadd.f32 %v6762_v52, %v6734_v10  ;;  %v17217_v52 = vld [vmem:[%s20797_s26 + $0x20] sm:$0xff]  ;;  %v19332_v17 = vsub.f32 %v17218_v36, %v19320_v45  ;;  %v7172_v19 = vand.u32 4294901760, %v7171_v54 }
 0xeb9   : > { %6929 = vmatpush.xpose.msrb.mxu1 %v6792_v34  ;;  %v19329_v10 = vand.u32 4294901760, %v17217_v52 }
 0xeba   : > { %v6973_v25 = vand.u32 4294901760, %v6763_v28 }
 0xebc   : > { %v7005_v53 = vsub.f32 %v6763_v28, %v6973_v25  ;;  %v7177_v28 = vsub.f32 %v19323_v40, %v7176_v49 }
 0xebd   : > { %6931 = vmatpush.xpose.msrb.mxu1 %v6794_v32  ;;  %v6737_v23 = vpop.f32.mrf.mxu2 }
 0xebe   : > { %v6738_v12 = vadd.f32 %v6737_v23, %v6701_v29  ;;  %v7006_v58 = vand.u32 4294901760, %v7005_v53  ;;  %v7182_v29 = vand.u32 4294901760, %v19332_v17  ;;  %v7178_v23 = vand.u32 4294901760, %v7177_v28 }
 0xec0   : > { %6933 = vmatmul.f32.vlgmr.msrb.gmra.mxu1 %v19295_v55  ;;  %v6767_v35 = vadd.f32 %v6766_v8, %v6738_v12  ;;  %v7007_v61 = vsub.f32 %v7005_v53, %v7006_v58  ;;  %v7183_v8 = vsub.f32 %v19332_v17, %v7182_v29 }
 0xec2   : > { %v6955_v4 = vsel %vm2616_vm4, %v6767_v35, 0  ;;  %v7008_v32 = vand.u32 4294901760, %v7007_v61  ;;  %v17223_v61 = vld [vmem:[%s20798_s8 + $0x28] sm:$0xff] }
 0xec3   : > { %v6971_v57 = vand.u32 4294901760, %v6955_v4 }
 0xec5   : > { %v6999_v33 = vsub.f32 %v6955_v4, %v6971_v57  ;;  %6972 = vmatpush.msrb.mxu2 %v6971_v57  ;;  %7056 = vmatpush.msra.mxu1 %v6971_v57 }
 0xec7   : > { %v7000_v63 = vand.u32 4294901760, %v6999_v33  ;;  %7031 = vmatpush.msra.mxu0 %v6999_v33  ;;  %6974 = vmatpush.msrb.mxu2 %v6973_v25 }
 0xec8   : > { %7058 = vmatpush.msra.mxu1 %v6973_v25 }
 0xec9   : > { %v7001_v62 = vsub.f32 %v6999_v33, %v7000_v63  ;;  %7034 = vmatpush.msra.mxu0 %v7005_v53  ;;  %7083 = vmatpush.msra.mxu2 %v7000_v63  ;;  %v7184_v53 = vand.u32 4294901760, %v7183_v8  ;;  %v17224_v63 = vld [vmem:[%s20798_s8 + $0x30] sm:$0xff] }
 0xeca   : > { %7173 = vmatpush.msrb.mxu1 %v7172_v19 }
 0xecb   : > { %v7002_v42 = vand.u32 4294901760, %v7001_v62  ;;  %7087 = vmatpush.msra.mxu2 %v7006_v58  ;;  %7140 = vmatpush.msrb.mxu0 %v19308_v2  ;;  %v17225_v58 = vld [vmem:[%s20798_s8 + $0x38] sm:$0xff]  ;;  %v19348_v62 = vand.u32 4294901760, %v17224_v63 }
 0xecc   : > { %7179 = vmatpush.msrb.mxu1 %v7178_v23  ;;  %v19344_v33 = vand.u32 4294901760, %v17225_v58 }
 0xecd   : > { %7003 = vmatpush.msrb.mxu3 %v7002_v42  ;;  %7142 = vmatpush.msrb.mxu0 %v19315_v47 }
 0xece   : > { %7185 = vmatpush.msrb.mxu1 %v7184_v53 }
 0xecf   : > { %7009 = vmatpush.msrb.mxu3 %v7008_v32  ;;  %7144 = vmatpush.msrb.mxu0 %v19320_v45  ;;  %v19351_v32 = vsub.f32 %v17225_v58, %v19344_v33 }
 0xed1   : > { %7108 = vmatpush.msra.mxu3 %v6971_v57  ;;  %7146 = vmatpush.msrb.mxu0 %v19329_v10 }
 0xed3   : > { %7110 = vmatpush.msra.mxu3 %v6973_v25  ;;  %v19338_v25 = vsub.f32 %v17217_v52, %v19329_v10 }
 0xed5   : > { %v7188_v12 = vand.u32 4294901760, %v19338_v25 }
 0xed7   : > { %v7189_v35 = vsub.f32 %v19338_v25, %v7188_v12 }
 0xed9   : > { %v7190_v4 = vand.u32 4294901760, %v7189_v35 }
 0xedb   : > { %7191 = vmatpush.msrb.mxu1 %v7190_v4 }
 0xf2d   : > { %v6802_v55 = vpop.f32.mrf.mxu0 }
 0xf33   : > { %v6884_v5 = vpop.f32.mrf.mxu3 }
 0xf35   : > { %v6833_v50 = vpop.f32.mrf.mxu1  ;;  %v6859_v56 = vpop.f32.mrf.mxu2 }
 0xf36   : > { %v6834_v59 = vadd.f32 %v6833_v50, %v6802_v55  ;;  %v6911_v34 = vpop.f32.mrf.mxu0  ;;  %v17222_v55 = vld [vmem:[%s20798_s8 + $0x20] sm:$0xff] }
 0xf38   : > { %v6860_v60 = vadd.f32 %v6859_v56, %v6834_v59  ;;  %v19354_v59 = vand.u32 4294901760, %v17223_v61 }
 0xf3a   : > { %v6885_v3 = vadd.f32 %v6884_v5, %v6860_v60  ;;  %v19358_v60 = vsub.f32 %v17224_v63, %v19348_v62  ;;  %v19360_v5 = vand.u32 4294901760, %v17222_v55 }
 0xf3c   : > { %v6912_v39 = vadd.f32 %v6911_v34, %v6885_v3  ;;  %v7373_v34 = vand.u32 4294901760, %v19351_v32 }
 0xf3d   : > { %v6934_v9 = vpop.f32.mrf.mxu1 }
 0xf3e   : > { %v6935_v0 = vadd.f32 %v6934_v9, %v6912_v39  ;;  %v19364_v39 = vsub.f32 %v17223_v61, %v19354_v59 }
 0xf40   : > { %v6937_v13 = vmul.f32 0.35355338, %v6935_v0  ;;  %v7379_v0 = vand.u32 4294901760, %v19358_v60 }
 0xf42   : > { %v6939_v51 = vsel %vm6938_vm12, %v6937_v13, -inf }
 0xf43   : > { %6940 = vmax.xlane.f32.xlu1 %v6939_v51 }
 0xfb6   : > { %v6941_v14 = vpop.xlane.xlu1 %6940 }
 0xfb7   : > { %v6942_v41 = vsub.f32 %v6937_v13, %v6941_v14  ;;  %v19369_v13 = vsub.f32 %v17222_v55, %v19360_v5  ;;  %v7374_v14 = vsub.f32 %v19351_v32, %v7373_v34 }
 0xfb9   : > { %v6943_v38 = vmul.f32 1.442695, %v6942_v41  ;;  %v7385_v41 = vand.u32 4294901760, %v19364_v39  ;;  %v7375_v15 = vand.u32 4294901760, %v7374_v14  ;;  %v17480_v14 = vld [vmem:[%s20804_s28 + $0x1] ss:$0 sm:$0xff] }
 0xfbb   : > { %17536 = vpow2.f32 %v6943_v38  ;;  %v7386_v36 = vsub.f32 %v19364_v39, %v7385_v41 }
 0xfc1   : > { %v17537_v1 = vpop.eup %17536 }
 0xfc2   : > { %v6945_v46 = vsel %vm6938_vm12, %v17537_v1, 0.0 }
 0xfc3   : > { %6946 = vadd.xlane.f32.xlu2 %v6945_v46  ;;  %v7391_v46 = vand.u32 4294901760, %v19369_v13 }
 0xfc5   : > { %v7392_v52 = vsub.f32 %v19369_v13, %v7391_v46 }
0x1036   : > { %v6947_v57 = vpop.xlane.xlu2 %6946 }
0x1037   : > { %17538 = vrcp.f32 %v6947_v57 }
0x103d   : > { %v17539_v42 = vpop.eup %17538 }
0x103e   : > { %v6949_v50 = vmul.f32 %v17539_v42, %v17537_v1  ;;  %v7380_v1 = vsub.f32 %v19358_v60, %v7379_v0 }
0x1040   : > { %v6952_v56 = vsel %vm6950_vm13, %v6949_v50, 0 }
0x1041   : > { %v6975_v3 = vand.u32 4294901760, %v6952_v56 }
0x1043   : > { %v6976_v9 = vsub.f32 %v6952_v56, %v6975_v3  ;;  %7011 = vmatmul.f32.vlgmr.msrb.gmra.mxu3 %v6975_v3 }
0x1044   : > { %7240 = vmatpush.msrb.mxu3 %v19308_v2 }
0x1045   : > { %7037 = vmatmul.f32.vlgmr.msra.gmra.mxu0 %v6976_v9  ;;  %v6977_v51 = vand.u32 4294901760, %v6976_v9 }
0x1046   : > { %7242 = vmatpush.msrb.mxu3 %v19315_v47  ;;  %7269 = vmatpush.msra.mxu0 %v7170_v44  ;;  %v7381_v44 = vand.u32 4294901760, %v7380_v1 }
0x1047   : > { %7062 = vmatmul.f32.vlgmr.msra.gmra.mxu1 %v6977_v51  ;;  %v6978_v38 = vsub.f32 %v6976_v9, %v6977_v51 }
0x1048   : > { %7244 = vmatpush.msrb.mxu3 %v19320_v45  ;;  %7273 = vmatpush.msra.mxu0 %v7176_v49 }
0x1049   : > { %v6979_v43 = vand.u32 4294901760, %v6978_v38  ;;  %7300 = vmatpush.msra.mxu1 %v19308_v2  ;;  %v7387_v2 = vand.u32 4294901760, %v7386_v36 }
0x104a   : > { %7246 = vmatpush.msrb.mxu3 %v19329_v10  ;;  %7277 = vmatpush.msra.mxu0 %v7182_v29  ;;  %v17227_v29 = vld [vmem:[%s20801_s2 + $0x20] sm:$0xff] }
0x104b   : > { %6980 = vmatmul.f32.vlgmr.msrb.gmra.mxu2 %v6979_v43  ;;  %7112 = vmatmul.f32.vlgmr.msra.gmra.mxu3 %v6975_v3  ;;  %v7566_v8 = vand.u32 4294901760, %v17227_v29 }
0x104c   : > { %7302 = vmatpush.msra.mxu1 %v19315_v47  ;;  %7211 = vmatpush.msrb.mxu2 %v19313_v37  ;;  %v7393_v47 = vand.u32 4294901760, %v7392_v52  ;;  %v17230_v37 = vld [vmem:[%s20801_s2 + $0x38] sm:$0xff] }
0x104d   : > { %7152 = vmatmul.f32.vlgmr.msrb.gmra.mxu0 %v19232_v31  ;;  %7376 = vmatpush.msra.mxu3 %v7375_v15  ;;  %v7616_v57 = vsub.f32 %v17227_v29, %v7566_v8 }
0x104e   : > { %7281 = vmatpush.msra.mxu0 %v7188_v12  ;;  %7304 = vmatpush.msra.mxu1 %v19320_v45  ;;  %v7560_v45 = vand.u32 4294901760, %v17230_v37 }
0x104f   : > { %7193 = vmatmul.f32.vlgmr.msrb.gmra.mxu1 %v19200_v21  ;;  %7214 = vmatpush.msrb.mxu2 %v19323_v40  ;;  %v17229_v40 = vld [vmem:[%s20801_s2 + $0x30] sm:$0xff]  ;;  %v7617_v63 = vand.u32 4294901760, %v7616_v57 }
0x1050   : > { %7306 = vmatpush.msra.mxu1 %v19329_v10  ;;  %7382 = vmatpush.msra.mxu3 %v7381_v44  ;;  %v7598_v54 = vsub.f32 %v17230_v37, %v7560_v45  ;;  %v7562_v49 = vand.u32 4294901760, %v17229_v40  ;;  %v17228_v10 = vld [vmem:[%s20801_s2 + $0x28] sm:$0xff] }
0x1051   : > { %7217 = vmatpush.msrb.mxu2 %v19332_v17  ;;  %7418 = vmatpush.msrb.mxu0 %v19351_v32  ;;  %v7564_v19 = vand.u32 4294901760, %v17228_v10 }
0x1052   : > { %7388 = vmatpush.msra.mxu3 %v7387_v2  ;;  %7452 = vmatpush.msrb.mxu1 %v19344_v33  ;;  %v7599_v17 = vand.u32 4294901760, %v7598_v54  ;;  %v7604_v28 = vsub.f32 %v17229_v40, %v7562_v49 }
0x1053   : > { %7089 = vmatmul.f32.vlgmr.msra.gmra.mxu2 %v6975_v3  ;;  %7250 = vmatmul.f32.vlgmr.msrb.gmra.mxu3 %v19212_v16  ;;  %v7610_v12 = vsub.f32 %v17228_v10, %v7564_v19 }
0x1054   : > { %7220 = vmatpush.msrb.mxu2 %v19338_v25  ;;  %7394 = vmatpush.msra.mxu3 %v7393_v47  ;;  %v7600_v25 = vsub.f32 %v7598_v54, %v7599_v17  ;;  %v7605_v23 = vand.u32 4294901760, %v7604_v28 }
0x1055   : > { %7283 = vmatmul.f32.vlgmr.msra.gmra.mxu0 %v19200_v21  ;;  %7454 = vmatpush.msrb.mxu1 %v19348_v62  ;;  %v7611_v4 = vand.u32 4294901760, %v7610_v12 }
0x1056   : > { %7335 = vmatpush.msra.mxu2 %v19344_v33  ;;  %7421 = vmatpush.msrb.mxu0 %v19358_v60  ;;  %v7601_v53 = vand.u32 4294901760, %v7600_v25  ;;  %v7606_v35 = vsub.f32 %v7604_v28, %v7605_v23 }
0x1057   : > { %7308 = vmatmul.f32.vlgmr.msra.gmra.mxu1 %v19200_v21  ;;  %7522 = vmatpush.msrb.mxu3 %v19344_v33  ;;  %v7612_v33 = vsub.f32 %v7610_v12, %v7611_v4 }
0x1058   : > { %7337 = vmatpush.msra.mxu2 %v19348_v62  ;;  %7424 = vmatpush.msrb.mxu0 %v19364_v39  ;;  %v7607_v58 = vand.u32 4294901760, %v7606_v35 }
0x1059   : > { %7456 = vmatpush.msrb.mxu1 %v19354_v59  ;;  %7524 = vmatpush.msrb.mxu3 %v19348_v62  ;;  %v7613_v61 = vand.u32 4294901760, %v7612_v33  ;;  %v7618_v62 = vsub.f32 %v7616_v57, %v7617_v63 }
0x105a   : > { %7339 = vmatpush.msra.mxu2 %v19354_v59  ;;  %7427 = vmatpush.msrb.mxu0 %v19369_v13 }
0x105b   : > { %7458 = vmatpush.msrb.mxu1 %v19360_v5  ;;  %7223 = vmatmul.f32.vlgmr.msrb.gmra.mxu2 %v19203_v7  ;;  %v7619_v42 = vand.u32 4294901760, %v7618_v62 }
0x105c   : > { %7396 = vmatmul.f32.vlgmr.msra.gmra.mxu3 %v19182_v27  ;;  %7341 = vmatpush.msra.mxu2 %v19360_v5 }
0x105d   : > { %7430 = vmatmul.f32.vlgmr.msrb.gmra.mxu0 %v19187_v26  ;;  %7526 = vmatpush.msrb.mxu3 %v19354_v59 }
0x105e   : > { %7487 = vmatpush.msrb.mxu2 %v7373_v34  ;;  %7561 = vmatpush.msra.mxu0 %v7560_v45  ;;  %v17479_v34 = vld [vmem:[%s20803_s23 + $0x1] ss:$0 sm:$0xff] }
0x105f   : > { %7462 = vmatmul.f32.vlgmr.msrb.gmra.mxu1 %v19196_v30  ;;  %7528 = vmatpush.msrb.mxu3 %v19360_v5 }
0x1060   : > { %7491 = vmatpush.msrb.mxu2 %v7379_v0  ;;  %7563 = vmatpush.msra.mxu0 %v7562_v49 }
0x1061   : > { %7678 = vmatpush.msra.mxu3 %v7560_v45  ;;  %7602 = vmatpush.msra.mxu1 %v7601_v53 }
0x1062   : > { %7495 = vmatpush.msrb.mxu2 %v7385_v41  ;;  %7565 = vmatpush.msra.mxu0 %v7564_v19 }
0x1063   : > { %7347 = vmatmul.f32.vlgmr.msra.gmra.mxu2 %v19234_v20  ;;  %7680 = vmatpush.msra.mxu3 %v7562_v49 }
0x1064   : > { %7400 = vmatmul.f32.gmra.mxu3 %v19198_v11  ;;  %7499 = vmatpush.msrb.mxu2 %v7391_v46 }
0x1065   : > { %7435 = vmatmul.f32.gmra.mxu0 %v19208_v22  ;;  %7682 = vmatpush.msra.mxu3 %v7564_v19 }
0x1066   : > { %7644 = vmatpush.msra.mxu2 %v7598_v54  ;;  %7567 = vmatpush.msra.mxu0 %v7566_v8 }
0x1067   : > { %7468 = vmatmul.f32.gmra.mxu1 %v19230_v24  ;;  %7684 = vmatpush.msra.mxu3 %v7566_v8 }
0x1068   : > { %7647 = vmatpush.msra.mxu2 %v7604_v28  ;;  %7608 = vmatpush.msra.mxu1 %v7607_v58 }
0x1069   : > { %7713 = vmatpush.msrb.mxu0 %v7599_v17 }
0x106a   : > { %7650 = vmatpush.msra.mxu2 %v7610_v12  ;;  %7614 = vmatpush.msra.mxu1 %v7613_v61 }
0x106b   : > { %7355 = vmatmul.f32.gmra.mxu2 %v19256_v18  ;;  %7717 = vmatpush.msrb.mxu0 %v7605_v23 }
0x106c   : > { %7530 = vmatmul.f32.vlgmr.msrb.gmra.mxu3 %v19182_v27  ;;  %7653 = vmatpush.msra.mxu2 %v7616_v57 }
0x106d   : > { %7573 = vmatmul.f32.vlgmr.msra.gmra.mxu0 %v19234_v20  ;;  %7620 = vmatpush.msra.mxu1 %v7619_v42 }
0x106e   : > { %7721 = vmatpush.msrb.mxu0 %v7611_v4 }
0x106f   : > { %7622 = vmatmul.f32.vlgmr.msra.gmra.mxu1 %v19182_v27 }
0x1070   : > { %7748 = vmatpush.msrb.mxu1 %v7560_v45  ;;  %7725 = vmatpush.msrb.mxu0 %v7617_v63 }
0x1072   : > { %7750 = vmatpush.msrb.mxu1 %v7562_v49 }
0x1073   : > { %7501 = vmatmul.f32.vlgmr.msrb.gmra.mxu2 %v19182_v27 }
0x1074   : > { %7534 = vmatmul.f32.gmra.mxu3 %v19198_v11  ;;  %7752 = vmatpush.msrb.mxu1 %v7564_v19 }
0x1075   : > { %7581 = vmatmul.f32.gmra.mxu0 %v19256_v18 }
0x1076   : > { %7754 = vmatpush.msrb.mxu1 %v7566_v8 }
0x1077   : > { %7626 = vmatmul.f32.gmra.mxu1 %v19198_v11 }
0x107b   : > { %7505 = vmatmul.f32.gmra.mxu2 %v19198_v11 }
0x107c   : > { %7688 = vmatmul.f32.vlgmr.msra.gmra.mxu3 %v19196_v30 }
0x107d   : > { %7727 = vmatmul.f32.vlgmr.msrb.gmra.mxu0 %v19182_v27 }
0x107f   : > { %7756 = vmatmul.f32.vlgmr.msrb.gmra.mxu1 %v19182_v27 }
0x1083   : > { %7656 = vmatmul.f32.vlgmr.msra.gmra.mxu2 %v19187_v26 }
0x1084   : > { %7694 = vmatmul.f32.gmra.mxu3 %v19230_v24 }
0x1085   : > { %7731 = vmatmul.f32.gmra.mxu0 %v19198_v11 }
0x1087   : > { %7760 = vmatmul.f32.gmra.mxu1 %v19198_v11 }
0x108b   : > { %7661 = vmatmul.f32.gmra.mxu2 %v19208_v22 }
0x10c2   : > { %v19445_v59 = vpop.f32.mrf.mxu0 }
0x10c4   : > { %v19449_v56 = vpop.f32.mrf.mxu1 }
0x10c6   : > { %v19437_v32 = vpop.f32.mrf.mxu3 }
0x10ca   : > { %v7153_v3 = vpop.f32.mrf.mxu0 }
0x10cb   : > { %v7154_v13 = vadd.f32 %v17479_v34, %v7153_v3 }
0x10cc   : > { %v7194_v39 = vpop.f32.mrf.mxu1 }
0x10cd   : > { %v7195_v41 = vadd.f32 %v7194_v39, %v7154_v13 }
0x10ce   : > { %v19441_v55 = vpop.f32.mrf.mxu2  ;;  %v19443_v50 = vpop.f32.mrf.mxu3 }
0x10d2   : > { %v7284_v51 = vpop.f32.mrf.mxu0 }
0x10d4   : > { %v7309_v1 = vpop.f32.mrf.mxu1 }
0x10d6   : > { %v19451_v60 = vpop.f32.mrf.mxu2  ;;  %v7251_v5 = vpop.f32.mrf.mxu3 }
0x10da   : > { %v7431_v44 = vpop.f32.mrf.mxu0 }
0x10dc   : > { %v7463_v37 = vpop.f32.mrf.mxu1 }
0x10de   : > { %v7224_v9 = vpop.f32.mrf.mxu2 }
0x10df   : > { %v7397_v0 = vpop.f32.mrf.mxu3  ;;  %v7225_v46 = vadd.f32 %v7224_v9, %v7195_v41 }
0x10e1   : > { %v7252_v36 = vadd.f32 %v7251_v5, %v7225_v46 }
0x10e2   : > { %v7436_v19 = vpop.f32.mrf.mxu0 }
0x10e3   : > { %v7285_v47 = vadd.f32 %v7284_v51, %v7252_v36 }
0x10e4   : > { %v7469_v12 = vpop.f32.mrf.mxu1 }
0x10e5   : > { %v7310_v54 = vadd.f32 %v7309_v1, %v7285_v47 }
0x10e6   : > { %v7348_v38 = vpop.f32.mrf.mxu2 }
0x10e7   : > { %v7349_v43 = vadd.f32 %v17480_v14, %v7348_v38  ;;  %v7401_v15 = vpop.f32.mrf.mxu3  ;;  %v7765_v25 = vsel %vm2446_vm3, %v7310_v54, 0 }
0x10e8   : > { %v7791_v53 = vand.u32 4294901760, %v7765_v25 }
0x10e9   : > { %v7398_v52 = vadd.f32 %v7397_v0, %v7349_v43  ;;  %v17481_v43 = vld [vmem:[%s20806_s16 + $0x1] ss:$0 sm:$0xff] }
0x10ea   : > { %v7792_v33 = vsub.f32 %v7765_v25, %v7791_v53  ;;  %v7574_v46 = vpop.f32.mrf.mxu0 }
0x10eb   : > { %v7432_v45 = vadd.f32 %v7431_v44, %v7398_v52 }
0x10ec   : > { %v7793_v5 = vand.u32 4294901760, %v7792_v33  ;;  %v7623_v36 = vpop.f32.mrf.mxu1 }
0x10ed   : > { %v7464_v10 = vadd.f32 %v7463_v37, %v7432_v45 }
0x10ee   : > { %v7356_v2 = vpop.f32.mrf.mxu2  ;;  %v7794_v9 = vsub.f32 %v7792_v33, %v7793_v5 }
0x10ef   : > { %v7357_v40 = vadd.f32 %v17480_v14, %v7356_v2  ;;  %v7531_v49 = vpop.f32.mrf.mxu3 }
0x10f0   : > { %v7795_v14 = vand.u32 4294901760, %v7794_v9 }
0x10f1   : > { %v7402_v17 = vadd.f32 %v7401_v15, %v7357_v40  ;;  %v7575_v15 = vadd.f32 %v17481_v43, %v7574_v46 }
0x10f2   : > { %v7582_v44 = vpop.f32.mrf.mxu0 }
0x10f3   : > { %v7437_v23 = vadd.f32 %v7436_v19, %v7402_v17  ;;  %v7624_v52 = vadd.f32 %v7623_v36, %v7575_v15  ;;  %v7583_v37 = vadd.f32 %v17481_v43, %v7582_v44 }
0x10f4   : > { %v7627_v40 = vpop.f32.mrf.mxu1 }
0x10f5   : > { %v7470_v35 = vadd.f32 %v7469_v12, %v7437_v23 }
0x10f6   : > { %v7502_v28 = vpop.f32.mrf.mxu2 }
0x10f7   : > { %v7503_v29 = vadd.f32 %v7502_v28, %v7464_v10  ;;  %v7535_v58 = vpop.f32.mrf.mxu3 }
0x10f9   : > { %v7532_v8 = vadd.f32 %v7531_v49, %v7503_v29  ;;  %v7628_v49 = vadd.f32 %v7627_v40, %v7583_v37 }
0x10fa   : > { %v7728_v54 = vpop.f32.mrf.mxu0 }
0x10fb   : > { %v7768_v4 = vsel %vm2446_vm3, %v7532_v8, 0 }
0x10fc   : > { %v7789_v61 = vand.u32 4294901760, %v7768_v4  ;;  %v7757_v25 = vpop.f32.mrf.mxu1 }
0x10fe   : > { %v7506_v57 = vpop.f32.mrf.mxu2  ;;  %v7821_v34 = vsub.f32 %v7768_v4, %v7789_v61 }
0x10ff   : > { %v7507_v63 = vadd.f32 %v7506_v57, %v7470_v35  ;;  %v7689_v47 = vpop.f32.mrf.mxu3 }
0x1100   : > { %v7822_v13 = vand.u32 4294901760, %v7821_v34 }
0x1101   : > { %v7536_v62 = vadd.f32 %v7535_v58, %v7507_v63 }
0x1102   : > { %v7823_v38 = vsub.f32 %v7821_v34, %v7822_v13  ;;  %v7732_v12 = vpop.f32.mrf.mxu0 }
0x1103   : > { %v7771_v42 = vsel %vm2446_vm3, %v7536_v62, 0 }
0x1104   : > { %v7787_v3 = vand.u32 4294901760, %v7771_v42  ;;  %v7824_v1 = vand.u32 4294901760, %v7823_v38  ;;  %v7761_v57 = vpop.f32.mrf.mxu1 }
0x1106   : > { %v7815_v39 = vsub.f32 %v7771_v42, %v7787_v3  ;;  %7788 = vmatpush.xpose.msrb.mxu2 %v7787_v3  ;;  %7872 = vmatpush.xpose.msra.mxu1 %v7787_v3  ;;  %v7657_v2 = vpop.f32.mrf.mxu2 }
0x1107   : > { %v7658_v45 = vadd.f32 %v7657_v2, %v7624_v52  ;;  %v7695_v29 = vpop.f32.mrf.mxu3 }
0x1108   : > { %7847 = vmatpush.xpose.msra.mxu0 %v7815_v39  ;;  %v7816_v0 = vand.u32 4294901760, %v7815_v39 }
0x1109   : > { %v7690_v10 = vadd.f32 %v7689_v47, %v7658_v45 }
0x110a   : > { %7790 = vmatpush.xpose.msrb.mxu2 %v7789_v61  ;;  %7874 = vmatpush.xpose.msra.mxu1 %v7789_v61  ;;  %v7817_v51 = vsub.f32 %v7815_v39, %v7816_v0 }
0x110b   : > { %v7729_v19 = vadd.f32 %v7728_v54, %v7690_v10 }
0x110c   : > { %7850 = vmatpush.xpose.msra.mxu0 %v7821_v34  ;;  %v7818_v41 = vand.u32 4294901760, %v7817_v51 }
0x110d   : > { %7796 = vmatmul.f32.vlgmr.msrb.gmra.mxu2 %v7795_v14  ;;  %7878 = vmatmul.f32.vlgmr.msra.gmra.mxu1 %v7793_v5  ;;  %v7758_v23 = vadd.f32 %v7757_v25, %v7729_v19 }
0x110e   : > { %7899 = vmatpush.xpose.msra.mxu2 %v7816_v0  ;;  %7819 = vmatpush.xpose.msrb.mxu3 %v7818_v41  ;;  %v7662_v17 = vpop.f32.mrf.mxu2 }
0x110f   : > { %7853 = vmatmul.f32.vlgmr.msra.gmra.mxu0 %v7792_v33  ;;  %v7663_v28 = vadd.f32 %v7662_v17, %v7628_v49 }
0x1111   : > { %v7696_v8 = vadd.f32 %v7695_v29, %v7663_v28 }
0x1112   : > { %7903 = vmatpush.xpose.msra.mxu2 %v7822_v13  ;;  %7825 = vmatpush.xpose.msrb.mxu3 %v7824_v1 }
0x1113   : > { %v7733_v35 = vadd.f32 %v7732_v12, %v7696_v8 }
0x1115   : > { %7827 = vmatmul.f32.vlgmr.msrb.gmra.mxu3 %v7791_v53  ;;  %7905 = vmatmul.f32.vlgmr.msra.gmra.mxu2 %v7791_v53  ;;  %v7762_v58 = vadd.f32 %v7761_v57, %v7733_v35  ;;  %v7116_v57 = vld [vmem:[%s20807_s22] sm:$0xff] }
0x1116   : > { %7924 = vmatpush.xpose.msra.mxu3 %v7787_v3 }
0x1117   : > { %v7948_v33 = vsel %vm2616_vm4, %v7762_v58, 0  ;;  %v7013_v58 = vadd.f32 %v19437_v32, %v19441_v55 }
0x1118   : > { %v7964_v63 = vand.u32 4294901760, %v7948_v33 }
0x111a   : > { %7926 = vmatpush.xpose.msra.mxu3 %v7789_v61  ;;  %v7992_v62 = vsub.f32 %v7948_v33, %v7964_v63  ;;  %7965 = vmatpush.msrb.mxu0 %v7964_v63  ;;  %v8278_v33 = vand.u32 4294901760, %v7116_v57 }
0x111c   : > { %v7993_v42 = vand.u32 4294901760, %v7992_v62  ;;  %8024 = vmatpush.msrb.mxu2 %v7992_v62 }
0x111d   : > { %7928 = vmatmul.f32.vlgmr.msra.gmra.mxu3 %v7791_v53  ;;  %v7966_v53 = vand.u32 4294901760, %v7758_v23 }
0x111e   : > { %8049 = vmatpush.msrb.mxu3 %v7964_v63  ;;  %v7994_v3 = vsub.f32 %v7992_v62, %v7993_v42 }
0x111f   : > { %v7998_v4 = vsub.f32 %v7758_v23, %v7966_v53  ;;  %7967 = vmatpush.msrb.mxu0 %v7966_v53  ;;  %v17232_v23 = vld [vmem:[%s20807_s22 + $0x8] sm:$0xff] }
0x1120   : > { %8051 = vmatpush.msrb.mxu3 %v7966_v53  ;;  %v7995_v34 = vand.u32 4294901760, %v7994_v3  ;;  %v8129_v8 = vand.u32 4294901760, %v17232_v23 }
0x1121   : > { %v7999_v61 = vand.u32 4294901760, %v7998_v4  ;;  %8027 = vmatpush.msrb.mxu2 %v7998_v4  ;;  %8076 = vmatpush.msra.mxu0 %v7993_v42 }
0x1122   : > { %7996 = vmatpush.msrb.mxu1 %v7995_v34  ;;  %v8156_v12 = vsub.f32 %v17232_v23, %v8129_v8 }
0x1123   : > { %v8000_v5 = vsub.f32 %v7998_v4, %v7999_v61  ;;  %8080 = vmatpush.msra.mxu0 %v7999_v61  ;;  %8130 = vmatpush.msra.mxu2 %v8129_v8  ;;  %v7039_v61 = vadd.f32 %v19445_v59, %v7013_v58 }
0x1125   : > { %v8001_v39 = vand.u32 4294901760, %v8000_v5  ;;  %v7064_v5 = vadd.f32 %v19449_v56, %v7039_v61  ;;  %v17234_v56 = vld [vmem:[%s20797_s26 + $0x48] sm:$0xff]  ;;  %v17240_v61 = vld [vmem:[%s20798_s8 + $0x50] sm:$0xff] }
0x1127   : > { %8002 = vmatpush.msrb.mxu1 %v8001_v39  ;;  %v7091_v34 = vadd.f32 %v19451_v60, %v7064_v5 }
0x1129   : > { %8101 = vmatpush.msra.mxu1 %v7964_v63  ;;  %v19468_v63 = vsub.f32 %v7116_v57, %v8278_v33  ;;  %v7114_v39 = vadd.f32 %v19443_v50, %v7091_v34 }
0x112b   : > { %8103 = vmatpush.msra.mxu1 %v7966_v53  ;;  %v8157_v53 = vand.u32 4294901760, %v8156_v12  ;;  %v8306_v62 = vand.u32 4294901760, %v19468_v63 }
0x112d   : > { %v8158_v35 = vsub.f32 %v8156_v12, %v8157_v53  ;;  %v8307_v42 = vsub.f32 %v19468_v63, %v8306_v62 }
0x112f   : > { %v8159_v4 = vand.u32 4294901760, %v8158_v35  ;;  %v8308_v3 = vand.u32 4294901760, %v8307_v42 }
0x1131   : > { %8160 = vmatpush.msra.mxu3 %v8159_v4 }
0x118a   : > { %v7879_v41 = vpop.f32.mrf.mxu1 }
0x118c   : > { %v7854_v51 = vpop.f32.mrf.mxu0 }
0x1190   : > { %v7797_v9 = vpop.f32.mrf.mxu2 }
0x1198   : > { %v7828_v0 = vpop.f32.mrf.mxu3  ;;  %v7906_v1 = vpop.f32.mrf.mxu2 }
0x1199   : > { %v7829_v13 = vadd.f32 %v7828_v0, %v7797_v9 }
0x119b   : > { %v7855_v14 = vadd.f32 %v7854_v51, %v7829_v13  ;;  %v17236_v13 = vld [vmem:[%s20797_s26 + $0x58] sm:$0xff]  ;;  %v17235_v51 = vld [vmem:[%s20797_s26 + $0x50] sm:$0xff] }
0x119d   : > { %v7880_v38 = vadd.f32 %v7879_v41, %v7855_v14  ;;  %v8261_v14 = vsel %vm2446_vm3, %v7114_v39, 0  ;;  %v19479_v41 = vand.u32 4294901760, %v17236_v13  ;;  %v19533_v39 = vand.u32 4294901760, %v17240_v61 }
0x119e   : > { %v19484_v60 = vand.u32 4294901760, %v8261_v14 }
0x119f   : > { %v7907_v46 = vadd.f32 %v7906_v1, %v7880_v38  ;;  %v19488_v50 = vsub.f32 %v17236_v13, %v19479_v41 }
0x11a0   : > { %v7929_v43 = vpop.f32.mrf.mxu3 }
0x11a1   : > { %v7930_v15 = vadd.f32 %v7929_v43, %v7907_v46  ;;  %v19482_v46 = vand.u32 4294901760, %v17235_v51 }
0x11a3   : > { %v7932_v36 = vmul.f32 0.35355338, %v7930_v15  ;;  %v17233_v15 = vld [vmem:[%s20797_s26 + $0x40] sm:$0xff] }
0x11a5   : > { %v7933_v44 = vsel %vm6938_vm12, %v7932_v36, -inf }
0x11a6   : > { %7934 = vmax.xlane.f32.xlu0 %v7933_v44  ;;  %v19490_v44 = vand.u32 4294901760, %v17234_v56 }
0x1219   : > { %v7935_v52 = vpop.xlane.xlu0 %7934 }
0x121a   : > { %v7936_v2 = vsub.f32 %v7932_v36, %v7935_v52 }
0x121c   : > { %v7937_v47 = vmul.f32 1.442695, %v7936_v2 }
0x121e   : > { %17540 = vpow2.f32 %v7937_v47  ;;  %v19493_v47 = vsub.f32 %v17235_v51, %v19482_v46 }
0x1224   : > { %v17541_v37 = vpop.eup %17540 }
0x1225   : > { %v7939_v45 = vsel %vm6938_vm12, %v17541_v37, 0.0 }
0x1226   : > { %7940 = vadd.xlane.f32.xlu1 %v7939_v45  ;;  %v19498_v45 = vsub.f32 %v8261_v14, %v19484_v60  ;;  %v19542_v14 = vsub.f32 %v17240_v61, %v19533_v39 }
0x1299   : > { %v7941_v40 = vpop.xlane.xlu1 %7940 }
0x129a   : > { %17542 = vrcp.f32 %v7941_v40 }
0x12a0   : > { %v17543_v54 = vpop.eup %17542 }
0x12a1   : > { %v7943_v49 = vmul.f32 %v17543_v54, %v17541_v37  ;;  %v19495_v37 = vand.u32 4294901760, %v17233_v15  ;;  %v8462_v54 = vand.u32 4294901760, %v19488_v50 }
0x12a3   : > { %v7945_v10 = vsel %vm6950_vm13, %v7943_v49, 0  ;;  %v19503_v49 = vsub.f32 %v17234_v56, %v19490_v44  ;;  %v8463_v23 = vsub.f32 %v19488_v50, %v8462_v54 }
0x12a4   : > { %v7968_v17 = vand.u32 4294901760, %v7945_v10 }
0x12a5   : > { %v8464_v42 = vand.u32 4294901760, %v8463_v23 }
0x12a6   : > { %v7969_v19 = vsub.f32 %v7945_v10, %v7968_v17  ;;  %8004 = vmatmul.f32.vlgmr.msrb.gmra.mxu1 %v7968_v17 }
0x12a7   : > { %8206 = vmatpush.msrb.mxu1 %v8129_v8 }
0x12a8   : > { %8030 = vmatmul.f32.vlgmr.msrb.gmra.mxu2 %v7969_v19  ;;  %v7970_v28 = vand.u32 4294901760, %v7969_v19 }
0x12a9   : > { %8232 = vmatpush.msrb.mxu2 %v8157_v53 }
0x12aa   : > { %8055 = vmatmul.f32.vlgmr.msrb.gmra.mxu3 %v7970_v28  ;;  %v7971_v29 = vsub.f32 %v7969_v19, %v7970_v28  ;;  %v19507_v19 = vsub.f32 %v17233_v15, %v19495_v37  ;;  %v8282_v28 = vand.u32 4294901760, %v19498_v45 }
0x12ab   : > { %8254 = vmatpush.msrb.mxu3 %v8129_v8  ;;  %v8474_v8 = vand.u32 4294901760, %v19503_v49 }
0x12ac   : > { %v7972_v25 = vand.u32 4294901760, %v7971_v29  ;;  %v8480_v35 = vand.u32 4294901760, %v19507_v19  ;;  %v8283_v57 = vsub.f32 %v19498_v45, %v8282_v28 }
0x12ae   : > { %7973 = vmatmul.f32.vlgmr.msrb.gmra.mxu0 %v7972_v25  ;;  %8105 = vmatmul.f32.vlgmr.msra.gmra.mxu1 %v7968_v17  ;;  %v17241_v25 = vld [vmem:[%s20798_s8 + $0x58] sm:$0xff] }
0x12af   : > { %8183 = vmatpush.msrb.mxu0 %v8156_v12  ;;  %8309 = vmatpush.msra.mxu1 %v8308_v3  ;;  %v19519_v4 = vand.u32 4294901760, %v17241_v25  ;;  %v17239_v3 = vld [vmem:[%s20798_s8 + $0x48] sm:$0xff] }
0x12b0   : > { %v19537_v13 = vand.u32 4294901760, %v17239_v3 }
0x12b6   : > { %8082 = vmatmul.f32.vlgmr.msra.gmra.mxu0 %v7968_v17  ;;  %v8468_v17 = vand.u32 4294901760, %v19493_v47 }
0x12b7   : > { %8279 = vmatpush.msra.mxu0 %v8278_v33 }
0x12b8   : > { %v8469_v53 = vsub.f32 %v19493_v47, %v8468_v17 }
0x12ba   : > { %v8470_v34 = vand.u32 4294901760, %v8469_v53 }
0x1323   : > { %v8005_v32 = vpop.f32.mrf.mxu1 }
0x132b   : > { %v7974_v55 = vpop.f32.mrf.mxu0  ;;  %v8031_v0 = vpop.f32.mrf.mxu2 }
0x132c   : > { %v8006_v9 = vadd.f32 %v8005_v32, %v7974_v55  ;;  %v8106_v52 = vpop.f32.mrf.mxu1  ;;  %v8481_v32 = vsub.f32 %v19507_v19, %v8480_v35  ;;  %v19531_v55 = vsub.f32 %v17241_v25, %v19519_v4 }
0x132d   : > { %v8056_v38 = vpop.f32.mrf.mxu3 }
0x132e   : > { %v8032_v59 = vadd.f32 %v8031_v0, %v8006_v9  ;;  %v8284_v9 = vand.u32 4294901760, %v8283_v57  ;;  %v8665_v51 = vand.u32 4294901760, %v19531_v55 }
0x1330   : > { %v8057_v1 = vadd.f32 %v8056_v38, %v8032_v59  ;;  %v8482_v59 = vand.u32 4294901760, %v8481_v32  ;;  %v8666_v56 = vsub.f32 %v19531_v55, %v8665_v51 }
0x1333   : > { %v8083_v43 = vpop.f32.mrf.mxu0 }
0x1334   : > { %v8084_v36 = vadd.f32 %v8083_v43, %v8057_v1  ;;  %v8671_v1 = vand.u32 4294901760, %v19542_v14 }
0x1336   : > { %v8107_v2 = vadd.f32 %v8106_v52, %v8084_v36  ;;  %v8667_v36 = vand.u32 4294901760, %v8666_v56  ;;  %v8672_v52 = vsub.f32 %v19542_v14, %v8671_v1 }
0x1338   : > { %v8112_v40 = vsel %vm2446_vm3, %v8107_v2, 0 }
0x1339   : > { %v8131_v10 = vand.u32 4294901760, %v8112_v40 }
0x133b   : > { %v8132_v29 = vsub.f32 %v8112_v40, %v8131_v10  ;;  %8162 = vmatmul.f32.vlgmr.msra.gmra.mxu3 %v8131_v10 }
0x133c   : > { %8355 = vmatpush.msra.mxu3 %v8278_v33 }
0x133d   : > { %v8133_v12 = vand.u32 4294901760, %v8132_v29  ;;  %8186 = vmatmul.f32.vlgmr.msrb.gmra.mxu0 %v8132_v29 }
0x133e   : > { %8381 = vmatpush.msrb.mxu0 %v8306_v62  ;;  %v8475_v62 = vsub.f32 %v19503_v49, %v8474_v8 }
0x133f   : > { %v8134_v58 = vsub.f32 %v8132_v29, %v8133_v12  ;;  %8210 = vmatmul.f32.vlgmr.msrb.gmra.mxu1 %v8133_v12 }
0x1340   : > { %8403 = vmatpush.msrb.mxu1 %v8278_v33  ;;  %v17238_v33 = vld [vmem:[%s20798_s8 + $0x40] sm:$0xff]  ;;  %v8476_v0 = vand.u32 4294901760, %v8475_v62 }
0x1341   : > { %v8135_v5 = vand.u32 4294901760, %v8134_v58  ;;  %v19544_v38 = vand.u32 4294901760, %v17238_v33 }
0x1343   : > { %8136 = vmatmul.f32.vlgmr.msra.gmra.mxu2 %v8135_v5  ;;  %8256 = vmatmul.f32.vlgmr.msrb.gmra.mxu3 %v8131_v10  ;;  %v8682_v43 = vsub.f32 %v17238_v33, %v19544_v38 }
0x1344   : > { %8465 = vmatpush.msrb.mxu3 %v8464_v42  ;;  %8332 = vmatpush.msra.mxu2 %v19468_v63  ;;  %v8676_v63 = vsub.f32 %v17239_v3, %v19537_v13 }
0x1345   : > { %8285 = vmatmul.f32.vlgmr.msra.gmra.mxu0 %v8284_v9  ;;  %v8683_v2 = vand.u32 4294901760, %v8682_v43 }
0x1346   : > { %8471 = vmatpush.msrb.mxu3 %v8470_v34  ;;  %8503 = vmatpush.msra.mxu0 %v19488_v50  ;;  %v8677_v15 = vand.u32 4294901760, %v8676_v63  ;;  %v17246_v50 = vld [vmem:[%s20801_s2 + $0x58] sm:$0xff] }
0x1347   : > { %8311 = vmatmul.f32.vlgmr.msra.gmra.mxu1 %v19484_v60 }
0x1348   : > { %8477 = vmatpush.msrb.mxu3 %v8476_v0  ;;  %8506 = vmatpush.msra.mxu0 %v19493_v47  ;;  %v8678_v40 = vsub.f32 %v8676_v63, %v8677_v15  ;;  %v17245_v47 = vld [vmem:[%s20801_s2 + $0x50] sm:$0xff] }
0x1349   : > { %8532 = vmatpush.msra.mxu1 %v19479_v41 }
0x134a   : > { %8483 = vmatpush.msrb.mxu3 %v8482_v59  ;;  %8509 = vmatpush.msra.mxu0 %v19503_v49 }
0x134b   : > { %8234 = vmatmul.f32.vlgmr.msrb.gmra.mxu2 %v8131_v10  ;;  %8359 = vmatmul.f32.vlgmr.msra.gmra.mxu3 %v8282_v28  ;;  %v8684_v10 = vsub.f32 %v8682_v43, %v8683_v2  ;;  %v17243_v28 = vld [vmem:[%s20801_s2 + $0x40] sm:$0xff] }
0x134c   : > { %8534 = vmatpush.msra.mxu1 %v19482_v46  ;;  %8432 = vmatpush.msrb.mxu2 %v19479_v41  ;;  %v8858_v23 = vand.u32 4294901760, %v17243_v28 }
0x134d   : > { %8383 = vmatmul.f32.vlgmr.msrb.gmra.mxu0 %v19484_v60  ;;  %8592 = vmatpush.msra.mxu3 %v19479_v41  ;;  %v8673_v41 = vand.u32 4294901760, %v8672_v52 }
0x134e   : > { %8512 = vmatpush.msra.mxu0 %v19507_v19  ;;  %8536 = vmatpush.msra.mxu1 %v19490_v44 }
0x134f   : > { %8405 = vmatmul.f32.vlgmr.msrb.gmra.mxu1 %v19484_v60  ;;  %8434 = vmatpush.msrb.mxu2 %v19482_v46  ;;  %v8679_v60 = vand.u32 4294901760, %v8678_v40 }
0x1350   : > { %8538 = vmatpush.msra.mxu1 %v19495_v37  ;;  %8594 = vmatpush.msra.mxu3 %v19482_v46  ;;  %v8685_v46 = vand.u32 4294901760, %v8684_v10 }
0x1351   : > { %8436 = vmatpush.msrb.mxu2 %v19490_v44  ;;  %8627 = vmatpush.msrb.mxu0 %v19519_v4 }
0x1352   : > { %8596 = vmatpush.msra.mxu3 %v19490_v44  ;;  %8668 = vmatpush.msrb.mxu1 %v8667_v36  ;;  %v8852_v44 = vand.u32 4294901760, %v17246_v50 }
0x1353   : > { %8335 = vmatmul.f32.vlgmr.msra.gmra.mxu2 %v19498_v45  ;;  %8485 = vmatmul.f32.vlgmr.msrb.gmra.mxu3 %v19200_v21  ;;  %v8854_v45 = vand.u32 4294901760, %v17245_v47 }
0x1354   : > { %8438 = vmatpush.msrb.mxu2 %v19495_v37  ;;  %8598 = vmatpush.msra.mxu3 %v19495_v37  ;;  %v8890_v37 = vsub.f32 %v17246_v50, %v8852_v44 }
0x1355   : > { %8515 = vmatmul.f32.vlgmr.msra.gmra.mxu0 %v19203_v7  ;;  %8674 = vmatpush.msrb.mxu1 %v8673_v41  ;;  %v8896_v19 = vsub.f32 %v17245_v47, %v8854_v45 }
0x1356   : > { %8561 = vmatpush.msra.mxu2 %v8462_v54  ;;  %8629 = vmatpush.msrb.mxu0 %v19533_v39  ;;  %v17244_v54 = vld [vmem:[%s20801_s2 + $0x48] sm:$0xff]  ;;  %v8891_v49 = vand.u32 4294901760, %v8890_v37 }
0x1357   : > { %8542 = vmatmul.f32.vlgmr.msra.gmra.mxu1 %v19212_v16  ;;  %8744 = vmatpush.msrb.mxu3 %v19519_v4  ;;  %v8897_v25 = vand.u32 4294901760, %v8896_v19 }
0x1358   : > { %8565 = vmatpush.msra.mxu2 %v8468_v17  ;;  %8631 = vmatpush.msrb.mxu0 %v19537_v13  ;;  %v8856_v17 = vand.u32 4294901760, %v17244_v54  ;;  %v8892_v29 = vsub.f32 %v8890_v37, %v8891_v49 }
0x1359   : > { %8680 = vmatpush.msrb.mxu1 %v8679_v60  ;;  %8746 = vmatpush.msrb.mxu3 %v19533_v39  ;;  %v8898_v53 = vsub.f32 %v8896_v19, %v8897_v25  ;;  %v17483_v60 = vld [vmem:[%s20804_s28 + $0x2] ss:$0 sm:$0xff] }
0x135a   : > { %8569 = vmatpush.msra.mxu2 %v8474_v8  ;;  %8633 = vmatpush.msrb.mxu0 %v19544_v38  ;;  %v8902_v8 = vsub.f32 %v17244_v54, %v8856_v17  ;;  %v8893_v12 = vand.u32 4294901760, %v8892_v29 }
0x135b   : > { %8686 = vmatpush.msrb.mxu1 %v8685_v46  ;;  %8444 = vmatmul.f32.vlgmr.msrb.gmra.mxu2 %v19232_v31  ;;  %v8899_v57 = vand.u32 4294901760, %v8898_v53 }
0x135c   : > { %8600 = vmatmul.f32.vlgmr.msra.gmra.mxu3 %v19200_v21  ;;  %8573 = vmatpush.msra.mxu2 %v8480_v35  ;;  %v8903_v35 = vand.u32 4294901760, %v8902_v8 }
0x135d   : > { %8639 = vmatmul.f32.vlgmr.msrb.gmra.mxu0 %v19234_v20  ;;  %8748 = vmatpush.msrb.mxu3 %v19537_v13 }
0x135e   : > { %8710 = vmatpush.msrb.mxu2 %v19531_v55  ;;  %8779 = vmatpush.msra.mxu0 %v8665_v51  ;;  %v8904_v58 = vsub.f32 %v8902_v8, %v8903_v35 }
0x135f   : > { %8688 = vmatmul.f32.vlgmr.msrb.gmra.mxu1 %v19182_v27  ;;  %8750 = vmatpush.msrb.mxu3 %v19544_v38 }
0x1360   : > { %8713 = vmatpush.msrb.mxu2 %v19542_v14  ;;  %8783 = vmatpush.msra.mxu0 %v8671_v1  ;;  %v8905_v42 = vand.u32 4294901760, %v8904_v58 }
0x1361   : > { %8814 = vmatpush.msra.mxu1 %v19519_v4  ;;  %v8908_v4 = vsub.f32 %v17243_v28, %v8858_v23  ;;  %8894 = vmatpush.msra.mxu3 %v8893_v12 }
0x1362   : > { %8716 = vmatpush.msrb.mxu2 %v8676_v63  ;;  %8787 = vmatpush.msra.mxu0 %v8677_v15 }
0x1363   : > { %8575 = vmatmul.f32.vlgmr.msra.gmra.mxu2 %v19200_v21  ;;  %8816 = vmatpush.msra.mxu1 %v19533_v39  ;;  %v8909_v61 = vand.u32 4294901760, %v8908_v4 }
0x1364   : > { %8754 = vmatmul.f32.vlgmr.msrb.gmra.mxu3 %v19196_v30  ;;  %8719 = vmatpush.msrb.mxu2 %v8682_v43  ;;  %v17482_v43 = vld [vmem:[%s20803_s23 + $0x2] ss:$0 sm:$0xff] }
0x1365   : > { %8647 = vmatmul.f32.gmra.mxu0 %v19256_v18  ;;  %8818 = vmatpush.msra.mxu1 %v19537_v13  ;;  %v8910_v62 = vsub.f32 %v8908_v4, %v8909_v61 }
0x1366   : > { %8791 = vmatpush.msra.mxu0 %v8683_v2  ;;  %8853 = vmatpush.msra.mxu2 %v8852_v44 }
0x1367   : > { %8692 = vmatmul.f32.gmra.mxu1 %v19198_v11  ;;  %8900 = vmatpush.msra.mxu3 %v8899_v57  ;;  %v8911_v5 = vand.u32 4294901760, %v8910_v62 }
0x1368   : > { %8820 = vmatpush.msra.mxu1 %v19544_v38  ;;  %8855 = vmatpush.msra.mxu2 %v8854_v45 }
0x1369   : > { %8936 = vmatpush.msrb.mxu0 %v8890_v37  ;;  %8906 = vmatpush.msra.mxu3 %v8905_v42 }
0x136a   : > { %8970 = vmatpush.msrb.mxu1 %v8852_v44  ;;  %8857 = vmatpush.msra.mxu2 %v8856_v17 }
0x136b   : > { %8722 = vmatmul.f32.vlgmr.msrb.gmra.mxu2 %v19187_v26  ;;  %8939 = vmatpush.msrb.mxu0 %v8896_v19 }
0x136c   : > { %8760 = vmatmul.f32.gmra.mxu3 %v19230_v24  ;;  %8972 = vmatpush.msrb.mxu1 %v8854_v45 }
0x136d   : > { %8793 = vmatmul.f32.vlgmr.msra.gmra.mxu0 %v19182_v27  ;;  %8859 = vmatpush.msra.mxu2 %v8858_v23 }
0x136e   : > { %8974 = vmatpush.msrb.mxu1 %v8856_v17  ;;  %8942 = vmatpush.msrb.mxu0 %v8902_v8 }
0x136f   : > { %8822 = vmatmul.f32.vlgmr.msra.gmra.mxu1 %v19182_v27  ;;  %9005 = vmatpush.msrb.mxu2 %v8891_v49 }
0x1370   : > { %8976 = vmatpush.msrb.mxu1 %v8858_v23  ;;  %8945 = vmatpush.msrb.mxu0 %v8908_v4 }
0x1371   : > { %9009 = vmatpush.msrb.mxu2 %v8897_v25  ;;  %8912 = vmatpush.msra.mxu3 %v8911_v5 }
0x1373   : > { %8727 = vmatmul.f32.gmra.mxu2 %v19208_v22  ;;  %9040 = vmatpush.msrb.mxu3 %v8852_v44 }
0x1374   : > { %9013 = vmatpush.msrb.mxu2 %v8903_v35  ;;  %8914 = vmatmul.f32.vlgmr.msra.gmra.mxu3 %v19182_v27 }
0x1375   : > { %8797 = vmatmul.f32.gmra.mxu0 %v19198_v11  ;;  %9042 = vmatpush.msrb.mxu3 %v8854_v45 }
0x1376   : > { %9017 = vmatpush.msrb.mxu2 %v8909_v61 }
0x1377   : > { %8826 = vmatmul.f32.gmra.mxu1 %v19198_v11  ;;  %9044 = vmatpush.msrb.mxu3 %v8856_v17 }
0x1379   : > { %9046 = vmatpush.msrb.mxu3 %v8858_v23 }
0x137b   : > { %8865 = vmatmul.f32.vlgmr.msra.gmra.mxu2 %v19234_v20 }
0x137c   : > { %8918 = vmatmul.f32.gmra.mxu3 %v19198_v11 }
0x137d   : > { %8948 = vmatmul.f32.vlgmr.msrb.gmra.mxu0 %v19187_v26 }
0x137f   : > { %8980 = vmatmul.f32.vlgmr.msrb.gmra.mxu1 %v19196_v30 }
0x1383   : > { %8873 = vmatmul.f32.gmra.mxu2 %v19256_v18 }
0x1384   : > { %9048 = vmatmul.f32.vlgmr.msrb.gmra.mxu3 %v19182_v27 }
0x1385   : > { %8953 = vmatmul.f32.gmra.mxu0 %v19208_v22 }
0x1387   : > { %8986 = vmatmul.f32.gmra.mxu1 %v19230_v24 }
0x138b   : > { %9019 = vmatmul.f32.vlgmr.msrb.gmra.mxu2 %v19182_v27 }
0x138c   : > { %9052 = vmatmul.f32.gmra.mxu3 %v19198_v11 }
0x1393   : > { %9023 = vmatmul.f32.gmra.mxu2 %v19198_v11 }
0x13ba   : > { %v19621_v3 = vpop.f32.mrf.mxu0 }
0x13bc   : > { %v19625_v34 = vpop.f32.mrf.mxu1 }
0x13be   : > { %v19627_v32 = vpop.f32.mrf.mxu3 }
0x13c2   : > { %v19629_v55 = vpop.f32.mrf.mxu0 }
0x13c4   : > { %v19633_v39 = vpop.f32.mrf.mxu1 }
0x13c6   : > { %v19635_v9 = vpop.f32.mrf.mxu2  ;;  %v19637_v33 = vpop.f32.mrf.mxu3 }
0x13ca   : > { %v19639_v0 = vpop.f32.mrf.mxu0 }
0x13cc   : > { %v19642_v13 = vpop.f32.mrf.mxu1 }
0x13ce   : > { %v19644_v59 = vpop.f32.mrf.mxu2  ;;  %v19646_v51 = vpop.f32.mrf.mxu3 }
0x13d2   : > { %v8516_v14 = vpop.f32.mrf.mxu0 }
0x13d4   : > { %v8543_v38 = vpop.f32.mrf.mxu1 }
0x13d6   : > { %v19648_v63 = vpop.f32.mrf.mxu2  ;;  %v8486_v56 = vpop.f32.mrf.mxu3 }
0x13da   : > { %v8640_v1 = vpop.f32.mrf.mxu0 }
0x13db   : > { %v8641_v47 = vadd.f32 %v17483_v60, %v8640_v1 }
0x13dc   : > { %v8689_v15 = vpop.f32.mrf.mxu1 }
0x13dd   : > { %v8690_v54 = vadd.f32 %v8689_v15, %v8641_v47 }
0x13de   : > { %v8445_v36 = vpop.f32.mrf.mxu2 }
0x13df   : > { %v8446_v52 = vadd.f32 %v17482_v43, %v8445_v36  ;;  %v8601_v40 = vpop.f32.mrf.mxu3 }
0x13e1   : > { %v8487_v2 = vadd.f32 %v8486_v56, %v8446_v52 }
0x13e2   : > { %v8648_v10 = vpop.f32.mrf.mxu0 }
0x13e3   : > { %v8517_v41 = vadd.f32 %v8516_v14, %v8487_v2  ;;  %v8649_v25 = vadd.f32 %v17483_v60, %v8648_v10 }
0x13e4   : > { %v8693_v50 = vpop.f32.mrf.mxu1 }
0x13e5   : > { %v8544_v44 = vadd.f32 %v8543_v38, %v8517_v41  ;;  %v8694_v53 = vadd.f32 %v8693_v50, %v8649_v25 }
0x13e6   : > { %v8576_v46 = vpop.f32.mrf.mxu2 }
0x13e7   : > { %v8577_v37 = vadd.f32 %v8576_v46, %v8544_v44  ;;  %v8755_v45 = vpop.f32.mrf.mxu3 }
0x13e9   : > { %v8602_v28 = vadd.f32 %v8601_v40, %v8577_v37 }
0x13ea   : > { %v8794_v17 = vpop.f32.mrf.mxu0 }
0x13eb   : > { %v9057_v12 = vsel %vm2446_vm3, %v8602_v28, 0 }
0x13ec   : > { %v8823_v29 = vpop.f32.mrf.mxu1  ;;  %v9083_v58 = vand.u32 4294901760, %v9057_v12 }
0x13ee   : > { %v8723_v49 = vpop.f32.mrf.mxu2  ;;  %v9084_v38 = vsub.f32 %v9057_v12, %v9083_v58 }
0x13ef   : > { %v8724_v19 = vadd.f32 %v8723_v49, %v8690_v54  ;;  %v8761_v57 = vpop.f32.mrf.mxu3  ;;  %v17484_v54 = vld [vmem:[%s20806_s16 + $0x2] ss:$0 sm:$0xff] }
0x13f0   : > { %v9085_v15 = vand.u32 4294901760, %v9084_v38 }
0x13f1   : > { %v8756_v23 = vadd.f32 %v8755_v45, %v8724_v19 }
0x13f2   : > { %v8798_v42 = vpop.f32.mrf.mxu0  ;;  %v9086_v41 = vsub.f32 %v9084_v38, %v9085_v15 }
0x13f3   : > { %v8795_v8 = vadd.f32 %v8794_v17, %v8756_v23 }
0x13f4   : > { %v8827_v14 = vpop.f32.mrf.mxu1  ;;  %v9087_v50 = vand.u32 4294901760, %v9086_v41 }
0x13f5   : > { %v8824_v35 = vadd.f32 %v8823_v29, %v8795_v8 }
0x13f6   : > { %v8728_v4 = vpop.f32.mrf.mxu2 }
0x13f7   : > { %v8729_v61 = vadd.f32 %v8728_v4, %v8694_v53  ;;  %v9060_v62 = vsel %vm2446_vm3, %v8824_v35, 0  ;;  %v8915_v19 = vpop.f32.mrf.mxu3 }
0x13f8   : > { %v9081_v1 = vand.u32 4294901760, %v9060_v62 }
0x13f9   : > { %v8762_v5 = vadd.f32 %v8761_v57, %v8729_v61 }
0x13fa   : > { %v9113_v2 = vsub.f32 %v9060_v62, %v9081_v1  ;;  %v8949_v17 = vpop.f32.mrf.mxu0 }
0x13fb   : > { %v8799_v56 = vadd.f32 %v8798_v42, %v8762_v5 }
0x13fc   : > { %v9114_v60 = vand.u32 4294901760, %v9113_v2  ;;  %v8981_v25 = vpop.f32.mrf.mxu1 }
0x13fd   : > { %v8828_v43 = vadd.f32 %v8827_v14, %v8799_v56 }
0x13fe   : > { %v9115_v47 = vsub.f32 %v9113_v2, %v9114_v60  ;;  %v8866_v45 = vpop.f32.mrf.mxu2 }
0x13ff   : > { %v9063_v36 = vsel %vm2446_vm3, %v8828_v43, 0  ;;  %v8867_v49 = vadd.f32 %v17484_v54, %v8866_v45  ;;  %v8919_v12 = vpop.f32.mrf.mxu3 }
0x1400   : > { %v9079_v52 = vand.u32 4294901760, %v9063_v36  ;;  %v9116_v37 = vand.u32 4294901760, %v9115_v47 }
0x1401   : > { %v8916_v29 = vadd.f32 %v8915_v19, %v8867_v49 }
0x1402   : > { %v9107_v40 = vsub.f32 %v9063_v36, %v9079_v52  ;;  %9080 = vmatpush.xpose.msra.mxu0 %v9079_v52  ;;  %9164 = vmatpush.xpose.msra.mxu3 %v9079_v52  ;;  %v8954_v57 = vpop.f32.mrf.mxu0 }
0x1403   : > { %v8950_v8 = vadd.f32 %v8949_v17, %v8916_v29 }
0x1404   : > { %9139 = vmatpush.xpose.msra.mxu2 %v9107_v40  ;;  %v9108_v10 = vand.u32 4294901760, %v9107_v40  ;;  %v8987_v62 = vpop.f32.mrf.mxu1 }
0x1405   : > { %v8982_v4 = vadd.f32 %v8981_v25, %v8950_v8 }
0x1406   : > { %9082 = vmatpush.xpose.msra.mxu0 %v9081_v1  ;;  %9166 = vmatpush.xpose.msra.mxu3 %v9081_v1  ;;  %v9109_v46 = vsub.f32 %v9107_v40, %v9108_v10  ;;  %v8874_v28 = vpop.f32.mrf.mxu2 }
0x1407   : > { %v8875_v23 = vadd.f32 %v17484_v54, %v8874_v28  ;;  %v9049_v5 = vpop.f32.mrf.mxu3 }
0x1408   : > { %9142 = vmatpush.xpose.msra.mxu2 %v9113_v2  ;;  %v9110_v44 = vand.u32 4294901760, %v9109_v46 }
0x1409   : > { %9088 = vmatmul.f32.vlgmr.msra.gmra.mxu0 %v9087_v50  ;;  %9170 = vmatmul.f32.vlgmr.msra.gmra.mxu3 %v9085_v15  ;;  %v8920_v35 = vadd.f32 %v8919_v12, %v8875_v23 }
0x140a   : > { %9191 = vmatpush.xpose.msrb.mxu0 %v9108_v10  ;;  %9111 = vmatpush.xpose.msra.mxu1 %v9110_v44 }
0x140b   : > { %9145 = vmatmul.f32.vlgmr.msra.gmra.mxu2 %v9084_v38  ;;  %v8955_v42 = vadd.f32 %v8954_v57, %v8920_v35 }
0x140d   : > { %v8988_v14 = vadd.f32 %v8987_v62, %v8955_v42 }
0x140e   : > { %9195 = vmatpush.xpose.msrb.mxu0 %v9114_v60  ;;  %9117 = vmatpush.xpose.msra.mxu1 %v9116_v37  ;;  %v9020_v53 = vpop.f32.mrf.mxu2 }
0x140f   : > { %v9021_v61 = vadd.f32 %v9020_v53, %v8982_v4  ;;  %v9053_v15 = vpop.f32.mrf.mxu3 }
0x1411   : > { %9119 = vmatmul.f32.vlgmr.msra.gmra.mxu1 %v9083_v58  ;;  %9197 = vmatmul.f32.vlgmr.msrb.gmra.mxu0 %v9083_v58 }
0x1412   : > { %9216 = vmatpush.xpose.msrb.mxu1 %v9079_v52 }
0x1416   : > { %9218 = vmatpush.xpose.msrb.mxu1 %v9081_v1  ;;  %v9024_v38 = vpop.f32.mrf.mxu2 }
0x1417   : > { %v9025_v1 = vadd.f32 %v9024_v38, %v8988_v14 }
0x1419   : > { %9220 = vmatmul.f32.vlgmr.msrb.gmra.mxu1 %v9083_v58  ;;  %v9050_v58 = vadd.f32 %v9049_v5, %v9021_v61  ;;  %v9054_v36 = vadd.f32 %v9053_v15, %v9025_v1  ;;  %v17248_v15 = vld [vmem:[%s20807_s22 + $0x10] sm:$0xff] }
0x141b   : > { %v9258_v56 = vand.u32 4294901760, %v9050_v58  ;;  %v9240_v52 = vsel %vm2616_vm4, %v9054_v36, 0  ;;  %v9421_v36 = vand.u32 4294901760, %v17248_v15 }
0x141c   : > { %v9256_v2 = vand.u32 4294901760, %v9240_v52 }
0x141d   : > { %v9290_v43 = vsub.f32 %v9050_v58, %v9258_v56 }
0x141e   : > { %v9284_v41 = vsub.f32 %v9240_v52, %v9256_v2  ;;  %9257 = vmatpush.msrb.mxu2 %v9256_v2  ;;  %9341 = vmatpush.msra.mxu1 %v9256_v2  ;;  %v9448_v52 = vsub.f32 %v17248_v15, %v9421_v36 }
0x141f   : > { %v9291_v40 = vand.u32 4294901760, %v9290_v43 }
0x1420   : > { %v9285_v10 = vand.u32 4294901760, %v9284_v41  ;;  %9316 = vmatpush.msra.mxu0 %v9284_v41  ;;  %9259 = vmatpush.msrb.mxu2 %v9258_v56 }
0x1421   : > { %v9292_v60 = vsub.f32 %v9290_v43, %v9291_v40  ;;  %9343 = vmatpush.msra.mxu1 %v9258_v56 }
0x1422   : > { %v9286_v46 = vsub.f32 %v9284_v41, %v9285_v10  ;;  %9319 = vmatpush.msra.mxu0 %v9290_v43  ;;  %9368 = vmatpush.msra.mxu2 %v9285_v10 }
0x1423   : > { %v9293_v44 = vand.u32 4294901760, %v9292_v60  ;;  %v17251_v60 = vld [vmem:[%s20797_s26 + $0x70] sm:$0xff] }
0x1424   : > { %v9287_v50 = vand.u32 4294901760, %v9286_v46  ;;  %9372 = vmatpush.msra.mxu2 %v9291_v40  ;;  %9422 = vmatpush.msrb.mxu0 %v9421_v36  ;;  %v17252_v40 = vld [vmem:[%s20797_s26 + $0x78] sm:$0xff] }
0x1425   : > { %v19662_v10 = vand.u32 4294901760, %v17252_v40 }
0x1426   : > { %9288 = vmatpush.msrb.mxu3 %v9287_v50 }
0x1427   : > { %v19667_v50 = vsub.f32 %v17252_v40, %v19662_v10 }
0x1428   : > { %9294 = vmatpush.msrb.mxu3 %v9293_v44  ;;  %v19669_v44 = vand.u32 4294901760, %v17251_v60 }
0x142a   : > { %9393 = vmatpush.msra.mxu3 %v9256_v2  ;;  %v9449_v2 = vand.u32 4294901760, %v9448_v52 }
0x142c   : > { %9395 = vmatpush.msra.mxu3 %v9258_v56  ;;  %v9450_v41 = vsub.f32 %v9448_v52, %v9449_v2 }
0x142e   : > { %v9451_v46 = vand.u32 4294901760, %v9450_v41 }
0x1430   : > { %9452 = vmatpush.msrb.mxu1 %v9451_v46 }
0x1486   : > { %v9089_v47 = vpop.f32.mrf.mxu0 }
0x148c   : > { %v9171_v17 = vpop.f32.mrf.mxu3 }
0x148e   : > { %v9120_v37 = vpop.f32.mrf.mxu1  ;;  %v9146_v54 = vpop.f32.mrf.mxu2 }
0x148f   : > { %v9121_v45 = vadd.f32 %v9120_v37, %v9089_v47  ;;  %v9198_v28 = vpop.f32.mrf.mxu0  ;;  %v17250_v47 = vld [vmem:[%s20797_s26 + $0x68] sm:$0xff]  ;;  %v9606_v37 = vand.u32 4294901760, %v19667_v50 }
0x1491   : > { %v9147_v49 = vadd.f32 %v9146_v54, %v9121_v45  ;;  %v19674_v45 = vand.u32 4294901760, %v17250_v47  ;;  %v19677_v54 = vsub.f32 %v17251_v60, %v19669_v44 }
0x1493   : > { %v9172_v19 = vadd.f32 %v9171_v17, %v9147_v49  ;;  %v17249_v49 = vld [vmem:[%s20797_s26 + $0x60] sm:$0xff]  ;;  %v9607_v17 = vsub.f32 %v19667_v50, %v9606_v37 }
0x1495   : > { %v9199_v29 = vadd.f32 %v9198_v28, %v9172_v19  ;;  %v9612_v19 = vand.u32 4294901760, %v19677_v54  ;;  %v19683_v28 = vand.u32 4294901760, %v17249_v49 }
0x1496   : > { %v9221_v25 = vpop.f32.mrf.mxu1 }
0x1497   : > { %v9222_v23 = vadd.f32 %v9221_v25, %v9199_v29  ;;  %v19686_v29 = vsub.f32 %v17250_v47, %v19674_v45  ;;  %v9608_v25 = vand.u32 4294901760, %v9607_v17 }
0x1499   : > { %v9224_v8 = vmul.f32 0.35355338, %v9222_v23  ;;  %v9613_v23 = vsub.f32 %v19677_v54, %v9612_v19 }
0x149b   : > { %v9225_v12 = vsel %vm6938_vm12, %v9224_v8, -inf }
0x149c   : > { %9226 = vmax.xlane.f32.xlu2 %v9225_v12  ;;  %v19692_v12 = vsub.f32 %v17249_v49, %v19683_v28 }
0x150f   : > { %v9227_v53 = vpop.xlane.xlu2 %9226 }
0x1510   : > { %v9228_v35 = vsub.f32 %v9224_v8, %v9227_v53  ;;  %v9618_v8 = vand.u32 4294901760, %v19686_v29  ;;  %v9614_v53 = vand.u32 4294901760, %v9613_v23 }
0x1512   : > { %v9229_v4 = vmul.f32 1.442695, %v9228_v35  ;;  %v9619_v35 = vsub.f32 %v19686_v29, %v9618_v8 }
0x1514   : > { %17544 = vpow2.f32 %v9229_v4  ;;  %v9624_v4 = vand.u32 4294901760, %v19692_v12 }
0x151a   : > { %v17545_v57 = vpop.eup %17544 }
0x151b   : > { %v9231_v61 = vsel %vm6938_vm12, %v17545_v57, 0.0 }
0x151c   : > { %9232 = vadd.xlane.f32.xlu0 %v9231_v61  ;;  %v9625_v61 = vsub.f32 %v19692_v12, %v9624_v4 }
0x158f   : > { %v9233_v42 = vpop.xlane.xlu0 %9232 }
0x1590   : > { %17546 = vrcp.f32 %v9233_v42  ;;  %v9626_v42 = vand.u32 4294901760, %v9625_v61 }
0x1596   : > { %v17547_v62 = vpop.eup %17546 }
0x1597   : > { %v9235_v5 = vmul.f32 %v17547_v62, %v17545_v57  ;;  %v9620_v57 = vand.u32 4294901760, %v9619_v35  ;;  %v17254_v35 = vld [vmem:[%s20798_s8 + $0x60] sm:$0xff] }
0x1599   : > { %v9237_v58 = vsel %vm6950_vm13, %v9235_v5, 0 }
0x159a   : > { %v9260_v14 = vand.u32 4294901760, %v9237_v58 }
0x159c   : > { %v9261_v38 = vsub.f32 %v9237_v58, %v9260_v14  ;;  %9296 = vmatmul.f32.vlgmr.msrb.gmra.mxu3 %v9260_v14 }
0x159d   : > { %9498 = vmatpush.msrb.mxu3 %v9421_v36 }
0x159e   : > { %9322 = vmatmul.f32.vlgmr.msra.gmra.mxu0 %v9261_v38  ;;  %v9262_v56 = vand.u32 4294901760, %v9261_v38 }
0x159f   : > { %9524 = vmatpush.msra.mxu0 %v9449_v2 }
0x15a0   : > { %9347 = vmatmul.f32.vlgmr.msra.gmra.mxu1 %v9262_v56  ;;  %v9263_v1 = vsub.f32 %v9261_v38, %v9262_v56  ;;  %v17257_v56 = vld [vmem:[%s20798_s8 + $0x78] sm:$0xff] }
0x15a1   : > { %9546 = vmatpush.msra.mxu1 %v9421_v36 }
0x15a2   : > { %v9264_v43 = vand.u32 4294901760, %v9263_v1 }
0x15a4   : > { %9265 = vmatmul.f32.vlgmr.msrb.gmra.mxu2 %v9264_v43  ;;  %9397 = vmatmul.f32.vlgmr.msra.gmra.mxu3 %v9260_v14  ;;  %v19698_v43 = vand.u32 4294901760, %v17257_v56 }
0x15a5   : > { %9475 = vmatpush.msrb.mxu2 %v9448_v52  ;;  %9609 = vmatpush.msra.mxu3 %v9608_v25  ;;  %v17256_v52 = vld [vmem:[%s20798_s8 + $0x70] sm:$0xff]  ;;  %v17255_v25 = vld [vmem:[%s20798_s8 + $0x68] sm:$0xff] }
0x15a6   : > { %v19702_v41 = vsub.f32 %v17257_v56, %v19698_v43  ;;  %v19704_v46 = vand.u32 4294901760, %v17256_v52 }
0x15a7   : > { %9615 = vmatpush.msra.mxu3 %v9614_v53 }
0x15a8   : > { %v9809_v17 = vand.u32 4294901760, %v19702_v41  ;;  %v19710_v23 = vsub.f32 %v17256_v52, %v19704_v46 }
0x15a9   : > { %9621 = vmatpush.msra.mxu3 %v9620_v57  ;;  %v19714_v57 = vand.u32 4294901760, %v17255_v25 }
0x15ab   : > { %9627 = vmatpush.msra.mxu3 %v9626_v42  ;;  %v9810_v42 = vsub.f32 %v19702_v41, %v9809_v17 }
0x15ac   : > { %9374 = vmatmul.f32.vlgmr.msra.gmra.mxu2 %v9260_v14 }
0x15ad   : > { %9576 = vmatpush.msra.mxu2 %v19662_v10  ;;  %v9811_v56 = vand.u32 4294901760, %v9810_v42 }
0x15af   : > { %9578 = vmatpush.msra.mxu2 %v19669_v44 }
0x15b1   : > { %9580 = vmatpush.msra.mxu2 %v19674_v45 }
0x15b3   : > { %9582 = vmatpush.msra.mxu2 %v19683_v28 }
0x161b   : > { %v9323_v14 = vpop.f32.mrf.mxu0 }
0x161d   : > { %v9348_v1 = vpop.f32.mrf.mxu1 }
0x161f   : > { %v9297_v62 = vpop.f32.mrf.mxu3 }
0x1627   : > { %v9266_v5 = vpop.f32.mrf.mxu2  ;;  %v9398_v40 = vpop.f32.mrf.mxu3 }
0x1628   : > { %v9298_v58 = vadd.f32 %v9297_v62, %v9266_v5  ;;  %v9815_v62 = vand.u32 4294901760, %v19710_v23  ;;  %v9776_v5 = vand.u32 4294901760, %v17254_v35 }
0x162a   : > { %v9324_v38 = vadd.f32 %v9323_v14, %v9298_v58  ;;  %v9820_v14 = vsub.f32 %v17255_v25, %v19714_v57 }
0x162c   : > { %v9349_v15 = vadd.f32 %v9348_v1, %v9324_v38  ;;  %v9816_v1 = vsub.f32 %v19710_v23, %v9815_v62 }
0x162f   : > { %v9375_v36 = vpop.f32.mrf.mxu2 }
0x1630   : > { %v9376_v2 = vadd.f32 %v9375_v36, %v9349_v15  ;;  %v9821_v15 = vand.u32 4294901760, %v9820_v14 }
0x1632   : > { %v9399_v60 = vadd.f32 %v9398_v40, %v9376_v2 }
0x1634   : > { %v9404_v47 = vsel %vm2446_vm3, %v9399_v60, 0 }
0x1635   : > { %v9423_v49 = vand.u32 4294901760, %v9404_v47 }
0x1637   : > { %v9424_v53 = vsub.f32 %v9404_v47, %v9423_v49  ;;  %9454 = vmatmul.f32.vlgmr.msrb.gmra.mxu1 %v9423_v49 }
0x1638   : > { %9676 = vmatpush.msrb.mxu1 %v19662_v10 }
0x1639   : > { %v9425_v61 = vand.u32 4294901760, %v9424_v53  ;;  %9478 = vmatmul.f32.vlgmr.msrb.gmra.mxu2 %v9424_v53 }
0x163a   : > { %9678 = vmatpush.msrb.mxu1 %v19669_v44  ;;  %9705 = vmatpush.msrb.mxu2 %v9606_v37  ;;  %v9826_v37 = vsub.f32 %v17254_v35, %v9776_v5 }
0x163b   : > { %v9426_v58 = vsub.f32 %v9424_v53, %v9425_v61  ;;  %9502 = vmatmul.f32.vlgmr.msrb.gmra.mxu3 %v9425_v61 }
0x163c   : > { %9680 = vmatpush.msrb.mxu1 %v19674_v45  ;;  %9709 = vmatpush.msrb.mxu2 %v9612_v19  ;;  %v9827_v19 = vand.u32 4294901760, %v9826_v37 }
0x163d   : > { %v9427_v38 = vand.u32 4294901760, %v9426_v58  ;;  %9736 = vmatpush.msrb.mxu3 %v19662_v10  ;;  %v9817_v10 = vand.u32 4294901760, %v9816_v1 }
0x163e   : > { %9682 = vmatpush.msrb.mxu1 %v19683_v28  ;;  %9713 = vmatpush.msrb.mxu2 %v9618_v8 }
0x163f   : > { %9428 = vmatmul.f32.vlgmr.msrb.gmra.mxu0 %v9427_v38  ;;  %9548 = vmatmul.f32.vlgmr.msra.gmra.mxu1 %v9423_v49 }
0x1640   : > { %9738 = vmatpush.msrb.mxu3 %v19669_v44  ;;  %9647 = vmatpush.msrb.mxu0 %v19667_v50  ;;  %v9822_v44 = vsub.f32 %v9820_v14, %v9821_v15 }
0x1641   : > { %9588 = vmatmul.f32.vlgmr.msra.gmra.mxu2 %v19232_v31  ;;  %9812 = vmatpush.msra.mxu1 %v9811_v56  ;;  %v9828_v31 = vsub.f32 %v9826_v37, %v9827_v19  ;;  %v17485_v56 = vld [vmem:[%s20803_s23 + $0x3] ss:$0 sm:$0xff] }
0x1642   : > { %9717 = vmatpush.msrb.mxu2 %v9624_v4  ;;  %9740 = vmatpush.msrb.mxu3 %v19674_v45  ;;  %v9823_v50 = vand.u32 4294901760, %v9822_v44  ;;  %v17486_v44 = vld [vmem:[%s20804_s28 + $0x3] ss:$0 sm:$0xff] }
0x1643   : > { %9629 = vmatmul.f32.vlgmr.msra.gmra.mxu3 %v19200_v21  ;;  %9650 = vmatpush.msrb.mxu0 %v19677_v54  ;;  %v9829_v45 = vand.u32 4294901760, %v9828_v31 }
0x1644   : > { %9742 = vmatpush.msrb.mxu3 %v19683_v28  ;;  %9854 = vmatpush.msra.mxu2 %v19702_v41 }
0x1645   : > { %9653 = vmatpush.msrb.mxu0 %v19686_v29  ;;  %9818 = vmatpush.msra.mxu1 %v9817_v10  ;;  %v17260_v29 = vld [vmem:[%s20801_s2 + $0x68] sm:$0xff] }
0x1646   : > { %9888 = vmatpush.msra.mxu3 %v19698_v43  ;;  %9857 = vmatpush.msra.mxu2 %v19710_v23 }
0x1647   : > { %9526 = vmatmul.f32.vlgmr.msra.gmra.mxu0 %v9423_v49  ;;  %9686 = vmatmul.f32.vlgmr.msrb.gmra.mxu1 %v19212_v16  ;;  %v17261_v16 = vld [vmem:[%s20801_s2 + $0x70] sm:$0xff] }
0x1648   : > { %9656 = vmatpush.msrb.mxu0 %v19692_v12  ;;  %9860 = vmatpush.msra.mxu2 %v9820_v14  ;;  %v9998_v28 = vand.u32 4294901760, %v17261_v16  ;;  %v10000_v12 = vand.u32 4294901760, %v17260_v29 }
0x1649   : > { %9719 = vmatmul.f32.vlgmr.msrb.gmra.mxu2 %v19200_v21  ;;  %9890 = vmatpush.msra.mxu3 %v19704_v46 }
0x164a   : > { %9771 = vmatpush.msra.mxu0 %v19698_v43  ;;  %9863 = vmatpush.msra.mxu2 %v9826_v37  ;;  %v10040_v4 = vsub.f32 %v17261_v16, %v9998_v28  ;;  %v10046_v40 = vsub.f32 %v17260_v29, %v10000_v12 }
0x164b   : > { %9744 = vmatmul.f32.vlgmr.msrb.gmra.mxu3 %v19200_v21  ;;  %9824 = vmatpush.msra.mxu1 %v9823_v50  ;;  %v17262_v21 = vld [vmem:[%s20801_s2 + $0x78] sm:$0xff] }
0x164c   : > { %9773 = vmatpush.msra.mxu0 %v19704_v46  ;;  %9892 = vmatpush.msra.mxu3 %v19714_v57  ;;  %v10041_v52 = vand.u32 4294901760, %v10040_v4 }
0x164d   : > { %9830 = vmatpush.msra.mxu1 %v9829_v45 }
0x164e   : > { %9775 = vmatpush.msra.mxu0 %v19714_v57  ;;  %9894 = vmatpush.msra.mxu3 %v9776_v5  ;;  %v10042_v60 = vsub.f32 %v10040_v4, %v10041_v52 }
0x164f   : > { %9659 = vmatmul.f32.vlgmr.msrb.gmra.mxu0 %v19203_v7  ;;  %9832 = vmatmul.f32.vlgmr.msra.gmra.mxu1 %v19182_v27  ;;  %v9996_v7 = vand.u32 4294901760, %v17262_v21 }
0x1650   : > { %9777 = vmatpush.msra.mxu0 %v9776_v5  ;;  %9958 = vmatpush.msrb.mxu1 %v19698_v43  ;;  %v17259_v43 = vld [vmem:[%s20801_s2 + $0x60] sm:$0xff]  ;;  %v10043_v49 = vand.u32 4294901760, %v10042_v60 }
0x1651   : > { %9866 = vmatmul.f32.vlgmr.msra.gmra.mxu2 %v19187_v26  ;;  %v10034_v54 = vsub.f32 %v17262_v21, %v9996_v7  ;;  %v10002_v2 = vand.u32 4294901760, %v17259_v43 }
0x1652   : > { %9923 = vmatpush.msrb.mxu0 %v9809_v17  ;;  %9960 = vmatpush.msrb.mxu1 %v19704_v46  ;;  %v10047_v46 = vand.u32 4294901760, %v10046_v40 }
0x1653   : > { %9898 = vmatmul.f32.vlgmr.msra.gmra.mxu3 %v19196_v30  ;;  %9997 = vmatpush.msrb.mxu2 %v9996_v7  ;;  %v10035_v8 = vand.u32 4294901760, %v10034_v54  ;;  %v10052_v47 = vsub.f32 %v17259_v43, %v10002_v2 }
0x1654   : > { %9927 = vmatpush.msrb.mxu0 %v9815_v62  ;;  %9962 = vmatpush.msrb.mxu1 %v19714_v57  ;;  %v10048_v17 = vsub.f32 %v10046_v40, %v10047_v46 }
0x1655   : > { %9999 = vmatpush.msrb.mxu2 %v9998_v28  ;;  %v10036_v36 = vsub.f32 %v10034_v54, %v10035_v8  ;;  %v10053_v25 = vand.u32 4294901760, %v10052_v47 }
0x1656   : > { %9931 = vmatpush.msrb.mxu0 %v9821_v15  ;;  %9964 = vmatpush.msrb.mxu1 %v9776_v5  ;;  %v10049_v23 = vand.u32 4294901760, %v10048_v17 }
0x1657   : > { %9783 = vmatmul.f32.vlgmr.msra.gmra.mxu0 %v19234_v20  ;;  %9836 = vmatmul.f32.gmra.mxu1 %v19198_v11  ;;  %v10037_v41 = vand.u32 4294901760, %v10036_v36  ;;  %v10054_v53 = vsub.f32 %v10052_v47, %v10053_v25 }
0x1658   : > { %9935 = vmatpush.msrb.mxu0 %v9827_v19  ;;  %10114 = vmatpush.msra.mxu1 %v9996_v7 }
0x1659   : > { %9871 = vmatmul.f32.gmra.mxu2 %v19208_v22  ;;  %10038 = vmatpush.msrb.mxu3 %v10037_v41  ;;  %v10055_v35 = vand.u32 4294901760, %v10054_v53 }
0x165a   : > { %10080 = vmatpush.msra.mxu0 %v10034_v54  ;;  %10116 = vmatpush.msra.mxu1 %v9998_v28 }
0x165b   : > { %9904 = vmatmul.f32.gmra.mxu3 %v19230_v24  ;;  %10001 = vmatpush.msrb.mxu2 %v10000_v12 }
0x165c   : > { %10083 = vmatpush.msra.mxu0 %v10040_v4  ;;  %10118 = vmatpush.msra.mxu1 %v10000_v12 }
0x165d   : > { %10003 = vmatpush.msrb.mxu2 %v10002_v2  ;;  %10044 = vmatpush.msrb.mxu3 %v10043_v49 }
0x165e   : > { %10086 = vmatpush.msra.mxu0 %v10046_v40  ;;  %10120 = vmatpush.msra.mxu1 %v10002_v2 }
0x165f   : > { %9791 = vmatmul.f32.gmra.mxu0 %v19256_v18  ;;  %9966 = vmatmul.f32.vlgmr.msrb.gmra.mxu1 %v19182_v27 }
0x1660   : > { %10149 = vmatpush.msra.mxu2 %v10035_v8  ;;  %10089 = vmatpush.msra.mxu0 %v10052_v47 }
0x1661   : > { %10009 = vmatmul.f32.vlgmr.msrb.gmra.mxu2 %v19234_v20  ;;  %10050 = vmatpush.msrb.mxu3 %v10049_v23 }
0x1662   : > { %10153 = vmatpush.msra.mxu2 %v10041_v52 }
0x1663   : > { %10056 = vmatpush.msrb.mxu3 %v10055_v35 }
0x1664   : > { %10157 = vmatpush.msra.mxu2 %v10047_v46  ;;  %10058 = vmatmul.f32.vlgmr.msrb.gmra.mxu3 %v19182_v27 }
0x1665   : > { %10184 = vmatpush.msra.mxu3 %v9996_v7 }
0x1666   : > { %10161 = vmatpush.msra.mxu2 %v10053_v25 }
0x1667   : > { %9937 = vmatmul.f32.vlgmr.msrb.gmra.mxu0 %v19182_v27  ;;  %9970 = vmatmul.f32.gmra.mxu1 %v19198_v11 }
0x1668   : > { %10186 = vmatpush.msra.mxu3 %v9998_v28 }
0x1669   : > { %10017 = vmatmul.f32.gmra.mxu2 %v19256_v18 }
0x166a   : > { %10188 = vmatpush.msra.mxu3 %v10000_v12 }
0x166c   : > { %10190 = vmatpush.msra.mxu3 %v10002_v2 }
0x166d   : > { %10062 = vmatmul.f32.gmra.mxu3 %v19198_v11 }
0x166f   : > { %9941 = vmatmul.f32.gmra.mxu0 %v19198_v11  ;;  %10124 = vmatmul.f32.vlgmr.msra.gmra.mxu1 %v19196_v30 }
0x1671   : > { %10163 = vmatmul.f32.vlgmr.msra.gmra.mxu2 %v19182_v27 }
0x1675   : > { %10192 = vmatmul.f32.vlgmr.msra.gmra.mxu3 %v19182_v27 }
0x1677   : > { %10092 = vmatmul.f32.vlgmr.msra.gmra.mxu0 %v19187_v26  ;;  %10130 = vmatmul.f32.gmra.mxu1 %v19230_v24 }
0x1679   : > { %10167 = vmatmul.f32.gmra.mxu2 %v19198_v11 }
0x167d   : > { %10196 = vmatmul.f32.gmra.mxu3 %v19198_v11 }
0x167f   : > { %10097 = vmatmul.f32.gmra.mxu0 %v19208_v22 }
0x16b4   : > { %v19777_v57 = vpop.f32.mrf.mxu1 }
0x16bc   : > { %v19781_v61 = vpop.f32.mrf.mxu0  ;;  %v19783_v42 = vpop.f32.mrf.mxu1 }
0x16bd   : > { %v19786_v62 = vpop.f32.mrf.mxu2 }
0x16be   : > { %v19788_v5 = vpop.f32.mrf.mxu3 }
0x16c4   : > { %v19790_v58 = vpop.f32.mrf.mxu0  ;;  %v9687_v14 = vpop.f32.mrf.mxu1 }
0x16c5   : > { %v9589_v38 = vpop.f32.mrf.mxu2 }
0x16c6   : > { %v9630_v1 = vpop.f32.mrf.mxu3  ;;  %v9590_v10 = vadd.f32 %v17485_v56, %v9589_v38 }
0x16c8   : > { %v9631_v31 = vadd.f32 %v9630_v1, %v9590_v10 }
0x16cc   : > { %v9660_v37 = vpop.f32.mrf.mxu0  ;;  %v9833_v15 = vpop.f32.mrf.mxu1 }
0x16cd   : > { %v9720_v19 = vpop.f32.mrf.mxu2  ;;  %v9661_v45 = vadd.f32 %v9660_v37, %v9631_v31 }
0x16ce   : > { %v9745_v21 = vpop.f32.mrf.mxu3 }
0x16cf   : > { %v9688_v54 = vadd.f32 %v9687_v14, %v9661_v45 }
0x16d1   : > { %v9721_v12 = vadd.f32 %v9720_v19, %v9688_v54 }
0x16d3   : > { %v9746_v52 = vadd.f32 %v9745_v21, %v9721_v12 }
0x16d4   : > { %v9784_v50 = vpop.f32.mrf.mxu0  ;;  %v9837_v16 = vpop.f32.mrf.mxu1 }
0x16d5   : > { %v9785_v7 = vadd.f32 %v17486_v44, %v9784_v50  ;;  %v9867_v28 = vpop.f32.mrf.mxu2  ;;  %v10201_v49 = vsel %vm2446_vm3, %v9746_v52, 0 }
0x16d6   : > { %v9899_v4 = vpop.f32.mrf.mxu3  ;;  %v10227_v53 = vand.u32 4294901760, %v10201_v49 }
0x16d7   : > { %v9834_v29 = vadd.f32 %v9833_v15, %v9785_v7 }
0x16d8   : > { %v10228_v1 = vsub.f32 %v10201_v49, %v10227_v53 }
0x16d9   : > { %v9868_v43 = vadd.f32 %v9867_v28, %v9834_v29 }
0x16da   : > { %v10229_v19 = vand.u32 4294901760, %v10228_v1 }
0x16db   : > { %v9900_v40 = vadd.f32 %v9899_v4, %v9868_v43  ;;  %v17487_v43 = vld [vmem:[%s20806_s16 + $0x3] ss:$0 sm:$0xff] }
0x16dc   : > { %v9792_v8 = vpop.f32.mrf.mxu0  ;;  %v9967_v2 = vpop.f32.mrf.mxu1  ;;  %v10230_v21 = vsub.f32 %v10228_v1, %v10229_v19 }
0x16dd   : > { %v9793_v36 = vadd.f32 %v17486_v44, %v9792_v8  ;;  %v9872_v60 = vpop.f32.mrf.mxu2 }
0x16de   : > { %v9905_v23 = vpop.f32.mrf.mxu3  ;;  %v10231_v28 = vand.u32 4294901760, %v10230_v21 }
0x16df   : > { %v9838_v41 = vadd.f32 %v9837_v16, %v9793_v36 }
0x16e1   : > { %v9873_v17 = vadd.f32 %v9872_v60, %v9838_v41 }
0x16e3   : > { %v9906_v35 = vadd.f32 %v9905_v23, %v9873_v17 }
0x16e4   : > { %v9938_v46 = vpop.f32.mrf.mxu0  ;;  %v9971_v56 = vpop.f32.mrf.mxu1 }
0x16e5   : > { %v9939_v47 = vadd.f32 %v9938_v46, %v9900_v40  ;;  %v10010_v4 = vpop.f32.mrf.mxu2 }
0x16e6   : > { %v10011_v36 = vadd.f32 %v17487_v43, %v10010_v4 }
0x16e7   : > { %v9968_v25 = vadd.f32 %v9967_v2, %v9939_v47  ;;  %v10059_v2 = vpop.f32.mrf.mxu3 }
0x16e8   : > { %v10060_v41 = vadd.f32 %v10059_v2, %v10011_v36 }
0x16e9   : > { %v10204_v14 = vsel %vm2446_vm3, %v9968_v25, 0 }
0x16ea   : > { %v10225_v15 = vand.u32 4294901760, %v10204_v14 }
0x16ec   : > { %v9942_v38 = vpop.f32.mrf.mxu0  ;;  %v10257_v50 = vsub.f32 %v10204_v14, %v10225_v15  ;;  %v10125_v60 = vpop.f32.mrf.mxu1 }
0x16ed   : > { %v9943_v37 = vadd.f32 %v9942_v38, %v9906_v35  ;;  %v10018_v40 = vpop.f32.mrf.mxu2 }
0x16ee   : > { %v10258_v16 = vand.u32 4294901760, %v10257_v50  ;;  %v10019_v46 = vadd.f32 %v17487_v43, %v10018_v40 }
0x16ef   : > { %v9972_v10 = vadd.f32 %v9971_v56, %v9943_v37 }
0x16f0   : > { %v10259_v8 = vsub.f32 %v10257_v50, %v10258_v16  ;;  %v10063_v49 = vpop.f32.mrf.mxu3 }
0x16f1   : > { %v10207_v44 = vsel %vm2446_vm3, %v9972_v10, 0  ;;  %v10064_v25 = vadd.f32 %v10063_v49, %v10019_v46 }
0x16f2   : > { %v10223_v31 = vand.u32 4294901760, %v10207_v44  ;;  %v10260_v12 = vand.u32 4294901760, %v10259_v8 }
0x16f4   : > { %v10251_v45 = vsub.f32 %v10207_v44, %v10223_v31  ;;  %10224 = vmatpush.xpose.msrb.mxu0 %v10223_v31  ;;  %10308 = vmatpush.xpose.msrb.mxu3 %v10223_v31  ;;  %v10093_v52 = vpop.f32.mrf.mxu0  ;;  %v10131_v56 = vpop.f32.mrf.mxu1 }
0x16f5   : > { %v10094_v47 = vadd.f32 %v10093_v52, %v10060_v41  ;;  %v10164_v17 = vpop.f32.mrf.mxu2 }
0x16f6   : > { %10283 = vmatpush.xpose.msrb.mxu2 %v10251_v45  ;;  %v10252_v7 = vand.u32 4294901760, %v10251_v45 }
0x16f7   : > { %v10126_v23 = vadd.f32 %v10125_v60, %v10094_v47 }
0x16f8   : > { %10226 = vmatpush.xpose.msrb.mxu0 %v10225_v15  ;;  %10310 = vmatpush.xpose.msrb.mxu3 %v10225_v15  ;;  %v10253_v54 = vsub.f32 %v10251_v45, %v10252_v7 }
0x16f9   : > { %v10165_v14 = vadd.f32 %v10164_v17, %v10126_v23 }
0x16fa   : > { %10286 = vmatpush.xpose.msrb.mxu2 %v10257_v50  ;;  %v10254_v29 = vand.u32 4294901760, %v10253_v54 }
0x16fb   : > { %10232 = vmatmul.f32.vlgmr.msrb.gmra.mxu0 %v10231_v28  ;;  %10314 = vmatmul.f32.vlgmr.msrb.gmra.mxu3 %v10229_v19 }
0x16fc   : > { %10335 = vmatpush.xpose.msra.mxu0 %v10252_v7  ;;  %10255 = vmatpush.xpose.msrb.mxu1 %v10254_v29  ;;  %v10098_v35 = vpop.f32.mrf.mxu0 }
0x16fd   : > { %10289 = vmatmul.f32.vlgmr.msrb.gmra.mxu2 %v10228_v1  ;;  %v10099_v38 = vadd.f32 %v10098_v35, %v10064_v25  ;;  %v10193_v1 = vpop.f32.mrf.mxu3 }
0x16ff   : > { %v10132_v37 = vadd.f32 %v10131_v56, %v10099_v38 }
0x1700   : > { %10339 = vmatpush.xpose.msra.mxu0 %v10258_v16  ;;  %10261 = vmatpush.xpose.msrb.mxu1 %v10260_v12 }
0x1703   : > { %10263 = vmatmul.f32.vlgmr.msrb.gmra.mxu1 %v10227_v53  ;;  %10341 = vmatmul.f32.vlgmr.msra.gmra.mxu0 %v10227_v53 }
0x1704   : > { %10360 = vmatpush.xpose.msra.mxu1 %v10223_v31 }
0x1705   : > { %v10197_v31 = vpop.f32.mrf.mxu3 }
0x1708   : > { %10362 = vmatpush.xpose.msra.mxu1 %v10225_v15  ;;  %v10168_v15 = vpop.f32.mrf.mxu2 }
0x1709   : > { %v10169_v19 = vadd.f32 %v10168_v15, %v10132_v37 }
0x170b   : > { %10364 = vmatmul.f32.vlgmr.msra.gmra.mxu1 %v10227_v53  ;;  %v10194_v53 = vadd.f32 %v10193_v1, %v10165_v14  ;;  %v10198_v50 = vadd.f32 %v10197_v31, %v10169_v19 }
0x170d   : > { %v10402_v10 = vand.u32 4294901760, %v10194_v53  ;;  %v10384_v45 = vsel %vm2616_vm4, %v10198_v50, 0 }
0x170e   : > { %v10400_v21 = vand.u32 4294901760, %v10384_v45 }
0x170f   : > { %v10434_v44 = vsub.f32 %v10194_v53, %v10402_v10 }
0x1710   : > { %v10428_v16 = vsub.f32 %v10384_v45, %v10400_v21  ;;  %10401 = vmatpush.msra.mxu2 %v10400_v21  ;;  %10485 = vmatpush.msrb.mxu1 %v10400_v21  ;;  %v17264_v45 = vld [vmem:[%s20807_s22 + $0x18] sm:$0xff] }
0x1711   : > { %v10435_v7 = vand.u32 4294901760, %v10434_v44 }
0x1712   : > { %v10429_v54 = vand.u32 4294901760, %v10428_v16  ;;  %10460 = vmatpush.msrb.mxu0 %v10428_v16  ;;  %10403 = vmatpush.msra.mxu2 %v10402_v10 }
0x1713   : > { %v10436_v28 = vsub.f32 %v10434_v44, %v10435_v7  ;;  %10487 = vmatpush.msrb.mxu1 %v10402_v10 }
0x1714   : > { %v10430_v29 = vsub.f32 %v10428_v16, %v10429_v54  ;;  %10463 = vmatpush.msrb.mxu0 %v10434_v44  ;;  %10512 = vmatpush.msrb.mxu2 %v10429_v54 }
0x1715   : > { %v10437_v12 = vand.u32 4294901760, %v10436_v28 }
0x1716   : > { %v10431_v8 = vand.u32 4294901760, %v10430_v29  ;;  %10516 = vmatpush.msrb.mxu2 %v10435_v7 }
0x1718   : > { %10432 = vmatpush.msra.mxu3 %v10431_v8 }
0x171a   : > { %10438 = vmatpush.msra.mxu3 %v10437_v12 }
0x171c   : > { %10537 = vmatpush.msrb.mxu3 %v10400_v21  ;;  %v10565_v21 = vand.u32 4294901760, %v17264_v45 }
0x171e   : > { %10539 = vmatpush.msrb.mxu3 %v10402_v10  ;;  %v10592_v7 = vsub.f32 %v17264_v45, %v10565_v21  ;;  %10566 = vmatpush.msra.mxu0 %v10565_v21 }
0x1720   : > { %v10593_v16 = vand.u32 4294901760, %v10592_v7 }
0x1722   : > { %v10594_v54 = vsub.f32 %v10592_v7, %v10593_v16 }
0x1724   : > { %v10595_v28 = vand.u32 4294901760, %v10594_v54 }
0x1726   : > { %10596 = vmatpush.msra.mxu1 %v10595_v28 }
0x1778   : > { %v10233_v4 = vpop.f32.mrf.mxu0 }
0x177e   : > { %v10315_v40 = vpop.f32.mrf.mxu3 }
0x1780   : > { %v10264_v43 = vpop.f32.mrf.mxu1  ;;  %v10290_v52 = vpop.f32.mrf.mxu2 }
0x1781   : > { %v10265_v36 = vadd.f32 %v10264_v43, %v10233_v4  ;;  %v10342_v60 = vpop.f32.mrf.mxu0 }
0x1783   : > { %v10291_v2 = vadd.f32 %v10290_v52, %v10265_v36 }
0x1785   : > { %v10316_v41 = vadd.f32 %v10315_v40, %v10291_v2 }
0x1787   : > { %v10343_v46 = vadd.f32 %v10342_v60, %v10316_v41 }
0x1788   : > { %v10365_v47 = vpop.f32.mrf.mxu1 }
0x1789   : > { %v10366_v49 = vadd.f32 %v10365_v47, %v10343_v46 }
0x178b   : > { %v10368_v17 = vmul.f32 0.35355338, %v10366_v49 }
0x178d   : > { %v10369_v25 = vsel %vm6938_vm12, %v10368_v17, -inf }
0x178e   : > { %10370 = vmax.xlane.f32.xlu1 %v10369_v25 }
0x1801   : > { %v10371_v23 = vpop.xlane.xlu1 %10370 }
0x1802   : > { %v10372_v35 = vsub.f32 %v10368_v17, %v10371_v23 }
0x1804   : > { %v10373_v14 = vmul.f32 1.442695, %v10372_v35  ;;  %v8164_v35 = vadd.f32 %v19627_v32, %v19635_v9 }
0x1806   : > { %17548 = vpow2.f32 %v10373_v14  ;;  %v8188_v14 = vadd.f32 %v19621_v3, %v8164_v35 }
0x180c   : > { %v17549_v38 = vpop.eup %17548 }
0x180d   : > { %v10375_v56 = vsel %vm6938_vm12, %v17549_v38, 0.0 }
0x180e   : > { %10376 = vadd.xlane.f32.xlu2 %v10375_v56 }
0x1881   : > { %v10377_v1 = vpop.xlane.xlu2 %10376 }
0x1882   : > { %17550 = vrcp.f32 %v10377_v1 }
0x1888   : > { %v17551_v53 = vpop.eup %17550 }
0x1889   : > { %v10379_v37 = vmul.f32 %v17551_v53, %v17549_v38  ;;  %v8212_v38 = vadd.f32 %v19625_v34, %v8188_v14 }
0x188b   : > { %v10381_v15 = vsel %vm6950_vm13, %v10379_v37, 0  ;;  %v8236_v56 = vadd.f32 %v19644_v59, %v8212_v38 }
0x188c   : > { %v10404_v10 = vand.u32 4294901760, %v10381_v15 }
0x188d   : > { %v8258_v1 = vadd.f32 %v19637_v33, %v8236_v56 }
0x188e   : > { %v10405_v19 = vsub.f32 %v10381_v15, %v10404_v10  ;;  %10440 = vmatmul.f32.vlgmr.msra.gmra.mxu3 %v10404_v10  ;;  %v9456_v15 = vadd.f32 %v19777_v57, %v19781_v61 }
0x188f   : > { %10642 = vmatpush.msra.mxu3 %v10565_v21  ;;  %v8287_v53 = vadd.f32 %v19629_v55, %v8258_v1 }
0x1890   : > { %10466 = vmatmul.f32.vlgmr.msrb.gmra.mxu0 %v10405_v19  ;;  %v10406_v44 = vand.u32 4294901760, %v10405_v19 }
0x1891   : > { %10668 = vmatpush.msrb.mxu0 %v10593_v16  ;;  %v8313_v37 = vadd.f32 %v19633_v39, %v8287_v53 }
0x1892   : > { %10491 = vmatmul.f32.vlgmr.msrb.gmra.mxu1 %v10406_v44  ;;  %v10407_v31 = vsub.f32 %v10405_v19, %v10406_v44  ;;  %v9480_v19 = vadd.f32 %v19786_v62, %v9456_v15 }
0x1893   : > { %10690 = vmatpush.msrb.mxu1 %v10565_v21  ;;  %v17488_v21 = vld [vmem:[%s20808_s15] ss:$0 sm:$0xff]  ;;  %s20811_s15 = sld [smem:[#allocation52_spill]] }
0x1894   : > { %v10408_v50 = vand.u32 4294901760, %v10407_v31  ;;  %v9504_v34 = vadd.f32 %v19788_v5, %v9480_v19 }
0x1896   : > { %10409 = vmatmul.f32.vlgmr.msra.gmra.mxu2 %v10408_v50  ;;  %10541 = vmatmul.f32.vlgmr.msrb.gmra.mxu3 %v10404_v10  ;;  %v9528_v55 = vadd.f32 %v19790_v58, %v9504_v34 }
0x1897   : > { %10619 = vmatpush.msra.mxu2 %v10592_v7 }
0x1898   : > { %v9550_v57 = vadd.f32 %v19783_v42, %v9528_v55 }
0x1899   : > { %v17489_v55 = vld [vmem:[%s20811_s15] ss:$0 sm:$0xff]  ;;  %s20814_s15 = sld [smem:[#allocation45_spill]] }
0x189e   : > { %10518 = vmatmul.f32.vlgmr.msrb.gmra.mxu2 %v10404_v10  ;;  %v8337_v10 = vadd.f32 %v19648_v63, %v8313_v37 }
0x18a0   : > { %v8361_v3 = vadd.f32 %v19646_v51, %v8337_v10 }
0x18a2   : > { %v8385_v39 = vadd.f32 %v19639_v0, %v8361_v3 }
0x18a4   : > { %v8407_v62 = vadd.f32 %v19642_v13, %v8385_v39 }
0x18a6   : > { %v9552_v45 = vadd.f32 %v9550_v57, %v8407_v62 }
0x190d   : > { %v10467_v4 = vpop.f32.mrf.mxu0 }
0x190f   : > { %v10492_v36 = vpop.f32.mrf.mxu1 }
0x1911   : > { %v10441_v29 = vpop.f32.mrf.mxu3 }
0x1919   : > { %v10410_v8 = vpop.f32.mrf.mxu2  ;;  %v10542_v41 = vpop.f32.mrf.mxu3 }
0x191a   : > { %v10442_v12 = vadd.f32 %v10441_v29, %v10410_v8  ;;  %v10738_v8 = vld [vmem:[%s20809_s7 + $0x18] sm:$0xff]  ;;  %s20812_s7 = sld [smem:[#allocation51_spill]] }
0x191c   : > { %v10468_v43 = vadd.f32 %v10467_v4, %v10442_v12  ;;  %v10758_v12 = vand.u32 4294901760, %v10738_v8  ;;  %v10737_v4 = vld [vmem:[%s20810_s18 + $0x10] sm:$0xff] }
0x191e   : > { %v10493_v52 = vadd.f32 %v10492_v36, %v10468_v43  ;;  %v10760_v43 = vand.u32 4294901760, %v10737_v4  ;;  %10759 = vmatpush.msrb.mxu2 %v10758_v12  ;;  %v10736_v36 = vld [vmem:[%s20810_s18 + $0x8] sm:$0xff] }
0x1920   : > { %10761 = vmatpush.msrb.mxu2 %v10760_v43  ;;  %v17490_v39 = vld [vmem:[%s20812_s7] ss:$0 sm:$0xff]  ;;  %s20815_s7 = sld [smem:[#allocation46_spill]] }
0x1921   : > { %v10519_v2 = vpop.f32.mrf.mxu2 }
0x1922   : > { %v10520_v40 = vadd.f32 %v10519_v2, %v10493_v52  ;;  %v10794_v2 = vsub.f32 %v10737_v4, %v10760_v43 }
0x1924   : > { %v10543_v60 = vadd.f32 %v10542_v41, %v10520_v40  ;;  %v10762_v40 = vand.u32 4294901760, %v10736_v36  ;;  %v10735_v41 = vld [vmem:[%s20810_s18] sm:$0xff] }
0x1926   : > { %v10548_v46 = vsel %vm2446_vm3, %v10543_v60, 0  ;;  %10763 = vmatpush.msrb.mxu2 %v10762_v40 }
0x1927   : > { %v10567_v47 = vand.u32 4294901760, %v10548_v46 }
0x1929   : > { %v10568_v49 = vsub.f32 %v10548_v46, %v10567_v47  ;;  %10598 = vmatmul.f32.vlgmr.msra.gmra.mxu1 %v10567_v47  ;;  %v10795_v46 = vand.u32 4294901760, %v10794_v2 }
0x192a   : > { %10859 = vmatpush.msra.mxu1 %v10758_v12 }
0x192b   : > { %v10569_v17 = vand.u32 4294901760, %v10568_v49  ;;  %10622 = vmatmul.f32.vlgmr.msra.gmra.mxu2 %v10568_v49 }
0x192c   : > { %10861 = vmatpush.msra.mxu1 %v10760_v43 }
0x192d   : > { %v10570_v25 = vsub.f32 %v10568_v49, %v10569_v17  ;;  %10646 = vmatmul.f32.vlgmr.msra.gmra.mxu3 %v10569_v17  ;;  %v10764_v49 = vand.u32 4294901760, %v10735_v41 }
0x192e   : > { %10863 = vmatpush.msra.mxu1 %v10762_v40 }
0x192f   : > { %v10571_v23 = vand.u32 4294901760, %v10570_v25  ;;  %v10796_v25 = vsub.f32 %v10794_v2, %v10795_v46  ;;  %v10806_v35 = vsub.f32 %v10735_v41, %v10764_v49  ;;  %10765 = vmatpush.msrb.mxu2 %v10764_v49 }
0x1930   : > { %10865 = vmatpush.msra.mxu1 %v10764_v49 }
0x1931   : > { %10572 = vmatmul.f32.vlgmr.msra.gmra.mxu0 %v10571_v23  ;;  %10692 = vmatmul.f32.vlgmr.msrb.gmra.mxu1 %v10567_v47  ;;  %v10797_v14 = vand.u32 4294901760, %v10796_v25  ;;  %v10807_v56 = vand.u32 4294901760, %v10806_v35 }
0x1933   : > { %v10808_v53 = vsub.f32 %v10806_v35, %v10807_v56 }
0x1935   : > { %v10809_v37 = vand.u32 4294901760, %v10808_v53  ;;  %v10932_v53 = vld [vmem:[%s20813_s1] sm:$0xff] }
0x1939   : > { %10670 = vmatmul.f32.vlgmr.msrb.gmra.mxu0 %v10567_v47  ;;  %v10800_v47 = vsub.f32 %v10736_v36, %v10762_v40 }
0x193b   : > { %v10801_v23 = vand.u32 4294901760, %v10800_v47 }
0x193d   : > { %v10802_v38 = vsub.f32 %v10800_v47, %v10801_v23 }
0x193f   : > { %v10803_v1 = vand.u32 4294901760, %v10802_v38 }
0x19a6   : > { %v10599_v32 = vpop.f32.mrf.mxu1 }
0x19ae   : > { %v10573_v9 = vpop.f32.mrf.mxu0  ;;  %v10623_v33 = vpop.f32.mrf.mxu2 }
0x19af   : > { %v10600_v59 = vadd.f32 %v10599_v32, %v10573_v9  ;;  %v10693_v51 = vpop.f32.mrf.mxu1 }
0x19b0   : > { %v10647_v31 = vpop.f32.mrf.mxu3 }
0x19b1   : > { %v10624_v44 = vadd.f32 %v10623_v33, %v10600_v59 }
0x19b3   : > { %v10648_v63 = vadd.f32 %v10647_v31, %v10624_v44 }
0x19b6   : > { %v10671_v61 = vpop.f32.mrf.mxu0 }
0x19b7   : > { %v10672_v50 = vadd.f32 %v10671_v61, %v10648_v63 }
0x19b9   : > { %v10694_v5 = vadd.f32 %v10693_v51, %v10672_v50 }
0x19bb   : > { %v10696_v7 = vadd.f32 %v10694_v5, %v9552_v45 }
0x19bd   : > { %v10701_v16 = vadd.f32 %v17488_v21, %v10696_v7  ;;  %v10939_v21 = vld [vmem:[%s20813_s1 + $0x38] sm:$0xff] }
0x19be   : > { %v19844_v7 = vand.u32 4294901760, %v10939_v21 }
0x19bf   : > { %v10702_v58 = vadd.f32 %v10701_v16, %v19191_v6  ;;  %v10788_v6 = vsub.f32 %v10738_v8, %v10758_v12  ;;  %v10938_v16 = vld [vmem:[%s20813_s1 + $0x30] sm:$0xff] }
0x19c1   : > { %v10703_v0 = vsel %vm6080_vm7, %v10702_v58, 0.0  ;;  %v10789_v52 = vand.u32 4294901760, %v10788_v6  ;;  %10830 = vmatpush.msra.mxu0 %v10788_v6 }
0x19c2   : > { %10704 = vadd.xlane.f32.xlu0 %v10703_v0  ;;  %v19850_v0 = vand.u32 4294901760, %v10938_v16 }
0x19c3   : > { %v10790_v60 = vsub.f32 %v10788_v6, %v10789_v52  ;;  %10833 = vmatpush.msra.mxu0 %v10794_v2  ;;  %10888 = vmatpush.msra.mxu2 %v10789_v52 }
0x19c5   : > { %v10791_v17 = vand.u32 4294901760, %v10790_v60  ;;  %10836 = vmatpush.msra.mxu0 %v10800_v47  ;;  %10892 = vmatpush.msra.mxu2 %v10795_v46  ;;  %v10934_v60 = vld [vmem:[%s20813_s1 + $0x10] sm:$0xff] }
0x19c7   : > { %10792 = vmatpush.msrb.mxu3 %v10791_v17  ;;  %10839 = vmatpush.msra.mxu0 %v10806_v35  ;;  %v10966_v17 = vand.u32 4294901760, %v10934_v60 }
0x19c8   : > { %10896 = vmatpush.msra.mxu2 %v10801_v23  ;;  %v10933_v23 = vld [vmem:[%s20813_s1 + $0x8] sm:$0xff] }
0x19c9   : > { %10798 = vmatpush.msrb.mxu3 %v10797_v14  ;;  %10957 = vmatpush.msrb.mxu0 %v19844_v7  ;;  %v11020_v38 = vsub.f32 %v10934_v60, %v10966_v17 }
0x19ca   : > { %10900 = vmatpush.msra.mxu2 %v10807_v56  ;;  %v10968_v56 = vand.u32 4294901760, %v10933_v23 }
0x19cb   : > { %10804 = vmatpush.msrb.mxu3 %v10803_v1  ;;  %10959 = vmatpush.msrb.mxu0 %v19850_v0 }
0x19cd   : > { %10810 = vmatpush.msrb.mxu3 %v10809_v37 }
0x19cf   : > { %10919 = vmatpush.msra.mxu3 %v10758_v12 }
0x19d1   : > { %10921 = vmatpush.msra.mxu3 %v10760_v43  ;;  %v10935_v43 = vld [vmem:[%s20813_s1 + $0x18] sm:$0xff] }
0x19d2   : > { %v10964_v41 = vand.u32 4294901760, %v10935_v43 }
0x19d3   : > { %10923 = vmatpush.msra.mxu3 %v10762_v40 }
0x19d4   : > { %v11014_v25 = vsub.f32 %v10935_v43, %v10964_v41  ;;  %v17492_v43 = vld [vmem:[%s20815_s7] ss:$0 sm:$0xff]  ;;  %s20818_s7 = sld [smem:[#allocation25_spill]] }
0x19d5   : > { %10925 = vmatpush.msra.mxu3 %v10764_v49 }
0x19d6   : > { %v11015_v1 = vand.u32 4294901760, %v11014_v25 }
0x19da   : > { %s20819_s2 = smov %s20818_s7 }
0x1a35   : > { %v10705_v42 = vpop.xlane.xlu0 %10704 }
0x1a36   : > { %v10706_v54 = vmul.f32 %v10705_v42, %v19128_v48  ;;  %v10937_v42 = vld [vmem:[%s20813_s1 + $0x28] sm:$0xff] }
0x1a38   : > { %v19826_v28 = vsub.f32 %v10702_v58, %v10706_v54  ;;  %v19848_v58 = vsub.f32 %v10939_v21, %v19844_v7 }
0x1a3a   : > { %v10708_v13 = vmul.f32 %v19826_v28, %v19826_v28  ;;  %v10991_v54 = vand.u32 4294901760, %v19848_v58 }
0x1a3c   : > { %v10709_v29 = vsel %vm6080_vm7, %v10708_v13, 0.0  ;;  %v19859_v13 = vand.u32 4294901760, %v10937_v42  ;;  %v10992_v8 = vsub.f32 %v19848_v58, %v10991_v54 }
0x1a3d   : > { %10710 = vadd.xlane.f32.xlu1 %v10709_v29  ;;  %v10936_v29 = vld [vmem:[%s20813_s1 + $0x20] sm:$0xff] }
0x1a3e   : > { %v19868_v4 = vsub.f32 %v10937_v42, %v19859_v13  ;;  %v19870_v6 = vand.u32 4294901760, %v10936_v29  ;;  %10961 = vmatpush.msrb.mxu0 %v19859_v13  ;;  %v10993_v36 = vand.u32 4294901760, %v10992_v8 }
0x1a40   : > { %v11003_v2 = vand.u32 4294901760, %v19868_v4  ;;  %v11008_v40 = vsub.f32 %v10936_v29, %v19870_v6  ;;  %10963 = vmatpush.msrb.mxu0 %v19870_v6  ;;  %10994 = vmatpush.msrb.mxu1 %v10993_v36 }
0x1a42   : > { %v11004_v47 = vsub.f32 %v19868_v4, %v11003_v2  ;;  %v11009_v49 = vand.u32 4294901760, %v11008_v40  ;;  %10965 = vmatpush.msrb.mxu0 %v10964_v41 }
0x1a44   : > { %v11005_v35 = vand.u32 4294901760, %v11004_v47  ;;  %v11010_v14 = vsub.f32 %v11008_v40, %v11009_v49  ;;  %10967 = vmatpush.msrb.mxu0 %v10966_v17 }
0x1a46   : > { %v11011_v37 = vand.u32 4294901760, %v11010_v14  ;;  %10969 = vmatpush.msrb.mxu0 %v10968_v56 }
0x1ab0   : > { %v10711_v15 = vpop.xlane.xlu1 %10710 }
0x1ab1   : > { %v10712_v10 = vmul.f32 %v10711_v15, %v19128_v48  ;;  %v11021_v15 = vand.u32 4294901760, %v11020_v38 }
0x1ab3   : > { %v10713_v19 = vadd.f32 1e-05, %v10712_v10  ;;  %v11026_v10 = vsub.f32 %v10933_v23, %v10968_v56 }
0x1ab5   : > { %17552 = vrsqrt.f32 %v10713_v19  ;;  %vm10720_vm15 = vweird.f32 %v10713_v19 }
0x1abb   : > { %v17553_v32 = vpop.eup %17552 }
0x1abc   : > { %v10715_v9 = vmul.f32 %v17553_v32, %v10713_v19  ;;  %vm10721_vm14 = vweird.f32 %v17553_v32  ;;  %v10970_v19 = vand.u32 4294901760, %v10932_v53 }
0x1abd   : > { %vm10722_vm0 = vmor %vm10720_vm15, %vm10721_vm14 }
0x1abe   : > { %v10716_v3 = vmul.f32 %v17553_v32, %v10715_v9  ;;  %v11022_v9 = vsub.f32 %v11020_v38, %v11021_v15  ;;  %10971 = vmatpush.msrb.mxu0 %v10970_v19 }
0x1ac0   : > { %v10717_v34 = vmul.f32 0.5, %v10716_v3  ;;  %v11027_v3 = vand.u32 4294901760, %v11026_v10 }
0x1ac2   : > { %v10718_v59 = vsub.f32 1.5, %v10717_v34  ;;  %v11032_v34 = vsub.f32 %v10932_v53, %v10970_v19 }
0x1ac4   : > { %v10719_v33 = vmul.f32 %v17553_v32, %v10718_v59 }
0x1ac6   : > { %v10723_v44 = vsel %vm10722_vm0, %v17553_v32, %v10719_v33  ;;  %v11016_v32 = vsub.f32 %v11014_v25, %v11015_v1  ;;  %v11023_v33 = vand.u32 4294901760, %v11022_v9 }
0x1ac7   : > { %v10724_v31 = vmul.f32 %v10723_v44, %v19826_v28  ;;  %v19857_v28 = vsub.f32 %v10938_v16, %v19850_v0  ;;  %v11033_v44 = vand.u32 4294901760, %v11032_v34 }
0x1ac8   : > { %v11017_v59 = vand.u32 4294901760, %v11016_v32 }
0x1ac9   : > { %v10729_v57 = vmul.f32 %v17489_v55, %v10724_v31  ;;  %v10997_v12 = vand.u32 4294901760, %v19857_v28  ;;  %v11028_v55 = vsub.f32 %v11026_v10, %v11027_v3  ;;  %v11034_v31 = vsub.f32 %v11032_v34, %v11033_v44 }
0x1acb   : > { %v19839_v63 = vadd.f32 %v17490_v39, %v10729_v57  ;;  %v10998_v52 = vsub.f32 %v19857_v28, %v10997_v12  ;;  %v11029_v39 = vand.u32 4294901760, %v11028_v55  ;;  %v11035_v57 = vand.u32 4294901760, %v11034_v31 }
0x1acd   : > { %v10744_v61 = vsel %vm1871_vm2, %v19839_v63, 0  ;;  %v10999_v46 = vand.u32 4294901760, %v10998_v52 }
0x1ace   : > { %v10766_v62 = vand.u32 4294901760, %v10744_v61 }
0x1acf   : > { %11000 = vmatpush.msrb.mxu1 %v10999_v46 }
0x1ad0   : > { %10812 = vmatmul.f32.vlgmr.msrb.gmra.mxu3 %v10766_v62  ;;  %v10767_v50 = vsub.f32 %v10744_v61, %v10766_v62  ;;  %v17491_v61 = vld [vmem:[%s20814_s15] ss:$0 sm:$0xff]  ;;  %s20816_s15 = sld [smem:[#allocation27_spill]] }
0x1ad1   : > { %11089 = vmatpush.msrb.mxu3 %v19844_v7  ;;  %11006 = vmatpush.msrb.mxu1 %v11005_v35 }
0x1ad2   : > { %10842 = vmatmul.f32.vlgmr.msra.gmra.mxu0 %v10767_v50  ;;  %v10768_v51 = vand.u32 4294901760, %v10767_v50 }
0x1ad3   : > { %11091 = vmatpush.msrb.mxu3 %v19850_v0  ;;  %11012 = vmatpush.msrb.mxu1 %v11011_v37 }
0x1ad4   : > { %10869 = vmatmul.f32.vlgmr.msra.gmra.mxu1 %v10768_v51  ;;  %v10769_v45 = vsub.f32 %v10767_v50, %v10768_v51  ;;  %11122 = vmatpush.msra.mxu0 %v10991_v54 }
0x1ad5   : > { %11093 = vmatpush.msrb.mxu3 %v19859_v13  ;;  %11018 = vmatpush.msrb.mxu1 %v11017_v59 }
0x1ad6   : > { %v10770_v5 = vand.u32 4294901760, %v10769_v45  ;;  %11126 = vmatpush.msra.mxu0 %v10997_v12  ;;  %s20817_s1 = smov %s20816_s15 }
0x1ad7   : > { %11095 = vmatpush.msrb.mxu3 %v19870_v6  ;;  %11024 = vmatpush.msrb.mxu1 %v11023_v33  ;;  %v11219_v9 = vld [vmem:[%s20817_s1 + $0x8] sm:$0xff]  ;;  %v11218_v33 = vld [vmem:[%s20817_s1] sm:$0xff] }
0x1ad8   : > { %10771 = vmatmul.f32.vlgmr.msrb.gmra.mxu2 %v10770_v5  ;;  %10927 = vmatmul.f32.vlgmr.msra.gmra.mxu3 %v10766_v62  ;;  %v11245_v59 = vand.u32 4294901760, %v11219_v9  ;;  %v11247_v31 = vand.u32 4294901760, %v11218_v33 }
0x1ad9   : > { %11052 = vmatpush.msrb.mxu2 %v19848_v58  ;;  %11097 = vmatpush.msrb.mxu3 %v10964_v41 }
0x1ada   : > { %11130 = vmatpush.msra.mxu0 %v11003_v2  ;;  %11030 = vmatpush.msrb.mxu1 %v11029_v39  ;;  %v11283_v39 = vsub.f32 %v11219_v9, %v11245_v59 }
0x1adb   : > { %11055 = vmatpush.msrb.mxu2 %v19857_v28  ;;  %11099 = vmatpush.msrb.mxu3 %v10966_v17 }
0x1adc   : > { %11134 = vmatpush.msra.mxu0 %v11009_v49  ;;  %11036 = vmatpush.msrb.mxu1 %v11035_v57 }
0x1add   : > { %11058 = vmatpush.msrb.mxu2 %v19868_v4  ;;  %11101 = vmatpush.msrb.mxu3 %v10968_v56 }
0x1ade   : > { %11165 = vmatpush.msra.mxu1 %v19844_v7  ;;  %11138 = vmatpush.msra.mxu0 %v11015_v1 }
0x1adf   : > { %11061 = vmatpush.msrb.mxu2 %v11008_v40  ;;  %11103 = vmatpush.msrb.mxu3 %v10970_v19 }
0x1ae0   : > { %10902 = vmatmul.f32.vlgmr.msra.gmra.mxu2 %v10766_v62  ;;  %11167 = vmatpush.msra.mxu1 %v19850_v0 }
0x1ae1   : > { %11064 = vmatpush.msrb.mxu2 %v11014_v25  ;;  %11142 = vmatpush.msra.mxu0 %v11021_v15  ;;  %v11221_v15 = vld [vmem:[%s20816_s15 + $0x18] sm:$0xff]  ;;  %s20820_s15 = sld [smem:[#allocation53_spill]] }
0x1ae2   : > { %11169 = vmatpush.msra.mxu1 %v19859_v13 }
0x1ae3   : > { %11067 = vmatpush.msrb.mxu2 %v11020_v38  ;;  %11146 = vmatpush.msra.mxu0 %v11027_v3 }
0x1ae4   : > { %11171 = vmatpush.msra.mxu1 %v19870_v6 }
0x1ae5   : > { %11070 = vmatpush.msrb.mxu2 %v11026_v10  ;;  %11150 = vmatpush.msra.mxu0 %v11033_v44  ;;  %v11241_v10 = vand.u32 4294901760, %v11221_v15 }
0x1ae6   : > { %11173 = vmatpush.msra.mxu1 %v10964_v41 }
0x1ae7   : > { %11073 = vmatpush.msrb.mxu2 %v11032_v34 }
0x1ae8   : > { %11175 = vmatpush.msra.mxu1 %v10966_v17 }
0x1ae9   : > { %11242 = vmatpush.msra.mxu2 %v11241_v10 }
0x1aea   : > { %11177 = vmatpush.msra.mxu1 %v10968_v56 }
0x1aec   : > { %11179 = vmatpush.msra.mxu1 %v10970_v19  ;;  %v11220_v19 = vld [vmem:[%s20817_s1 + $0x10] sm:$0xff] }
0x1aed   : > { %v11243_v32 = vand.u32 4294901760, %v11220_v19 }
0x1aef   : > { %v11277_v34 = vsub.f32 %v11220_v19, %v11243_v32  ;;  %11244 = vmatpush.msra.mxu2 %v11243_v32 }
0x1af1   : > { %v11278_v44 = vand.u32 4294901760, %v11277_v34  ;;  %11246 = vmatpush.msra.mxu2 %v11245_v59 }
0x1af3   : > { %11248 = vmatpush.msra.mxu2 %v11247_v31 }
0x1b4f   : > { %v10843_v5 = vpop.f32.mrf.mxu0 }
0x1b51   : > { %v10870_v7 = vpop.f32.mrf.mxu1 }
0x1b53   : > { %v10813_v62 = vpop.f32.mrf.mxu3 }
0x1b5b   : > { %v10772_v50 = vpop.f32.mrf.mxu2  ;;  %v10928_v42 = vpop.f32.mrf.mxu3 }
0x1b5c   : > { %v10773_v51 = vadd.f32 %v17491_v61, %v10772_v50  ;;  %v11279_v61 = vsub.f32 %v11277_v34, %v11278_v44  ;;  %v11289_v50 = vsub.f32 %v11218_v33, %v11247_v31 }
0x1b5e   : > { %v10814_v45 = vadd.f32 %v10813_v62, %v10773_v51  ;;  %v11284_v62 = vand.u32 4294901760, %v11283_v39  ;;  %v11280_v51 = vand.u32 4294901760, %v11279_v61 }
0x1b60   : > { %v10844_v21 = vadd.f32 %v10843_v5, %v10814_v45  ;;  %v11285_v45 = vsub.f32 %v11283_v39, %v11284_v62  ;;  %v11290_v5 = vand.u32 4294901760, %v11289_v50 }
0x1b62   : > { %v10871_v16 = vadd.f32 %v10870_v7, %v10844_v21  ;;  %v11286_v21 = vand.u32 4294901760, %v11285_v45  ;;  %v11291_v7 = vsub.f32 %v11289_v50, %v11290_v5 }
0x1b63   : > { %v10903_v58 = vpop.f32.mrf.mxu2 }
0x1b64   : > { %v10904_v0 = vadd.f32 %v10903_v58, %v10871_v16  ;;  %v11292_v16 = vand.u32 4294901760, %v11291_v7 }
0x1b66   : > { %v10929_v54 = vadd.f32 %v10928_v42, %v10904_v0 }
0x1b68   : > { %v10931_v28 = vmax.f32 %v10929_v54, 0.0  ;;  %v11417_v54 = vld [vmem:[%s20818_s7 + $0x18] sm:$0xff]  ;;  %s20821_s7 = sld [smem:[#allocation28_spill]] }
0x1b6a   : > { %v10946_v13 = vsel %vm10944_vm1, %v10931_v28, 0 }
0x1b6b   : > { %v10972_v29 = vand.u32 4294901760, %v10946_v13 }
0x1b6d   : > { %v10973_v8 = vsub.f32 %v10946_v13, %v10972_v29  ;;  %11038 = vmatmul.f32.vlgmr.msrb.gmra.mxu1 %v10972_v29  ;;  %v11434_v13 = vand.u32 4294901760, %v11417_v54 }
0x1b6e   : > { %11402 = vmatpush.msrb.mxu1 %v11241_v10  ;;  %s20822_s3 = smov %s20821_s7 }
0x1b6f   : > { %v10974_v12 = vand.u32 4294901760, %v10973_v8  ;;  %11076 = vmatmul.f32.vlgmr.msrb.gmra.mxu2 %v10973_v8  ;;  %v11639_v45 = vld [vmem:[%s20822_s3 + $0x8] sm:$0xff] }
0x1b70   : > { %11404 = vmatpush.msrb.mxu1 %v11243_v32 }
0x1b71   : > { %v10975_v4 = vsub.f32 %v10973_v8, %v10974_v12  ;;  %11107 = vmatmul.f32.vlgmr.msrb.gmra.mxu3 %v10974_v12  ;;  %v11416_v8 = vld [vmem:[%s20819_s2 + $0x10] sm:$0xff]  ;;  %v19908_v12 = vsub.f32 %v11417_v54, %v11434_v13 }
0x1b72   : > { %11406 = vmatpush.msrb.mxu1 %v11245_v59 }
0x1b73   : > { %v10976_v6 = vand.u32 4294901760, %v10975_v4  ;;  %v11436_v4 = vand.u32 4294901760, %v11416_v8 }
0x1b74   : > { %11408 = vmatpush.msrb.mxu1 %v11247_v31 }
0x1b75   : > { %10977 = vmatmul.f32.vlgmr.msrb.gmra.mxu0 %v10976_v6  ;;  %11181 = vmatmul.f32.vlgmr.msra.gmra.mxu1 %v10972_v29 }
0x1b76   : > { %11552 = vmatpush.msra.mxu1 %v11434_v13 }
0x1b78   : > { %11554 = vmatpush.msra.mxu1 %v11436_v4 }
0x1b7d   : > { %11152 = vmatmul.f32.vlgmr.msra.gmra.mxu0 %v10972_v29 }
0x1bea   : > { %v11039_v36 = vpop.f32.mrf.mxu1 }
0x1bf2   : > { %v10978_v52 = vpop.f32.mrf.mxu0  ;;  %v11077_v41 = vpop.f32.mrf.mxu2 }
0x1bf3   : > { %v10979_v2 = vadd.f32 %v17492_v43, %v10978_v52  ;;  %v11182_v25 = vpop.f32.mrf.mxu1  ;;  %v11415_v43 = vld [vmem:[%s20819_s2 + $0x8] sm:$0xff]  ;;  %v19911_v52 = vsub.f32 %v11416_v8, %v11436_v4 }
0x1bf4   : > { %v11108_v46 = vpop.f32.mrf.mxu3 }
0x1bf5   : > { %v11040_v40 = vadd.f32 %v11039_v36, %v10979_v2  ;;  %v11438_v36 = vand.u32 4294901760, %v11415_v43 }
0x1bf7   : > { %v11078_v60 = vadd.f32 %v11077_v41, %v11040_v40  ;;  %v11414_v40 = vld [vmem:[%s20819_s2] sm:$0xff]  ;;  %11556 = vmatpush.msra.mxu1 %v11438_v36 }
0x1bf8   : > { %v11440_v41 = vand.u32 4294901760, %v11414_v40 }
0x1bf9   : > { %v11109_v47 = vadd.f32 %v11108_v46, %v11078_v60  ;;  %v11484_v60 = vsub.f32 %v11415_v43, %v11438_v36 }
0x1bfa   : > { %v11153_v49 = vpop.f32.mrf.mxu0  ;;  %11558 = vmatpush.msra.mxu1 %v11440_v41 }
0x1bfb   : > { %v11154_v17 = vadd.f32 %v11153_v49, %v11109_v47  ;;  %v11490_v47 = vsub.f32 %v11414_v40, %v11440_v41 }
0x1bfd   : > { %v11183_v23 = vadd.f32 %v11182_v25, %v11154_v17  ;;  %v17493_v17 = vld [vmem:[#allocation2] ss:$0 sm:$0xff]  ;;  %v11473_v25 = vand.u32 4294901760, %v19908_v12  ;;  %v11491_v19 = vand.u32 4294901760, %v11490_v47 }
0x1bff   : > { %v11185_v35 = vadd.f32 %v11183_v23, %v19839_v63  ;;  %v11271_v63 = vsub.f32 %v11221_v15, %v11241_v10 }
0x1c01   : > { %v11186_v14 = vsel %vm6080_vm7, %v11185_v35, 0.0  ;;  %v11272_v3 = vand.u32 4294901760, %v11271_v63  ;;  %11313 = vmatpush.msrb.mxu2 %v11271_v63 }
0x1c02   : > { %11187 = vadd.xlane.f32.xlu2 %v11186_v14 }
0x1c03   : > { %v11273_v55 = vsub.f32 %v11271_v63, %v11272_v3  ;;  %11371 = vmatpush.msrb.mxu0 %v11272_v3  ;;  %11316 = vmatpush.msrb.mxu2 %v11277_v34 }
0x1c05   : > { %v11274_v57 = vand.u32 4294901760, %v11273_v55  ;;  %11375 = vmatpush.msrb.mxu0 %v11278_v44  ;;  %11319 = vmatpush.msrb.mxu2 %v11283_v39 }
0x1c07   : > { %11275 = vmatpush.msra.mxu3 %v11274_v57  ;;  %11379 = vmatpush.msrb.mxu0 %v11284_v62  ;;  %v11641_v57 = vld [vmem:[%s20821_s7 + $0x18] sm:$0xff]  ;;  %v11640_v62 = vld [vmem:[%s20822_s3 + $0x10] sm:$0xff]  ;;  %s20825_s7 = sld [smem:[#allocation21_spill]] }
0x1c08   : > { %11322 = vmatpush.msrb.mxu2 %v11289_v50  ;;  %v11658_v61 = vand.u32 4294901760, %v11641_v57 }
0x1c09   : > { %11281 = vmatpush.msra.mxu3 %v11280_v51  ;;  %11383 = vmatpush.msrb.mxu0 %v11290_v5  ;;  %v11660_v51 = vand.u32 4294901760, %v11640_v62 }
0x1c0a   : > { %v11696_v50 = vsub.f32 %v11641_v57, %v11658_v61 }
0x1c0b   : > { %11287 = vmatpush.msra.mxu3 %v11286_v21  ;;  %11518 = vmatpush.msra.mxu0 %v19908_v12  ;;  %v11662_v21 = vand.u32 4294901760, %v11639_v45  ;;  %v11702_v7 = vsub.f32 %v11640_v62, %v11660_v51 }
0x1c0c   : > { %v11697_v5 = vand.u32 4294901760, %v11696_v50 }
0x1c0d   : > { %11293 = vmatpush.msra.mxu3 %v11292_v16  ;;  %11521 = vmatpush.msra.mxu0 %v19911_v52  ;;  %v11638_v16 = vld [vmem:[%s20822_s3] sm:$0xff]  ;;  %v11708_v54 = vsub.f32 %v11639_v45, %v11662_v21  ;;  %s20826_s5 = smov %s20825_s7 }
0x1c0f   : > { %11342 = vmatpush.msrb.mxu3 %v11241_v10  ;;  %11524 = vmatpush.msra.mxu0 %v11484_v60 }
0x1c11   : > { %11344 = vmatpush.msrb.mxu3 %v11243_v32  ;;  %11527 = vmatpush.msra.mxu0 %v11490_v47 }
0x1c13   : > { %11346 = vmatpush.msrb.mxu3 %v11245_v59 }
0x1c15   : > { %11348 = vmatpush.msrb.mxu3 %v11247_v31 }
0x1c75   : > { %v11188_v38 = vpop.xlane.xlu2 %11187 }
0x1c76   : > { %v11189_v56 = vmul.f32 %v11188_v38, %v19128_v48  ;;  %v11479_v38 = vand.u32 4294901760, %v19911_v52 }
0x1c78   : > { %v19896_v1 = vsub.f32 %v11185_v35, %v11189_v56  ;;  %v17494_v35 = vld [vmem:[%s20820_s15] ss:$0 sm:$0xff]  ;;  %v11480_v10 = vsub.f32 %v19911_v52, %v11479_v38  ;;  %s20823_s15 = sld [smem:[#allocation23_spill]] }
0x1c7a   : > { %v11191_v53 = vmul.f32 %v19896_v1, %v19896_v1  ;;  %v11481_v34 = vand.u32 4294901760, %v11480_v10 }
0x1c7c   : > { %v11192_v37 = vsel %vm6080_vm7, %v11191_v53, 0.0  ;;  %v11474_v53 = vsub.f32 %v19908_v12, %v11473_v25 }
0x1c7d   : > { %11193 = vadd.xlane.f32.xlu0 %v11192_v37  ;;  %v11485_v37 = vand.u32 4294901760, %v11484_v60 }
0x1c7e   : > { %v11475_v32 = vand.u32 4294901760, %v11474_v53  ;;  %s20824_s4 = smov %s20823_s15 }
0x1c7f   : > { %v11486_v9 = vsub.f32 %v11484_v60, %v11485_v37  ;;  %v17495_v60 = vld [vmem:[%s20823_s15] ss:$0 sm:$0xff]  ;;  %s20827_s15 = sld [smem:[#allocation24_spill]] }
0x1c81   : > { %v11487_v33 = vand.u32 4294901760, %v11486_v9 }
0x1c85   : > { %s20828_s6 = smov %s20827_s15 }
0x1cf0   : > { %v11194_v58 = vpop.xlane.xlu0 %11193 }
0x1cf1   : > { %v11195_v0 = vmul.f32 %v11194_v58, %v19128_v48  ;;  %v11698_v58 = vsub.f32 %v11696_v50, %v11697_v5 }
0x1cf3   : > { %v11196_v42 = vadd.f32 1e-05, %v11195_v0  ;;  %v11703_v0 = vand.u32 4294901760, %v11702_v7 }
0x1cf5   : > { %17554 = vrsqrt.f32 %v11196_v42  ;;  %vm11203_vm5 = vweird.f32 %v11196_v42 }
0x1cfb   : > { %v17555_v28 = vpop.eup %17554 }
0x1cfc   : > { %v11198_v29 = vmul.f32 %v17555_v28, %v11196_v42  ;;  %vm11204_vm4 = vweird.f32 %v17555_v28  ;;  %v11664_v42 = vand.u32 4294901760, %v11638_v16 }
0x1cfd   : > { %vm11205_vm6 = vmor %vm11203_vm5, %vm11204_vm4 }
0x1cfe   : > { %v11199_v6 = vmul.f32 %v17555_v28, %v11198_v29  ;;  %v11709_v29 = vand.u32 4294901760, %v11708_v54  ;;  %v11714_v8 = vsub.f32 %v11638_v16, %v11664_v42 }
0x1d00   : > { %v11200_v2 = vmul.f32 0.5, %v11199_v6  ;;  %v11715_v6 = vand.u32 4294901760, %v11714_v8 }
0x1d02   : > { %v11201_v46 = vsub.f32 1.5, %v11200_v2 }
0x1d04   : > { %v11202_v49 = vmul.f32 %v17555_v28, %v11201_v46 }
0x1d06   : > { %v11206_v23 = vsel %vm11205_vm6, %v17555_v28, %v11202_v49  ;;  %v11699_v28 = vand.u32 4294901760, %v11698_v58 }
0x1d07   : > { %v11207_v14 = vmul.f32 %v11206_v23, %v19896_v1  ;;  %v11492_v1 = vsub.f32 %v11490_v47, %v11491_v19 }
0x1d09   : > { %v11212_v56 = vmul.f32 %v17493_v17, %v11207_v14  ;;  %v11493_v44 = vand.u32 4294901760, %v11492_v1 }
0x1d0b   : > { %v19921_v15 = vadd.f32 %v17494_v35, %v11212_v56 }
0x1d0d   : > { %v11227_v63 = vsel %vm1871_vm2, %v19921_v15, 0 }
0x1d0e   : > { %v19926_v3 = vand.u32 4294901760, %v11227_v63 }
0x1d10   : > { %v19929_v59 = vsub.f32 %v11227_v63, %v19926_v3  ;;  %11295 = vmatmul.f32.vlgmr.msra.gmra.mxu3 %v19926_v3  ;;  %11385 = vmatmul.f32.vlgmr.msrb.gmra.mxu0 %v19926_v3 }
0x1d11   : > { %11410 = vmatmul.f32.vlgmr.msrb.gmra.mxu1 %v19926_v3  ;;  %11476 = vmatpush.msra.mxu3 %v11475_v32 }
0x1d12   : > { %v19935_v55 = vand.u32 4294901760, %v19929_v59  ;;  %11659 = vmatpush.msrb.mxu0 %v11658_v61  ;;  %11700 = vmatpush.msrb.mxu1 %v11699_v28 }
0x1d13   : > { %11482 = vmatpush.msra.mxu3 %v11481_v34 }
0x1d14   : > { %v11252_v39 = vsub.f32 %v19929_v59, %v19935_v55  ;;  %11661 = vmatpush.msrb.mxu0 %v11660_v51 }
0x1d15   : > { %11488 = vmatpush.msra.mxu3 %v11487_v33 }
0x1d16   : > { %v19939_v31 = vand.u32 4294901760, %v11252_v39  ;;  %11663 = vmatpush.msrb.mxu0 %v11662_v21 }
0x1d17   : > { %11494 = vmatpush.msra.mxu3 %v11493_v44 }
0x1d18   : > { %11254 = vmatmul.f32.vlgmr.msra.gmra.mxu2 %v19939_v31  ;;  %11352 = vmatmul.f32.vlgmr.msrb.gmra.mxu3 %v19935_v55 }
0x1d19   : > { %11435 = vmatpush.msra.mxu2 %v11434_v13  ;;  %11530 = vmatmul.f32.vlgmr.msra.gmra.mxu0 %v19187_v26 }
0x1d1a   : > { %11622 = vmatpush.msrb.mxu3 %v11434_v13  ;;  %11562 = vmatmul.f32.vlgmr.msra.gmra.mxu1 %v19196_v30  ;;  %v11704_v13 = vsub.f32 %v11702_v7, %v11703_v0 }
0x1d1b   : > { %11437 = vmatpush.msra.mxu2 %v11436_v4  ;;  %11665 = vmatpush.msrb.mxu0 %v11664_v42 }
0x1d1c   : > { %11624 = vmatpush.msrb.mxu3 %v11436_v4  ;;  %v11705_v12 = vand.u32 4294901760, %v11704_v13  ;;  %v11710_v4 = vsub.f32 %v11708_v54, %v11709_v29 }
0x1d1d   : > { %11439 = vmatpush.msra.mxu2 %v11438_v36  ;;  %11811 = vmatpush.msra.mxu0 %v11697_v5 }
0x1d1e   : > { %11626 = vmatpush.msrb.mxu3 %v11438_v36  ;;  %11706 = vmatpush.msrb.mxu1 %v11705_v12  ;;  %v11711_v43 = vand.u32 4294901760, %v11710_v4  ;;  %v11716_v36 = vsub.f32 %v11714_v8, %v11715_v6 }
0x1d1f   : > { %11441 = vmatpush.msra.mxu2 %v11440_v41  ;;  %11815 = vmatpush.msra.mxu0 %v11703_v0 }
0x1d20   : > { %11325 = vmatmul.f32.vlgmr.msrb.gmra.mxu2 %v19929_v59  ;;  %11496 = vmatmul.f32.vlgmr.msra.gmra.mxu3 %v19182_v27  ;;  %v11717_v52 = vand.u32 4294901760, %v11716_v36 }
0x1d21   : > { %11587 = vmatpush.msrb.mxu2 %v11473_v25  ;;  %11628 = vmatpush.msrb.mxu3 %v11440_v41  ;;  %v17496_v25 = vld [vmem:[%s20825_s7] ss:$0 sm:$0xff]  ;;  %s20829_s7 = sld [smem:[#allocation20_spill]] }
0x1d22   : > { %11535 = vmatmul.f32.gmra.mxu0 %v19208_v22  ;;  %11568 = vmatmul.f32.gmra.mxu1 %v19230_v24 }
0x1d23   : > { %11591 = vmatpush.msrb.mxu2 %v11479_v38  ;;  %11776 = vmatpush.msra.mxu3 %v11658_v61 }
0x1d24   : > { %11712 = vmatpush.msrb.mxu1 %v11711_v43  ;;  %11819 = vmatpush.msra.mxu0 %v11709_v29 }
0x1d25   : > { %11595 = vmatpush.msrb.mxu2 %v11485_v37  ;;  %11778 = vmatpush.msra.mxu3 %v11660_v51 }
0x1d26   : > { %11718 = vmatpush.msrb.mxu1 %v11717_v52  ;;  %11823 = vmatpush.msra.mxu0 %v11715_v6 }
0x1d27   : > { %11599 = vmatpush.msrb.mxu2 %v11491_v19  ;;  %11780 = vmatpush.msra.mxu3 %v11662_v21 }
0x1d28   : > { %11447 = vmatmul.f32.vlgmr.msra.gmra.mxu2 %v19234_v20  ;;  %11500 = vmatmul.f32.gmra.mxu3 %v19198_v11 }
0x1d29   : > { %11742 = vmatpush.msra.mxu2 %v11696_v50  ;;  %11782 = vmatpush.msra.mxu3 %v11664_v42 }
0x1d2a   : > { %11671 = vmatmul.f32.vlgmr.msrb.gmra.mxu0 %v19234_v20  ;;  %11720 = vmatmul.f32.vlgmr.msrb.gmra.mxu1 %v19182_v27 }
0x1d2b   : > { %11745 = vmatpush.msra.mxu2 %v11702_v7  ;;  %11846 = vmatpush.msra.mxu1 %v11658_v61 }
0x1d2d   : > { %11748 = vmatpush.msra.mxu2 %v11708_v54  ;;  %11848 = vmatpush.msra.mxu1 %v11660_v51 }
0x1d2f   : > { %11751 = vmatpush.msra.mxu2 %v11714_v8  ;;  %11850 = vmatpush.msra.mxu1 %v11662_v21 }
0x1d30   : > { %11455 = vmatmul.f32.gmra.mxu2 %v19256_v18  ;;  %11630 = vmatmul.f32.vlgmr.msrb.gmra.mxu3 %v19182_v27 }
0x1d31   : > { %11852 = vmatpush.msra.mxu1 %v11664_v42 }
0x1d32   : > { %11679 = vmatmul.f32.gmra.mxu0 %v19256_v18  ;;  %11724 = vmatmul.f32.gmra.mxu1 %v19198_v11 }
0x1d38   : > { %11601 = vmatmul.f32.vlgmr.msrb.gmra.mxu2 %v19182_v27  ;;  %11634 = vmatmul.f32.gmra.mxu3 %v19198_v11 }
0x1d3a   : > { %11825 = vmatmul.f32.vlgmr.msra.gmra.mxu0 %v19182_v27  ;;  %11854 = vmatmul.f32.vlgmr.msra.gmra.mxu1 %v19182_v27 }
0x1d40   : > { %11605 = vmatmul.f32.gmra.mxu2 %v19198_v11  ;;  %11786 = vmatmul.f32.vlgmr.msra.gmra.mxu3 %v19196_v30 }
0x1d42   : > { %11829 = vmatmul.f32.gmra.mxu0 %v19198_v11  ;;  %11858 = vmatmul.f32.gmra.mxu1 %v19198_v11 }
0x1d48   : > { %11754 = vmatmul.f32.vlgmr.msra.gmra.mxu2 %v19187_v26  ;;  %11792 = vmatmul.f32.gmra.mxu3 %v19230_v24 }
0x1d50   : > { %11759 = vmatmul.f32.gmra.mxu2 %v19208_v22 }
0x1d8d   : > { %v11386_v17 = vpop.f32.mrf.mxu0 }
0x1d8e   : > { %v11411_v14 = vpop.f32.mrf.mxu1 }
0x1d93   : > { %v11296_v2 = vpop.f32.mrf.mxu3 }
0x1d96   : > { %v11531_v10 = vpop.f32.mrf.mxu0 }
0x1d97   : > { %v11563_v9 = vpop.f32.mrf.mxu1 }
0x1d9b   : > { %v11255_v40 = vpop.f32.mrf.mxu2  ;;  %v11353_v41 = vpop.f32.mrf.mxu3 }
0x1d9c   : > { %v11256_v49 = vadd.f32 %v17495_v60, %v11255_v40 }
0x1d9e   : > { %v11297_v23 = vadd.f32 %v11296_v2, %v11256_v49 }
0x1d9f   : > { %v11536_v61 = vpop.f32.mrf.mxu0  ;;  %v11569_v21 = vpop.f32.mrf.mxu1 }
0x1da3   : > { %v11326_v46 = vpop.f32.mrf.mxu2  ;;  %v11497_v47 = vpop.f32.mrf.mxu3 }
0x1da4   : > { %v11327_v38 = vadd.f32 %v11326_v46, %v11297_v23 }
0x1da6   : > { %v11354_v37 = vadd.f32 %v11353_v41, %v11327_v38 }
0x1da7   : > { %v11672_v49 = vpop.f32.mrf.mxu0  ;;  %v11721_v23 = vpop.f32.mrf.mxu1 }
0x1da8   : > { %v11387_v32 = vadd.f32 %v11386_v17, %v11354_v37  ;;  %v17497_v17 = vld [vmem:[%s20827_s15] ss:$0 sm:$0xff]  ;;  %s20830_s15 = sshll.u32 %s18266_s11, 2  ;;  %s20831_s11 = sld [smem:[#allocation26_spill]] }
0x1da9   : > { %s1690_s8 = scalar_lea.vmem %s20829_s7, %s20830_s15  ;;  %s20833_s7 = sld [smem:[#allocation22_spill]] }
0x1daa   : > { %v11412_v33 = vadd.f32 %v11411_v14, %v11387_v32  ;;  %s20834_s15 = sld [smem:[#allocation31_spill]] }
0x1dab   : > { %v11448_v35 = vpop.f32.mrf.mxu2  ;;  %v11501_v53 = vpop.f32.mrf.mxu3 }
0x1dac   : > { %v11449_v56 = vadd.f32 %v17496_v25, %v11448_v35  ;;  %v11863_v51 = vsel %vm2446_vm3, %v11412_v33, 0 }
0x1dad   : > { %v11889_v7 = vand.u32 4294901760, %v11863_v51 }
0x1dae   : > { %v11498_v19 = vadd.f32 %v11497_v47, %v11449_v56 }
0x1daf   : > { %v11890_v54 = vsub.f32 %v11863_v51, %v11889_v7  ;;  %v11680_v35 = vpop.f32.mrf.mxu0 }
0x1db0   : > { %v11532_v34 = vadd.f32 %v11531_v10, %v11498_v19  ;;  %v11725_v10 = vpop.f32.mrf.mxu1 }
0x1db1   : > { %v11891_v12 = vand.u32 4294901760, %v11890_v54 }
0x1db2   : > { %v11564_v39 = vadd.f32 %v11563_v9, %v11532_v34 }
0x1db3   : > { %v11456_v63 = vpop.f32.mrf.mxu2  ;;  %v11631_v44 = vpop.f32.mrf.mxu3  ;;  %v11892_v36 = vsub.f32 %v11890_v54, %v11891_v12 }
0x1db4   : > { %v11457_v1 = vadd.f32 %v17496_v25, %v11456_v63  ;;  %v11673_v25 = vadd.f32 %v17497_v17, %v11672_v49 }
0x1db5   : > { %v11893_v41 = vand.u32 4294901760, %v11892_v36 }
0x1db6   : > { %v11502_v57 = vadd.f32 %v11501_v53, %v11457_v1  ;;  %v11722_v14 = vadd.f32 %v11721_v23, %v11673_v25  ;;  %v11681_v53 = vadd.f32 %v17497_v17, %v11680_v35 }
0x1db7   : > { %v11826_v19 = vpop.f32.mrf.mxu0 }
0x1db8   : > { %v11537_v45 = vadd.f32 %v11536_v61, %v11502_v57  ;;  %v11726_v63 = vadd.f32 %v11725_v10, %v11681_v53  ;;  %v17266_v10 = vld [vmem:[%s20817_s1 + $0x28] sm:$0xff] }
0x1dba   : > { %v11570_v16 = vadd.f32 %v11569_v21, %v11537_v45 }
0x1dbb   : > { %v11602_v62 = vpop.f32.mrf.mxu2  ;;  %v11635_v42 = vpop.f32.mrf.mxu3 }
0x1dbc   : > { %v11603_v50 = vadd.f32 %v11602_v62, %v11564_v39 }
0x1dbe   : > { %v11632_v5 = vadd.f32 %v11631_v44, %v11603_v50  ;;  %v11855_v44 = vpop.f32.mrf.mxu1 }
0x1dbf   : > { %v11830_v61 = vpop.f32.mrf.mxu0 }
0x1dc0   : > { %v11866_v58 = vsel %vm2446_vm3, %v11632_v5, 0 }
0x1dc1   : > { %v11887_v13 = vand.u32 4294901760, %v11866_v58 }
0x1dc3   : > { %v11606_v0 = vpop.f32.mrf.mxu2  ;;  %v11919_v6 = vsub.f32 %v11866_v58, %v11887_v13  ;;  %v11787_v56 = vpop.f32.mrf.mxu3 }
0x1dc4   : > { %v11607_v28 = vadd.f32 %v11606_v0, %v11570_v16 }
0x1dc5   : > { %v11920_v2 = vand.u32 4294901760, %v11919_v6 }
0x1dc6   : > { %v11636_v29 = vadd.f32 %v11635_v42, %v11607_v28  ;;  %v11859_v45 = vpop.f32.mrf.mxu1 }
0x1dc7   : > { %v11921_v46 = vsub.f32 %v11919_v6, %v11920_v2 }
0x1dc8   : > { %v11869_v8 = vsel %vm2446_vm3, %v11636_v29, 0 }
0x1dc9   : > { %v11885_v4 = vand.u32 4294901760, %v11869_v8  ;;  %v11922_v47 = vand.u32 4294901760, %v11921_v46 }
0x1dcb   : > { %v11913_v43 = vsub.f32 %v11869_v8, %v11885_v4  ;;  %11886 = vmatpush.xpose.msrb.mxu2 %v11885_v4  ;;  %11970 = vmatpush.xpose.msrb.mxu1 %v11885_v4  ;;  %v11755_v38 = vpop.f32.mrf.mxu2  ;;  %v11793_v33 = vpop.f32.mrf.mxu3 }
0x1dcc   : > { %v11756_v37 = vadd.f32 %v11755_v38, %v11722_v14  ;;  %v17268_v14 = vld [vmem:[%s20817_s1 + $0x38] sm:$0xff] }
0x1dcd   : > { %11945 = vmatpush.xpose.msrb.mxu0 %v11913_v43  ;;  %v11914_v52 = vand.u32 4294901760, %v11913_v43  ;;  %v19989_v38 = vand.u32 4294901760, %v17268_v14 }
0x1dce   : > { %v11788_v32 = vadd.f32 %v11787_v56, %v11756_v37  ;;  %v17267_v56 = vld [vmem:[%s20817_s1 + $0x30] sm:$0xff] }
0x1dcf   : > { %11888 = vmatpush.xpose.msrb.mxu2 %v11887_v13  ;;  %11972 = vmatpush.xpose.msrb.mxu1 %v11887_v13  ;;  %v11915_v40 = vsub.f32 %v11913_v43, %v11914_v52  ;;  %v19994_v53 = vsub.f32 %v17268_v14, %v19989_v38  ;;  %v19996_v37 = vand.u32 4294901760, %v17267_v56 }
0x1dd0   : > { %v11827_v34 = vadd.f32 %v11826_v19, %v11788_v32 }
0x1dd1   : > { %11948 = vmatpush.xpose.msrb.mxu0 %v11919_v6  ;;  %v11916_v60 = vand.u32 4294901760, %v11915_v40  ;;  %v12262_v19 = vand.u32 4294901760, %v19994_v53  ;;  %v20004_v32 = vsub.f32 %v17267_v56, %v19996_v37 }
0x1dd2   : > { %11894 = vmatmul.f32.vlgmr.msrb.gmra.mxu2 %v11893_v41  ;;  %11976 = vmatmul.f32.vlgmr.msrb.gmra.mxu1 %v11891_v12  ;;  %v11856_v39 = vadd.f32 %v11855_v44, %v11827_v34 }
0x1dd3   : > { %11997 = vmatpush.xpose.msra.mxu2 %v11914_v52  ;;  %11917 = vmatpush.xpose.msrb.mxu3 %v11916_v60  ;;  %v11760_v9 = vpop.f32.mrf.mxu2  ;;  %v12263_v34 = vsub.f32 %v19994_v53, %v12262_v19 }
0x1dd4   : > { %11951 = vmatmul.f32.vlgmr.msrb.gmra.mxu0 %v11890_v54  ;;  %v11761_v1 = vadd.f32 %v11760_v9, %v11726_v63  ;;  %v12065_v62 = vand.u32 4294901760, %v11856_v39  ;;  %v20001_v63 = vand.u32 4294901760, %v17266_v10  ;;  %v17265_v9 = vld [vmem:[%s20817_s1 + $0x20] sm:$0xff] }
0x1dd6   : > { %v11794_v57 = vadd.f32 %v11793_v33, %v11761_v1  ;;  %v12097_v51 = vsub.f32 %v11856_v39, %v12065_v62  ;;  %v12268_v1 = vand.u32 4294901760, %v20004_v32  ;;  %v20010_v33 = vand.u32 4294901760, %v17265_v9 }
0x1dd7   : > { %12001 = vmatpush.xpose.msra.mxu2 %v11920_v2  ;;  %11923 = vmatpush.xpose.msrb.mxu3 %v11922_v47  ;;  %v19981_v2 = vld [vmem:[%s1690_s8] sm:$0xf]  ;;  %v20013_v44 = vsub.f32 %v17266_v10, %v20001_v63  ;;  %v12264_v39 = vand.u32 4294901760, %v12263_v34  ;;  %v17277_v34 = vld [vmem:[%s20822_s3 + $0x30] sm:$0xff]  ;;  %s20832_s8 = smov %s20831_s11 }
0x1dd8   : > { %v11831_v50 = vadd.f32 %v11830_v61, %v11794_v57  ;;  %vm12031_vm8 = vcmp.gt.f32.partialorder %v19981_v2, 0.5  ;;  %v12269_v57 = vsub.f32 %v20004_v32, %v12268_v1 }
0x1dd9   : > { %v12274_v61 = vand.u32 4294901760, %v20013_v44 }
0x1dda   : > { %11925 = vmatmul.f32.vlgmr.msrb.gmra.mxu3 %v11889_v7  ;;  %12003 = vmatmul.f32.vlgmr.msra.gmra.mxu2 %v11889_v7  ;;  %v11860_v5 = vadd.f32 %v11859_v45, %v11831_v50  ;;  %v12270_v50 = vand.u32 4294901760, %v12269_v57 }
0x1ddb   : > { %12022 = vmatpush.xpose.msra.mxu3 %v11885_v4 }
0x1ddc   : > { %v12063_v21 = vand.u32 4294901760, %v11860_v5 }
0x1dde   : > { %v12091_v16 = vsub.f32 %v11860_v5, %v12063_v21  ;;  %12064 = vmatpush.msra.mxu0 %v12063_v21 }
0x1ddf   : > { %12024 = vmatpush.xpose.msra.mxu3 %v11887_v13 }
0x1de0   : > { %v12092_v58 = vand.u32 4294901760, %v12091_v16  ;;  %12123 = vmatpush.msrb.mxu2 %v12091_v16  ;;  %12066 = vmatpush.msra.mxu0 %v12065_v62 }
0x1de2   : > { %12026 = vmatmul.f32.vlgmr.msra.gmra.mxu3 %v11889_v7  ;;  %v12098_v7 = vand.u32 4294901760, %v12097_v51  ;;  %v12093_v42 = vsub.f32 %v12091_v16, %v12092_v58  ;;  %12126 = vmatpush.msrb.mxu2 %v12097_v51 }
0x1de3   : > { %12148 = vmatpush.msrb.mxu3 %v12063_v21  ;;  %12175 = vmatpush.msrb.mxu0 %v12092_v58  ;;  %v17273_v58 = vld [vmem:[%s20819_s2 + $0x38] sm:$0xff] }
0x1de4   : > { %v12099_v0 = vsub.f32 %v12097_v51, %v12098_v7  ;;  %v12094_v54 = vand.u32 4294901760, %v12093_v42  ;;  %12232 = vmatpush.msra.mxu2 %v19989_v38  ;;  %v12275_v51 = vsub.f32 %v20013_v44, %v12274_v61  ;;  %v17272_v42 = vld [vmem:[%s20819_s2 + $0x30] sm:$0xff] }
0x1de5   : > { %12150 = vmatpush.msrb.mxu3 %v12065_v62  ;;  %12179 = vmatpush.msrb.mxu0 %v12098_v7 }
0x1de6   : > { %v12100_v28 = vand.u32 4294901760, %v12099_v0  ;;  %12095 = vmatpush.msra.mxu1 %v12094_v54  ;;  %12234 = vmatpush.msra.mxu2 %v19996_v37  ;;  %v12276_v5 = vand.u32 4294901760, %v12275_v51  ;;  %v20025_v0 = vand.u32 4294901760, %v17273_v58 }
0x1de7   : > { %12265 = vmatpush.msra.mxu3 %v12264_v39 }
0x1de8   : > { %12101 = vmatpush.msra.mxu1 %v12100_v28  ;;  %12236 = vmatpush.msra.mxu2 %v20001_v63  ;;  %v20029_v28 = vsub.f32 %v17273_v58, %v20025_v0 }
0x1de9   : > { %12271 = vmatpush.msra.mxu3 %v12270_v50 }
0x1dea   : > { %12200 = vmatpush.msrb.mxu1 %v12063_v21  ;;  %12238 = vmatpush.msra.mxu2 %v20010_v33 }
0x1deb   : > { %12277 = vmatpush.msra.mxu3 %v12276_v5 }
0x1dec   : > { %12202 = vmatpush.msrb.mxu1 %v12065_v62  ;;  %v20019_v62 = vsub.f32 %v17265_v9, %v20010_v33 }
0x1dee   : > { %v12280_v45 = vand.u32 4294901760, %v20019_v62 }
0x1df0   : > { %v12281_v21 = vsub.f32 %v20019_v62, %v12280_v45 }
0x1df2   : > { %v12282_v7 = vand.u32 4294901760, %v12281_v21 }
0x1df4   : > { %12283 = vmatpush.msra.mxu3 %v12282_v7 }
0x1e4f   : > { %v11977_v6 = vpop.f32.mrf.mxu1 }
0x1e51   : > { %v11952_v12 = vpop.f32.mrf.mxu0 }
0x1e55   : > { %v11895_v13 = vpop.f32.mrf.mxu2 }
0x1e5d   : > { %v11926_v29 = vpop.f32.mrf.mxu3  ;;  %v12004_v36 = vpop.f32.mrf.mxu2 }
0x1e5e   : > { %v11927_v8 = vadd.f32 %v11926_v29, %v11895_v13  ;;  %v20031_v29 = vand.u32 4294901760, %v17272_v42 }
0x1e60   : > { %v11953_v4 = vadd.f32 %v11952_v12, %v11927_v8 }
0x1e62   : > { %v11978_v43 = vadd.f32 %v11977_v6, %v11953_v4  ;;  %v12465_v4 = vand.u32 4294901760, %v20029_v28  ;;  %v17271_v6 = vld [vmem:[%s20819_s2 + $0x28] sm:$0xff] }
0x1e64   : > { %v12005_v52 = vadd.f32 %v12004_v36, %v11978_v43  ;;  %v20037_v43 = vsub.f32 %v17272_v42, %v20031_v29 }
0x1e65   : > { %v12027_v40 = vpop.f32.mrf.mxu3 }
0x1e66   : > { %v12028_v41 = vadd.f32 %v12027_v40, %v12005_v52  ;;  %v17270_v52 = vld [vmem:[%s20819_s2 + $0x20] sm:$0xff]  ;;  %v20041_v40 = vand.u32 4294901760, %v17271_v6 }
0x1e68   : > { %v12030_v60 = vmul.f32 0.35355338, %v12028_v41 }
0x1e6a   : > { %v12032_v46 = vsel %vm12031_vm8, -1e+30, %v12030_v60  ;;  %v12466_v60 = vsub.f32 %v20029_v28, %v12465_v4 }
0x1e6b   : > { %v12034_v47 = vsel %vm12033_vm9, %v12032_v46, -inf }
0x1e6c   : > { %12035 = vmax.xlane.f32.xlu1 %v12034_v47  ;;  %v12432_v47 = vand.u32 4294901760, %v17270_v52 }
0x1e6e   : > { %v12482_v14 = vsub.f32 %v17270_v52, %v12432_v47 }
0x1e70   : > { %v12483_v10 = vand.u32 4294901760, %v12482_v14 }
0x1edf   : > { %v12036_v49 = vpop.xlane.xlu1 %12035 }
0x1ee0   : > { %v12037_v17 = vsub.f32 %v12032_v46, %v12036_v49  ;;  %v12471_v46 = vand.u32 4294901760, %v20037_v43 }
0x1ee2   : > { %v12038_v25 = vmul.f32 1.442695, %v12037_v17  ;;  %v12476_v17 = vsub.f32 %v17271_v6, %v20041_v40 }
0x1ee4   : > { %17556 = vpow2.f32 %v12038_v25  ;;  %v12477_v56 = vand.u32 4294901760, %v12476_v17 }
0x1eea   : > { %v17557_v23 = vpop.eup %17556 }
0x1eeb   : > { %v12040_v35 = vsel %vm12033_vm9, %v17557_v23, 0.0 }
0x1eec   : > { %12041 = vadd.xlane.f32.xlu2 %v12040_v35  ;;  %v12472_v35 = vsub.f32 %v20037_v43, %v12471_v46 }
0x1f5f   : > { %v12042_v16 = vpop.xlane.xlu2 %12041 }
0x1f60   : > { %17558 = vrcp.f32 %v12042_v16 }
0x1f66   : > { %v17559_v54 = vpop.eup %17558 }
0x1f67   : > { %v12044_v13 = vmul.f32 %v17559_v54, %v17557_v23  ;;  %v12467_v23 = vand.u32 4294901760, %v12466_v60 }
0x1f69   : > { %v12047_v8 = vsel %vm12045_vm10, %v12044_v13, 0 }
0x1f6a   : > { %v12067_v12 = vand.u32 4294901760, %v12047_v8 }
0x1f6c   : > { %v12068_v36 = vsub.f32 %v12047_v8, %v12067_v12  ;;  %12103 = vmatmul.f32.vlgmr.msra.gmra.mxu1 %v12067_v12 }
0x1f6d   : > { %12332 = vmatpush.msra.mxu1 %v19989_v38 }
0x1f6e   : > { %12129 = vmatmul.f32.vlgmr.msrb.gmra.mxu2 %v12068_v36  ;;  %v12069_v41 = vand.u32 4294901760, %v12068_v36 }
0x1f6f   : > { %12334 = vmatpush.msra.mxu1 %v19996_v37  ;;  %12361 = vmatpush.msrb.mxu2 %v12262_v19 }
0x1f70   : > { %12154 = vmatmul.f32.vlgmr.msrb.gmra.mxu3 %v12069_v41  ;;  %v12070_v49 = vsub.f32 %v12068_v36, %v12069_v41  ;;  %v17498_v41 = vld [vmem:[%s20824_s4 + $0x1] ss:$0 sm:$0xff] }
0x1f71   : > { %12336 = vmatpush.msra.mxu1 %v20001_v63  ;;  %12365 = vmatpush.msrb.mxu2 %v12268_v1 }
0x1f72   : > { %v12071_v25 = vand.u32 4294901760, %v12070_v49  ;;  %12392 = vmatpush.msrb.mxu3 %v19989_v38  ;;  %v12473_v38 = vand.u32 4294901760, %v12472_v35 }
0x1f73   : > { %12338 = vmatpush.msra.mxu1 %v20010_v33  ;;  %12369 = vmatpush.msrb.mxu2 %v12274_v61 }
0x1f74   : > { %12072 = vmatmul.f32.vlgmr.msra.gmra.mxu0 %v12071_v25  ;;  %12204 = vmatmul.f32.vlgmr.msrb.gmra.mxu1 %v12067_v12  ;;  %v17499_v25 = vld [vmem:[%s20826_s5 + $0x1] ss:$0 sm:$0xff] }
0x1f75   : > { %12394 = vmatpush.msrb.mxu3 %v19996_v37  ;;  %12303 = vmatpush.msra.mxu0 %v19994_v53  ;;  %v12478_v37 = vsub.f32 %v12476_v17, %v12477_v56  ;;  %v12484_v53 = vsub.f32 %v12482_v14, %v12483_v10 }
0x1f76   : > { %12244 = vmatmul.f32.vlgmr.msra.gmra.mxu2 %v19939_v31  ;;  %12468 = vmatpush.msrb.mxu1 %v12467_v23 }
0x1f77   : > { %12373 = vmatpush.msrb.mxu2 %v12280_v45  ;;  %12396 = vmatpush.msrb.mxu3 %v20001_v63  ;;  %v12479_v19 = vand.u32 4294901760, %v12478_v37  ;;  %v12485_v63 = vand.u32 4294901760, %v12484_v53 }
0x1f78   : > { %12285 = vmatmul.f32.vlgmr.msra.gmra.mxu3 %v19926_v3  ;;  %12306 = vmatpush.msra.mxu0 %v20004_v32  ;;  %v17278_v32 = vld [vmem:[%s20822_s3 + $0x38] sm:$0xff] }
0x1f79   : > { %12398 = vmatpush.msrb.mxu3 %v20010_v33  ;;  %12510 = vmatpush.msra.mxu2 %v20029_v28  ;;  %v12652_v9 = vand.u32 4294901760, %v17278_v32  ;;  %v12654_v33 = vand.u32 4294901760, %v17277_v34 }
0x1f7a   : > { %12309 = vmatpush.msra.mxu0 %v20013_v44  ;;  %12474 = vmatpush.msrb.mxu1 %v12473_v38  ;;  %v17276_v44 = vld [vmem:[%s20822_s3 + $0x28] sm:$0xff] }
0x1f7b   : > { %12544 = vmatpush.msra.mxu3 %v20025_v0  ;;  %12513 = vmatpush.msra.mxu2 %v20037_v43  ;;  %v12690_v1 = vsub.f32 %v17278_v32, %v12652_v9  ;;  %v12656_v57 = vand.u32 4294901760, %v17276_v44  ;;  %v12696_v61 = vsub.f32 %v17277_v34, %v12654_v33 }
0x1f7c   : > { %12181 = vmatmul.f32.vlgmr.msrb.gmra.mxu0 %v12067_v12  ;;  %12342 = vmatmul.f32.vlgmr.msra.gmra.mxu1 %v19935_v55 }
0x1f7d   : > { %12312 = vmatpush.msra.mxu0 %v20019_v62  ;;  %12516 = vmatpush.msra.mxu2 %v12476_v17  ;;  %v12691_v39 = vand.u32 4294901760, %v12690_v1  ;;  %v17275_v62 = vld [vmem:[%s20822_s3 + $0x20] sm:$0xff]  ;;  %v12697_v51 = vand.u32 4294901760, %v12696_v61  ;;  %v12702_v5 = vsub.f32 %v17276_v44, %v12656_v57 }
0x1f7e   : > { %12375 = vmatmul.f32.vlgmr.msrb.gmra.mxu2 %v19926_v3  ;;  %12546 = vmatpush.msra.mxu3 %v20031_v29  ;;  %v12658_v45 = vand.u32 4294901760, %v17275_v62 }
0x1f7f   : > { %12427 = vmatpush.msrb.mxu0 %v20025_v0  ;;  %12519 = vmatpush.msra.mxu2 %v12482_v14  ;;  %v12692_v50 = vsub.f32 %v12690_v1, %v12691_v39  ;;  %v12698_v7 = vsub.f32 %v12696_v61, %v12697_v51  ;;  %v12703_v16 = vand.u32 4294901760, %v12702_v5 }
0x1f80   : > { %12400 = vmatmul.f32.vlgmr.msrb.gmra.mxu3 %v19926_v3  ;;  %12480 = vmatpush.msrb.mxu1 %v12479_v19  ;;  %v12708_v58 = vsub.f32 %v17275_v62, %v12658_v45 }
0x1f81   : > { %12429 = vmatpush.msrb.mxu0 %v20031_v29  ;;  %12548 = vmatpush.msra.mxu3 %v20041_v40  ;;  %v12693_v21 = vand.u32 4294901760, %v12692_v50  ;;  %v12704_v42 = vsub.f32 %v12702_v5, %v12703_v16 }
0x1f82   : > { %12486 = vmatpush.msrb.mxu1 %v12485_v63  ;;  %12653 = vmatpush.msrb.mxu2 %v12652_v9  ;;  %v12709_v54 = vand.u32 4294901760, %v12708_v58 }
0x1f83   : > { %12431 = vmatpush.msrb.mxu0 %v20041_v40  ;;  %12550 = vmatpush.msra.mxu3 %v12432_v47  ;;  %v12705_v28 = vand.u32 4294901760, %v12704_v42 }
0x1f84   : > { %12315 = vmatmul.f32.vlgmr.msra.gmra.mxu0 %v19929_v59  ;;  %12488 = vmatmul.f32.vlgmr.msrb.gmra.mxu1 %v19182_v27  ;;  %v12710_v13 = vsub.f32 %v12708_v58, %v12709_v54 }
0x1f85   : > { %12433 = vmatpush.msrb.mxu0 %v12432_v47  ;;  %12614 = vmatpush.msra.mxu1 %v20025_v0  ;;  %v12699_v0 = vand.u32 4294901760, %v12698_v7 }
0x1f86   : > { %12522 = vmatmul.f32.vlgmr.msra.gmra.mxu2 %v19187_v26  ;;  %12694 = vmatpush.msrb.mxu3 %v12693_v21 }
0x1f87   : > { %12579 = vmatpush.msra.mxu0 %v12465_v4  ;;  %12616 = vmatpush.msra.mxu1 %v20031_v29  ;;  %v12711_v29 = vand.u32 4294901760, %v12710_v13 }
0x1f88   : > { %12554 = vmatmul.f32.vlgmr.msra.gmra.mxu3 %v19196_v30  ;;  %12655 = vmatpush.msrb.mxu2 %v12654_v33 }
0x1f89   : > { %12583 = vmatpush.msra.mxu0 %v12471_v46  ;;  %12618 = vmatpush.msra.mxu1 %v20041_v40 }
0x1f8a   : > { %12657 = vmatpush.msrb.mxu2 %v12656_v57  ;;  %12700 = vmatpush.msrb.mxu3 %v12699_v0 }
0x1f8b   : > { %12587 = vmatpush.msra.mxu0 %v12477_v56  ;;  %12620 = vmatpush.msra.mxu1 %v12432_v47 }
0x1f8c   : > { %12439 = vmatmul.f32.vlgmr.msrb.gmra.mxu0 %v19234_v20  ;;  %12492 = vmatmul.f32.gmra.mxu1 %v19198_v11 }
0x1f8d   : > { %12591 = vmatpush.msra.mxu0 %v12483_v10  ;;  %12770 = vmatpush.msrb.mxu1 %v12652_v9 }
0x1f8e   : > { %12527 = vmatmul.f32.gmra.mxu2 %v19208_v22  ;;  %12706 = vmatpush.msrb.mxu3 %v12705_v28 }
0x1f8f   : > { %12736 = vmatpush.msrb.mxu0 %v12690_v1  ;;  %12772 = vmatpush.msrb.mxu1 %v12654_v33 }
0x1f90   : > { %12560 = vmatmul.f32.gmra.mxu3 %v19230_v24  ;;  %12659 = vmatpush.msrb.mxu2 %v12658_v45 }
0x1f91   : > { %12739 = vmatpush.msrb.mxu0 %v12696_v61  ;;  %12774 = vmatpush.msrb.mxu1 %v12656_v57 }
0x1f92   : > { %12805 = vmatpush.msra.mxu2 %v12691_v39  ;;  %12712 = vmatpush.msrb.mxu3 %v12711_v29 }
0x1f93   : > { %12742 = vmatpush.msrb.mxu0 %v12702_v5  ;;  %12776 = vmatpush.msrb.mxu1 %v12658_v45 }
0x1f94   : > { %12447 = vmatmul.f32.gmra.mxu0 %v19256_v18  ;;  %12622 = vmatmul.f32.vlgmr.msra.gmra.mxu1 %v19182_v27 }
0x1f95   : > { %12745 = vmatpush.msrb.mxu0 %v12708_v58  ;;  %12809 = vmatpush.msra.mxu2 %v12697_v51 }
0x1f96   : > { %12665 = vmatmul.f32.vlgmr.msrb.gmra.mxu2 %v19234_v20  ;;  %12840 = vmatpush.msra.mxu3 %v12652_v9 }
0x1f97   : > { %12813 = vmatpush.msra.mxu2 %v12703_v16 }
0x1f98   : > { %12714 = vmatmul.f32.vlgmr.msrb.gmra.mxu3 %v19182_v27 }
0x1f99   : > { %12817 = vmatpush.msra.mxu2 %v12709_v54  ;;  %12842 = vmatpush.msra.mxu3 %v12654_v33 }
0x1f9b   : > { %12844 = vmatpush.msra.mxu3 %v12656_v57 }
0x1f9c   : > { %12593 = vmatmul.f32.vlgmr.msra.gmra.mxu0 %v19182_v27  ;;  %12626 = vmatmul.f32.gmra.mxu1 %v19198_v11 }
0x1f9d   : > { %12846 = vmatpush.msra.mxu3 %v12658_v45 }
0x1f9e   : > { %12673 = vmatmul.f32.gmra.mxu2 %v19256_v18 }
0x1fa0   : > { %12718 = vmatmul.f32.gmra.mxu3 %v19198_v11 }
0x1fa4   : > { %12597 = vmatmul.f32.gmra.mxu0 %v19198_v11  ;;  %12780 = vmatmul.f32.vlgmr.msrb.gmra.mxu1 %v19196_v30 }
0x1fa6   : > { %12819 = vmatmul.f32.vlgmr.msra.gmra.mxu2 %v19182_v27 }
0x1fa8   : > { %12848 = vmatmul.f32.vlgmr.msra.gmra.mxu3 %v19182_v27 }
0x1fac   : > { %12748 = vmatmul.f32.vlgmr.msrb.gmra.mxu0 %v19187_v26  ;;  %12786 = vmatmul.f32.gmra.mxu1 %v19230_v24 }
0x1fae   : > { %12823 = vmatmul.f32.gmra.mxu2 %v19198_v11 }
0x1fb0   : > { %12852 = vmatmul.f32.gmra.mxu3 %v19198_v11 }
0x1fb4   : > { %12753 = vmatmul.f32.gmra.mxu0 %v19208_v22 }
0x1fe9   : > { %v20104_v8 = vpop.f32.mrf.mxu1 }
0x1ff1   : > { %v20108_v12 = vpop.f32.mrf.mxu0  ;;  %v20110_v4 = vpop.f32.mrf.mxu1 }
0x1ff2   : > { %v20112_v6 = vpop.f32.mrf.mxu2 }
0x1ff3   : > { %v20115_v43 = vpop.f32.mrf.mxu3 }
0x1ff9   : > { %v20117_v36 = vpop.f32.mrf.mxu0  ;;  %v12343_v52 = vpop.f32.mrf.mxu1 }
0x1ffa   : > { %v12245_v40 = vpop.f32.mrf.mxu2 }
0x1ffb   : > { %v12286_v60 = vpop.f32.mrf.mxu3  ;;  %v12246_v49 = vadd.f32 %v17498_v41, %v12245_v40 }
0x1ffd   : > { %v12287_v23 = vadd.f32 %v12286_v60, %v12246_v49 }
0x2001   : > { %v12316_v46 = vpop.f32.mrf.mxu0  ;;  %v12489_v47 = vpop.f32.mrf.mxu1 }
0x2002   : > { %v12376_v17 = vpop.f32.mrf.mxu2  ;;  %v12317_v14 = vadd.f32 %v12316_v46, %v12287_v23 }
0x2003   : > { %v12401_v56 = vpop.f32.mrf.mxu3 }
0x2004   : > { %v12344_v37 = vadd.f32 %v12343_v52, %v12317_v14 }
0x2006   : > { %v12377_v32 = vadd.f32 %v12376_v17, %v12344_v37 }
0x2008   : > { %v12402_v33 = vadd.f32 %v12401_v56, %v12377_v32 }
0x2009   : > { %v12440_v35 = vpop.f32.mrf.mxu0  ;;  %v12493_v10 = vpop.f32.mrf.mxu1 }
0x200a   : > { %v12441_v38 = vadd.f32 %v17499_v25, %v12440_v35  ;;  %v12523_v53 = vpop.f32.mrf.mxu2  ;;  %v12857_v51 = vsel %vm2446_vm3, %v12402_v33, 0 }
0x200b   : > { %v12555_v9 = vpop.f32.mrf.mxu3  ;;  %v12883_v7 = vand.u32 4294901760, %v12857_v51 }
0x200c   : > { %v12490_v19 = vadd.f32 %v12489_v47, %v12441_v38 }
0x200d   : > { %v12884_v54 = vsub.f32 %v12857_v51, %v12883_v7 }
0x200e   : > { %v12524_v34 = vadd.f32 %v12523_v53, %v12490_v19 }
0x200f   : > { %v12885_v52 = vand.u32 4294901760, %v12884_v54 }
0x2010   : > { %v12556_v39 = vadd.f32 %v12555_v9, %v12524_v34 }
0x2011   : > { %v12448_v63 = vpop.f32.mrf.mxu0  ;;  %v12623_v44 = vpop.f32.mrf.mxu1  ;;  %v12886_v47 = vsub.f32 %v12884_v54, %v12885_v52 }
0x2012   : > { %v12449_v1 = vadd.f32 %v17499_v25, %v12448_v63  ;;  %v12528_v61 = vpop.f32.mrf.mxu2 }
0x2013   : > { %v12561_v21 = vpop.f32.mrf.mxu3  ;;  %v12887_v23 = vand.u32 4294901760, %v12886_v47 }
0x2014   : > { %v12494_v57 = vadd.f32 %v12493_v10, %v12449_v1  ;;  %v17500_v10 = vld [vmem:[%s20828_s6 + $0x1] ss:$0 sm:$0xff] }
0x2016   : > { %v12529_v45 = vadd.f32 %v12528_v61, %v12494_v57 }
0x2018   : > { %v12562_v16 = vadd.f32 %v12561_v21, %v12529_v45 }
0x2019   : > { %v12594_v62 = vpop.f32.mrf.mxu0  ;;  %v12627_v42 = vpop.f32.mrf.mxu1 }
0x201a   : > { %v12595_v50 = vadd.f32 %v12594_v62, %v12556_v39  ;;  %v12666_v38 = vpop.f32.mrf.mxu2 }
0x201b   : > { %v12667_v37 = vadd.f32 %v17500_v10, %v12666_v38  ;;  %v12715_v19 = vpop.f32.mrf.mxu3 }
0x201c   : > { %v12624_v5 = vadd.f32 %v12623_v44, %v12595_v50 }
0x201d   : > { %v12716_v32 = vadd.f32 %v12715_v19, %v12667_v37 }
0x201e   : > { %v12860_v58 = vsel %vm2446_vm3, %v12624_v5, 0 }
0x201f   : > { %v12881_v13 = vand.u32 4294901760, %v12860_v58 }
0x2021   : > { %v12598_v0 = vpop.f32.mrf.mxu0  ;;  %v12913_v60 = vsub.f32 %v12860_v58, %v12881_v13  ;;  %v12781_v9 = vpop.f32.mrf.mxu1 }
0x2022   : > { %v12599_v28 = vadd.f32 %v12598_v0, %v12562_v16  ;;  %v12674_v63 = vpop.f32.mrf.mxu2 }
0x2023   : > { %v12914_v17 = vand.u32 4294901760, %v12913_v60  ;;  %v12675_v34 = vadd.f32 %v17500_v10, %v12674_v63  ;;  %v12719_v33 = vpop.f32.mrf.mxu3 }
0x2024   : > { %v12628_v29 = vadd.f32 %v12627_v42, %v12599_v28 }
0x2025   : > { %v12915_v14 = vsub.f32 %v12913_v60, %v12914_v17  ;;  %v12720_v39 = vadd.f32 %v12719_v33, %v12675_v34 }
0x2026   : > { %v12863_v40 = vsel %vm2446_vm3, %v12628_v29, 0 }
0x2027   : > { %v12879_v41 = vand.u32 4294901760, %v12863_v40  ;;  %v12916_v56 = vand.u32 4294901760, %v12915_v14 }
0x2029   : > { %v12907_v46 = vsub.f32 %v12863_v40, %v12879_v41  ;;  %12880 = vmatpush.xpose.msra.mxu0 %v12879_v41  ;;  %12964 = vmatpush.xpose.msrb.mxu3 %v12879_v41  ;;  %v12749_v53 = vpop.f32.mrf.mxu0  ;;  %v12787_v51 = vpop.f32.mrf.mxu1 }
0x202a   : > { %v12750_v1 = vadd.f32 %v12749_v53, %v12716_v32  ;;  %v12820_v44 = vpop.f32.mrf.mxu2 }
0x202b   : > { %12939 = vmatpush.xpose.msrb.mxu2 %v12907_v46  ;;  %v12908_v49 = vand.u32 4294901760, %v12907_v46  ;;  %v12849_v45 = vpop.f32.mrf.mxu3 }
0x202c   : > { %v12782_v57 = vadd.f32 %v12781_v9, %v12750_v1 }
0x202d   : > { %12882 = vmatpush.xpose.msra.mxu0 %v12881_v13  ;;  %12966 = vmatpush.xpose.msrb.mxu3 %v12881_v13  ;;  %v12909_v25 = vsub.f32 %v12907_v46, %v12908_v49 }
0x202e   : > { %v12821_v62 = vadd.f32 %v12820_v44, %v12782_v57 }
0x202f   : > { %12942 = vmatpush.xpose.msrb.mxu2 %v12913_v60  ;;  %v12910_v35 = vand.u32 4294901760, %v12909_v25 }
0x2030   : > { %12888 = vmatmul.f32.vlgmr.msra.gmra.mxu0 %v12887_v23  ;;  %12970 = vmatmul.f32.vlgmr.msrb.gmra.mxu3 %v12885_v52  ;;  %v12850_v5 = vadd.f32 %v12849_v45, %v12821_v62 }
0x2031   : > { %12991 = vmatpush.xpose.msrb.mxu0 %v12908_v49  ;;  %12911 = vmatpush.xpose.msra.mxu1 %v12910_v35  ;;  %v12754_v61 = vpop.f32.mrf.mxu0 }
0x2032   : > { %12945 = vmatmul.f32.vlgmr.msrb.gmra.mxu2 %v12884_v54  ;;  %v12755_v50 = vadd.f32 %v12754_v61, %v12720_v39  ;;  %v13056_v16 = vand.u32 4294901760, %v12850_v5 }
0x2033   : > { %v12853_v42 = vpop.f32.mrf.mxu3 }
0x2034   : > { %v12788_v21 = vadd.f32 %v12787_v51, %v12755_v50  ;;  %v13088_v0 = vsub.f32 %v12850_v5, %v13056_v16 }
0x2035   : > { %12995 = vmatpush.xpose.msrb.mxu0 %v12914_v17  ;;  %12917 = vmatpush.xpose.msra.mxu1 %v12916_v56 }
0x2038   : > { %12919 = vmatmul.f32.vlgmr.msra.gmra.mxu1 %v12883_v7  ;;  %12997 = vmatmul.f32.vlgmr.msrb.gmra.mxu0 %v12883_v7 }
0x2039   : > { %13016 = vmatpush.xpose.msrb.mxu1 %v12879_v41 }
0x203d   : > { %13018 = vmatpush.xpose.msrb.mxu1 %v12881_v13  ;;  %v13089_v13 = vand.u32 4294901760, %v13088_v0 }
0x203f   : > { %v13090_v40 = vsub.f32 %v13088_v0, %v13089_v13 }
0x2040   : > { %13020 = vmatmul.f32.vlgmr.msrb.gmra.mxu1 %v12883_v7  ;;  %v12824_v7 = vpop.f32.mrf.mxu2 }
0x2041   : > { %v12825_v58 = vadd.f32 %v12824_v7, %v12788_v21  ;;  %v13091_v46 = vand.u32 4294901760, %v13090_v40  ;;  %v17280_v21 = vld [vmem:[%s20831_s11 + $0x8] sm:$0xff]  ;;  %s20836_s11 = sld [smem:[#allocation34_spill]] }
0x2042   : > { %v13219_v7 = vand.u32 4294901760, %v17280_v21 }
0x2043   : > { %v12854_v54 = vadd.f32 %v12853_v42, %v12825_v58 }
0x2045   : > { %v13054_v28 = vand.u32 4294901760, %v12854_v54 }
0x2047   : > { %v13082_v29 = vsub.f32 %v12854_v54, %v13054_v28  ;;  %13055 = vmatpush.msra.mxu2 %v13054_v28  ;;  %13139 = vmatpush.msra.mxu1 %v13054_v28  ;;  %v12208_v54 = vld [vmem:[%s20832_s8] sm:$0xff] }
0x2049   : > { %v13083_v52 = vand.u32 4294901760, %v13082_v29  ;;  %13114 = vmatpush.msra.mxu0 %v13082_v29  ;;  %13057 = vmatpush.msra.mxu2 %v13056_v16 }
0x204a   : > { %13141 = vmatpush.msra.mxu1 %v13056_v16 }
0x204b   : > { %v13084_v41 = vsub.f32 %v13082_v29, %v13083_v52  ;;  %13117 = vmatpush.msra.mxu0 %v13088_v0  ;;  %13166 = vmatpush.msrb.mxu2 %v13083_v52 }
0x204d   : > { %v13085_v60 = vand.u32 4294901760, %v13084_v41  ;;  %13170 = vmatpush.msrb.mxu2 %v13089_v13  ;;  %13220 = vmatpush.msrb.mxu0 %v13219_v7  ;;  %v13368_v13 = vand.u32 4294901760, %v12208_v54 }
0x204f   : > { %13086 = vmatpush.msra.mxu3 %v13085_v60  ;;  %v20134_v29 = vsub.f32 %v12208_v54, %v13368_v13 }
0x2051   : > { %13092 = vmatpush.msra.mxu3 %v13091_v46  ;;  %v13396_v40 = vand.u32 4294901760, %v20134_v29 }
0x2053   : > { %13191 = vmatpush.msrb.mxu3 %v13054_v28  ;;  %v12105_v28 = vadd.f32 %v20104_v8, %v20108_v12  ;;  %v13397_v41 = vsub.f32 %v20134_v29, %v13396_v40 }
0x2055   : > { %13193 = vmatpush.msrb.mxu3 %v13056_v16  ;;  %v13246_v16 = vsub.f32 %v17280_v21, %v13219_v7  ;;  %v12131_v52 = vadd.f32 %v20112_v6, %v12105_v28  ;;  %v13398_v46 = vand.u32 4294901760, %v13397_v41  ;;  %v17289_v21 = vld [vmem:[%s20819_s2 + $0x58] sm:$0xff]  ;;  %v17288_v41 = vld [vmem:[%s20819_s2 + $0x50] sm:$0xff] }
0x2056   : > { %v20185_v54 = vand.u32 4294901760, %v17289_v21 }
0x2057   : > { %v13247_v58 = vand.u32 4294901760, %v13246_v16  ;;  %v12156_v60 = vadd.f32 %v20115_v43, %v12131_v52  ;;  %v17282_v43 = vld [vmem:[%s20817_s1 + $0x48] sm:$0xff] }
0x2059   : > { %v13248_v0 = vsub.f32 %v13246_v16, %v13247_v58 }
0x205b   : > { %v13249_v42 = vand.u32 4294901760, %v13248_v0 }
0x205d   : > { %13250 = vmatpush.msrb.mxu1 %v13249_v42 }
0x20ad   : > { %v12889_v47 = vpop.f32.mrf.mxu0 }
0x20b3   : > { %v12971_v35 = vpop.f32.mrf.mxu3 }
0x20b5   : > { %v12920_v49 = vpop.f32.mrf.mxu1  ;;  %v12946_v25 = vpop.f32.mrf.mxu2 }
0x20b6   : > { %v12921_v17 = vadd.f32 %v12920_v49, %v12889_v47  ;;  %v12998_v56 = vpop.f32.mrf.mxu0  ;;  %v12183_v47 = vadd.f32 %v20117_v36, %v12156_v60 }
0x20b8   : > { %v12947_v23 = vadd.f32 %v12946_v25, %v12921_v17  ;;  %v12206_v49 = vadd.f32 %v20110_v4, %v12183_v47  ;;  %v17287_v47 = vld [vmem:[%s20819_s2 + $0x48] sm:$0xff] }
0x20ba   : > { %v12972_v14 = vadd.f32 %v12971_v35, %v12947_v23  ;;  %v17284_v23 = vld [vmem:[%s20817_s1 + $0x58] sm:$0xff]  ;;  %v17283_v35 = vld [vmem:[%s20817_s1 + $0x50] sm:$0xff] }
0x20bc   : > { %v12999_v38 = vadd.f32 %v12998_v56, %v12972_v14  ;;  %v13351_v14 = vsel %vm2446_vm3, %v12206_v49, 0  ;;  %v20145_v56 = vand.u32 4294901760, %v17284_v23  ;;  %v20197_v49 = vsub.f32 %v17289_v21, %v20185_v54 }
0x20bd   : > { %v13021_v10 = vpop.f32.mrf.mxu1  ;;  %v20150_v36 = vand.u32 4294901760, %v13351_v14 }
0x20be   : > { %v13022_v37 = vadd.f32 %v13021_v10, %v12999_v38  ;;  %v20154_v4 = vsub.f32 %v17284_v23, %v20145_v56 }
0x20c0   : > { %v13024_v53 = vmul.f32 0.35355338, %v13022_v37  ;;  %v20148_v37 = vand.u32 4294901760, %v17283_v35 }
0x20c2   : > { %v13025_v19 = vsel %vm12031_vm8, -1e+30, %v13024_v53 }
0x20c3   : > { %v13026_v63 = vsel %vm12033_vm9, %v13025_v19, -inf }
0x20c4   : > { %13027 = vmax.xlane.f32.xlu0 %v13026_v63 }
0x2137   : > { %v13028_v32 = vpop.xlane.xlu0 %13027 }
0x2138   : > { %v13029_v9 = vsub.f32 %v13025_v19, %v13028_v32  ;;  %v17281_v19 = vld [vmem:[%s20817_s1 + $0x40] sm:$0xff]  ;;  %v20156_v32 = vand.u32 4294901760, %v17282_v43 }
0x213a   : > { %v13030_v34 = vmul.f32 1.442695, %v13029_v9 }
0x213c   : > { %17560 = vpow2.f32 %v13030_v34 }
0x2142   : > { %v17561_v1 = vpop.eup %17560 }
0x2143   : > { %v13032_v33 = vsel %vm12033_vm9, %v17561_v1, 0.0 }
0x2144   : > { %13033 = vadd.xlane.f32.xlu1 %v13032_v33  ;;  %v20161_v33 = vand.u32 4294901760, %v17281_v19 }
0x21b7   : > { %v13034_v44 = vpop.xlane.xlu1 %13033 }
0x21b8   : > { %17562 = vrcp.f32 %v13034_v44  ;;  %v20164_v44 = vsub.f32 %v13351_v14, %v20150_v36  ;;  %v13755_v14 = vand.u32 4294901760, %v20197_v49 }
0x21be   : > { %v17563_v39 = vpop.eup %17562 }
0x21bf   : > { %v13036_v57 = vmul.f32 %v17563_v39, %v17561_v1  ;;  %v20159_v1 = vsub.f32 %v17283_v35, %v20148_v37 }
0x21c1   : > { %v13038_v61 = vsel %vm12045_vm10, %v13036_v57, 0  ;;  %v13552_v57 = vand.u32 4294901760, %v20154_v4 }
0x21c2   : > { %v13058_v62 = vand.u32 4294901760, %v13038_v61 }
0x21c4   : > { %v13059_v50 = vsub.f32 %v13038_v61, %v13058_v62  ;;  %13094 = vmatmul.f32.vlgmr.msra.gmra.mxu3 %v13058_v62  ;;  %v20169_v61 = vsub.f32 %v17282_v43, %v20156_v32 }
0x21c5   : > { %13296 = vmatpush.msra.mxu3 %v13219_v7 }
0x21c6   : > { %13120 = vmatmul.f32.vlgmr.msra.gmra.mxu0 %v13059_v50  ;;  %v13060_v51 = vand.u32 4294901760, %v13059_v50 }
0x21c7   : > { %13322 = vmatpush.msra.mxu0 %v13247_v58 }
0x21c8   : > { %13145 = vmatmul.f32.vlgmr.msra.gmra.mxu1 %v13060_v51  ;;  %v13061_v45 = vsub.f32 %v13059_v50, %v13060_v51  ;;  %v13558_v50 = vand.u32 4294901760, %v20159_v1  ;;  %v20173_v51 = vsub.f32 %v17281_v19, %v20161_v33 }
0x21c9   : > { %13344 = vmatpush.msra.mxu1 %v13219_v7  ;;  %v13553_v7 = vsub.f32 %v20154_v4, %v13552_v57 }
0x21ca   : > { %v13062_v5 = vand.u32 4294901760, %v13061_v45  ;;  %v13372_v45 = vand.u32 4294901760, %v20164_v44  ;;  %v13559_v0 = vsub.f32 %v20159_v1, %v13558_v50  ;;  %v13570_v42 = vand.u32 4294901760, %v20173_v51 }
0x21cb   : > { %v13554_v60 = vand.u32 4294901760, %v13553_v7 }
0x21cc   : > { %13063 = vmatmul.f32.vlgmr.msra.gmra.mxu2 %v13062_v5  ;;  %13195 = vmatmul.f32.vlgmr.msrb.gmra.mxu3 %v13058_v62  ;;  %v13373_v28 = vsub.f32 %v20164_v44, %v13372_v45 }
0x21cd   : > { %13273 = vmatpush.msra.mxu2 %v13246_v16  ;;  %13399 = vmatpush.msrb.mxu3 %v13398_v46  ;;  %v13564_v16 = vand.u32 4294901760, %v20169_v61 }
0x21d4   : > { %13172 = vmatmul.f32.vlgmr.msrb.gmra.mxu2 %v13058_v62 }
0x21d5   : > { %13369 = vmatpush.msrb.mxu2 %v13368_v13 }
0x2243   : > { %v13121_v25 = vpop.f32.mrf.mxu0 }
0x2245   : > { %v13146_v38 = vpop.f32.mrf.mxu1 }
0x2247   : > { %v13095_v8 = vpop.f32.mrf.mxu3 }
0x224f   : > { %v13064_v12 = vpop.f32.mrf.mxu2  ;;  %v13196_v9 = vpop.f32.mrf.mxu3 }
0x2250   : > { %v13096_v17 = vadd.f32 %v13095_v8, %v13064_v12  ;;  %v13560_v8 = vand.u32 4294901760, %v13559_v0  ;;  %v13571_v12 = vsub.f32 %v20173_v51, %v13570_v42 }
0x2252   : > { %v13122_v6 = vadd.f32 %v13121_v25, %v13096_v17  ;;  %v20199_v17 = vand.u32 4294901760, %v17288_v41  ;;  %v13374_v25 = vand.u32 4294901760, %v13373_v28  ;;  %v13572_v35 = vand.u32 4294901760, %v13571_v12 }
0x2254   : > { %v13147_v10 = vadd.f32 %v13146_v38, %v13122_v6  ;;  %v20203_v6 = vand.u32 4294901760, %v17287_v47  ;;  %v20208_v38 = vsub.f32 %v17288_v41, %v20199_v17 }
0x2257   : > { %v13173_v53 = vpop.f32.mrf.mxu2 }
0x2258   : > { %v13174_v63 = vadd.f32 %v13173_v53, %v13147_v10  ;;  %v13756_v10 = vsub.f32 %v20197_v49, %v13755_v14  ;;  %v13761_v53 = vand.u32 4294901760, %v20208_v38 }
0x225a   : > { %v13197_v34 = vadd.f32 %v13196_v9, %v13174_v63  ;;  %v13757_v9 = vand.u32 4294901760, %v13756_v10 }
0x225c   : > { %v13202_v39 = vsel %vm2446_vm3, %v13197_v34, 0  ;;  %v13762_v34 = vsub.f32 %v20208_v38, %v13761_v53 }
0x225d   : > { %v13221_v62 = vand.u32 4294901760, %v13202_v39 }
0x225f   : > { %v13222_v5 = vsub.f32 %v13202_v39, %v13221_v62  ;;  %13252 = vmatmul.f32.vlgmr.msrb.gmra.mxu1 %v13221_v62 }
0x2260   : > { %13445 = vmatpush.msrb.mxu1 %v13368_v13 }
0x2261   : > { %v13223_v58 = vand.u32 4294901760, %v13222_v5  ;;  %13276 = vmatmul.f32.vlgmr.msra.gmra.mxu2 %v13222_v5 }
0x2262   : > { %13471 = vmatpush.msra.mxu2 %v13396_v40  ;;  %v13565_v40 = vsub.f32 %v20169_v61, %v13564_v16 }
0x2263   : > { %v13224_v52 = vsub.f32 %v13222_v5, %v13223_v58  ;;  %13300 = vmatmul.f32.vlgmr.msra.gmra.mxu3 %v13223_v58  ;;  %v17291_v5 = vld [vmem:[%s20822_s3 + $0x40] sm:$0xff] }
0x2264   : > { %13493 = vmatpush.msra.mxu3 %v13368_v13  ;;  %v17286_v13 = vld [vmem:[%s20819_s2 + $0x40] sm:$0xff]  ;;  %v13566_v23 = vand.u32 4294901760, %v13565_v40 }
0x2265   : > { %v13225_v46 = vand.u32 4294901760, %v13224_v52  ;;  %v20210_v43 = vand.u32 4294901760, %v17286_v13 }
0x2267   : > { %13226 = vmatmul.f32.vlgmr.msrb.gmra.mxu0 %v13225_v46  ;;  %13346 = vmatmul.f32.vlgmr.msra.gmra.mxu1 %v13221_v62  ;;  %v20222_v19 = vsub.f32 %v17286_v13, %v20210_v43 }
0x2268   : > { %13555 = vmatpush.msra.mxu1 %v13554_v60  ;;  %13422 = vmatpush.msrb.mxu0 %v20134_v29  ;;  %v20215_v29 = vsub.f32 %v17287_v47, %v20203_v6 }
0x2269   : > { %13375 = vmatmul.f32.vlgmr.msrb.gmra.mxu2 %v13374_v25  ;;  %v13773_v39 = vand.u32 4294901760, %v20222_v19 }
0x226a   : > { %13561 = vmatpush.msra.mxu1 %v13560_v8  ;;  %13593 = vmatpush.msrb.mxu2 %v20154_v4  ;;  %v13767_v63 = vand.u32 4294901760, %v20215_v29  ;;  %v17294_v4 = vld [vmem:[%s20822_s3 + $0x58] sm:$0xff] }
0x226b   : > { %13401 = vmatmul.f32.vlgmr.msrb.gmra.mxu3 %v20150_v36 }
0x226c   : > { %13567 = vmatpush.msra.mxu1 %v13566_v23  ;;  %13596 = vmatpush.msrb.mxu2 %v20159_v1  ;;  %v17293_v1 = vld [vmem:[%s20822_s3 + $0x50] sm:$0xff] }
0x226d   : > { %13622 = vmatpush.msrb.mxu3 %v20145_v56 }
0x226e   : > { %13573 = vmatpush.msra.mxu1 %v13572_v35  ;;  %13599 = vmatpush.msrb.mxu2 %v20169_v61 }
0x226f   : > { %13324 = vmatmul.f32.vlgmr.msra.gmra.mxu0 %v13221_v62  ;;  %13449 = vmatmul.f32.vlgmr.msrb.gmra.mxu1 %v13372_v45  ;;  %v13768_v62 = vsub.f32 %v20215_v29, %v13767_v63  ;;  %v13774_v45 = vsub.f32 %v20222_v19, %v13773_v39 }
0x2270   : > { %13624 = vmatpush.msrb.mxu3 %v20148_v37  ;;  %13522 = vmatpush.msra.mxu0 %v20145_v56 }
0x2271   : > { %13473 = vmatmul.f32.vlgmr.msra.gmra.mxu2 %v20150_v36  ;;  %13682 = vmatpush.msrb.mxu1 %v20145_v56  ;;  %v13763_v56 = vand.u32 4294901760, %v13762_v34 }
0x2272   : > { %13602 = vmatpush.msrb.mxu2 %v20173_v51  ;;  %13626 = vmatpush.msrb.mxu3 %v20156_v32 }
0x2273   : > { %13495 = vmatmul.f32.vlgmr.msra.gmra.mxu3 %v20150_v36  ;;  %13524 = vmatpush.msra.mxu0 %v20148_v37  ;;  %v13775_v36 = vand.u32 4294901760, %v13774_v45 }
0x2274   : > { %13628 = vmatpush.msrb.mxu3 %v20161_v33  ;;  %13684 = vmatpush.msrb.mxu1 %v20148_v37  ;;  %v13769_v37 = vand.u32 4294901760, %v13768_v62 }
0x2275   : > { %13717 = vmatpush.msra.mxu2 %v20185_v54  ;;  %13526 = vmatpush.msra.mxu0 %v20156_v32 }
0x2276   : > { %13686 = vmatpush.msrb.mxu1 %v20156_v32  ;;  %13758 = vmatpush.msra.mxu3 %v13757_v9  ;;  %v13942_v32 = vand.u32 4294901760, %v17294_v4 }
0x2277   : > { %13425 = vmatmul.f32.vlgmr.msrb.gmra.mxu0 %v20164_v44  ;;  %13575 = vmatmul.f32.vlgmr.msra.gmra.mxu1 %v19926_v3  ;;  %v13944_v44 = vand.u32 4294901760, %v17293_v1 }
0x2278   : > { %13719 = vmatpush.msra.mxu2 %v20199_v17  ;;  %13528 = vmatpush.msra.mxu0 %v20161_v33 }
0x2279   : > { %13605 = vmatmul.f32.vlgmr.msrb.gmra.mxu2 %v19929_v59  ;;  %13688 = vmatpush.msrb.mxu1 %v20161_v33  ;;  %v13980_v33 = vsub.f32 %v17294_v4, %v13942_v32  ;;  %v13986_v51 = vsub.f32 %v17293_v1, %v13944_v44 }
0x227a   : > { %13721 = vmatpush.msra.mxu2 %v20203_v6  ;;  %13764 = vmatpush.msra.mxu3 %v13763_v56  ;;  %v17502_v56 = vld [vmem:[%s20826_s5 + $0x2] ss:$0 sm:$0xff] }
0x227b   : > { %13632 = vmatmul.f32.vlgmr.msrb.gmra.mxu3 %v19935_v55  ;;  %13651 = vmatpush.msrb.mxu0 %v13552_v57  ;;  %v17292_v57 = vld [vmem:[%s20822_s3 + $0x48] sm:$0xff]  ;;  %v13981_v61 = vand.u32 4294901760, %v13980_v33  ;;  %v13987_v7 = vand.u32 4294901760, %v13986_v51 }
0x227c   : > { %13723 = vmatpush.msra.mxu2 %v20210_v43  ;;  %13770 = vmatpush.msra.mxu3 %v13769_v37 }
0x227d   : > { %13655 = vmatpush.msrb.mxu0 %v13558_v50  ;;  %13834 = vmatpush.msra.mxu1 %v20185_v54  ;;  %v13946_v50 = vand.u32 4294901760, %v17292_v57  ;;  %v13982_v21 = vsub.f32 %v13980_v33, %v13981_v61 }
0x227e   : > { %13776 = vmatpush.msra.mxu3 %v13775_v36  ;;  %13869 = vmatpush.msrb.mxu2 %v13755_v14 }
0x227f   : > { %13534 = vmatmul.f32.vlgmr.msra.gmra.mxu0 %v19939_v31  ;;  %13690 = vmatmul.f32.vlgmr.msrb.gmra.mxu1 %v19926_v3  ;;  %v13992_v58 = vsub.f32 %v17292_v57, %v13946_v50  ;;  %v13983_v0 = vand.u32 4294901760, %v13982_v21 }
0x2280   : > { %13659 = vmatpush.msrb.mxu0 %v13564_v16  ;;  %13836 = vmatpush.msra.mxu1 %v20199_v17  ;;  %v13948_v16 = vand.u32 4294901760, %v17291_v5 }
0x2281   : > { %13729 = vmatmul.f32.vlgmr.msra.gmra.mxu2 %v19234_v20  ;;  %13904 = vmatpush.msrb.mxu3 %v20185_v54  ;;  %v13993_v54 = vand.u32 4294901760, %v13992_v58 }
0x2282   : > { %13663 = vmatpush.msrb.mxu0 %v13570_v42  ;;  %13873 = vmatpush.msrb.mxu2 %v13761_v53  ;;  %v13988_v42 = vsub.f32 %v13986_v51, %v13987_v7  ;;  %v13998_v28 = vsub.f32 %v17291_v5, %v13948_v16 }
0x2283   : > { %13778 = vmatmul.f32.vlgmr.msra.gmra.mxu3 %v19182_v27  ;;  %13838 = vmatpush.msra.mxu1 %v20203_v6  ;;  %v13994_v41 = vsub.f32 %v13992_v58, %v13993_v54 }
0x2284   : > { %13800 = vmatpush.msra.mxu0 %v20197_v49  ;;  %13877 = vmatpush.msrb.mxu2 %v13767_v63  ;;  %v13989_v52 = vand.u32 4294901760, %v13988_v42  ;;  %v13999_v60 = vand.u32 4294901760, %v13998_v28 }
0x2285   : > { %13906 = vmatpush.msrb.mxu3 %v20199_v17  ;;  %13840 = vmatpush.msra.mxu1 %v20210_v43  ;;  %v13995_v46 = vand.u32 4294901760, %v13994_v41 }
0x2286   : > { %13803 = vmatpush.msra.mxu0 %v20208_v38  ;;  %13881 = vmatpush.msrb.mxu2 %v13773_v39  ;;  %v14000_v47 = vsub.f32 %v13998_v28, %v13999_v60 }
0x2287   : > { %13665 = vmatmul.f32.vlgmr.msrb.gmra.mxu0 %v19926_v3  ;;  %13908 = vmatpush.msrb.mxu3 %v20203_v6 }
0x2288   : > { %13806 = vmatpush.msra.mxu0 %v20215_v29  ;;  %13844 = vmatmul.f32.vlgmr.msra.gmra.mxu1 %v19196_v30  ;;  %v14001_v8 = vand.u32 4294901760, %v14000_v47  ;;  %v17501_v29 = vld [vmem:[%s20824_s4 + $0x2] ss:$0 sm:$0xff] }
0x2289   : > { %13737 = vmatmul.f32.gmra.mxu2 %v19256_v18  ;;  %13910 = vmatpush.msrb.mxu3 %v20210_v43 }
0x228a   : > { %13809 = vmatpush.msra.mxu0 %v20222_v19  ;;  %14026 = vmatpush.msra.mxu2 %v13980_v33 }
0x228b   : > { %13782 = vmatmul.f32.gmra.mxu3 %v19198_v11  ;;  %13984 = vmatpush.msrb.mxu1 %v13983_v0 }
0x228c   : > { %13943 = vmatpush.msrb.mxu0 %v13942_v32  ;;  %14060 = vmatpush.msra.mxu3 %v13942_v32 }
0x228d   : > { %14029 = vmatpush.msra.mxu2 %v13986_v51  ;;  %13990 = vmatpush.msrb.mxu1 %v13989_v52 }
0x228e   : > { %13945 = vmatpush.msrb.mxu0 %v13944_v44  ;;  %14062 = vmatpush.msra.mxu3 %v13944_v44 }
0x228f   : > { %13812 = vmatmul.f32.vlgmr.msra.gmra.mxu0 %v19187_v26  ;;  %14032 = vmatpush.msra.mxu2 %v13992_v58 }
0x2290   : > { %13850 = vmatmul.f32.gmra.mxu1 %v19230_v24  ;;  %13947 = vmatpush.msrb.mxu0 %v13946_v50 }
0x2291   : > { %13883 = vmatmul.f32.vlgmr.msrb.gmra.mxu2 %v19182_v27  ;;  %14064 = vmatpush.msra.mxu3 %v13946_v50 }
0x2292   : > { %13949 = vmatpush.msrb.mxu0 %v13948_v16  ;;  %14035 = vmatpush.msra.mxu2 %v13998_v28 }
0x2293   : > { %13912 = vmatmul.f32.vlgmr.msrb.gmra.mxu3 %v19182_v27  ;;  %13996 = vmatpush.msrb.mxu1 %v13995_v46 }
0x2294   : > { %14066 = vmatpush.msra.mxu3 %v13948_v16  ;;  %14095 = vmatpush.msra.mxu0 %v13981_v61 }
0x2295   : > { %14002 = vmatpush.msrb.mxu1 %v14001_v8 }
0x2296   : > { %14099 = vmatpush.msra.mxu0 %v13987_v7 }
0x2297   : > { %13817 = vmatmul.f32.gmra.mxu0 %v19208_v22  ;;  %14130 = vmatpush.msra.mxu1 %v13942_v32 }
0x2298   : > { %14103 = vmatpush.msra.mxu0 %v13993_v54  ;;  %14004 = vmatmul.f32.vlgmr.msrb.gmra.mxu1 %v19182_v27 }
0x2299   : > { %13887 = vmatmul.f32.gmra.mxu2 %v19198_v11  ;;  %14132 = vmatpush.msra.mxu1 %v13944_v44 }
0x229a   : > { %14107 = vmatpush.msra.mxu0 %v13999_v60 }
0x229b   : > { %13916 = vmatmul.f32.gmra.mxu3 %v19198_v11  ;;  %14134 = vmatpush.msra.mxu1 %v13946_v50 }
0x229d   : > { %14136 = vmatpush.msra.mxu1 %v13948_v16 }
0x229f   : > { %13955 = vmatmul.f32.vlgmr.msrb.gmra.mxu0 %v19234_v20 }
0x22a0   : > { %14008 = vmatmul.f32.gmra.mxu1 %v19198_v11 }
0x22a1   : > { %14038 = vmatmul.f32.vlgmr.msra.gmra.mxu2 %v19187_v26 }
0x22a3   : > { %14070 = vmatmul.f32.vlgmr.msra.gmra.mxu3 %v19196_v30 }
0x22a7   : > { %13963 = vmatmul.f32.gmra.mxu0 %v19256_v18 }
0x22a8   : > { %14138 = vmatmul.f32.vlgmr.msra.gmra.mxu1 %v19182_v27 }
0x22a9   : > { %14043 = vmatmul.f32.gmra.mxu2 %v19208_v22 }
0x22ab   : > { %14076 = vmatmul.f32.gmra.mxu3 %v19230_v24 }
0x22af   : > { %14109 = vmatmul.f32.vlgmr.msra.gmra.mxu0 %v19182_v27 }
0x22b0   : > { %14142 = vmatmul.f32.gmra.mxu1 %v19198_v11 }
0x22b7   : > { %14113 = vmatmul.f32.gmra.mxu0 %v19198_v11 }
0x22dc   : > { %v20293_v40 = vpop.f32.mrf.mxu1 }
0x22e4   : > { %v20297_v12 = vpop.f32.mrf.mxu0  ;;  %v20299_v49 = vpop.f32.mrf.mxu2 }
0x22e5   : > { %v20305_v25 = vpop.f32.mrf.mxu1 }
0x22e6   : > { %v20303_v17 = vpop.f32.mrf.mxu3 }
0x22ec   : > { %v20309_v13 = vpop.f32.mrf.mxu0  ;;  %v20311_v23 = vpop.f32.mrf.mxu2 }
0x22ed   : > { %v20315_v35 = vpop.f32.mrf.mxu1 }
0x22ee   : > { %v20313_v6 = vpop.f32.mrf.mxu3 }
0x22f4   : > { %v20319_v14 = vpop.f32.mrf.mxu0  ;;  %v20321_v38 = vpop.f32.mrf.mxu2 }
0x22f5   : > { %v13576_v10 = vpop.f32.mrf.mxu1 }
0x22f6   : > { %v20323_v43 = vpop.f32.mrf.mxu3 }
0x22fc   : > { %v13535_v53 = vpop.f32.mrf.mxu0  ;;  %v13606_v19 = vpop.f32.mrf.mxu2 }
0x22fd   : > { %v13536_v63 = vadd.f32 %v17501_v29, %v13535_v53  ;;  %v13691_v37 = vpop.f32.mrf.mxu1 }
0x22fe   : > { %v13633_v9 = vpop.f32.mrf.mxu3 }
0x22ff   : > { %v13577_v34 = vadd.f32 %v13576_v10, %v13536_v63 }
0x2301   : > { %v13607_v45 = vadd.f32 %v13606_v19, %v13577_v34 }
0x2303   : > { %v13634_v32 = vadd.f32 %v13633_v9, %v13607_v45 }
0x2304   : > { %v13666_v39 = vpop.f32.mrf.mxu0  ;;  %v13730_v62 = vpop.f32.mrf.mxu2 }
0x2305   : > { %v13731_v4 = vadd.f32 %v17502_v56, %v13730_v62  ;;  %v13667_v57 = vadd.f32 %v13666_v39, %v13634_v32  ;;  %v13845_v50 = vpop.f32.mrf.mxu1 }
0x2306   : > { %v13779_v36 = vpop.f32.mrf.mxu3 }
0x2307   : > { %v13780_v44 = vadd.f32 %v13779_v36, %v13731_v4  ;;  %v13692_v21 = vadd.f32 %v13691_v37, %v13667_v57 }
0x2309   : > { %v14147_v54 = vsel %vm2446_vm3, %v13692_v21, 0 }
0x230a   : > { %v14173_v46 = vand.u32 4294901760, %v14147_v54 }
0x230c   : > { %v13738_v1 = vpop.f32.mrf.mxu2  ;;  %v13813_v33 = vpop.f32.mrf.mxu0  ;;  %v14174_v10 = vsub.f32 %v14147_v54, %v14173_v46 }
0x230d   : > { %v13814_v51 = vadd.f32 %v13813_v33, %v13780_v44  ;;  %v13739_v5 = vadd.f32 %v17502_v56, %v13738_v1  ;;  %v13851_v60 = vpop.f32.mrf.mxu1 }
0x230e   : > { %v13783_v61 = vpop.f32.mrf.mxu3  ;;  %v14175_v34 = vand.u32 4294901760, %v14174_v10 }
0x230f   : > { %v13846_v7 = vadd.f32 %v13845_v50, %v13814_v51  ;;  %v13784_v0 = vadd.f32 %v13783_v61, %v13739_v5  ;;  %v17503_v50 = vld [vmem:[%s20828_s6 + $0x2] ss:$0 sm:$0xff] }
0x2310   : > { %v14176_v37 = vsub.f32 %v14174_v10, %v14175_v34 }
0x2312   : > { %v14177_v1 = vand.u32 4294901760, %v14176_v37 }
0x2314   : > { %v13818_v16 = vpop.f32.mrf.mxu0  ;;  %v13884_v58 = vpop.f32.mrf.mxu2 }
0x2315   : > { %v13885_v42 = vadd.f32 %v13884_v58, %v13846_v7  ;;  %v13819_v52 = vadd.f32 %v13818_v16, %v13784_v0  ;;  %v14005_v5 = vpop.f32.mrf.mxu1 }
0x2316   : > { %v13913_v28 = vpop.f32.mrf.mxu3 }
0x2317   : > { %v13914_v41 = vadd.f32 %v13913_v28, %v13885_v42  ;;  %v13852_v47 = vadd.f32 %v13851_v60, %v13819_v52 }
0x2319   : > { %v14150_v8 = vsel %vm2446_vm3, %v13914_v41, 0 }
0x231a   : > { %v14171_v19 = vand.u32 4294901760, %v14150_v8 }
0x231c   : > { %v13888_v29 = vpop.f32.mrf.mxu2  ;;  %v14203_v56 = vsub.f32 %v14150_v8, %v14171_v19  ;;  %v13956_v61 = vpop.f32.mrf.mxu0 }
0x231d   : > { %v13889_v53 = vadd.f32 %v13888_v29, %v13852_v47  ;;  %v13957_v51 = vadd.f32 %v17503_v50, %v13956_v61  ;;  %v14009_v54 = vpop.f32.mrf.mxu1 }
0x231e   : > { %v13917_v63 = vpop.f32.mrf.mxu3  ;;  %v14204_v4 = vand.u32 4294901760, %v14203_v56 }
0x231f   : > { %v13918_v9 = vadd.f32 %v13917_v63, %v13889_v53  ;;  %v14006_v7 = vadd.f32 %v14005_v5, %v13957_v51 }
0x2320   : > { %v14205_v44 = vsub.f32 %v14203_v56, %v14204_v4 }
0x2321   : > { %v14153_v39 = vsel %vm2446_vm3, %v13918_v9, 0 }
0x2322   : > { %v14169_v62 = vand.u32 4294901760, %v14153_v39  ;;  %v14206_v57 = vand.u32 4294901760, %v14205_v44 }
0x2324   : > { %v14197_v45 = vsub.f32 %v14153_v39, %v14169_v62  ;;  %14170 = vmatpush.xpose.msrb.mxu2 %v14169_v62  ;;  %14254 = vmatpush.xpose.msrb.mxu1 %v14169_v62  ;;  %v13964_v21 = vpop.f32.mrf.mxu0  ;;  %v14039_v16 = vpop.f32.mrf.mxu2 }
0x2325   : > { %v13965_v0 = vadd.f32 %v17503_v50, %v13964_v21  ;;  %v14040_v42 = vadd.f32 %v14039_v16, %v14006_v7 }
0x2326   : > { %14229 = vmatpush.xpose.msrb.mxu0 %v14197_v45  ;;  %v14198_v36 = vand.u32 4294901760, %v14197_v45  ;;  %v14071_v58 = vpop.f32.mrf.mxu3 }
0x2327   : > { %v14010_v52 = vadd.f32 %v14009_v54, %v13965_v0  ;;  %v14072_v41 = vadd.f32 %v14071_v58, %v14040_v42 }
0x2328   : > { %14172 = vmatpush.xpose.msrb.mxu2 %v14171_v19  ;;  %14256 = vmatpush.xpose.msrb.mxu1 %v14171_v19  ;;  %v14199_v32 = vsub.f32 %v14197_v45, %v14198_v36 }
0x232a   : > { %14232 = vmatpush.xpose.msrb.mxu0 %v14203_v56  ;;  %v14200_v33 = vand.u32 4294901760, %v14199_v32 }
0x232b   : > { %14178 = vmatmul.f32.vlgmr.msrb.gmra.mxu2 %v14177_v1  ;;  %14260 = vmatmul.f32.vlgmr.msrb.gmra.mxu1 %v14175_v34 }
0x232c   : > { %14281 = vmatpush.xpose.msra.mxu2 %v14198_v36  ;;  %14201 = vmatpush.xpose.msrb.mxu3 %v14200_v33  ;;  %v14110_v28 = vpop.f32.mrf.mxu0  ;;  %v14044_v60 = vpop.f32.mrf.mxu2 }
0x232d   : > { %14235 = vmatmul.f32.vlgmr.msrb.gmra.mxu0 %v14174_v10  ;;  %v14111_v47 = vadd.f32 %v14110_v28, %v14072_v41  ;;  %v14045_v8 = vadd.f32 %v14044_v60, %v14010_v52  ;;  %v14139_v10 = vpop.f32.mrf.mxu1 }
0x232e   : > { %v14077_v29 = vpop.f32.mrf.mxu3 }
0x232f   : > { %v14078_v53 = vadd.f32 %v14077_v29, %v14045_v8 }
0x2330   : > { %14285 = vmatpush.xpose.msra.mxu2 %v14204_v4  ;;  %14207 = vmatpush.xpose.msrb.mxu3 %v14206_v57 }
0x2333   : > { %14209 = vmatmul.f32.vlgmr.msrb.gmra.mxu3 %v14173_v46  ;;  %14287 = vmatmul.f32.vlgmr.msra.gmra.mxu2 %v14173_v46 }
0x2334   : > { %14306 = vmatpush.xpose.msra.mxu3 %v14169_v62 }
0x2335   : > { %v14143_v39 = vpop.f32.mrf.mxu1 }
0x2338   : > { %14308 = vmatpush.xpose.msra.mxu3 %v14171_v19  ;;  %v14114_v19 = vpop.f32.mrf.mxu0 }
0x2339   : > { %v14115_v9 = vadd.f32 %v14114_v19, %v14078_v53 }
0x233b   : > { %14310 = vmatmul.f32.vlgmr.msra.gmra.mxu3 %v14173_v46  ;;  %v14140_v46 = vadd.f32 %v14139_v10, %v14111_v47  ;;  %v14144_v62 = vadd.f32 %v14143_v39, %v14115_v9 }
0x233d   : > { %v14346_v63 = vand.u32 4294901760, %v14140_v46  ;;  %v14344_v56 = vand.u32 4294901760, %v14144_v62 }
0x233f   : > { %v14378_v34 = vsub.f32 %v14140_v46, %v14346_v63  ;;  %v14372_v37 = vsub.f32 %v14144_v62, %v14344_v56  ;;  %14345 = vmatpush.msra.mxu0 %v14344_v56  ;;  %14429 = vmatpush.msrb.mxu3 %v14344_v56  ;;  %v17296_v62 = vld [vmem:[%s20832_s8 + $0x10] sm:$0xff] }
0x2341   : > { %v14379_v45 = vand.u32 4294901760, %v14378_v34  ;;  %v14373_v36 = vand.u32 4294901760, %v14372_v37  ;;  %14404 = vmatpush.msrb.mxu2 %v14372_v37  ;;  %14347 = vmatpush.msra.mxu0 %v14346_v63 }
0x2342   : > { %14431 = vmatpush.msrb.mxu3 %v14346_v63 }
0x2343   : > { %v14380_v4 = vsub.f32 %v14378_v34, %v14379_v45  ;;  %v14374_v32 = vsub.f32 %v14372_v37, %v14373_v36  ;;  %14407 = vmatpush.msrb.mxu2 %v14378_v34  ;;  %14456 = vmatpush.msrb.mxu0 %v14373_v36  ;;  %v17300_v36 = vld [vmem:[%s20817_s1 + $0x78] sm:$0xff] }
0x2345   : > { %v14375_v1 = vand.u32 4294901760, %v14374_v32  ;;  %v14381_v33 = vand.u32 4294901760, %v14380_v4  ;;  %14460 = vmatpush.msrb.mxu0 %v14379_v45  ;;  %v20339_v32 = vand.u32 4294901760, %v17300_v36 }
0x2347   : > { %14376 = vmatpush.msra.mxu1 %v14375_v1  ;;  %v17299_v1 = vld [vmem:[%s20817_s1 + $0x70] sm:$0xff] }
0x2349   : > { %14382 = vmatpush.msra.mxu1 %v14381_v33 }
0x234b   : > { %14481 = vmatpush.msrb.mxu1 %v14344_v56  ;;  %v14509_v56 = vand.u32 4294901760, %v17296_v62 }
0x234d   : > { %14483 = vmatpush.msrb.mxu1 %v14346_v63  ;;  %v14536_v45 = vsub.f32 %v17296_v62, %v14509_v56  ;;  %14510 = vmatpush.msra.mxu2 %v14509_v56 }
0x234f   : > { %v14537_v37 = vand.u32 4294901760, %v14536_v45 }
0x2351   : > { %v14538_v4 = vsub.f32 %v14536_v45, %v14537_v37 }
0x2353   : > { %v14539_v33 = vand.u32 4294901760, %v14538_v4 }
0x2355   : > { %14540 = vmatpush.msra.mxu3 %v14539_v33 }
0x23a8   : > { %v14261_v5 = vpop.f32.mrf.mxu1 }
0x23aa   : > { %v14236_v50 = vpop.f32.mrf.mxu0 }
0x23ae   : > { %v14179_v44 = vpop.f32.mrf.mxu2 }
0x23b6   : > { %v14210_v57 = vpop.f32.mrf.mxu3  ;;  %v14288_v7 = vpop.f32.mrf.mxu2 }
0x23b7   : > { %v14211_v61 = vadd.f32 %v14210_v57, %v14179_v44  ;;  %v20344_v44 = vsub.f32 %v17300_v36, %v20339_v32  ;;  %v20346_v57 = vand.u32 4294901760, %v17299_v1  ;;  %v17303_v36 = vld [vmem:[%s20819_s2 + $0x68] sm:$0xff] }
0x23b9   : > { %v14237_v51 = vadd.f32 %v14236_v50, %v14211_v61  ;;  %v17298_v61 = vld [vmem:[%s20817_s1 + $0x68] sm:$0xff]  ;;  %v14694_v50 = vand.u32 4294901760, %v20344_v44 }
0x23bb   : > { %v14262_v21 = vadd.f32 %v14261_v5, %v14237_v51  ;;  %v20351_v51 = vand.u32 4294901760, %v17298_v61  ;;  %v20354_v5 = vsub.f32 %v17299_v1, %v20346_v57 }
0x23bd   : > { %v14289_v16 = vadd.f32 %v14288_v7, %v14262_v21  ;;  %v17297_v21 = vld [vmem:[%s20817_s1 + $0x60] sm:$0xff]  ;;  %v14695_v7 = vsub.f32 %v20344_v44, %v14694_v50  ;;  %s20835_s1 = smov %s20834_s15 }
0x23be   : > { %v14311_v58 = vpop.f32.mrf.mxu3 }
0x23bf   : > { %v14312_v0 = vadd.f32 %v14311_v58, %v14289_v16  ;;  %v14700_v16 = vand.u32 4294901760, %v20354_v5  ;;  %v20360_v58 = vand.u32 4294901760, %v17297_v21 }
0x23c1   : > { %v14314_v42 = vmul.f32 0.35355338, %v14312_v0  ;;  %v20363_v0 = vsub.f32 %v17298_v61, %v20351_v51 }
0x23c3   : > { %v14315_v54 = vsel %vm12031_vm8, -1e+30, %v14314_v42  ;;  %v14696_v42 = vand.u32 4294901760, %v14695_v7 }
0x23c4   : > { %v14316_v28 = vsel %vm12033_vm9, %v14315_v54, -inf }
0x23c5   : > { %14317 = vmax.xlane.f32.xlu2 %v14316_v28  ;;  %v14706_v28 = vand.u32 4294901760, %v20363_v0 }
0x2438   : > { %v14318_v52 = vpop.xlane.xlu2 %14317 }
0x2439   : > { %v14319_v41 = vsub.f32 %v14315_v54, %v14318_v52  ;;  %v14701_v54 = vsub.f32 %v20354_v5, %v14700_v16  ;;  %v20369_v52 = vsub.f32 %v17297_v21, %v20360_v58  ;;  %v17302_v21 = vld [vmem:[%s20819_s2 + $0x60] sm:$0xff] }
0x243b   : > { %v14320_v60 = vmul.f32 1.442695, %v14319_v41  ;;  %v14702_v41 = vand.u32 4294901760, %v14701_v54 }
0x243d   : > { %17564 = vpow2.f32 %v14320_v60  ;;  %v14707_v60 = vsub.f32 %v20363_v0, %v14706_v28 }
0x2443   : > { %v17565_v47 = vpop.eup %17564 }
0x2444   : > { %v14322_v8 = vsel %vm12033_vm9, %v17565_v47, 0.0 }
0x2445   : > { %14323 = vadd.xlane.f32.xlu0 %v14322_v8  ;;  %v14708_v8 = vand.u32 4294901760, %v14707_v60  ;;  %v20391_v60 = vand.u32 4294901760, %v17302_v21 }
0x24b8   : > { %v14324_v29 = vpop.xlane.xlu0 %14323 }
0x24b9   : > { %17566 = vrcp.f32 %v14324_v29 }
0x24bf   : > { %v17567_v10 = vpop.eup %17566 }
0x24c0   : > { %v14326_v46 = vmul.f32 %v17567_v10, %v17565_v47  ;;  %v14712_v47 = vand.u32 4294901760, %v20369_v52 }
0x24c2   : > { %v14328_v53 = vsel %vm12045_vm10, %v14326_v46, 0  ;;  %v14713_v29 = vsub.f32 %v20369_v52, %v14712_v47 }
0x24c3   : > { %v14348_v19 = vand.u32 4294901760, %v14328_v53 }
0x24c4   : > { %v14714_v10 = vand.u32 4294901760, %v14713_v29 }
0x24c5   : > { %v14349_v63 = vsub.f32 %v14328_v53, %v14348_v19  ;;  %14384 = vmatmul.f32.vlgmr.msra.gmra.mxu1 %v14348_v19 }
0x24c6   : > { %14586 = vmatpush.msra.mxu1 %v14509_v56 }
0x24c7   : > { %14410 = vmatmul.f32.vlgmr.msrb.gmra.mxu2 %v14349_v63  ;;  %v14350_v9 = vand.u32 4294901760, %v14349_v63 }
0x24c8   : > { %14612 = vmatpush.msrb.mxu2 %v14537_v37 }
0x24c9   : > { %14435 = vmatmul.f32.vlgmr.msrb.gmra.mxu3 %v14350_v9  ;;  %v14351_v34 = vsub.f32 %v14349_v63, %v14350_v9 }
0x24ca   : > { %14634 = vmatpush.msrb.mxu3 %v14509_v56  ;;  %v17304_v56 = vld [vmem:[%s20819_s2 + $0x70] sm:$0xff] }
0x24cb   : > { %v14352_v39 = vand.u32 4294901760, %v14351_v34  ;;  %v17305_v34 = vld [vmem:[%s20819_s2 + $0x78] sm:$0xff]  ;;  %v20379_v1 = vand.u32 4294901760, %v17304_v56 }
0x24cc   : > { %v20375_v62 = vand.u32 4294901760, %v17305_v34 }
0x24cd   : > { %14353 = vmatmul.f32.vlgmr.msra.gmra.mxu0 %v14352_v39  ;;  %14485 = vmatmul.f32.vlgmr.msrb.gmra.mxu1 %v14348_v19 }
0x24ce   : > { %14563 = vmatpush.msra.mxu0 %v14536_v45  ;;  %14697 = vmatpush.msrb.mxu1 %v14696_v42  ;;  %v20382_v61 = vsub.f32 %v17305_v34, %v20375_v62  ;;  %v20385_v42 = vand.u32 4294901760, %v17303_v36 }
0x24d0   : > { %14703 = vmatpush.msrb.mxu1 %v14702_v41  ;;  %v20389_v41 = vsub.f32 %v17304_v56, %v20379_v1  ;;  %v14897_v29 = vand.u32 4294901760, %v20382_v61 }
0x24d2   : > { %14709 = vmatpush.msrb.mxu1 %v14708_v8 }
0x24d4   : > { %14715 = vmatpush.msrb.mxu1 %v14714_v10  ;;  %v20395_v10 = vsub.f32 %v17303_v36, %v20385_v42 }
0x24d5   : > { %14462 = vmatmul.f32.vlgmr.msrb.gmra.mxu0 %v14348_v19 }
0x24d6   : > { %14664 = vmatpush.msrb.mxu0 %v20339_v32  ;;  %v14909_v34 = vand.u32 4294901760, %v20395_v10 }
0x24d8   : > { %14666 = vmatpush.msrb.mxu0 %v20346_v57 }
0x24da   : > { %14668 = vmatpush.msrb.mxu0 %v20351_v51 }
0x24dc   : > { %14670 = vmatpush.msrb.mxu0 %v20360_v58 }
0x2542   : > { %v14385_v46 = vpop.f32.mrf.mxu1 }
0x254a   : > { %v14354_v53 = vpop.f32.mrf.mxu0  ;;  %v14411_v63 = vpop.f32.mrf.mxu2 }
0x254b   : > { %v14386_v19 = vadd.f32 %v14385_v46, %v14354_v53  ;;  %v14486_v33 = vpop.f32.mrf.mxu1  ;;  %v14903_v53 = vand.u32 4294901760, %v20389_v41 }
0x254c   : > { %v14436_v39 = vpop.f32.mrf.mxu3 }
0x254d   : > { %v14412_v9 = vadd.f32 %v14411_v63, %v14386_v19  ;;  %v20400_v19 = vsub.f32 %v17302_v21, %v20391_v60  ;;  %v14904_v56 = vsub.f32 %v20389_v41, %v14903_v53 }
0x254f   : > { %v14437_v45 = vadd.f32 %v14436_v39, %v14412_v9  ;;  %v14898_v9 = vsub.f32 %v20382_v61, %v14897_v29 }
0x2551   : > { %v14899_v36 = vand.u32 4294901760, %v14898_v9 }
0x2552   : > { %v14463_v37 = vpop.f32.mrf.mxu0 }
0x2553   : > { %v14464_v4 = vadd.f32 %v14463_v37, %v14437_v45  ;;  %v14915_v45 = vand.u32 4294901760, %v20400_v19 }
0x2555   : > { %v14487_v7 = vadd.f32 %v14486_v33, %v14464_v4  ;;  %v14916_v4 = vsub.f32 %v20400_v19, %v14915_v45 }
0x2557   : > { %v14492_v54 = vsel %vm2446_vm3, %v14487_v7, 0 }
0x2558   : > { %v14511_v8 = vand.u32 4294901760, %v14492_v54 }
0x255a   : > { %v14512_v46 = vsub.f32 %v14492_v54, %v14511_v8  ;;  %14542 = vmatmul.f32.vlgmr.msra.gmra.mxu3 %v14511_v8 }
0x255b   : > { %14764 = vmatpush.msra.mxu3 %v20339_v32 }
0x255c   : > { %v14513_v63 = vand.u32 4294901760, %v14512_v46  ;;  %14566 = vmatmul.f32.vlgmr.msra.gmra.mxu0 %v14512_v46 }
0x255d   : > { %14766 = vmatpush.msra.mxu3 %v20346_v57  ;;  %14793 = vmatpush.msra.mxu0 %v14694_v50  ;;  %v14910_v50 = vsub.f32 %v20395_v10, %v14909_v34 }
0x255e   : > { %v14514_v39 = vsub.f32 %v14512_v46, %v14513_v63  ;;  %14590 = vmatmul.f32.vlgmr.msra.gmra.mxu1 %v14513_v63 }
0x255f   : > { %14768 = vmatpush.msra.mxu3 %v20351_v51  ;;  %14797 = vmatpush.msra.mxu0 %v14700_v16  ;;  %v14905_v16 = vand.u32 4294901760, %v14904_v56 }
0x2560   : > { %v14515_v37 = vand.u32 4294901760, %v14514_v39  ;;  %14824 = vmatpush.msra.mxu1 %v20339_v32  ;;  %v14911_v32 = vand.u32 4294901760, %v14910_v50 }
0x2561   : > { %14770 = vmatpush.msra.mxu3 %v20360_v58  ;;  %14801 = vmatpush.msra.mxu0 %v14706_v28  ;;  %v17307_v28 = vld [vmem:[%s20822_s3 + $0x60] sm:$0xff] }
0x2562   : > { %14516 = vmatmul.f32.vlgmr.msra.gmra.mxu2 %v14515_v37  ;;  %14636 = vmatmul.f32.vlgmr.msrb.gmra.mxu3 %v14511_v8 }
0x2563   : > { %14826 = vmatpush.msra.mxu1 %v20346_v57  ;;  %14735 = vmatpush.msra.mxu2 %v20344_v44  ;;  %v14917_v57 = vand.u32 4294901760, %v14916_v4 }
0x2564   : > { %14676 = vmatmul.f32.vlgmr.msrb.gmra.mxu0 %v19939_v31  ;;  %14900 = vmatpush.msrb.mxu3 %v14899_v36 }
0x2565   : > { %14805 = vmatpush.msra.mxu0 %v14712_v47  ;;  %14828 = vmatpush.msra.mxu1 %v20351_v51  ;;  %v17308_v51 = vld [vmem:[%s20822_s3 + $0x68] sm:$0xff] }
0x2566   : > { %14717 = vmatmul.f32.vlgmr.msrb.gmra.mxu1 %v19926_v3  ;;  %14738 = vmatpush.msra.mxu2 %v20354_v5 }
0x2567   : > { %14830 = vmatpush.msra.mxu1 %v20360_v58  ;;  %14906 = vmatpush.msrb.mxu3 %v14905_v16  ;;  %v15088_v58 = vand.u32 4294901760, %v17308_v51  ;;  %v17504_v16 = vld [vmem:[%s20824_s4 + $0x3] ss:$0 sm:$0xff] }
0x2568   : > { %14741 = vmatpush.msra.mxu2 %v20363_v0  ;;  %14942 = vmatpush.msrb.mxu0 %v20382_v61 }
0x2569   : > { %14912 = vmatpush.msrb.mxu3 %v14911_v32  ;;  %14976 = vmatpush.msrb.mxu1 %v20375_v62 }
0x256a   : > { %14614 = vmatmul.f32.vlgmr.msrb.gmra.mxu2 %v14511_v8  ;;  %14774 = vmatmul.f32.vlgmr.msra.gmra.mxu3 %v19935_v55  ;;  %v17309_v55 = vld [vmem:[%s20822_s3 + $0x70] sm:$0xff] }
0x256b   : > { %14744 = vmatpush.msra.mxu2 %v20369_v52  ;;  %14918 = vmatpush.msrb.mxu3 %v14917_v57  ;;  %v15086_v44 = vand.u32 4294901760, %v17309_v55 }
0x256c   : > { %14807 = vmatmul.f32.vlgmr.msra.gmra.mxu0 %v19926_v3  ;;  %14978 = vmatpush.msrb.mxu1 %v20379_v1 }
0x256d   : > { %14859 = vmatpush.msrb.mxu2 %v20375_v62  ;;  %14945 = vmatpush.msrb.mxu0 %v20389_v41  ;;  %v15128_v0 = vsub.f32 %v17309_v55, %v15086_v44  ;;  %v17505_v55 = vld [vmem:[%s20826_s5 + $0x3] ss:$0 sm:$0xff] }
0x256e   : > { %14832 = vmatmul.f32.vlgmr.msra.gmra.mxu1 %v19926_v3  ;;  %15046 = vmatpush.msra.mxu3 %v20375_v62  ;;  %v17310_v3 = vld [vmem:[%s20822_s3 + $0x78] sm:$0xff]  ;;  %v15090_v62 = vand.u32 4294901760, %v17307_v28 }
0x256f   : > { %14861 = vmatpush.msrb.mxu2 %v20379_v1  ;;  %14948 = vmatpush.msrb.mxu0 %v20395_v10  ;;  %v15129_v47 = vand.u32 4294901760, %v15128_v0 }
0x2570   : > { %14980 = vmatpush.msrb.mxu1 %v20385_v42  ;;  %15048 = vmatpush.msra.mxu3 %v20379_v1  ;;  %v15134_v1 = vsub.f32 %v17308_v51, %v15088_v58  ;;  %v15140_v7 = vsub.f32 %v17307_v28, %v15090_v62 }
0x2571   : > { %14863 = vmatpush.msrb.mxu2 %v20385_v42  ;;  %14951 = vmatpush.msrb.mxu0 %v20400_v19  ;;  %v15130_v61 = vsub.f32 %v15128_v0, %v15129_v47 }
0x2572   : > { %14982 = vmatpush.msrb.mxu1 %v20391_v60  ;;  %14747 = vmatmul.f32.vlgmr.msra.gmra.mxu2 %v19929_v59  ;;  %v15084_v59 = vand.u32 4294901760, %v17310_v3  ;;  %v15135_v21 = vand.u32 4294901760, %v15134_v1  ;;  %v15141_v41 = vand.u32 4294901760, %v15140_v7 }
0x2573   : > { %14920 = vmatmul.f32.vlgmr.msrb.gmra.mxu3 %v19182_v27  ;;  %14865 = vmatpush.msrb.mxu2 %v20391_v60 }
0x2574   : > { %14954 = vmatmul.f32.vlgmr.msrb.gmra.mxu0 %v19187_v26  ;;  %15050 = vmatpush.msra.mxu3 %v20385_v42  ;;  %v15122_v31 = vsub.f32 %v17310_v3, %v15084_v59  ;;  %v15131_v42 = vand.u32 4294901760, %v15130_v61  ;;  %v15136_v54 = vsub.f32 %v15134_v1, %v15135_v21  ;;  %v15142_v8 = vsub.f32 %v15140_v7, %v15141_v41 }
0x2575   : > { %15011 = vmatpush.msra.mxu2 %v14897_v29  ;;  %15085 = vmatpush.msra.mxu0 %v15084_v59 }
0x2576   : > { %14986 = vmatmul.f32.vlgmr.msrb.gmra.mxu1 %v19196_v30  ;;  %15052 = vmatpush.msra.mxu3 %v20391_v60  ;;  %v15123_v5 = vand.u32 4294901760, %v15122_v31  ;;  %v15137_v60 = vand.u32 4294901760, %v15136_v54  ;;  %v15143_v29 = vand.u32 4294901760, %v15142_v8 }
0x2577   : > { %15015 = vmatpush.msra.mxu2 %v14903_v53  ;;  %15087 = vmatpush.msra.mxu0 %v15086_v44 }
0x2578   : > { %15202 = vmatpush.msrb.mxu3 %v15084_v59  ;;  %v15124_v52 = vsub.f32 %v15122_v31, %v15123_v5 }
0x2579   : > { %15019 = vmatpush.msra.mxu2 %v14909_v34  ;;  %15089 = vmatpush.msra.mxu0 %v15088_v58 }
0x257a   : > { %14871 = vmatmul.f32.vlgmr.msrb.gmra.mxu2 %v19234_v20  ;;  %15204 = vmatpush.msrb.mxu3 %v15086_v44  ;;  %v15125_v33 = vand.u32 4294901760, %v15124_v52 }
0x257b   : > { %14924 = vmatmul.f32.gmra.mxu3 %v19198_v11  ;;  %15023 = vmatpush.msra.mxu2 %v14915_v45 }
0x257c   : > { %14959 = vmatmul.f32.gmra.mxu0 %v19208_v22  ;;  %15206 = vmatpush.msrb.mxu3 %v15088_v58 }
0x257d   : > { %15168 = vmatpush.msrb.mxu2 %v15122_v31  ;;  %15091 = vmatpush.msra.mxu0 %v15090_v62 }
0x257e   : > { %14992 = vmatmul.f32.gmra.mxu1 %v19230_v24  ;;  %15208 = vmatpush.msrb.mxu3 %v15090_v62 }
0x257f   : > { %15171 = vmatpush.msrb.mxu2 %v15128_v0  ;;  %15126 = vmatpush.msra.mxu1 %v15125_v33 }
0x2580   : > { %15237 = vmatpush.msrb.mxu0 %v15123_v5 }
0x2581   : > { %15174 = vmatpush.msrb.mxu2 %v15134_v1  ;;  %15132 = vmatpush.msra.mxu1 %v15131_v42 }
0x2582   : > { %14879 = vmatmul.f32.gmra.mxu2 %v19256_v18  ;;  %15241 = vmatpush.msrb.mxu0 %v15129_v47 }
0x2583   : > { %15054 = vmatmul.f32.vlgmr.msra.gmra.mxu3 %v19182_v27  ;;  %15177 = vmatpush.msrb.mxu2 %v15140_v7 }
0x2584   : > { %15097 = vmatmul.f32.vlgmr.msra.gmra.mxu0 %v19234_v20  ;;  %15138 = vmatpush.msra.mxu1 %v15137_v60 }
0x2585   : > { %15245 = vmatpush.msrb.mxu0 %v15135_v21 }
0x2586   : > { %15144 = vmatpush.msra.mxu1 %v15143_v29 }
0x2587   : > { %15146 = vmatmul.f32.vlgmr.msra.gmra.mxu1 %v19182_v27  ;;  %15249 = vmatpush.msrb.mxu0 %v15141_v41 }
0x2588   : > { %15272 = vmatpush.msrb.mxu1 %v15084_v59 }
0x258a   : > { %15025 = vmatmul.f32.vlgmr.msra.gmra.mxu2 %v19182_v27  ;;  %15274 = vmatpush.msrb.mxu1 %v15086_v44 }
0x258b   : > { %15058 = vmatmul.f32.gmra.mxu3 %v19198_v11 }
0x258c   : > { %15105 = vmatmul.f32.gmra.mxu0 %v19256_v18  ;;  %15276 = vmatpush.msrb.mxu1 %v15088_v58 }
0x258e   : > { %15278 = vmatpush.msrb.mxu1 %v15090_v62 }
0x258f   : > { %15150 = vmatmul.f32.gmra.mxu1 %v19198_v11 }
0x2592   : > { %15029 = vmatmul.f32.gmra.mxu2 %v19198_v11 }
0x2593   : > { %15212 = vmatmul.f32.vlgmr.msrb.gmra.mxu3 %v19196_v30 }
0x2594   : > { %15251 = vmatmul.f32.vlgmr.msrb.gmra.mxu0 %v19182_v27 }
0x2597   : > { %15280 = vmatmul.f32.vlgmr.msrb.gmra.mxu1 %v19182_v27 }
0x259a   : > { %15180 = vmatmul.f32.vlgmr.msrb.gmra.mxu2 %v19187_v26 }
0x259b   : > { %15218 = vmatmul.f32.gmra.mxu3 %v19230_v24 }
0x259c   : > { %15255 = vmatmul.f32.gmra.mxu0 %v19198_v11 }
0x259f   : > { %15284 = vmatmul.f32.gmra.mxu1 %v19198_v11 }
0x25a2   : > { %15185 = vmatmul.f32.gmra.mxu2 %v19208_v22 }
0x25d9   : > { %v14567_v63 = vpop.f32.mrf.mxu0 }
0x25db   : > { %v14591_v34 = vpop.f32.mrf.mxu1 }
0x25dd   : > { %v14543_v10 = vpop.f32.mrf.mxu3 }
0x25e1   : > { %v14677_v50 = vpop.f32.mrf.mxu0 }
0x25e2   : > { %v14678_v3 = vadd.f32 %v17504_v16, %v14677_v50 }
0x25e3   : > { %v14718_v4 = vpop.f32.mrf.mxu1 }
0x25e4   : > { %v14719_v31 = vadd.f32 %v14718_v4, %v14678_v3 }
0x25e5   : > { %v14517_v46 = vpop.f32.mrf.mxu2  ;;  %v14637_v53 = vpop.f32.mrf.mxu3 }
0x25e6   : > { %v14544_v19 = vadd.f32 %v14543_v10, %v14517_v46 }
0x25e8   : > { %v14568_v9 = vadd.f32 %v14567_v63, %v14544_v19 }
0x25e9   : > { %v14808_v59 = vpop.f32.mrf.mxu0 }
0x25ea   : > { %v14592_v39 = vadd.f32 %v14591_v34, %v14568_v9 }
0x25eb   : > { %v14833_v51 = vpop.f32.mrf.mxu1 }
0x25ed   : > { %v14615_v56 = vpop.f32.mrf.mxu2  ;;  %v14775_v37 = vpop.f32.mrf.mxu3 }
0x25ee   : > { %v14616_v45 = vadd.f32 %v14615_v56, %v14592_v39 }
0x25f0   : > { %v20472_v36 = vadd.f32 %v14637_v53, %v14616_v45 }
0x25f1   : > { %v14955_v52 = vpop.f32.mrf.mxu0 }
0x25f3   : > { %v14987_v33 = vpop.f32.mrf.mxu1 }
0x25f5   : > { %v14748_v32 = vpop.f32.mrf.mxu2 }
0x25f6   : > { %v14921_v57 = vpop.f32.mrf.mxu3  ;;  %v14749_v5 = vadd.f32 %v14748_v32, %v14719_v31 }
0x25f8   : > { %v14776_v28 = vadd.f32 %v14775_v37, %v14749_v5 }
0x25f9   : > { %v14960_v60 = vpop.f32.mrf.mxu0 }
0x25fa   : > { %v14809_v1 = vadd.f32 %v14808_v59, %v14776_v28 }
0x25fb   : > { %v14993_v19 = vpop.f32.mrf.mxu1 }
0x25fc   : > { %v14834_v7 = vadd.f32 %v14833_v51, %v14809_v1 }
0x25fd   : > { %v14872_v44 = vpop.f32.mrf.mxu2 }
0x25fe   : > { %v14873_v58 = vadd.f32 %v17505_v55, %v14872_v44  ;;  %v14925_v0 = vpop.f32.mrf.mxu3  ;;  %v15289_v10 = vsel %vm2446_vm3, %v14834_v7, 0 }
0x25ff   : > { %v15315_v63 = vand.u32 4294901760, %v15289_v10 }
0x2600   : > { %v14922_v47 = vadd.f32 %v14921_v57, %v14873_v58 }
0x2601   : > { %v15316_v45 = vsub.f32 %v15289_v10, %v15315_v63 }
0x2602   : > { %v14956_v61 = vadd.f32 %v14955_v52, %v14922_v47  ;;  %v15098_v52 = vpop.f32.mrf.mxu0  ;;  %v17506_v47 = vld [vmem:[%s20828_s6 + $0x3] ss:$0 sm:$0xff] }
0x2603   : > { %v15317_v4 = vand.u32 4294901760, %v15316_v45 }
0x2604   : > { %v14988_v54 = vadd.f32 %v14987_v33, %v14956_v61  ;;  %v15147_v1 = vpop.f32.mrf.mxu1 }
0x2605   : > { %v14880_v62 = vpop.f32.mrf.mxu2 }
0x2606   : > { %v14881_v21 = vadd.f32 %v17505_v55, %v14880_v62  ;;  %v15055_v42 = vpop.f32.mrf.mxu3  ;;  %v15318_v55 = vsub.f32 %v15316_v45, %v15317_v4  ;;  %v15099_v62 = vadd.f32 %v17506_v47, %v15098_v52 }
0x2608   : > { %v14926_v41 = vadd.f32 %v14925_v0, %v14881_v21  ;;  %v15319_v5 = vand.u32 4294901760, %v15318_v55  ;;  %v15148_v61 = vadd.f32 %v15147_v1, %v15099_v62 }
0x260a   : > { %v14961_v46 = vadd.f32 %v14960_v60, %v14926_v41  ;;  %v15106_v33 = vpop.f32.mrf.mxu0 }
0x260c   : > { %v14994_v9 = vadd.f32 %v14993_v19, %v14961_v46  ;;  %v15151_v41 = vpop.f32.mrf.mxu1 }
0x260d   : > { %v15026_v8 = vpop.f32.mrf.mxu2 }
0x260e   : > { %v15027_v29 = vadd.f32 %v15026_v8, %v14988_v54  ;;  %v15059_v56 = vpop.f32.mrf.mxu3 }
0x2610   : > { %v15056_v53 = vadd.f32 %v15055_v42, %v15027_v29  ;;  %v15107_v42 = vadd.f32 %v17506_v47, %v15106_v33 }
0x2612   : > { %v15292_v34 = vsel %vm2446_vm3, %v15056_v53, 0  ;;  %v15252_v60 = vpop.f32.mrf.mxu0  ;;  %v15152_v8 = vadd.f32 %v15151_v41, %v15107_v42 }
0x2613   : > { %v15313_v50 = vand.u32 4294901760, %v15292_v34 }
0x2615   : > { %v15030_v39 = vpop.f32.mrf.mxu2  ;;  %v15345_v57 = vsub.f32 %v15292_v34, %v15313_v50 }
0x2616   : > { %v15031_v37 = vadd.f32 %v15030_v39, %v14994_v9  ;;  %v15213_v7 = vpop.f32.mrf.mxu3  ;;  %v15281_v9 = vpop.f32.mrf.mxu1 }
0x2617   : > { %v15346_v44 = vand.u32 4294901760, %v15345_v57 }
0x2618   : > { %v15060_v16 = vadd.f32 %v15059_v56, %v15031_v37 }
0x2619   : > { %v15347_v0 = vsub.f32 %v15345_v57, %v15346_v44 }
0x261a   : > { %v15295_v32 = vsel %vm2446_vm3, %v15060_v16, 0  ;;  %v15256_v39 = vpop.f32.mrf.mxu0 }
0x261b   : > { %v15311_v3 = vand.u32 4294901760, %v15295_v32  ;;  %v15348_v28 = vand.u32 4294901760, %v15347_v0 }
0x261d   : > { %v15339_v59 = vsub.f32 %v15295_v32, %v15311_v3  ;;  %15312 = vmatpush.xpose.msra.mxu2 %v15311_v3  ;;  %15396 = vmatpush.xpose.msra.mxu1 %v15311_v3  ;;  %v15181_v21 = vpop.f32.mrf.mxu2 }
0x261e   : > { %v15182_v54 = vadd.f32 %v15181_v21, %v15148_v61  ;;  %v15219_v19 = vpop.f32.mrf.mxu3 }
0x261f   : > { %15371 = vmatpush.xpose.msra.mxu0 %v15339_v59  ;;  %v15340_v31 = vand.u32 4294901760, %v15339_v59 }
0x2620   : > { %v15214_v29 = vadd.f32 %v15213_v7, %v15182_v54 }
0x2621   : > { %15314 = vmatpush.xpose.msra.mxu2 %v15313_v50  ;;  %15398 = vmatpush.xpose.msra.mxu1 %v15313_v50  ;;  %v15341_v51 = vsub.f32 %v15339_v59, %v15340_v31 }
0x2622   : > { %v15253_v46 = vadd.f32 %v15252_v60, %v15214_v29 }
0x2623   : > { %15374 = vmatpush.xpose.msra.mxu0 %v15345_v57  ;;  %v15342_v58 = vand.u32 4294901760, %v15341_v51 }
0x2624   : > { %15320 = vmatmul.f32.vlgmr.msra.gmra.mxu2 %v15319_v5  ;;  %15402 = vmatmul.f32.vlgmr.msra.gmra.mxu1 %v15317_v4 }
0x2625   : > { %15423 = vmatpush.xpose.msrb.mxu2 %v15340_v31  ;;  %15343 = vmatpush.xpose.msra.mxu3 %v15342_v58  ;;  %v15186_v10 = vpop.f32.mrf.mxu2 }
0x2626   : > { %15377 = vmatmul.f32.vlgmr.msra.gmra.mxu0 %v15316_v45  ;;  %v15187_v53 = vadd.f32 %v15186_v10, %v15152_v8 }
0x2628   : > { %v15220_v34 = vadd.f32 %v15219_v19, %v15187_v53 }
0x2629   : > { %15427 = vmatpush.xpose.msrb.mxu2 %v15346_v44  ;;  %15349 = vmatpush.xpose.msra.mxu3 %v15348_v28 }
0x262a   : > { %v15257_v45 = vadd.f32 %v15256_v39, %v15220_v34 }
0x262c   : > { %15351 = vmatmul.f32.vlgmr.msra.gmra.mxu3 %v15315_v63  ;;  %15429 = vmatmul.f32.vlgmr.msrb.gmra.mxu2 %v15315_v63 }
0x262d   : > { %15448 = vmatpush.xpose.msrb.mxu3 %v15311_v3 }
0x2631   : > { %15450 = vmatpush.xpose.msrb.mxu3 %v15313_v50  ;;  %v15285_v50 = vpop.f32.mrf.mxu1 }
0x2632   : > { %v15286_v16 = vadd.f32 %v15285_v50, %v15257_v45  ;;  %v17312_v45 = vld [vmem:[%s20832_s8 + $0x18] sm:$0xff] }
0x2634   : > { %15452 = vmatmul.f32.vlgmr.msrb.gmra.mxu3 %v15315_v63  ;;  %v15282_v63 = vadd.f32 %v15281_v9, %v15253_v46  ;;  %v15486_v4 = vand.u32 4294901760, %v15286_v16 }
0x2636   : > { %v15488_v56 = vand.u32 4294901760, %v15282_v63  ;;  %v15514_v57 = vsub.f32 %v15286_v16, %v15486_v4  ;;  %15487 = vmatpush.msrb.mxu0 %v15486_v4  ;;  %15571 = vmatpush.msra.mxu3 %v15486_v4 }
0x2638   : > { %v15520_v37 = vsub.f32 %v15282_v63, %v15488_v56  ;;  %v15515_v3 = vand.u32 4294901760, %v15514_v57  ;;  %15546 = vmatpush.msra.mxu2 %v15514_v57  ;;  %15489 = vmatpush.msrb.mxu0 %v15488_v56 }
0x2639   : > { %15573 = vmatpush.msra.mxu3 %v15488_v56 }
0x263a   : > { %v15521_v32 = vand.u32 4294901760, %v15520_v37  ;;  %v15516_v55 = vsub.f32 %v15514_v57, %v15515_v3  ;;  %15549 = vmatpush.msra.mxu2 %v15520_v37  ;;  %15598 = vmatpush.msra.mxu0 %v15515_v3 }
0x263c   : > { %v15522_v59 = vsub.f32 %v15520_v37, %v15521_v32  ;;  %v15517_v31 = vand.u32 4294901760, %v15516_v55  ;;  %15602 = vmatpush.msra.mxu0 %v15521_v32  ;;  %v15651_v37 = vand.u32 4294901760, %v17312_v45 }
0x263e   : > { %v15523_v44 = vand.u32 4294901760, %v15522_v59  ;;  %15518 = vmatpush.msrb.mxu1 %v15517_v31  ;;  %v15678_v50 = vsub.f32 %v17312_v45, %v15651_v37  ;;  %15652 = vmatpush.msrb.mxu2 %v15651_v37 }
0x2640   : > { %15524 = vmatpush.msrb.mxu1 %v15523_v44  ;;  %v15679_v16 = vand.u32 4294901760, %v15678_v50 }
0x2642   : > { %15623 = vmatpush.msra.mxu1 %v15486_v4  ;;  %v15680_v4 = vsub.f32 %v15678_v50, %v15679_v16 }
0x2644   : > { %15625 = vmatpush.msra.mxu1 %v15488_v56  ;;  %v15681_v32 = vand.u32 4294901760, %v15680_v4 }
0x2646   : > { %15682 = vmatpush.msrb.mxu3 %v15681_v32  ;;  %v15823_v32 = vld [vmem:[%s20835_s1 + $0x10] sm:$0xff] }
0x26a1   : > { %v15403_v52 = vpop.f32.mrf.mxu1 }
0x26a3   : > { %v15378_v0 = vpop.f32.mrf.mxu0 }
0x26a7   : > { %v15321_v51 = vpop.f32.mrf.mxu2 }
0x26af   : > { %v15352_v5 = vpop.f32.mrf.mxu3  ;;  %v15430_v62 = vpop.f32.mrf.mxu2 }
0x26b0   : > { %v15353_v58 = vadd.f32 %v15352_v5, %v15321_v51 }
0x26b2   : > { %v15379_v28 = vadd.f32 %v15378_v0, %v15353_v58 }
0x26b4   : > { %v15404_v47 = vadd.f32 %v15403_v52, %v15379_v28 }
0x26b6   : > { %v15431_v1 = vadd.f32 %v15430_v62, %v15404_v47 }
0x26b7   : > { %v15453_v33 = vpop.f32.mrf.mxu3 }
0x26b8   : > { %v15454_v61 = vadd.f32 %v15453_v33, %v15431_v1 }
0x26ba   : > { %v15456_v21 = vmul.f32 0.35355338, %v15454_v61 }
0x26bc   : > { %v15457_v7 = vsel %vm12031_vm8, -1e+30, %v15456_v21  ;;  %v13254_v21 = vadd.f32 %v20293_v40, %v20297_v12 }
0x26bd   : > { %v15458_v42 = vsel %vm12033_vm9, %v15457_v7, -inf }
0x26be   : > { %15459 = vmax.xlane.f32.xlu1 %v15458_v42 }
0x2731   : > { %v15460_v54 = vpop.xlane.xlu1 %15459 }
0x2732   : > { %v15461_v41 = vsub.f32 %v15457_v7, %v15460_v54  ;;  %v13278_v7 = vadd.f32 %v20299_v49, %v13254_v21 }
0x2734   : > { %v15462_v60 = vmul.f32 1.442695, %v15461_v41  ;;  %v13302_v42 = vadd.f32 %v20303_v17, %v13278_v7 }
0x2736   : > { %17568 = vpow2.f32 %v15462_v60  ;;  %v13326_v54 = vadd.f32 %v20309_v13, %v13302_v42 }
0x2738   : > { %v13348_v41 = vadd.f32 %v20305_v25, %v13326_v54 }
0x273a   : > { %v13377_v60 = vadd.f32 %v20311_v23, %v13348_v41 }
0x273c   : > { %v17569_v8 = vpop.eup %17568 }
0x273d   : > { %v15464_v29 = vsel %vm12033_vm9, %v17569_v8, 0.0 }
0x273e   : > { %15465 = vadd.xlane.f32.xlu2 %v15464_v29 }
0x27b1   : > { %v15466_v10 = vpop.xlane.xlu2 %15465 }
0x27b2   : > { %17570 = vrcp.f32 %v15466_v10 }
0x27b8   : > { %v17571_v46 = vpop.eup %17570 }
0x27b9   : > { %v15468_v53 = vmul.f32 %v17571_v46, %v17569_v8  ;;  %v13403_v8 = vadd.f32 %v20313_v6, %v13377_v60 }
0x27bb   : > { %v15470_v19 = vsel %vm12045_vm10, %v15468_v53, 0  ;;  %v13427_v29 = vadd.f32 %v20319_v14, %v13403_v8 }
0x27bc   : > { %v15490_v9 = vand.u32 4294901760, %v15470_v19 }
0x27bd   : > { %v13451_v53 = vadd.f32 %v20315_v35, %v13427_v29 }
0x27be   : > { %v15491_v63 = vsub.f32 %v15470_v19, %v15490_v9  ;;  %15526 = vmatmul.f32.vlgmr.msrb.gmra.mxu1 %v15490_v9 }
0x27bf   : > { %15728 = vmatpush.msrb.mxu1 %v15651_v37  ;;  %v13475_v17 = vadd.f32 %v20321_v38, %v13451_v53 }
0x27c0   : > { %15552 = vmatmul.f32.vlgmr.msra.gmra.mxu2 %v15491_v63  ;;  %v15492_v34 = vand.u32 4294901760, %v15491_v63 }
0x27c1   : > { %15754 = vmatpush.msra.mxu2 %v15679_v16  ;;  %v13497_v25 = vadd.f32 %v20323_v43, %v13475_v17  ;;  %v15824_v16 = vld [vmem:[%s20834_s15 + $0x18] sm:$0xff]  ;;  %s20838_s15 = sld [smem:[#allocation32_spill]] }
0x27c2   : > { %15577 = vmatmul.f32.vlgmr.msra.gmra.mxu3 %v15492_v34  ;;  %v15493_v39 = vsub.f32 %v15491_v63, %v15492_v34  ;;  %v17507_v34 = vld [vmem:[%s20833_s7] ss:$0 sm:$0xff]  ;;  %v15844_v4 = vand.u32 4294901760, %v15824_v16  ;;  %s20837_s7 = sld [smem:[#allocation33_spill]] }
0x27c3   : > { %15776 = vmatpush.msra.mxu3 %v15651_v37  ;;  %v14640_v14 = vadd.f32 %v20472_v36, %v13497_v25 }
0x27c4   : > { %v15494_v56 = vand.u32 4294901760, %v15493_v39 }
0x27c6   : > { %15495 = vmatmul.f32.vlgmr.msrb.gmra.mxu0 %v15494_v56  ;;  %15627 = vmatmul.f32.vlgmr.msra.gmra.mxu1 %v15490_v9 }
0x27c7   : > { %15705 = vmatpush.msrb.mxu0 %v15678_v50 }
0x27c8   : > { %v17509_v17 = vld [vmem:[%s20837_s7] ss:$0 sm:$0xff]  ;;  %s20841_s7 = sld [smem:[#allocation30_spill]] }
0x27ce   : > { %15604 = vmatmul.f32.vlgmr.msra.gmra.mxu0 %v15490_v9 }
0x27cf   : > { %15845 = vmatpush.msra.mxu0 %v15844_v4 }
0x283b   : > { %v15527_v57 = vpop.f32.mrf.mxu1 }
0x2843   : > { %v15496_v3 = vpop.f32.mrf.mxu0  ;;  %v15553_v55 = vpop.f32.mrf.mxu2 }
0x2844   : > { %v15528_v59 = vadd.f32 %v15527_v57, %v15496_v3  ;;  %v15628_v0 = vpop.f32.mrf.mxu1  ;;  %v15846_v57 = vand.u32 4294901760, %v15823_v32  ;;  %v15822_v3 = vld [vmem:[%s20835_s1 + $0x8] sm:$0xff] }
0x2845   : > { %v15578_v44 = vpop.f32.mrf.mxu3 }
0x2846   : > { %v15554_v31 = vadd.f32 %v15553_v55, %v15528_v59  ;;  %v15880_v55 = vsub.f32 %v15823_v32, %v15846_v57  ;;  %15847 = vmatpush.msra.mxu0 %v15846_v57 }
0x2848   : > { %v15579_v51 = vadd.f32 %v15578_v44, %v15554_v31  ;;  %v15848_v31 = vand.u32 4294901760, %v15822_v3  ;;  %v15821_v44 = vld [vmem:[%s20835_s1] sm:$0xff]  ;;  %s20839_s1 = smov %s20838_s15 }
0x284a   : > { %15849 = vmatpush.msra.mxu0 %v15848_v31 }
0x284b   : > { %v15605_v5 = vpop.f32.mrf.mxu0 }
0x284c   : > { %v15606_v58 = vadd.f32 %v15605_v5, %v15579_v51  ;;  %v15881_v5 = vand.u32 4294901760, %v15880_v55 }
0x284e   : > { %v15629_v28 = vadd.f32 %v15628_v0, %v15606_v58  ;;  %v15886_v58 = vsub.f32 %v15822_v3, %v15848_v31  ;;  %v15850_v0 = vand.u32 4294901760, %v15821_v44  ;;  %v16021_v3 = vld [vmem:[%s20839_s1 + $0x18] sm:$0xff] }
0x2850   : > { %v15634_v52 = vsel %vm2446_vm3, %v15629_v28, 0  ;;  %15851 = vmatpush.msra.mxu0 %v15850_v0 }
0x2851   : > { %v15653_v47 = vand.u32 4294901760, %v15634_v52 }
0x2853   : > { %v15654_v62 = vsub.f32 %v15634_v52, %v15653_v47  ;;  %15684 = vmatmul.f32.vlgmr.msrb.gmra.mxu3 %v15653_v47  ;;  %v15882_v52 = vsub.f32 %v15880_v55, %v15881_v5 }
0x2854   : > { %15945 = vmatpush.msrb.mxu3 %v15844_v4 }
0x2855   : > { %v15655_v1 = vand.u32 4294901760, %v15654_v62  ;;  %15708 = vmatmul.f32.vlgmr.msrb.gmra.mxu0 %v15654_v62 }
0x2856   : > { %15947 = vmatpush.msrb.mxu3 %v15846_v57 }
0x2857   : > { %v15656_v33 = vsub.f32 %v15654_v62, %v15655_v1  ;;  %15732 = vmatmul.f32.vlgmr.msrb.gmra.mxu1 %v15655_v1  ;;  %v15892_v62 = vsub.f32 %v15821_v44, %v15850_v0  ;;  %v15883_v1 = vand.u32 4294901760, %v15882_v52 }
0x2858   : > { %15949 = vmatpush.msrb.mxu3 %v15848_v31 }
0x2859   : > { %v15657_v61 = vand.u32 4294901760, %v15656_v33 }
0x285a   : > { %15951 = vmatpush.msrb.mxu3 %v15850_v0 }
0x285b   : > { %15658 = vmatmul.f32.vlgmr.msrb.gmra.mxu2 %v15657_v61  ;;  %15778 = vmatmul.f32.vlgmr.msra.gmra.mxu3 %v15653_v47  ;;  %v15893_v61 = vand.u32 4294901760, %v15892_v62 }
0x285d   : > { %v15894_v7 = vsub.f32 %v15892_v62, %v15893_v61 }
0x285f   : > { %v15895_v42 = vand.u32 4294901760, %v15894_v7 }
0x2863   : > { %15756 = vmatmul.f32.vlgmr.msra.gmra.mxu2 %v15653_v47  ;;  %v15887_v47 = vand.u32 4294901760, %v15886_v58 }
0x2865   : > { %v15888_v33 = vsub.f32 %v15886_v58, %v15887_v47 }
0x2867   : > { %v15889_v21 = vand.u32 4294901760, %v15888_v33 }
0x28d2   : > { %v15709_v12 = vpop.f32.mrf.mxu0 }
0x28d4   : > { %v15733_v19 = vpop.f32.mrf.mxu1 }
0x28d6   : > { %v15685_v10 = vpop.f32.mrf.mxu3 }
0x28de   : > { %v15659_v46 = vpop.f32.mrf.mxu2  ;;  %v15779_v6 = vpop.f32.mrf.mxu3 }
0x28df   : > { %v15686_v40 = vadd.f32 %v15685_v10, %v15659_v46 }
0x28e1   : > { %v15710_v49 = vadd.f32 %v15709_v12, %v15686_v40  ;;  %v17508_v12 = vld [vmem:[%s20836_s11] ss:$0 sm:$0xff]  ;;  %s20840_s11 = sld [smem:[#allocation29_spill]] }
0x28e3   : > { %v15734_v13 = vadd.f32 %v15733_v19, %v15710_v49 }
0x28e6   : > { %v15757_v9 = vpop.f32.mrf.mxu2 }
0x28e7   : > { %v15758_v23 = vadd.f32 %v15757_v9, %v15734_v13 }
0x28e9   : > { %v15780_v63 = vadd.f32 %v15779_v6, %v15758_v23 }
0x28eb   : > { %v15782_v39 = vadd.f32 %v15780_v63, %v14640_v14 }
0x28ed   : > { %v15787_v35 = vadd.f32 %v17507_v34, %v15782_v39  ;;  %v16025_v39 = vld [vmem:[%s20838_s15 + $0x38] sm:$0xff]  ;;  %s20842_s15 = sld [smem:[#allocation57_spill]] }
0x28ef   : > { %v15788_v56 = vadd.f32 %v15787_v35, %v19921_v15  ;;  %v15874_v15 = vsub.f32 %v15824_v16, %v15844_v4  ;;  %v20523_v35 = vand.u32 4294901760, %v16025_v39  ;;  %v16022_v16 = vld [vmem:[%s20839_s1 + $0x20] sm:$0xff] }
0x28f1   : > { %v15789_v38 = vsel %vm6080_vm7, %v15788_v56, 0.0  ;;  %v15875_v59 = vand.u32 4294901760, %v15874_v15  ;;  %15916 = vmatpush.msrb.mxu2 %v15874_v15 }
0x28f2   : > { %15790 = vadd.xlane.f32.xlu0 %v15789_v38  ;;  %v20527_v38 = vsub.f32 %v16025_v39, %v20523_v35 }
0x28f3   : > { %v15876_v51 = vsub.f32 %v15874_v15, %v15875_v59  ;;  %15919 = vmatpush.msrb.mxu2 %v15880_v55  ;;  %15974 = vmatpush.msrb.mxu0 %v15875_v59 }
0x28f5   : > { %v15877_v28 = vand.u32 4294901760, %v15876_v51  ;;  %15922 = vmatpush.msrb.mxu2 %v15886_v58  ;;  %15978 = vmatpush.msrb.mxu0 %v15881_v5  ;;  %v16049_v51 = vand.u32 4294901760, %v16021_v3  ;;  %v16020_v5 = vld [vmem:[%s20839_s1 + $0x10] sm:$0xff] }
0x28f6   : > { %v16051_v52 = vand.u32 4294901760, %v16020_v5 }
0x28f7   : > { %15878 = vmatpush.msra.mxu1 %v15877_v28  ;;  %15925 = vmatpush.msrb.mxu2 %v15892_v62  ;;  %v16019_v62 = vld [vmem:[%s20839_s1 + $0x8] sm:$0xff] }
0x28f8   : > { %15982 = vmatpush.msrb.mxu0 %v15887_v47  ;;  %v16099_v47 = vsub.f32 %v16021_v3, %v16049_v51 }
0x28f9   : > { %15884 = vmatpush.msra.mxu1 %v15883_v1  ;;  %16042 = vmatpush.msra.mxu2 %v20523_v35 }
0x28fa   : > { %15986 = vmatpush.msrb.mxu0 %v15893_v61  ;;  %v16105_v61 = vsub.f32 %v16020_v5, %v16051_v52  ;;  %v16100_v7 = vand.u32 4294901760, %v16099_v47 }
0x28fb   : > { %15890 = vmatpush.msra.mxu1 %v15889_v21  ;;  %v16053_v21 = vand.u32 4294901760, %v16019_v62 }
0x28fd   : > { %15896 = vmatpush.msra.mxu1 %v15895_v42  ;;  %v16018_v42 = vld [vmem:[%s20839_s1] sm:$0xff] }
0x28ff   : > { %16005 = vmatpush.msrb.mxu1 %v15844_v4 }
0x2901   : > { %16007 = vmatpush.msrb.mxu1 %v15846_v57  ;;  %v20549_v57 = vand.u32 4294901760, %v16022_v16 }
0x2903   : > { %16009 = vmatpush.msrb.mxu1 %v15848_v31  ;;  %v16093_v44 = vsub.f32 %v16022_v16, %v20549_v57 }
0x2905   : > { %16011 = vmatpush.msrb.mxu1 %v15850_v0  ;;  %v16094_v28 = vand.u32 4294901760, %v16093_v44 }
0x2907   : > { %v16095_v33 = vsub.f32 %v16093_v44, %v16094_v28 }
0x2965   : > { %v15791_v45 = vpop.xlane.xlu0 %15790 }
0x2966   : > { %v15792_v37 = vmul.f32 %v15791_v45, %v19128_v48 }
0x2968   : > { %v20505_v43 = vsub.f32 %v15788_v56, %v15792_v37  ;;  %v16024_v56 = vld [vmem:[%s20839_s1 + $0x30] sm:$0xff]  ;;  %v16023_v37 = vld [vmem:[%s20839_s1 + $0x28] sm:$0xff]  ;;  %s20843_s1 = smov %s20842_s15 }
0x2969   : > { %v20529_v45 = vand.u32 4294901760, %v16024_v56 }
0x296a   : > { %v15794_v50 = vmul.f32 %v20505_v43, %v20505_v43 }
0x296b   : > { %16044 = vmatpush.msra.mxu2 %v20529_v45 }
0x296c   : > { %v15795_v36 = vsel %vm6080_vm7, %v15794_v50, 0.0  ;;  %v20536_v50 = vsub.f32 %v16024_v56, %v20529_v45 }
0x296d   : > { %15796 = vadd.xlane.f32.xlu1 %v15795_v36  ;;  %v20538_v36 = vand.u32 4294901760, %v16023_v37 }
0x296e   : > { %v16082_v32 = vand.u32 4294901760, %v20536_v50 }
0x296f   : > { %v20547_v15 = vsub.f32 %v16023_v37, %v20538_v36  ;;  %16046 = vmatpush.msra.mxu2 %v20538_v36 }
0x2970   : > { %v16083_v55 = vsub.f32 %v20536_v50, %v16082_v32 }
0x2971   : > { %v16088_v31 = vand.u32 4294901760, %v20547_v15  ;;  %16048 = vmatpush.msra.mxu2 %v20549_v57 }
0x2972   : > { %v16084_v58 = vand.u32 4294901760, %v16083_v55 }
0x2973   : > { %v16089_v0 = vsub.f32 %v20547_v15, %v16088_v31  ;;  %16050 = vmatpush.msra.mxu2 %v16049_v51 }
0x2975   : > { %v16090_v1 = vand.u32 4294901760, %v16089_v0  ;;  %16052 = vmatpush.msra.mxu2 %v16051_v52 }
0x2977   : > { %16054 = vmatpush.msra.mxu2 %v16053_v21 }
0x29e0   : > { %v15797_v54 = vpop.xlane.xlu1 %15796 }
0x29e1   : > { %v15798_v41 = vmul.f32 %v15797_v54, %v19128_v48  ;;  %v16096_v54 = vand.u32 4294901760, %v16095_v33 }
0x29e3   : > { %v15799_v60 = vadd.f32 1e-05, %v15798_v41  ;;  %v16106_v41 = vand.u32 4294901760, %v16105_v61 }
0x29e5   : > { %17572 = vrsqrt.f32 %v15799_v60  ;;  %vm15806_vm11 = vweird.f32 %v15799_v60 }
0x29eb   : > { %v17573_v8 = vpop.eup %17572 }
0x29ec   : > { %v15801_v29 = vmul.f32 %v17573_v8, %v15799_v60  ;;  %vm15807_vm3 = vweird.f32 %v17573_v8  ;;  %v16111_v60 = vsub.f32 %v16019_v62, %v16053_v21 }
0x29ed   : > { %vm15808_vm12 = vmor %vm15806_vm11, %vm15807_vm3 }
0x29ee   : > { %v15802_v10 = vmul.f32 %v17573_v8, %v15801_v29  ;;  %v16101_v29 = vsub.f32 %v16099_v47, %v16100_v7 }
0x29f0   : > { %v15803_v46 = vmul.f32 0.5, %v15802_v10  ;;  %v16107_v10 = vsub.f32 %v16105_v61, %v16106_v41 }
0x29f2   : > { %v15804_v53 = vsub.f32 1.5, %v15803_v46  ;;  %v16112_v46 = vand.u32 4294901760, %v16111_v60 }
0x29f4   : > { %v15805_v40 = vmul.f32 %v17573_v8, %v15804_v53 }
0x29f6   : > { %v15809_v49 = vsel %vm15808_vm12, %v17573_v8, %v15805_v40  ;;  %v16055_v8 = vand.u32 4294901760, %v16018_v42  ;;  %v16102_v40 = vand.u32 4294901760, %v16101_v29  ;;  %v16305_v29 = vld [vmem:[%s18128_s17 + $0x10] sm:$0xff] }
0x29f7   : > { %v15810_v19 = vmul.f32 %v15809_v49, %v20505_v43  ;;  %v16076_v43 = vand.u32 4294901760, %v20527_v38  ;;  %v16113_v49 = vsub.f32 %v16111_v60, %v16112_v46 }
0x29f8   : > { %v16117_v53 = vsub.f32 %v16018_v42, %v16055_v8  ;;  %16056 = vmatpush.msra.mxu2 %v16055_v8 }
0x29f9   : > { %v15815_v13 = vmul.f32 %v17508_v12, %v15810_v19  ;;  %v16077_v4 = vsub.f32 %v20527_v38, %v16076_v43  ;;  %v16108_v12 = vand.u32 4294901760, %v16107_v10  ;;  %v16114_v19 = vand.u32 4294901760, %v16113_v49  ;;  %v16303_v49 = vld [vmem:[%s18128_s17] sm:$0xff] }
0x29fa   : > { %v16328_v10 = vand.u32 4294901760, %v16305_v29 }
0x29fb   : > { %v20518_v9 = vadd.f32 %v17509_v17, %v15815_v13  ;;  %v16078_v59 = vand.u32 4294901760, %v16077_v4  ;;  %v16118_v17 = vand.u32 4294901760, %v16117_v53 }
0x29fd   : > { %v15830_v25 = vsel %vm1871_vm2, %v20518_v9, 0  ;;  %16079 = vmatpush.msra.mxu3 %v16078_v59  ;;  %v16119_v13 = vsub.f32 %v16117_v53, %v16118_v17  ;;  %v17511_v59 = vld [vmem:[%s20841_s7] ss:$0 sm:$0xff]  ;;  %s20845_s7 = sld [smem:[#allocation35_spill]] }
0x29fe   : > { %v15852_v23 = vand.u32 4294901760, %v15830_v25 }
0x29ff   : > { %16085 = vmatpush.msra.mxu3 %v16084_v58 }
0x2a00   : > { %15898 = vmatmul.f32.vlgmr.msra.gmra.mxu1 %v15852_v23  ;;  %v15853_v6 = vsub.f32 %v15830_v25, %v15852_v23  ;;  %v16120_v25 = vand.u32 4294901760, %v16119_v13 }
0x2a01   : > { %16174 = vmatpush.msra.mxu1 %v20523_v35  ;;  %16091 = vmatpush.msra.mxu3 %v16090_v1 }
0x2a02   : > { %15928 = vmatmul.f32.vlgmr.msrb.gmra.mxu2 %v15853_v6  ;;  %v15854_v14 = vand.u32 4294901760, %v15853_v6 }
0x2a03   : > { %16176 = vmatpush.msra.mxu1 %v20529_v45  ;;  %16097 = vmatpush.msra.mxu3 %v16096_v54 }
0x2a04   : > { %15955 = vmatmul.f32.vlgmr.msrb.gmra.mxu3 %v15854_v14  ;;  %v15855_v63 = vsub.f32 %v15853_v6, %v15854_v14  ;;  %16207 = vmatpush.msrb.mxu2 %v16076_v43 }
0x2a05   : > { %16178 = vmatpush.msra.mxu1 %v20538_v36  ;;  %16103 = vmatpush.msra.mxu3 %v16102_v40  ;;  %v16362_v40 = vsub.f32 %v16305_v29, %v16328_v10 }
0x2a06   : > { %v15856_v34 = vand.u32 4294901760, %v15855_v63  ;;  %16211 = vmatpush.msrb.mxu2 %v16082_v32 }
0x2a07   : > { %16180 = vmatpush.msra.mxu1 %v20549_v57  ;;  %16109 = vmatpush.msra.mxu3 %v16108_v12 }
0x2a08   : > { %15857 = vmatmul.f32.vlgmr.msra.gmra.mxu0 %v15856_v34  ;;  %16013 = vmatmul.f32.vlgmr.msrb.gmra.mxu1 %v15852_v23 }
0x2a09   : > { %16137 = vmatpush.msra.mxu0 %v20527_v38  ;;  %16182 = vmatpush.msra.mxu1 %v16049_v51 }
0x2a0a   : > { %16215 = vmatpush.msrb.mxu2 %v16088_v31  ;;  %16115 = vmatpush.msra.mxu3 %v16114_v19  ;;  %v16363_v19 = vand.u32 4294901760, %v16362_v40 }
0x2a0b   : > { %16140 = vmatpush.msra.mxu0 %v20536_v50  ;;  %16184 = vmatpush.msra.mxu1 %v16051_v52 }
0x2a0c   : > { %16219 = vmatpush.msrb.mxu2 %v16094_v28  ;;  %16121 = vmatpush.msra.mxu3 %v16120_v25  ;;  %v16332_v25 = vand.u32 4294901760, %v16303_v49 }
0x2a0d   : > { %16143 = vmatpush.msra.mxu0 %v20547_v15  ;;  %16186 = vmatpush.msra.mxu1 %v16053_v21 }
0x2a0e   : > { %16250 = vmatpush.msrb.mxu3 %v20523_v35  ;;  %16223 = vmatpush.msrb.mxu2 %v16100_v7 }
0x2a0f   : > { %16146 = vmatpush.msra.mxu0 %v16093_v44  ;;  %16188 = vmatpush.msra.mxu1 %v16055_v8 }
0x2a10   : > { %15988 = vmatmul.f32.vlgmr.msrb.gmra.mxu0 %v15852_v23  ;;  %16252 = vmatpush.msrb.mxu3 %v20529_v45  ;;  %v17510_v23 = vld [vmem:[%s20840_s11] ss:$0 sm:$0xff]  ;;  %s20844_s11 = sld [smem:[#allocation36_spill]] }
0x2a11   : > { %16149 = vmatpush.msra.mxu0 %v16099_v47  ;;  %16227 = vmatpush.msrb.mxu2 %v16106_v41 }
0x2a12   : > { %16254 = vmatpush.msrb.mxu3 %v20538_v36 }
0x2a13   : > { %16152 = vmatpush.msra.mxu0 %v16105_v61  ;;  %16231 = vmatpush.msrb.mxu2 %v16112_v46  ;;  %v16304_v46 = vld [vmem:[%s18128_s17 + $0x8] sm:$0xff] }
0x2a14   : > { %16256 = vmatpush.msrb.mxu3 %v20549_v57  ;;  %v16330_v12 = vand.u32 4294901760, %v16304_v46 }
0x2a15   : > { %16155 = vmatpush.msra.mxu0 %v16111_v60  ;;  %16235 = vmatpush.msrb.mxu2 %v16118_v17  ;;  %v16306_v60 = vld [vmem:[%s18128_s17 + $0x18] sm:$0xff] }
0x2a16   : > { %16258 = vmatpush.msrb.mxu3 %v16049_v51  ;;  %v16368_v13 = vsub.f32 %v16304_v46, %v16330_v12 }
0x2a17   : > { %16158 = vmatpush.msra.mxu0 %v16117_v53 }
0x2a18   : > { %16260 = vmatpush.msrb.mxu3 %v16051_v52 }
0x2a1a   : > { %16262 = vmatpush.msrb.mxu3 %v16053_v21 }
0x2a1c   : > { %16264 = vmatpush.msrb.mxu3 %v16055_v8  ;;  %v16326_v8 = vand.u32 4294901760, %v16306_v60 }
0x2a1e   : > { %16327 = vmatpush.msrb.mxu0 %v16326_v8 }
0x2a20   : > { %16329 = vmatpush.msrb.mxu0 %v16328_v10 }
0x2a22   : > { %16331 = vmatpush.msrb.mxu0 %v16330_v12 }
0x2a24   : > { %16333 = vmatpush.msrb.mxu0 %v16332_v25 }
0x2a7d   : > { %v15899_v6 = vpop.f32.mrf.mxu1 }
0x2a85   : > { %v15858_v14 = vpop.f32.mrf.mxu0  ;;  %v15929_v39 = vpop.f32.mrf.mxu2 }
0x2a86   : > { %v15859_v63 = vadd.f32 %v17510_v23, %v15858_v14  ;;  %v16014_v43 = vpop.f32.mrf.mxu1  ;;  %v16369_v14 = vand.u32 4294901760, %v16368_v13 }
0x2a87   : > { %v15956_v56 = vpop.f32.mrf.mxu3 }
0x2a88   : > { %v15900_v34 = vadd.f32 %v15899_v6, %v15859_v63  ;;  %v16364_v6 = vsub.f32 %v16362_v40, %v16363_v19  ;;  %v16374_v63 = vsub.f32 %v16303_v49, %v16332_v25 }
0x2a8a   : > { %v15930_v35 = vadd.f32 %v15929_v39, %v15900_v34  ;;  %v16365_v34 = vand.u32 4294901760, %v16364_v6  ;;  %v16370_v39 = vsub.f32 %v16368_v13, %v16369_v14 }
0x2a8c   : > { %v15957_v38 = vadd.f32 %v15956_v56, %v15930_v35  ;;  %v16375_v35 = vand.u32 4294901760, %v16374_v63  ;;  %v16371_v56 = vand.u32 4294901760, %v16370_v39 }
0x2a8d   : > { %v15989_v45 = vpop.f32.mrf.mxu0 }
0x2a8e   : > { %v15990_v37 = vadd.f32 %v15989_v45, %v15957_v38  ;;  %v16376_v38 = vsub.f32 %v16374_v63, %v16375_v35 }
0x2a90   : > { %v16015_v50 = vadd.f32 %v16014_v43, %v15990_v37  ;;  %v16377_v45 = vand.u32 4294901760, %v16376_v38 }
0x2a92   : > { %v16017_v36 = vmax.f32 %v16015_v50, 0.0 }
0x2a94   : > { %v16031_v16 = vsel %vm10944_vm1, %v16017_v36, 0  ;;  %v16502_v36 = vld [vmem:[%s20842_s15 + $0x18] sm:$0xff]  ;;  %s20603_s15 = sand.u32 1, %s17797_s10  }
0x2a95   : > { %v16057_v4 = vand.u32 4294901760, %v16031_v16  ;;  %s16898_s5 = scalar_lea.sflag [#allocation4], %s20603_s15 }
0x2a97   : > { %v16058_v32 = vsub.f32 %v16031_v16, %v16057_v4  ;;  %16123 = vmatmul.f32.vlgmr.msra.gmra.mxu3 %v16057_v4  ;;  %v20586_v16 = vand.u32 4294901760, %v16502_v36 }
0x2a98   : > { %16487 = vmatpush.msra.mxu3 %v16326_v8 }
0x2a99   : > { %v16059_v15 = vand.u32 4294901760, %v16058_v32  ;;  %16161 = vmatmul.f32.vlgmr.msra.gmra.mxu0 %v16058_v32 }
0x2a9a   : > { %16489 = vmatpush.msra.mxu3 %v16328_v10 }
0x2a9b   : > { %v16060_v57 = vsub.f32 %v16058_v32, %v16059_v15  ;;  %16192 = vmatmul.f32.vlgmr.msra.gmra.mxu1 %v16059_v15  ;;  %v20589_v32 = vsub.f32 %v16502_v36, %v20586_v16  ;;  %v16501_v15 = vld [vmem:[%s20843_s1 + $0x10] sm:$0xff] }
0x2a9c   : > { %16491 = vmatpush.msra.mxu3 %v16330_v12 }
0x2a9d   : > { %v16061_v3 = vand.u32 4294901760, %v16060_v57  ;;  %v16521_v57 = vand.u32 4294901760, %v16501_v15 }
0x2a9e   : > { %16493 = vmatpush.msra.mxu3 %v16332_v25 }
0x2a9f   : > { %16062 = vmatmul.f32.vlgmr.msra.gmra.mxu2 %v16061_v3  ;;  %16266 = vmatmul.f32.vlgmr.msrb.gmra.mxu3 %v16057_v4 }
0x2aa0   : > { %16637 = vmatpush.msrb.mxu3 %v20586_v16 }
0x2aa2   : > { %16639 = vmatpush.msrb.mxu3 %v16521_v57 }
0x2aa7   : > { %16237 = vmatmul.f32.vlgmr.msrb.gmra.mxu2 %v16057_v4 }
0x2b16   : > { %v16162_v5 = vpop.f32.mrf.mxu0 }
0x2b18   : > { %v16193_v0 = vpop.f32.mrf.mxu1 }
0x2b1a   : > { %v16124_v55 = vpop.f32.mrf.mxu3 }
0x2b22   : > { %v16063_v31 = vpop.f32.mrf.mxu2  ;;  %v16267_v62 = vpop.f32.mrf.mxu3 }
0x2b23   : > { %v16064_v44 = vadd.f32 %v17511_v59, %v16063_v31  ;;  %v16500_v59 = vld [vmem:[%s20843_s1 + $0x8] sm:$0xff] }
0x2b24   : > { %v16523_v31 = vand.u32 4294901760, %v16500_v59 }
0x2b25   : > { %v16125_v51 = vadd.f32 %v16124_v55, %v16064_v44  ;;  %v20595_v55 = vsub.f32 %v16501_v15, %v16521_v57 }
0x2b26   : > { %16641 = vmatpush.msrb.mxu3 %v16523_v31 }
0x2b27   : > { %v16163_v58 = vadd.f32 %v16162_v5, %v16125_v51  ;;  %v16499_v51 = vld [vmem:[%s20843_s1] sm:$0xff]  ;;  %v20599_v5 = vsub.f32 %v16500_v59, %v16523_v31  ;;  %s20725_s1 = sshll.u32 %s20603_s15, 2 }
0x2b29   : > { %v16194_v28 = vadd.f32 %v16193_v0, %v16163_v58  ;;  %v16525_v58 = vand.u32 4294901760, %v16499_v51 }
0x2b2a   : > { %v16238_v52 = vpop.f32.mrf.mxu2 }
0x2b2b   : > { %v16239_v47 = vadd.f32 %v16238_v52, %v16194_v28  ;;  %v16575_v28 = vsub.f32 %v16499_v51, %v16525_v58  ;;  %16643 = vmatpush.msrb.mxu3 %v16525_v58 }
0x2b2d   : > { %v16268_v1 = vadd.f32 %v16267_v62, %v16239_v47  ;;  %v17512_v47 = vld [vmem:[%s20844_s11] ss:$0 sm:$0xff]  ;;  %v16558_v62 = vand.u32 4294901760, %v20589_v32  ;;  %v16576_v29 = vand.u32 4294901760, %v16575_v28  ;;  %s20618_s11 = scalar_lea.vmem [#allocation10], %s20725_s1  ;;  %s20733_s1 = sshll.u32 %s18161_s0, 2 }
0x2b2e   : > { %s16913_s2 = scalar_lea.hbm %s20778_s12, %s20733_s1  ;;  %s16915_s3 = sshll.u32 %s20618_s11, 4  ;;  %s16916_s3 = int_to_ptr.vmem [resolvable:$true] %s16915_s3 }
0x2b2f   : > { %v16270_v33 = vadd.f32 %v16268_v1, %v20518_v9  ;;  %v16356_v9 = vsub.f32 %v16306_v60, %v16326_v8  ;;  %s16917_s4 = sshll.u32 %s16913_s2, 4  ;;  %s16918_s4 = int_to_ptr.hbm [resolvable:$true] %s16917_s4 }
0x2b30   : > { %s17713_s6 = sshra.s32 %s16918_s4, 4  ;;  %s17714_s6 = int_to_ptr.hbm [resolvable:$true] %s17713_s6 }
0x2b31   : > { %v16271_v61 = vsel %vm6080_vm7, %v16270_v33, 0.0  ;;  %v16357_v53 = vand.u32 4294901760, %v16356_v9  ;;  %16398 = vmatpush.msra.mxu0 %v16356_v9  ;;  %s17715_s8 = scalar_lea.hbm %s17714_s6, 4  ;;  %p17720_p4 = scmp.lt.s32.totalorder %s17714_s6, %s20778_s12 }
0x2b32   : > { %16272 = vadd.xlane.f32.xlu2 %v16271_v61  ;;  %p17716_p9 = scmp.ne.s32.totalorder %s17714_s6, %s17715_s8  ;;  %p17721_p7 = scmp.lt.s32.totalorder %s17719_s9, %s17715_s8 }
0x2b33   : > { %v16358_v17 = vsub.f32 %v16356_v9, %v16357_v53  ;;  %16456 = vmatpush.msra.mxu2 %v16357_v53  ;;  %16401 = vmatpush.msra.mxu0 %v16362_v40  ;;  %v16577_v40 = vsub.f32 %v16575_v28, %v16576_v29 }
0x2b34   : > { %p17717_p12 = pnand %p17716_p9, %p18178_p5  ;;  %p17722_p8 = por %p17721_p7, %p17720_p4 }
0x2b35   : > { %v16359_v23 = vand.u32 4294901760, %v16358_v17  ;;  %16460 = vmatpush.msra.mxu2 %v16363_v19  ;;  %16404 = vmatpush.msra.mxu0 %v16368_v13  ;;  %v16578_v19 = vand.u32 4294901760, %v16577_v40 }
0x2b36   : > { %p17718_p0 = pneg %p17717_p12 }
0x2b37   : > { %16360 = vmatpush.msrb.mxu1 %v16359_v23  ;;  %16464 = vmatpush.msra.mxu2 %v16369_v14 }
0x2b38   : > { %16407 = vmatpush.msra.mxu0 %v16374_v63  ;;  %v17515_v63 = vld [vmem:[#allocation7] ss:$0 sm:$0xff]  ;;  %p17723_p11 = pnand %p17722_p8, %p17718_p0 }
0x2b39   : > { %16366 = vmatpush.msrb.mxu1 %v16365_v34  ;;  %16468 = vmatpush.msra.mxu2 %v16375_v35 }
0x2b3b   : > { %16372 = vmatpush.msrb.mxu1 %v16371_v56  ;;  %16603 = vmatpush.msrb.mxu2 %v20589_v32 }
0x2b3d   : > { %16378 = vmatpush.msrb.mxu1 %v16377_v45  ;;  %16606 = vmatpush.msrb.mxu2 %v20595_v55 }
0x2b3f   : > { %16427 = vmatpush.msra.mxu1 %v16326_v8  ;;  %16609 = vmatpush.msrb.mxu2 %v20599_v5 }
0x2b41   : > { %16429 = vmatpush.msra.mxu1 %v16328_v10  ;;  %16612 = vmatpush.msrb.mxu2 %v16575_v28 }
0x2b43   : > { %16431 = vmatpush.msra.mxu1 %v16330_v12 }
0x2b45   : > { %16433 = vmatpush.msra.mxu1 %v16332_v25 }
0x2ba5   : > { %v16273_v21 = vpop.xlane.xlu2 %16272 }
0x2ba6   : > { %v16274_v7 = vmul.f32 %v16273_v21, %v19128_v48  ;;  %v16564_v21 = vand.u32 4294901760, %v20595_v55 }
0x2ba8   : > { %v20575_v42 = vsub.f32 %v16270_v33, %v16274_v7  ;;  %v17513_v33 = vld [vmem:[%s20845_s7] ss:$0 sm:$0xff]  ;;  %v16565_v8 = vsub.f32 %v20595_v55, %v16564_v21 }
0x2baa   : > { %v16276_v54 = vmul.f32 %v20575_v42, %v20575_v42  ;;  %v16566_v53 = vand.u32 4294901760, %v16565_v8 }
0x2bac   : > { %v16277_v41 = vsel %vm6080_vm7, %v16276_v54, 0.0  ;;  %v16559_v54 = vsub.f32 %v20589_v32, %v16558_v62 }
0x2bad   : > { %16278 = vadd.xlane.f32.xlu0 %v16277_v41  ;;  %v16570_v41 = vand.u32 4294901760, %v20599_v5 }
0x2bae   : > { %v16560_v10 = vand.u32 4294901760, %v16559_v54 }
0x2baf   : > { %v16571_v46 = vsub.f32 %v20599_v5, %v16570_v41 }
0x2bb1   : > { %v16572_v49 = vand.u32 4294901760, %v16571_v46 }
0x2c20   : > { %v16279_v37 = vpop.xlane.xlu0 %16278 }
0x2c21   : > { %v16280_v43 = vmul.f32 %v16279_v37, %v19128_v48 }
0x2c23   : > { %v16281_v50 = vadd.f32 1e-05, %v16280_v43 }
0x2c25   : > { %17574 = vrsqrt.f32 %v16281_v50  ;;  %vm16288_vm14 = vweird.f32 %v16281_v50 }
0x2c2b   : > { %v17575_v4 = vpop.eup %17574 }
0x2c2c   : > { %v16283_v48 = vmul.f32 %v17575_v4, %v16281_v50  ;;  %vm16289_vm13 = vweird.f32 %v17575_v4 }
0x2c2d   : > { %vm16290_vm15 = vmor %vm16288_vm14, %vm16289_vm13 }
0x2c2e   : > { %v16284_v3 = vmul.f32 %v17575_v4, %v16283_v48 }
0x2c30   : > { %v16285_v44 = vmul.f32 0.5, %v16284_v3 }
0x2c32   : > { %v16286_v0 = vsub.f32 1.5, %v16285_v44 }
0x2c34   : > { %v16287_v52 = vmul.f32 %v17575_v4, %v16286_v0 }
0x2c36   : > { %v16291_v1 = vsel %vm16290_vm15, %v17575_v4, %v16287_v52 }
0x2c37   : > { %v16292_v61 = vmul.f32 %v16291_v1, %v20575_v42 }
0x2c39   : > { %v16297_v7 = vmul.f32 %v17512_v47, %v16292_v61 }
0x2c3b   : > { %v16302_v60 = vadd.f32 %v17513_v33, %v16297_v7 }
0x2c3d   : > { %v16312_v9 = vsel %vm1871_vm2, %v16302_v60, 0  ;;  %16895 = vst.msk [vmem:[%s20618_s11] sm:$0xf] %vm6080_vm7, %v16302_v60 }
0x2c3e   : > { %v16334_v42 = vand.u32 4294901760, %v16312_v9 }
0x2c40   : > { %v16335_v12 = vsub.f32 %v16312_v9, %v16334_v42  ;;  %16380 = vmatmul.f32.vlgmr.msrb.gmra.mxu1 %v16334_v42  ;;  %16470 = vmatmul.f32.vlgmr.msra.gmra.mxu2 %v16334_v42 }
0x2c41   : > { %16495 = vmatmul.f32.vlgmr.msra.gmra.mxu3 %v16334_v42  ;;  %16561 = vmatpush.msrb.mxu1 %v16560_v10 }
0x2c42   : > { %v16336_v17 = vand.u32 4294901760, %v16335_v12 }
0x2c43   : > { %16567 = vmatpush.msrb.mxu1 %v16566_v53 }
0x2c44   : > { %v16337_v13 = vsub.f32 %v16335_v12, %v16336_v17 }
0x2c45   : > { %16573 = vmatpush.msrb.mxu1 %v16572_v49 }
0x2c46   : > { %v16338_v25 = vand.u32 4294901760, %v16337_v13 }
0x2c47   : > { %16579 = vmatpush.msrb.mxu1 %v16578_v19 }
0x2c48   : > { %16339 = vmatmul.f32.vlgmr.msrb.gmra.mxu0 %v16338_v25  ;;  %16437 = vmatmul.f32.vlgmr.msra.gmra.mxu1 %v16336_v17 }
0x2c49   : > { %16520 = vmatpush.msrb.mxu0 %v20586_v16  ;;  %16615 = vmatmul.f32.vlgmr.msrb.gmra.mxu2 %v19187_v26 }
0x2c4a   : > { %16647 = vmatmul.f32.vlgmr.msrb.gmra.mxu3 %v19196_v30  ;;  %16707 = vmatpush.msra.mxu1 %v20586_v16 }
0x2c4b   : > { %16522 = vmatpush.msrb.mxu0 %v16521_v57 }
0x2c4c   : > { %16709 = vmatpush.msra.mxu1 %v16521_v57 }
0x2c4d   : > { %16524 = vmatpush.msrb.mxu0 %v16523_v31 }
0x2c4e   : > { %16711 = vmatpush.msra.mxu1 %v16523_v31 }
0x2c4f   : > { %16526 = vmatpush.msrb.mxu0 %v16525_v58 }
0x2c50   : > { %16410 = vmatmul.f32.vlgmr.msra.gmra.mxu0 %v16335_v12  ;;  %16581 = vmatmul.f32.vlgmr.msrb.gmra.mxu1 %v19182_v27 }
0x2c51   : > { %16620 = vmatmul.f32.gmra.mxu2 %v19208_v22  ;;  %16672 = vmatpush.msra.mxu0 %v16558_v62 }
0x2c52   : > { %16653 = vmatmul.f32.gmra.mxu3 %v19230_v24  ;;  %16713 = vmatpush.msra.mxu1 %v16525_v58  ;;  %v17514_v24 = vld [vmem:[#allocation8] ss:$0 sm:$0xff] }
0x2c53   : > { %16676 = vmatpush.msra.mxu0 %v16564_v21 }
0x2c55   : > { %16680 = vmatpush.msra.mxu0 %v16570_v41 }
0x2c57   : > { %16684 = vmatpush.msra.mxu0 %v16576_v29 }
0x2c58   : > { %16532 = vmatmul.f32.vlgmr.msrb.gmra.mxu0 %v19234_v20  ;;  %16585 = vmatmul.f32.gmra.mxu1 %v19198_v11 }
0x2c60   : > { %16540 = vmatmul.f32.gmra.mxu0 %v19256_v18  ;;  %16715 = vmatmul.f32.vlgmr.msra.gmra.mxu1 %v19182_v27 }
0x2c68   : > { %16686 = vmatmul.f32.vlgmr.msra.gmra.mxu0 %v19182_v27  ;;  %16719 = vmatmul.f32.gmra.mxu1 %v19198_v11 }
0x2c70   : > { %16690 = vmatmul.f32.gmra.mxu0 %v19198_v11 }
0x2cbd   : > { %v16381_v26 = vpop.f32.mrf.mxu1 }
0x2cc3   : > { %v16471_v20 = vpop.f32.mrf.mxu2 }
0x2cc4   : > { %v16496_v18 = vpop.f32.mrf.mxu3 }
0x2cc5   : > { %v16340_v30 = vpop.f32.mrf.mxu0  ;;  %v16438_v22 = vpop.f32.mrf.mxu1 }
0x2cc6   : > { %v16341_v14 = vadd.f32 %v17514_v24, %v16340_v30 }
0x2cc8   : > { %v16382_v34 = vadd.f32 %v16381_v26, %v16341_v14 }
0x2ccc   : > { %v16616_v45 = vpop.f32.mrf.mxu2 }
0x2ccd   : > { %v16411_v23 = vpop.f32.mrf.mxu0  ;;  %v16582_v6 = vpop.f32.mrf.mxu1 }
0x2cce   : > { %v16412_v35 = vadd.f32 %v16411_v23, %v16382_v34  ;;  %v16648_v50 = vpop.f32.mrf.mxu3 }
0x2cd0   : > { %v16439_v27 = vadd.f32 %v16438_v22, %v16412_v35 }
0x2cd2   : > { %v16472_v11 = vadd.f32 %v16471_v20, %v16439_v27 }
0x2cd4   : > { %v16497_v4 = vadd.f32 %v16496_v18, %v16472_v11  ;;  %v16621_v57 = vpop.f32.mrf.mxu2 }
0x2cd5   : > { %v16533_v39 = vpop.f32.mrf.mxu0  ;;  %v16586_v38 = vpop.f32.mrf.mxu1 }
0x2cd6   : > { %v16534_v56 = vadd.f32 %v17515_v63, %v16533_v39  ;;  %v16724_v55 = vsel %vm1871_vm2, %v16497_v4, 0  ;;  %v16654_v51 = vpop.f32.mrf.mxu3 }
0x2cd7   : > { %v16750_v5 = vand.u32 4294901760, %v16724_v55 }
0x2cd8   : > { %v16583_v37 = vadd.f32 %v16582_v6, %v16534_v56 }
0x2cd9   : > { %v16751_v47 = vsub.f32 %v16724_v55, %v16750_v5 }
0x2cda   : > { %v16617_v36 = vadd.f32 %v16616_v45, %v16583_v37 }
0x2cdb   : > { %v16752_v61 = vand.u32 4294901760, %v16751_v47 }
0x2cdc   : > { %v16649_v48 = vadd.f32 %v16648_v50, %v16617_v36 }
0x2cdd   : > { %v16541_v43 = vpop.f32.mrf.mxu0  ;;  %v16716_v32 = vpop.f32.mrf.mxu1  ;;  %v16753_v60 = vsub.f32 %v16751_v47, %v16752_v61 }
0x2cde   : > { %v16542_v16 = vadd.f32 %v17515_v63, %v16541_v43 }
0x2cdf   : > { %v16754_v10 = vand.u32 4294901760, %v16753_v60 }
0x2ce0   : > { %v16587_v15 = vadd.f32 %v16586_v38, %v16542_v16 }
0x2ce2   : > { %v16622_v31 = vadd.f32 %v16621_v57, %v16587_v15 }
0x2ce4   : > { %v16655_v58 = vadd.f32 %v16654_v51, %v16622_v31 }
0x2ce5   : > { %v16687_v3 = vpop.f32.mrf.mxu0  ;;  %v16720_v52 = vpop.f32.mrf.mxu1 }
0x2ce6   : > { %v16688_v59 = vadd.f32 %v16687_v3, %v16649_v48 }
0x2ce8   : > { %v16717_v44 = vadd.f32 %v16716_v32, %v16688_v59 }
0x2cea   : > { %v16727_v0 = vsel %vm1871_vm2, %v16717_v44, 0 }
0x2ceb   : > { %v16748_v1 = vand.u32 4294901760, %v16727_v0 }
0x2ced   : > { %v16691_v28 = vpop.f32.mrf.mxu0  ;;  %v16780_v7 = vsub.f32 %v16727_v0, %v16748_v1 }
0x2cee   : > { %v16692_v62 = vadd.f32 %v16691_v28, %v16655_v58 }
0x2cef   : > { %v16781_v29 = vand.u32 4294901760, %v16780_v7 }
0x2cf0   : > { %v16721_v33 = vadd.f32 %v16720_v52, %v16692_v62 }
0x2cf1   : > { %v16782_v42 = vsub.f32 %v16780_v7, %v16781_v29 }
0x2cf2   : > { %v16730_v21 = vsel %vm1871_vm2, %v16721_v33, 0 }
0x2cf3   : > { %v16746_v54 = vand.u32 4294901760, %v16730_v21  ;;  %v16783_v53 = vand.u32 4294901760, %v16782_v42 }
0x2cf5   : > { %v16774_v41 = vsub.f32 %v16730_v21, %v16746_v54  ;;  %16747 = vmatpush.xpose.msra.mxu2 %v16746_v54  ;;  %16883 = vmatpush.xpose.msrb.mxu1 %v16746_v54 }
0x2cf7   : > { %v16775_v8 = vand.u32 4294901760, %v16774_v41 }
0x2cf9   : > { %16749 = vmatpush.xpose.msra.mxu2 %v16748_v1  ;;  %16858 = vmatpush.xpose.msrb.mxu0 %v16775_v8  ;;  %v16776_v9 = vsub.f32 %v16774_v41, %v16775_v8 }
0x2cfa   : > { %16885 = vmatpush.xpose.msrb.mxu1 %v16748_v1 }
0x2cfb   : > { %v16777_v46 = vand.u32 4294901760, %v16776_v9 }
0x2cfc   : > { %16755 = vmatmul.f32.vlgmr.msra.gmra.mxu2 %v16754_v10 }
0x2cfd   : > { %16806 = vmatpush.xpose.msrb.mxu2 %v16774_v41  ;;  %16887 = vmatmul.f32.vlgmr.msrb.gmra.mxu1 %v16750_v5 }
0x2cfe   : > { %16778 = vmatpush.xpose.msra.mxu3 %v16777_v46  ;;  %16862 = vmatpush.xpose.msrb.mxu0 %v16781_v29 }
0x2d01   : > { %16809 = vmatpush.xpose.msrb.mxu2 %v16780_v7  ;;  %16864 = vmatmul.f32.vlgmr.msrb.gmra.mxu0 %v16750_v5 }
0x2d02   : > { %16784 = vmatpush.xpose.msra.mxu3 %v16783_v53 }
0x2d04   : > { %16812 = vmatmul.f32.vlgmr.msrb.gmra.mxu2 %v16751_v47 }
0x2d05   : > { %16786 = vmatmul.f32.vlgmr.msra.gmra.mxu3 %v16750_v5 }
0x2d06   : > { %16831 = vmatpush.xpose.msrb.mxu3 %v16746_v54 }
0x2d0a   : > { %16833 = vmatpush.xpose.msrb.mxu3 %v16748_v1 }
0x2d0d   : > { %16837 = vmatmul.f32.vlgmr.msrb.gmra.mxu3 %v16752_v61 }
0x2d0e   : > { %17726 = shalt.err (!%p17723_p11)
}
0x2d0f   : > { %s20847_s11 = sld [smem:[#allocation60_spill]]  ;;  %s20849_s9 = sshll.u32 %s18161_s0, 2 }
0x2d10   : > { %17336 = dma.vmem_to_hbm [thread:$0]  (%p18178_p5), %s16916_s3, 64, %s16918_s4, %s16898_s5  }
0x2d11   : > { %s20850_s2 = sshll.u32 %s20603_s15, 2  ;;  %s16903_s4 = scalar_lea.sflag [#allocation12], %s20603_s15 }
0x2d12   : > { %s1674_s8 = scalar_lea.vmem [#allocation11], %s20850_s2 }
0x2d13   : > { %s16929_s5 = sshll.u32 %s1674_s8, 4  ;;  %s16930_s5 = int_to_ptr.vmem [resolvable:$true] %s16929_s5 }
0x2d15   : > { %s20848_s1 = smov %s20847_s11  ;;  %s16927_s6 = scalar_lea.hbm %s20847_s11, %s20849_s9 }
0x2d16   : > { %s16931_s3 = sshll.u32 %s16927_s6, 4  ;;  %s17747_s11 = scalar_lea.hbm %s20848_s1, 8  ;;  %s16932_s3 = int_to_ptr.hbm [resolvable:$true] %s16931_s3 }
0x2d17   : > { %s17741_s12 = sshra.s32 %s16932_s3, 4  ;;  %s17742_s12 = int_to_ptr.hbm [resolvable:$true] %s17741_s12 }
0x2d18   : > { %s17743_s0 = scalar_lea.hbm %s17742_s12, 4  ;;  %p17748_p3 = scmp.lt.s32.totalorder %s17742_s12, %s20848_s1 }
0x2d19   : > { %p17744_p13 = scmp.ne.s32.totalorder %s17742_s12, %s17743_s0  ;;  %p17749_p10 = scmp.lt.s32.totalorder %s17747_s11, %s17743_s0 }
0x2d1b   : > { %p17745_p1 = pnand %p17744_p13, %p18178_p5  ;;  %p17750_p9 = por %p17749_p10, %p17748_p3 }
0x2d1d   : > { %p17746_p2 = pneg %p17745_p1 }
0x2d1f   : > { %p17751_p12 = pnand %p17750_p9, %p17746_p2 }
0x2d7a   : > { %v16888_v22 = vpop.f32.mrf.mxu1 }
0x2d7e   : > { %v16865_v26 = vpop.f32.mrf.mxu0 }
0x2d7f   : > { %v16756_v40 = vpop.f32.mrf.mxu2 }
0x2d87   : > { %v16813_v17 = vpop.f32.mrf.mxu2 }
0x2d88   : > { %v16787_v12 = vpop.f32.mrf.mxu3 }
0x2d89   : > { %v16788_v49 = vadd.f32 %v16787_v12, %v16756_v40 }
0x2d8b   : > { %v16814_v19 = vadd.f32 %v16813_v17, %v16788_v49 }
0x2d90   : > { %v16838_v13 = vpop.f32.mrf.mxu3 }
0x2d91   : > { %v16839_v25 = vadd.f32 %v16838_v13, %v16814_v19 }
0x2d93   : > { %v16866_v30 = vadd.f32 %v16865_v26, %v16839_v25 }
0x2d95   : > { %v16889_v24 = vadd.f32 %v16888_v22, %v16866_v30 }
0x2d97   : > { %v16891_v23 = vmul.f32 0.17677669, %v16889_v24 }
0x2d99   : > { %17576 = vtanh.f32 %v16891_v23 }
0x2d9f   : > { %v17577_v6 = vpop.eup %17576 }
0x2da0   : > { %v16893_v14 = vmul.f32 10.0, %v17577_v6 }
0x2da2   : > { %v16894_v20 = vsel %vm12031_vm8, -1e+09, %v16893_v14 }
0x2da3   : > { %16896 = vst.msk [vmem:[%s1674_s8] sm:$0xf] %vm12033_vm9, %v16894_v20 }
0x2da4   : > { %17754 = shalt.err (!%p17751_p12)
}
0x2da5   : > { %17337 = dma.vmem_to_hbm [thread:$0]  (%p18178_p5), %s16930_s5, 64, %s16932_s3, %s16903_s4  }
0x2da6 PF: > { %s20851_s9 = sld [smem:[#allocation63_spill]] }
0x2da7   : > { %s20852_s6 = sld [smem:[#allocation61_spill]] }
0x2dac   : > { %p17368_p0 = scmp.ge.s32.totalorder %s20851_s9, 2 }
0x2dad   : > { %s16943_s2 = sand.u32 1, %s20852_s6  }
0x2dae   : > { %p17354_p4 = pnand %p17368_p0, %p18182_p6  ;;  %s16944_s8 = scalar_lea.sflag [#allocation4], %s16943_s2 }
0x2db0   : > { %p17355_p7 = pneg %p17354_p4 }
0x2db2   : > { %17784 = dma.done.wait (%p17355_p7), %s16944_s8, 64  }
0x2db3   : > { %17786 = vsyncadd (%p17355_p7), %s16944_s8, 4294967232  ;;  %s16954_s12 = scalar_lea.sflag [#allocation12], %s16943_s2 }
0x2db4   : > { %17788 = dma.done.wait (%p17355_p7), %s16954_s12, 64  }
0x2db5   : > { %17790 = vsyncadd (%p17355_p7), %s16954_s12, 4294967232  ;;  %s20854_s15 = sld [smem:[#allocation64_spill]]  ;;  %s20857_s7 = smov %s17797_s10 }
0x2db6   : > { %s20855_s0 = sld [smem:[#allocation62_spill]] }
0x2db7   : > { %s20856_s11 = sld [smem:[#allocation65_spill]] }
0x2dbb   : > { %p124_p5 = scmp.ge.s32.totalorder %s20854_s15, 4  }
0x2dbc   : > { %s20858_s10 = smov %s20855_s0 }
0x2dbd   :  { %126 = sbr.rel (!%p124_p5) target bundleno = 113 (0x71), region = 422 }
0x2dc2   :  { %16960 = vsyncpa [#allocation3], 1 }
0x2dc3   :  { %16962 = vsyncpa [#allocation3 + $0x1], 1 }
0x2dc4   :  { %16963 = vsyncpa [#allocation6], 1 }
0x2dc5   :  { %16964 = vsyncpa [#allocation9], 1 }
0x2dc6   :  { %16965 = vsyncpa [#allocation4], 1 }
0x2dc7   :  { %16967 = vsyncpa [#allocation4 + $0x1], 1 }
0x2dc8   :  { %16968 = vsyncpa [#allocation12], 1 }
0x2dc9   :  { %16970 = vsyncpa [#allocation12 + $0x1], 1 }

</bundles_post_ra>
